<compile_context>
chip_gen: v7x
topology: tpu7x:2x2x1
jax: 0.10.0
libtpu: 0.0.40
codegen_flags: <defaults>
</compile_context>

<pallas_src>
import math
import functools

import jax
import jax.numpy as jnp
from jax import lax
from jax.experimental import pallas as pl
from jax.experimental.pallas import tpu as pltpu

_MASK_VALUE = -1e30
_NUM_LANES = 128
_NUM_SUBLANES = 8


def _vmem_limit_bytes():
    """Per-generation scoped-VMEM budget (v7x has 64 MiB physical, v5e/v6e 128)."""
    try:
        cap = int(pltpu.get_tpu_info().vmem_capacity_bytes)
    except Exception:  # pragma: no cover - defensive fallback
        cap = 64 * 1024 * 1024
    return max(32 * 1024 * 1024, min(cap * 3 // 4, 100 * 1024 * 1024))


# ----------------------------- tiled matmul -------------------------------

def _matmul_kernel(x_ref, w_ref, o_ref, acc_ref):
    @pl.when(pl.program_id(2) == 0)
    def _init():
        acc_ref[...] = jnp.zeros_like(acc_ref)

    acc_ref[...] += jnp.dot(x_ref[...], w_ref[...],
                            preferred_element_type=jnp.float32)

    @pl.when(pl.program_id(2) == pl.num_programs(2) - 1)
    def _finalize():
        o_ref[...] = acc_ref[...].astype(o_ref.dtype)


def pallas_matmul(x, w, *, out_dtype=jnp.bfloat16, tm=256, tn=256, tk=512):
    """x: (M, K) bf16, w: (K, N) bf16 -> (M, N) out_dtype, f32 MXU accumulation."""
    M, K = x.shape
    K2, N = w.shape
    assert K == K2
    tm, tn, tk = min(tm, M), min(tn, N), min(tk, K)
    assert M % tm == 0 and N % tn == 0 and K % tk == 0, (M, N, K, tm, tn, tk)
    grid = (M // tm, N // tn, K // tk)
    return pl.pallas_call(
        _matmul_kernel,
        out_shape=jax.ShapeDtypeStruct((M, N), out_dtype),
        grid_spec=pltpu.PrefetchScalarGridSpec(
            num_scalar_prefetch=0,
            grid=grid,
            in_specs=[
                pl.BlockSpec((tm, tk), lambda i, j, k: (i, k)),
                pl.BlockSpec((tk, tn), lambda i, j, k: (k, j)),
            ],
            out_specs=pl.BlockSpec((tm, tn), lambda i, j, k: (i, j)),
            scratch_shapes=[pltpu.VMEM((tm, tn), jnp.float32)],
        ),
        compiler_params=pltpu.CompilerParams(
            dimension_semantics=("parallel", "parallel", "arbitrary"),
            vmem_limit_bytes=_vmem_limit_bytes(),
        ),
    )(x, w)


# ------------------------- flash attention kernel --------------------------

def _flash_attn_kernel(q_seg_ref, kv_seg_ref, q_ref, k_ref, v_ref, o_ref,
                       m_sc, l_sc, acc_sc, *, n_rep, head_dim, tq, tk):
    qi = pl.program_id(2)
    ki = pl.program_id(3)

    @pl.when(ki == 0)
    def _init():
        m_sc[...] = jnp.full_like(m_sc, _MASK_VALUE)
        l_sc[...] = jnp.zeros_like(l_sc)
        acc_sc[...] = jnp.zeros_like(acc_sc)

    # Skip KV tiles entirely in the causal future of this Q tile (their DMA is
    # also skipped via the clamped index_map in the wrapper).
    @pl.when(ki * tk <= qi * tq + (tq - 1))
    def _compute():
        k = k_ref[...]                                  # (tk, D) bf16
        v = v_ref[...]                                  # (tk, D) bf16

        row = qi * tq + lax.broadcasted_iota(jnp.int32, (tq, tk), 0)
        col = ki * tk + lax.broadcasted_iota(jnp.int32, (tq, tk), 1)
        seg_q = q_seg_ref[...][:, :1]                   # (tq, 1)
        seg_k = kv_seg_ref[...][:1, :]                  # (1, tk)
        allowed = (seg_q == seg_k) & (row >= col)       # block-diagonal causal

        # All n_rep query heads sharing this KV head (softmax scale already
        # folded into wq in the wrapper).
        for r in range(n_rep):
            q = q_ref[:, r * head_dim:(r + 1) * head_dim]     # (tq, D) bf16
            s = lax.dot_general(q, k, (((1,), (1,)), ((), ())),
                                preferred_element_type=jnp.float32)  # (tq, tk)
            s = jnp.where(allowed, s, _MASK_VALUE)

            m_prev = m_sc[r]
            m_new = jnp.maximum(m_prev, jnp.max(s, axis=-1, keepdims=True))
            alpha = jnp.exp(m_prev - m_new)
            p = jnp.exp(s - m_new)
            l_sc[r] = alpha * l_sc[r] + jnp.sum(p, axis=-1, keepdims=True)
            acc_sc[r] = alpha * acc_sc[r] + jnp.dot(
                p.astype(v.dtype), v, preferred_element_type=jnp.float32)
            m_sc[r] = m_new

    @pl.when(ki == pl.num_programs(3) - 1)
    def _finalize():
        for r in range(n_rep):
            inv_l = pl.reciprocal(l_sc[r], approx=True)
            o_ref[:, r * head_dim:(r + 1) * head_dim] = (
                acc_sc[r] * inv_l).astype(o_ref.dtype)


def pallas_flash_attention(q, k, v, segment_ids, *, n_heads, n_kv_heads,
                           head_dim, block_q=256, block_k=512):
    """
    q: (B, S, H*D) bf16, k/v: (B, S, Hkv*D) bf16, segment_ids: (B, S) int32.
    Returns (B, S, H*D) bf16.  Grid is (B, Hkv, S/tq, S/tk); the n_rep query
    heads that share a KV head are processed together (one KV fetch).  The
    softmax scale must already be folded into q (done in attention_forward).
    """
    B, S, _ = q.shape
    assert n_heads % n_kv_heads == 0
    n_rep = n_heads // n_kv_heads
    tq, tk = min(block_q, S), min(block_k, S)
    assert S % tq == 0 and S % tk == 0, (S, tq, tk)
    assert head_dim % _NUM_LANES == 0, "head_dim must be lane-aligned (128)"

    seg = segment_ids.astype(jnp.int32)
    # Lane/sublane-dense segment id layouts (as in the reference TPU flash kernel).
    q_seg = lax.broadcast_in_dim(seg, (B, S, _NUM_LANES), (0, 1))
    kv_seg = lax.broadcast_in_dim(seg, (B, _NUM_SUBLANES, S), (0, 2))

    def kv_blk(qi, ki):
        # KV tiles entirely in the causal future reuse block 0 (already
        # resident) so Pallas skips the HBM->VMEM copy for masked-out steps.
        return jnp.where(ki * tk <= qi * tq + (tq - 1), ki, 0)

    grid = (B, n_kv_heads, S // tq, S // tk)
    kernel = functools.partial(_flash_attn_kernel, n_rep=n_rep,
                               head_dim=head_dim, tq=tq, tk=tk)
    return pl.pallas_call(
        kernel,
        out_shape=jax.ShapeDtypeStruct((B, S, n_heads * head_dim), jnp.bfloat16),
        grid_spec=pltpu.PrefetchScalarGridSpec(
            num_scalar_prefetch=0,
            grid=grid,
            in_specs=[
                pl.BlockSpec((None, tq, _NUM_LANES),
                             lambda b, g, qi, ki: (b, qi, 0)),
                pl.BlockSpec((None, _NUM_SUBLANES, tk),
                             lambda b, g, qi, ki: (b, 0, kv_blk(qi, ki))),
                pl.BlockSpec((None, tq, n_rep * head_dim),
                             lambda b, g, qi, ki: (b, qi, g)),
                pl.BlockSpec((None, tk, head_dim),
                             lambda b, g, qi, ki: (b, kv_blk(qi, ki), g)),
                pl.BlockSpec((None, tk, head_dim),
                             lambda b, g, qi, ki: (b, kv_blk(qi, ki), g)),
            ],
            out_specs=pl.BlockSpec((None, tq, n_rep * head_dim),
                                   lambda b, g, qi, ki: (b, qi, g)),
            scratch_shapes=[
                pltpu.VMEM((n_rep, tq, 1), jnp.float32),         # running max
                pltpu.VMEM((n_rep, tq, 1), jnp.float32),         # running sum
                pltpu.VMEM((n_rep, tq, head_dim), jnp.float32),  # output acc
            ],
        ),
        compiler_params=pltpu.CompilerParams(
            dimension_semantics=("parallel", "parallel", "parallel", "arbitrary"),
            vmem_limit_bytes=_vmem_limit_bytes(),
        ),
    )(q_seg, kv_seg, q, k, v)


# ------------------------------ JAX glue ----------------------------------

def precompute_freqs_cis(head_dim, seqlen, theta=10000.0):
    freqs = 1.0 / (
        theta ** (jnp.arange(0, head_dim, 2, dtype=jnp.float32) / head_dim)
    )
    t = jnp.arange(seqlen, dtype=jnp.float32)
    angles = jnp.outer(t, freqs)                      # (S, D/2)
    return jnp.cos(angles), jnp.sin(angles)


def apply_rotary_emb_half(x, cos, sin):
    # x: (B, S, H, D) in de-interleaved ("rotate-half") layout: feature i pairs
    # with feature D/2+i and uses freq i.  Lane-contiguous half slices, no
    # interleave reshapes.  Computed in f32, cast back to x.dtype.
    half = x.shape[-1] // 2
    xf = x.astype(jnp.float32)
    x0, x1 = xf[..., :half], xf[..., half:]
    c = cos[None, :, None, :]
    s = sin[None, :, None, :]
    return jnp.concatenate([x0 * c - x1 * s, x0 * s + x1 * c],
                           axis=-1).astype(x.dtype)


def apply_rotary_emb_interleaved(x, cos, sin):
    # Original llama form (consecutive (real, imag) pairs), used by the
    # pure-JAX reference only.
    B, S, H, D = x.shape
    xr = x.astype(jnp.float32).reshape(B, S, H, D // 2, 2)
    x0, x1 = xr[..., 0], xr[..., 1]
    c = cos[None, :, None, :]
    s = sin[None, :, None, :]
    o0 = x0 * c - x1 * s
    o1 = x0 * s + x1 * c
    return jnp.stack([o0, o1], axis=-1).reshape(B, S, H, D).astype(x.dtype)


@functools.partial(jax.jit,
                   static_argnames=("n_heads", "n_kv_heads", "block_q", "block_k"))
def attention_forward(x, wq, wk, wv, wo, cos, sin, segment_ids, *,
                      n_heads, n_kv_heads, block_q=256, block_k=512):
    """Pallas-backed equivalent of Attention.forward (model_parallel_size=1)."""
    B, S, dim = x.shape
    head_dim = dim // n_heads
    q_out = n_heads * head_dim
    kv_out = n_kv_heads * head_dim
    scale = 1.0 / math.sqrt(head_dim)

    # Per-head de-interleave permutation of the Q/K output features:
    # rotary pair (2i, 2i+1) -> positions (i, D/2+i).  Q.K^T is invariant to a
    # common permutation of the head dim, so attention output is unchanged,
    # while RoPE becomes the cheap rotate-half form.
    perm = jnp.concatenate([jnp.arange(0, head_dim, 2),
                            jnp.arange(1, head_dim, 2)])
    q_rows = (jnp.arange(n_heads)[:, None] * head_dim + perm[None, :]).reshape(-1)
    k_rows = (jnp.arange(n_kv_heads)[:, None] * head_dim + perm[None, :]).reshape(-1)

    # Fused QKV projection.  The 1/sqrt(head_dim) softmax scale is folded into
    # wq here (fuses with the concat/transpose/cast weight prep), so the flash
    # kernel never scales the (tq, tk) score tiles.
    w_fused = jnp.concatenate([wq[q_rows] * scale, wk[k_rows], wv], axis=0)
    w_qkv_t = w_fused.T.astype(jnp.bfloat16)

    x2 = x.reshape(B * S, dim).astype(jnp.bfloat16)
    qkv = pallas_matmul(x2, w_qkv_t, out_dtype=jnp.bfloat16)   # (B*S, q+2*kv)

    xq = qkv[:, :q_out].reshape(B, S, n_heads, head_dim)
    xk = qkv[:, q_out:q_out + kv_out].reshape(B, S, n_kv_heads, head_dim)
    xv = qkv[:, q_out + kv_out:].reshape(B, S, kv_out)

    # TODO(synk): fuse RoPE into the QKV matmul epilogue (cheap VPU work; kept
    # as XLA elementwise glue in rotate-half form here).
    xq = apply_rotary_emb_half(xq, cos, sin).reshape(B, S, q_out)
    xk = apply_rotary_emb_half(xk, cos, sin).reshape(B, S, kv_out)

    # Flash attention in (B, S, H*D) layout — no HBM transposes; GQA heads
    # sharing a KV head are batched in the kernel.
    out = pallas_flash_attention(xq, xk, xv, segment_ids,
                                 n_heads=n_heads, n_kv_heads=n_kv_heads,
                                 head_dim=head_dim,
                                 block_q=block_q, block_k=block_k)

    # Output projection.
    out2 = pallas_matmul(out.reshape(B * S, q_out), wo.T.astype(jnp.bfloat16),
                         out_dtype=jnp.float32)
    return out2.reshape(B, S, dim)


# --------------------------- pure-JAX reference ----------------------------

def reference_forward(x, wq, wk, wv, wo, cos, sin, segment_ids,
                      n_heads, n_kv_heads):
    """Standard (non-flash) attention in the ORIGINAL llama formulation
    (interleaved RoPE, unpermuted / unscaled weights), mirroring the kernel's
    bf16/f32 numeric policy."""
    B, S, dim = x.shape
    head_dim = dim // n_heads
    n_rep = n_heads // n_kv_heads

    def mm(a, w):
        return jnp.dot(a.astype(jnp.bfloat16), w.astype(jnp.bfloat16),
                       preferred_element_type=jnp.float32).astype(jnp.bfloat16)

    x2 = x.reshape(B * S, dim)
    xq = mm(x2, wq.T).reshape(B, S, n_heads, head_dim)
    xk = mm(x2, wk.T).reshape(B, S, n_kv_heads, head_dim)
    xv = mm(x2, wv.T).reshape(B, S, n_kv_heads, head_dim)
    xq = apply_rotary_emb_interleaved(xq, cos, sin)
    xk = apply_rotary_emb_interleaved(xk, cos, sin)
    xk = jnp.repeat(xk, n_rep, axis=2)
    xv = jnp.repeat(xv, n_rep, axis=2)
    q = jnp.transpose(xq, (0, 2, 1, 3)).astype(jnp.float32)
    k = jnp.transpose(xk, (0, 2, 1, 3)).astype(jnp.float32)
    v = jnp.transpose(xv, (0, 2, 1, 3)).astype(jnp.float32)
    scores = jnp.einsum("bhqd,bhkd->bhqk", q, k) / math.sqrt(head_dim)
    row = jnp.arange(S)[:, None]
    col = jnp.arange(S)[None, :]
    allowed = (segment_ids[:, :, None] == segment_ids[:, None, :]) & (row >= col)
    scores = jnp.where(allowed[:, None, :, :], scores, -jnp.inf)
    p = jax.nn.softmax(scores, axis=-1)
    out = jnp.einsum("bhqk,bhkd->bhqd", p, v)
    out = jnp.transpose(out, (0, 2, 1, 3)).reshape(B * S, n_heads * head_dim)
    out = out.astype(jnp.bfloat16)
    return jnp.dot(out, wo.T.astype(jnp.bfloat16),
                   preferred_element_type=jnp.float32).reshape(B, S, dim)


# --------------------------------- main ------------------------------------

if __name__ == "__main__":
    # Small (but tile-exercising) config consistent with ModelArgs, parallel size 1.
    B, S = 2, 256
    dim = 512
    n_heads = 4
    n_kv_heads = 2
    head_dim = dim // n_heads          # 128 (lane-aligned, as in real llama)

    key = jax.random.PRNGKey(0)
    kx, kq, kk, kv, ko = jax.random.split(key, 5)
    x = jax.random.normal(kx, (B, S, dim), dtype=jnp.float32)
    wq = 0.02 * jax.random.normal(kq, (n_heads * head_dim, dim), dtype=jnp.float32)
    wk = 0.02 * jax.random.normal(kk, (n_kv_heads * head_dim, dim), dtype=jnp.float32)
    wv = 0.02 * jax.random.normal(kv, (n_kv_heads * head_dim, dim), dtype=jnp.float32)
    wo = 0.02 * jax.random.normal(ko, (dim, n_heads * head_dim), dtype=jnp.float32)

    cos, sin = precompute_freqs_cis(head_dim, S)

    # seq_len_list -> block-diagonal causal mask per batch element
    # (equivalent to BlockDiagonalCausalMask.from_seqlens in the module).
    seq_len_list = [[100, 156], [256]]
    segment_ids = jnp.stack([
        jnp.concatenate([jnp.full((l,), i, dtype=jnp.int32)
                         for i, l in enumerate(lens)])
        for lens in seq_len_list
    ])  # (B, S)

    out = attention_forward(x, wq, wk, wv, wo, cos, sin, segment_ids,
                            n_heads=n_heads, n_kv_heads=n_kv_heads,
                            block_q=128, block_k=128)
    out = jax.block_until_ready(out)

    ref = reference_forward(x, wq, wk, wv, wo, cos, sin, segment_ids,
                            n_heads, n_kv_heads)
    assert out.shape == (B, S, dim)
    err = float(jnp.max(jnp.abs(out - ref)))
    assert err < 3e-2, err
    print("KERNEL_OK")
</pallas_src>

<mosaic_0001>
module attributes {stable_mosaic.version = 11 : i64} {
  func.func @_matmul_kernel(%arg0: i32, %arg1: i32, %arg2: i32, %arg3: memref<256x512xbf16, #tpu.memory_space<vmem>>, %arg4: memref<512x256xbf16, #tpu.memory_space<vmem>>, %arg5: memref<256x256xbf16, #tpu.memory_space<vmem>>, %arg6: memref<256x256xf32, #tpu.memory_space<vmem>>) attributes {dimension_semantics = [#tpu.dimension_semantics<parallel>, #tpu.dimension_semantics<parallel>, #tpu.dimension_semantics<arbitrary>], iteration_bounds = array<i64: 2, 4, 1>, scalar_prefetch = 0 : i64, scratch_operands = 1 : i64, tpu.core_type = #tpu.core_type<tc>, window_params = [{transform_indices = @transform_0, window_bounds = array<i64: 256, 512>}, {transform_indices = @transform_1, window_bounds = array<i64: 512, 256>}, {transform_indices = @transform_2, window_bounds = array<i64: 256, 256>}]} {
    %c0_i32 = arith.constant 0 : i32
    %0 = arith.cmpi eq, %arg2, %c0_i32 : i32
    %1 = arith.extui %0 : i1 to i32
    %c0_i32_0 = arith.constant 0 : i32
    %2 = arith.cmpi ne, %1, %c0_i32_0 : i32
    scf.if %2 {
      %cst_10 = arith.constant 0.000000e+00 : f32
      %12 = vector.broadcast %cst_10 : f32 to vector<256x256xf32>
      %c0_11 = arith.constant 0 : index
      %c0_12 = arith.constant 0 : index
      %13 = vector.load %arg6[%c0_11, %c0_12] : memref<256x256xf32, #tpu.memory_space<vmem>>, vector<256x256xf32>
      tpu.vector_store %arg6[%c0_11, %c0_12], %12 {strides = array<i32>} : memref<256x256xf32, #tpu.memory_space<vmem>>, vector<256x256xf32>,
    } else {
    }
    %c0 = arith.constant 0 : index
    %c0_1 = arith.constant 0 : index
    %3 = vector.load %arg6[%c0, %c0_1] : memref<256x256xf32, #tpu.memory_space<vmem>>, vector<256x256xf32>
    %c0_2 = arith.constant 0 : index
    %c0_3 = arith.constant 0 : index
    %4 = vector.load %arg3[%c0_2, %c0_3] : memref<256x512xbf16, #tpu.memory_space<vmem>>, vector<256x512xbf16>
    %c0_4 = arith.constant 0 : index
    %c0_5 = arith.constant 0 : index
    %5 = vector.load %arg4[%c0_4, %c0_5] : memref<512x256xbf16, #tpu.memory_space<vmem>>, vector<512x256xbf16>
    %cst = arith.constant dense<0.000000e+00> : vector<256x256xf32>
    %6 = tpu.matmul %4, %5, %cst {dimension_numbers = #tpu.dot_dimension_numbers<[1], [0], [0], [1], [0, 0, 1, 1], [], []>} : vector<256x512xbf16>, vector<512x256xbf16>, vector<256x256xf32> -> vector<256x256xf32>
    %7 = arith.addf %3, %6 : vector<256x256xf32>
    %c0_6 = arith.constant 0 : index
    %c0_7 = arith.constant 0 : index
    %8 = vector.load %arg6[%c0_6, %c0_7] : memref<256x256xf32, #tpu.memory_space<vmem>>, vector<256x256xf32>
    tpu.vector_store %arg6[%c0_6, %c0_7], %7 {strides = array<i32>} : memref<256x256xf32, #tpu.memory_space<vmem>>, vector<256x256xf32>,
    %c0_i32_8 = arith.constant 0 : i32
    %9 = arith.cmpi eq, %arg2, %c0_i32_8 : i32
    %10 = arith.extui %9 : i1 to i32
    %c0_i32_9 = arith.constant 0 : i32
    %11 = arith.cmpi ne, %10, %c0_i32_9 : i32
    scf.if %11 {
      %c0_10 = arith.constant 0 : index
      %c0_11 = arith.constant 0 : index
      %12 = vector.load %arg6[%c0_10, %c0_11] : memref<256x256xf32, #tpu.memory_space<vmem>>, vector<256x256xf32>
      %13 = arith.truncf %12 : vector<256x256xf32> to vector<256x256xbf16>
      %c0_12 = arith.constant 0 : index
      %c0_13 = arith.constant 0 : index
      %14 = vector.load %arg5[%c0_12, %c0_13] : memref<256x256xbf16, #tpu.memory_space<vmem>>, vector<256x256xbf16>
      tpu.vector_store %arg5[%c0_12, %c0_13], %13 {strides = array<i32>} : memref<256x256xbf16, #tpu.memory_space<vmem>>, vector<256x256xbf16>,
    } else {
    }
    return
  }
  func.func @transform_0(%arg0: i32, %arg1: i32, %arg2: i32) -> (i32, i32) {
    %c0_i32 = arith.constant 0 : i32
    return %arg0, %arg2 : i32, i32
  }
  func.func @transform_1(%arg0: i32, %arg1: i32, %arg2: i32) -> (i32, i32) {
    %c0_i32 = arith.constant 0 : i32
    return %arg2, %arg1 : i32, i32
  }
  func.func @transform_2(%arg0: i32, %arg1: i32, %arg2: i32) -> (i32, i32) {
    %c0_i32 = arith.constant 0 : i32
    return %arg0, %arg1 : i32, i32
  }
}

module attributes {stable_mosaic.version = 11 : i64} {
  func.func @_flash_attn_kernel(%arg0: i32, %arg1: i32, %arg2: i32, %arg3: i32, %arg4: memref<1x128x128xi32, #tpu.memory_space<vmem>>, %arg5: memref<1x8x128xi32, #tpu.memory_space<vmem>>, %arg6: memref<1x128x256xbf16, #tpu.memory_space<vmem>>, %arg7: memref<1x128x128xbf16, #tpu.memory_space<vmem>>, %arg8: memref<1x128x128xbf16, #tpu.memory_space<vmem>>, %arg9: memref<1x128x256xbf16, #tpu.memory_space<vmem>>, %arg10: memref<2x128x1xf32, #tpu.memory_space<vmem>>, %arg11: memref<2x128x1xf32, #tpu.memory_space<vmem>>, %arg12: memref<2x128x128xf32, #tpu.memory_space<vmem>>) attributes {dimension_semantics = [#tpu.dimension_semantics<parallel>, #tpu.dimension_semantics<parallel>, #tpu.dimension_semantics<parallel>, #tpu.dimension_semantics<arbitrary>], iteration_bounds = array<i64: 2, 2, 2, 2>, scalar_prefetch = 0 : i64, scratch_operands = 3 : i64, tpu.core_type = #tpu.core_type<tc>, window_params = [{transform_indices = @transform_0, window_bounds = array<i64: 1, 128, 128>}, {transform_indices = @transform_1, window_bounds = array<i64: 1, 8, 128>}, {transform_indices = @transform_2, window_bounds = array<i64: 1, 128, 256>}, {transform_indices = @transform_3, window_bounds = array<i64: 1, 128, 128>}, {transform_indices = @transform_4, window_bounds = array<i64: 1, 128, 128>}, {transform_indices = @transform_5, window_bounds = array<i64: 1, 128, 256>}]} {
    %c0_i32 = arith.constant 0 : i32
    %0 = arith.cmpi eq, %arg3, %c0_i32 : i32
    %1 = arith.extui %0 : i1 to i32
    %c0_i32_0 = arith.constant 0 : i32
    %2 = arith.cmpi ne, %1, %c0_i32_0 : i32
    scf.if %2 {
      %cst = arith.constant -1.000000e+30 : f32
      %12 = vector.broadcast %cst : f32 to vector<2x128x1xf32>
      %c0 = arith.constant 0 : index
      %c0_4 = arith.constant 0 : index
      %c0_5 = arith.constant 0 : index
      %13 = vector.load %arg10[%c0, %c0_4, %c0_5] : memref<2x128x1xf32, #tpu.memory_space<vmem>>, vector<2x128x1xf32>
      tpu.vector_store %arg10[%c0, %c0_4, %c0_5], %12 {strides = array<i32>} : memref<2x128x1xf32, #tpu.memory_space<vmem>>, vector<2x128x1xf32>,
      %cst_6 = arith.constant 0.000000e+00 : f32
      %14 = vector.broadcast %cst_6 : f32 to vector<2x128x1xf32>
      %c0_7 = arith.constant 0 : index
      %c0_8 = arith.constant 0 : index
      %c0_9 = arith.constant 0 : index
      %15 = vector.load %arg11[%c0_7, %c0_8, %c0_9] : memref<2x128x1xf32, #tpu.memory_space<vmem>>, vector<2x128x1xf32>
      tpu.vector_store %arg11[%c0_7, %c0_8, %c0_9], %14 {strides = array<i32>} : memref<2x128x1xf32, #tpu.memory_space<vmem>>, vector<2x128x1xf32>,
      %cst_10 = arith.constant 0.000000e+00 : f32
      %16 = vector.broadcast %cst_10 : f32 to vector<2x128x128xf32>
      %c0_11 = arith.constant 0 : index
      %c0_12 = arith.constant 0 : index
      %c0_13 = arith.constant 0 : index
      %17 = vector.load %arg12[%c0_11, %c0_12, %c0_13] : memref<2x128x128xf32, #tpu.memory_space<vmem>>, vector<2x128x128xf32>
      tpu.vector_store %arg12[%c0_11, %c0_12, %c0_13], %16 {strides = array<i32>} : memref<2x128x128xf32, #tpu.memory_space<vmem>>, vector<2x128x128xf32>,
    } else {
    }
    %c128_i32 = arith.constant 128 : i32
    %3 = arith.muli %arg3, %c128_i32 : i32
    %c128_i32_1 = arith.constant 128 : i32
    %4 = arith.muli %arg2, %c128_i32_1 : i32
    %c127_i32 = arith.constant 127 : i32
    %5 = arith.addi %4, %c127_i32 : i32
    %6 = arith.cmpi sle, %3, %5 : i32
    %7 = arith.extui %6 : i1 to i32
    %c0_i32_2 = arith.constant 0 : i32
    %8 = arith.cmpi ne, %7, %c0_i32_2 : i32
    scf.if %8 {
      %c0 = arith.constant 0 : index
      %c0_4 = arith.constant 0 : index
      %c0_5 = arith.constant 0 : index
      %12 = vector.load %arg7[%c0, %c0_4, %c0_5] : memref<1x128x128xbf16, #tpu.memory_space<vmem>>, vector<1x128x128xbf16>
      %13 = vector.shape_cast %12 : vector<1x128x128xbf16> to vector<128x128xbf16>
      %c0_6 = arith.constant 0 : index
      %c0_7 = arith.constant 0 : index
      %c0_8 = arith.constant 0 : index
      %14 = vector.load %arg8[%c0_6, %c0_7, %c0_8] : memref<1x128x128xbf16, #tpu.memory_space<vmem>>, vector<1x128x128xbf16>
      %15 = vector.shape_cast %14 : vector<1x128x128xbf16> to vector<128x128xbf16>
      %c128_i32_9 = arith.constant 128 : i32
      %16 = arith.muli %arg2, %c128_i32_9 : i32
      %17 = tpu.iota {dimensions = array<i32: 0>} : vector<128x128xi32>
      %18 = vector.broadcast %16 : i32 to vector<128x128xi32>
      %19 = arith.addi %18, %17 : vector<128x128xi32>
      %c128_i32_10 = arith.constant 128 : i32
      %20 = arith.muli %arg3, %c128_i32_10 : i32
      %21 = tpu.iota {dimensions = array<i32: 1>} : vector<128x128xi32>
      %22 = vector.broadcast %20 : i32 to vector<128x128xi32>
      %23 = arith.addi %22, %21 : vector<128x128xi32>
      %c0_11 = arith.constant 0 : index
      %c0_12 = arith.constant 0 : index
      %c0_13 = arith.constant 0 : index
      %24 = vector.load %arg4[%c0_11, %c0_12, %c0_13] : memref<1x128x128xi32, #tpu.memory_space<vmem>>, vector<1x128x128xi32>
      %25 = vector.shape_cast %24 : vector<1x128x128xi32> to vector<128x128xi32>
      %26 = vector.extract_strided_slice %25 {offsets = [0, 0], sizes = [128, 1], strides = [1, 1]} : vector<128x128xi32> to vector<128x1xi32>
      %c0_14 = arith.constant 0 : index
      %c0_15 = arith.constant 0 : index
      %c0_16 = arith.constant 0 : index
      %27 = vector.load %arg5[%c0_14, %c0_15, %c0_16] : memref<1x8x128xi32, #tpu.memory_space<vmem>>, vector<1x8x128xi32>
      %28 = vector.shape_cast %27 : vector<1x8x128xi32> to vector<8x128xi32>
      %29 = vector.extract_strided_slice %28 {offsets = [0, 0], sizes = [1, 128], strides = [1, 1]} : vector<8x128xi32> to vector<1x128xi32>
      %30 = vector.broadcast %26 : vector<128x1xi32> to vector<128x128xi32>
      %31 = vector.broadcast %29 : vector<1x128xi32> to vector<128x128xi32>
      %32 = arith.cmpi eq, %30, %31 : vector<128x128xi32>
      %33 = arith.cmpi sge, %19, %23 : vector<128x128xi32>
      %34 = arith.andi %32, %33 : vector<128x128xi1>
      %c0_17 = arith.constant 0 : index
      %c0_18 = arith.constant 0 : index
      %c0_19 = arith.constant 0 : index
      %35 = vector.load %arg6[%c0_17, %c0_18, %c0_19] : memref<1x128x256xbf16, #tpu.memory_space<vmem>>, vector<1x128x128xbf16>
      %36 = vector.shape_cast %35 : vector<1x128x128xbf16> to vector<128x128xbf16>
      %cst = arith.constant dense<0.000000e+00> : vector<128x128xf32>
      %37 = tpu.matmul %36, %13, %cst {dimension_numbers = #tpu.dot_dimension_numbers<[1], [1], [0], [0], [0, 0, 1, 0], [], []>} : vector<128x128xbf16>, vector<128x128xbf16>, vector<128x128xf32> -> vector<128x128xf32>
      %cst_20 = arith.constant -1.000000e+30 : f32
      %38 = vector.broadcast %cst_20 : f32 to vector<128x128xf32>
      %39 = arith.select %34, %37, %38 : vector<128x128xi1>, vector<128x128xf32>
      %c0_21 = arith.constant 0 : index
      %c0_22 = arith.constant 0 : index
      %c0_23 = arith.constant 0 : index
      %40 = vector.load %arg10[%c0_21, %c0_22, %c0_23] : memref<2x128x1xf32, #tpu.memory_space<vmem>>, vector<1x128x1xf32>
      %41 = vector.shape_cast %40 : vector<1x128x1xf32> to vector<128x1xf32>
      %cst_24 = arith.constant dense<0xFF800000> : vector<128xf32>
      %42 = vector.multi_reduction <maximumf>, %39, %cst_24 [1] : vector<128x128xf32> to vector<128xf32>
      %43 = vector.shape_cast %42 : vector<128xf32> to vector<128x1xf32>
      %44 = arith.maximumf %41, %43 : vector<128x1xf32>
      %45 = arith.subf %41, %44 : vector<128x1xf32>
      %46 = math.exp %45 : vector<128x1xf32>
      %47 = vector.broadcast %44 : vector<128x1xf32> to vector<128x128xf32>
      %48 = arith.subf %39, %47 : vector<128x128xf32>
      %49 = math.exp %48 : vector<128x128xf32>
      %c0_25 = arith.constant 0 : index
      %c0_26 = arith.constant 0 : index
      %c0_27 = arith.constant 0 : index
      %50 = vector.load %arg11[%c0_25, %c0_26, %c0_27] : memref<2x128x1xf32, #tpu.memory_space<vmem>>, vector<1x128x1xf32>
      %51 = vector.shape_cast %50 : vector<1x128x1xf32> to vector<128x1xf32>
      %52 = arith.mulf %46, %51 : vector<128x1xf32>
      %cst_28 = arith.constant dense<0.000000e+00> : vector<128xf32>
      %53 = vector.multi_reduction <add>, %49, %cst_28 [1] : vector<128x128xf32> to vector<128xf32>
      %54 = vector.shape_cast %53 : vector<128xf32> to vector<128x1xf32>
      %55 = arith.addf %52, %54 : vector<128x1xf32>
      %c0_29 = arith.constant 0 : index
      %c0_30 = arith.constant 0 : index
      %c0_31 = arith.constant 0 : index
      %56 = vector.load %arg11[%c0_29, %c0_30, %c0_31] : memref<2x128x1xf32, #tpu.memory_space<vmem>>, vector<1x128x1xf32>
      %57 = vector.shape_cast %56 : vector<1x128x1xf32> to vector<128x1xf32>
      %58 = vector.shape_cast %55 : vector<128x1xf32> to vector<1x128x1xf32>
      tpu.vector_store %arg11[%c0_29, %c0_30, %c0_31], %58 {strides = array<i32>} : memref<2x128x1xf32, #tpu.memory_space<vmem>>, vector<1x128x1xf32>,
      %c0_32 = arith.constant 0 : index
      %c0_33 = arith.constant 0 : index
      %c0_34 = arith.constant 0 : index
      %59 = vector.load %arg12[%c0_32, %c0_33, %c0_34] : memref<2x128x128xf32, #tpu.memory_space<vmem>>, vector<1x128x128xf32>
      %60 = vector.shape_cast %59 : vector<1x128x128xf32> to vector<128x128xf32>
      %61 = vector.broadcast %46 : vector<128x1xf32> to vector<128x128xf32>
      %62 = arith.mulf %61, %60 : vector<128x128xf32>
      %63 = arith.truncf %49 : vector<128x128xf32> to vector<128x128xbf16>
      %cst_35 = arith.constant dense<0.000000e+00> : vector<128x128xf32>
      %64 = tpu.matmul %63, %15, %cst_35 {dimension_numbers = #tpu.dot_dimension_numbers<[1], [0], [0], [1], [0, 0, 1, 1], [], []>} : vector<128x128xbf16>, vector<128x128xbf16>, vector<128x128xf32> -> vector<128x128xf32>
      %65 = arith.addf %62, %64 : vector<128x128xf32>
      %c0_36 = arith.constant 0 : index
      %c0_37 = arith.constant 0 : index
      %c0_38 = arith.constant 0 : index
      %66 = vector.load %arg12[%c0_36, %c0_37, %c0_38] : memref<2x128x128xf32, #tpu.memory_space<vmem>>, vector<1x128x128xf32>
      %67 = vector.shape_cast %66 : vector<1x128x128xf32> to vector<128x128xf32>
      %68 = vector.shape_cast %65 : vector<128x128xf32> to vector<1x128x128xf32>
      tpu.vector_store %arg12[%c0_36, %c0_37, %c0_38], %68 {strides = array<i32>} : memref<2x128x128xf32, #tpu.memory_space<vmem>>, vector<1x128x128xf32>,
      %c0_39 = arith.constant 0 : index
      %c0_40 = arith.constant 0 : index
      %c0_41 = arith.constant 0 : index
      %69 = vector.load %arg10[%c0_39, %c0_40, %c0_41] : memref<2x128x1xf32, #tpu.memory_space<vmem>>, vector<1x128x1xf32>
      %70 = vector.shape_cast %69 : vector<1x128x1xf32> to vector<128x1xf32>
      %71 = vector.shape_cast %44 : vector<128x1xf32> to vector<1x128x1xf32>
      tpu.vector_store %arg10[%c0_39, %c0_40, %c0_41], %71 {strides = array<i32>} : memref<2x128x1xf32, #tpu.memory_space<vmem>>, vector<1x128x1xf32>,
      %c0_42 = arith.constant 0 : index
      %c0_43 = arith.constant 0 : index
      %c128 = arith.constant 128 : index
      %72 = vector.load %arg6[%c0_42, %c0_43, %c128] : memref<1x128x256xbf16, #tpu.memory_space<vmem>>, vector<1x128x128xbf16>
      %73 = vector.shape_cast %72 : vector<1x128x128xbf16> to vector<128x128xbf16>
      %cst_44 = arith.constant dense<0.000000e+00> : vector<128x128xf32>
      %74 = tpu.matmul %73, %13, %cst_44 {dimension_numbers = #tpu.dot_dimension_numbers<[1], [1], [0], [0], [0, 0, 1, 0], [], []>} : vector<128x128xbf16>, vector<128x128xbf16>, vector<128x128xf32> -> vector<128x128xf32>
      %cst_45 = arith.constant -1.000000e+30 : f32
      %75 = vector.broadcast %cst_45 : f32 to vector<128x128xf32>
      %76 = arith.select %34, %74, %75 : vector<128x128xi1>, vector<128x128xf32>
      %c1 = arith.constant 1 : index
      %c0_46 = arith.constant 0 : index
      %c0_47 = arith.constant 0 : index
      %77 = vector.load %arg10[%c1, %c0_46, %c0_47] : memref<2x128x1xf32, #tpu.memory_space<vmem>>, vector<1x128x1xf32>
      %78 = vector.shape_cast %77 : vector<1x128x1xf32> to vector<128x1xf32>
      %cst_48 = arith.constant dense<0xFF800000> : vector<128xf32>
      %79 = vector.multi_reduction <maximumf>, %76, %cst_48 [1] : vector<128x128xf32> to vector<128xf32>
      %80 = vector.shape_cast %79 : vector<128xf32> to vector<128x1xf32>
      %81 = arith.maximumf %78, %80 : vector<128x1xf32>
      %82 = arith.subf %78, %81 : vector<128x1xf32>
      %83 = math.exp %82 : vector<128x1xf32>
      %84 = vector.broadcast %81 : vector<128x1xf32> to vector<128x128xf32>
      %85 = arith.subf %76, %84 : vector<128x128xf32>
      %86 = math.exp %85 : vector<128x128xf32>
      %c1_49 = arith.constant 1 : index
      %c0_50 = arith.constant 0 : index
      %c0_51 = arith.constant 0 : index
      %87 = vector.load %arg11[%c1_49, %c0_50, %c0_51] : memref<2x128x1xf32, #tpu.memory_space<vmem>>, vector<1x128x1xf32>
      %88 = vector.shape_cast %87 : vector<1x128x1xf32> to vector<128x1xf32>
      %89 = arith.mulf %83, %88 : vector<128x1xf32>
      %cst_52 = arith.constant dense<0.000000e+00> : vector<128xf32>
      %90 = vector.multi_reduction <add>, %86, %cst_52 [1] : vector<128x128xf32> to vector<128xf32>
      %91 = vector.shape_cast %90 : vector<128xf32> to vector<128x1xf32>
      %92 = arith.addf %89, %91 : vector<128x1xf32>
      %c1_53 = arith.constant 1 : index
      %c0_54 = arith.constant 0 : index
      %c0_55 = arith.constant 0 : index
      %93 = vector.load %arg11[%c1_53, %c0_54, %c0_55] : memref<2x128x1xf32, #tpu.memory_space<vmem>>, vector<1x128x1xf32>
      %94 = vector.shape_cast %93 : vector<1x128x1xf32> to vector<128x1xf32>
      %95 = vector.shape_cast %92 : vector<128x1xf32> to vector<1x128x1xf32>
      tpu.vector_store %arg11[%c1_53, %c0_54, %c0_55], %95 {strides = array<i32>} : memref<2x128x1xf32, #tpu.memory_space<vmem>>, vector<1x128x1xf32>,
      %c1_56 = arith.constant 1 : index
      %c0_57 = arith.constant 0 : index
      %c0_58 = arith.constant 0 : index
      %96 = vector.load %arg12[%c1_56, %c0_57, %c0_58] : memref<2x128x128xf32, #tpu.memory_space<vmem>>, vector<1x128x128xf32>
      %97 = vector.shape_cast %96 : vector<1x128x128xf32> to vector<128x128xf32>
      %98 = vector.broadcast %83 : vector<128x1xf32> to vector<128x128xf32>
      %99 = arith.mulf %98, %97 : vector<128x128xf32>
      %100 = arith.truncf %86 : vector<128x128xf32> to vector<128x128xbf16>
      %cst_59 = arith.constant dense<0.000000e+00> : vector<128x128xf32>
      %101 = tpu.matmul %100, %15, %cst_59 {dimension_numbers = #tpu.dot_dimension_numbers<[1], [0], [0], [1], [0, 0, 1, 1], [], []>} : vector<128x128xbf16>, vector<128x128xbf16>, vector<128x128xf32> -> vector<128x128xf32>
      %102 = arith.addf %99, %101 : vector<128x128xf32>
      %c1_60 = arith.constant 1 : index
      %c0_61 = arith.constant 0 : index
      %c0_62 = arith.constant 0 : index
      %103 = vector.load %arg12[%c1_60, %c0_61, %c0_62] : memref<2x128x128xf32, #tpu.memory_space<vmem>>, vector<1x128x128xf32>
      %104 = vector.shape_cast %103 : vector<1x128x128xf32> to vector<128x128xf32>
      %105 = vector.shape_cast %102 : vector<128x128xf32> to vector<1x128x128xf32>
      tpu.vector_store %arg12[%c1_60, %c0_61, %c0_62], %105 {strides = array<i32>} : memref<2x128x128xf32, #tpu.memory_space<vmem>>, vector<1x128x128xf32>,
      %c1_63 = arith.constant 1 : index
      %c0_64 = arith.constant 0 : index
      %c0_65 = arith.constant 0 : index
      %106 = vector.load %arg10[%c1_63, %c0_64, %c0_65] : memref<2x128x1xf32, #tpu.memory_space<vmem>>, vector<1x128x1xf32>
      %107 = vector.shape_cast %106 : vector<1x128x1xf32> to vector<128x1xf32>
      %108 = vector.shape_cast %81 : vector<128x1xf32> to vector<1x128x1xf32>
      tpu.vector_store %arg10[%c1_63, %c0_64, %c0_65], %108 {strides = array<i32>} : memref<2x128x1xf32, #tpu.memory_space<vmem>>, vector<1x128x1xf32>,
    } else {
    }
    %c1_i32 = arith.constant 1 : i32
    %9 = arith.cmpi eq, %arg3, %c1_i32 : i32
    %10 = arith.extui %9 : i1 to i32
    %c0_i32_3 = arith.constant 0 : i32
    %11 = arith.cmpi ne, %10, %c0_i32_3 : i32
    scf.if %11 {
      %c0 = arith.constant 0 : index
      %c0_4 = arith.constant 0 : index
      %c0_5 = arith.constant 0 : index
      %12 = vector.load %arg11[%c0, %c0_4, %c0_5] : memref<2x128x1xf32, #tpu.memory_space<vmem>>, vector<1x128x1xf32>
      %13 = vector.shape_cast %12 : vector<1x128x1xf32> to vector<128x1xf32>
      %14 = tpu.reciprocal %13 {approx = true} : vector<128x1xf32> -> vector<128x1xf32>
      %c0_6 = arith.constant 0 : index
      %c0_7 = arith.constant 0 : index
      %c0_8 = arith.constant 0 : index
      %15 = vector.load %arg12[%c0_6, %c0_7, %c0_8] : memref<2x128x128xf32, #tpu.memory_space<vmem>>, vector<1x128x128xf32>
      %16 = vector.shape_cast %15 : vector<1x128x128xf32> to vector<128x128xf32>
      %17 = vector.broadcast %14 : vector<128x1xf32> to vector<128x128xf32>
      %18 = arith.mulf %16, %17 : vector<128x128xf32>
      %19 = arith.truncf %18 : vector<128x128xf32> to vector<128x128xbf16>
      %c0_9 = arith.constant 0 : index
      %c0_10 = arith.constant 0 : index
      %c0_11 = arith.constant 0 : index
      %20 = vector.load %arg9[%c0_9, %c0_10, %c0_11] : memref<1x128x256xbf16, #tpu.memory_space<vmem>>, vector<1x128x128xbf16>
      %21 = vector.shape_cast %20 : vector<1x128x128xbf16> to vector<128x128xbf16>
      %22 = vector.shape_cast %19 : vector<128x128xbf16> to vector<1x128x128xbf16>
      tpu.vector_store %arg9[%c0_9, %c0_10, %c0_11], %22 {strides = array<i32>} : memref<1x128x256xbf16, #tpu.memory_space<vmem>>, vector<1x128x128xbf16>,
      %c1 = arith.constant 1 : index
      %c0_12 = arith.constant 0 : index
      %c0_13 = arith.constant 0 : index
      %23 = vector.load %arg11[%c1, %c0_12, %c0_13] : memref<2x128x1xf32, #tpu.memory_space<vmem>>, vector<1x128x1xf32>
      %24 = vector.shape_cast %23 : vector<1x128x1xf32> to vector<128x1xf32>
      %25 = tpu.reciprocal %24 {approx = true} : vector<128x1xf32> -> vector<128x1xf32>
      %c1_14 = arith.constant 1 : index
      %c0_15 = arith.constant 0 : index
      %c0_16 = arith.constant 0 : index
      %26 = vector.load %arg12[%c1_14, %c0_15, %c0_16] : memref<2x128x128xf32, #tpu.memory_space<vmem>>, vector<1x128x128xf32>
      %27 = vector.shape_cast %26 : vector<1x128x128xf32> to vector<128x128xf32>
      %28 = vector.broadcast %25 : vector<128x1xf32> to vector<128x128xf32>
      %29 = arith.mulf %27, %28 : vector<128x128xf32>
      %30 = arith.truncf %29 : vector<128x128xf32> to vector<128x128xbf16>
      %c0_17 = arith.constant 0 : index
      %c0_18 = arith.constant 0 : index
      %c128 = arith.constant 128 : index
      %31 = vector.load %arg9[%c0_17, %c0_18, %c128] : memref<1x128x256xbf16, #tpu.memory_space<vmem>>, vector<1x128x128xbf16>
      %32 = vector.shape_cast %31 : vector<1x128x128xbf16> to vector<128x128xbf16>
      %33 = vector.shape_cast %30 : vector<128x128xbf16> to vector<1x128x128xbf16>
      tpu.vector_store %arg9[%c0_17, %c0_18, %c128], %33 {strides = array<i32>} : memref<1x128x256xbf16, #tpu.memory_space<vmem>>, vector<1x128x128xbf16>,
    } else {
    }
    return
  }
  func.func @transform_0(%arg0: i32, %arg1: i32, %arg2: i32, %arg3: i32) -> (i32, i32, i32) {
    %c0_i32 = arith.constant 0 : i32
    %c0_i32_0 = arith.constant 0 : i32
    return %arg0, %arg2, %c0_i32 : i32, i32, i32
  }
  func.func @transform_1(%arg0: i32, %arg1: i32, %arg2: i32, %arg3: i32) -> (i32, i32, i32) {
    %c128_i32 = arith.constant 128 : i32
    %0 = arith.muli %arg3, %c128_i32 : i32
    %c128_i32_0 = arith.constant 128 : i32
    %1 = arith.muli %arg2, %c128_i32_0 : i32
    %c127_i32 = arith.constant 127 : i32
    %2 = arith.addi %1, %c127_i32 : i32
    %3 = arith.cmpi sle, %0, %2 : i32
    %c0_i32 = arith.constant 0 : i32
    %4 = arith.select %3, %arg3, %c0_i32 : i32
    %c0_i32_1 = arith.constant 0 : i32
    %c0_i32_2 = arith.constant 0 : i32
    return %arg0, %c0_i32_1, %4 : i32, i32, i32
  }
  func.func @transform_2(%arg0: i32, %arg1: i32, %arg2: i32, %arg3: i32) -> (i32, i32, i32) {
    %c0_i32 = arith.constant 0 : i32
    return %arg0, %arg2, %arg1 : i32, i32, i32
  }
  func.func @transform_3(%arg0: i32, %arg1: i32, %arg2: i32, %arg3: i32) -> (i32, i32, i32) {
    %c128_i32 = arith.constant 128 : i32
    %0 = arith.muli %arg3, %c128_i32 : i32
    %c128_i32_0 = arith.constant 128 : i32
    %1 = arith.muli %arg2, %c128_i32_0 : i32
    %c127_i32 = arith.constant 127 : i32
    %2 = arith.addi %1, %c127_i32 : i32
    %3 = arith.cmpi sle, %0, %2 : i32
    %c0_i32 = arith.constant 0 : i32
    %4 = arith.select %3, %arg3, %c0_i32 : i32
    %c0_i32_1 = arith.constant 0 : i32
    return %arg0, %4, %arg1 : i32, i32, i32
  }
  func.func @transform_4(%arg0: i32, %arg1: i32, %arg2: i32, %arg3: i32) -> (i32, i32, i32) {
    %c128_i32 = arith.constant 128 : i32
    %0 = arith.muli %arg3, %c128_i32 : i32
    %c128_i32_0 = arith.constant 128 : i32
    %1 = arith.muli %arg2, %c128_i32_0 : i32
    %c127_i32 = arith.constant 127 : i32
    %2 = arith.addi %1, %c127_i32 : i32
    %3 = arith.cmpi sle, %0, %2 : i32
    %c0_i32 = arith.constant 0 : i32
    %4 = arith.select %3, %arg3, %c0_i32 : i32
    %c0_i32_1 = arith.constant 0 : i32
    return %arg0, %4, %arg1 : i32, i32, i32
  }
  func.func @transform_5(%arg0: i32, %arg1: i32, %arg2: i32, %arg3: i32) -> (i32, i32, i32) {
    %c0_i32 = arith.constant 0 : i32
    return %arg0, %arg2, %arg1 : i32, i32, i32
  }
}

module attributes {stable_mosaic.version = 11 : i64} {
  func.func @_matmul_kernel(%arg0: i32, %arg1: i32, %arg2: i32, %arg3: memref<256x512xbf16, #tpu.memory_space<vmem>>, %arg4: memref<512x256xbf16, #tpu.memory_space<vmem>>, %arg5: memref<256x256xf32, #tpu.memory_space<vmem>>, %arg6: memref<256x256xf32, #tpu.memory_space<vmem>>) attributes {dimension_semantics = [#tpu.dimension_semantics<parallel>, #tpu.dimension_semantics<parallel>, #tpu.dimension_semantics<arbitrary>], iteration_bounds = array<i64: 2, 2, 1>, scalar_prefetch = 0 : i64, scratch_operands = 1 : i64, tpu.core_type = #tpu.core_type<tc>, window_params = [{transform_indices = @transform_0, window_bounds = array<i64: 256, 512>}, {transform_indices = @transform_1, window_bounds = array<i64: 512, 256>}, {transform_indices = @transform_2, window_bounds = array<i64: 256, 256>}]} {
    %c0_i32 = arith.constant 0 : i32
    %0 = arith.cmpi eq, %arg2, %c0_i32 : i32
    %1 = arith.extui %0 : i1 to i32
    %c0_i32_0 = arith.constant 0 : i32
    %2 = arith.cmpi ne, %1, %c0_i32_0 : i32
    scf.if %2 {
      %cst_10 = arith.constant 0.000000e+00 : f32
      %12 = vector.broadcast %cst_10 : f32 to vector<256x256xf32>
      %c0_11 = arith.constant 0 : index
      %c0_12 = arith.constant 0 : index
      %13 = vector.load %arg6[%c0_11, %c0_12] : memref<256x256xf32, #tpu.memory_space<vmem>>, vector<256x256xf32>
      tpu.vector_store %arg6[%c0_11, %c0_12], %12 {strides = array<i32>} : memref<256x256xf32, #tpu.memory_space<vmem>>, vector<256x256xf32>,
    } else {
    }
    %c0 = arith.constant 0 : index
    %c0_1 = arith.constant 0 : index
    %3 = vector.load %arg6[%c0, %c0_1] : memref<256x256xf32, #tpu.memory_space<vmem>>, vector<256x256xf32>
    %c0_2 = arith.constant 0 : index
    %c0_3 = arith.constant 0 : index
    %4 = vector.load %arg3[%c0_2, %c0_3] : memref<256x512xbf16, #tpu.memory_space<vmem>>, vector<256x512xbf16>
    %c0_4 = arith.constant 0 : index
    %c0_5 = arith.constant 0 : index
    %5 = vector.load %arg4[%c0_4, %c0_5] : memref<512x256xbf16, #tpu.memory_space<vmem>>, vector<512x256xbf16>
    %cst = arith.constant dense<0.000000e+00> : vector<256x256xf32>
    %6 = tpu.matmul %4, %5, %cst {dimension_numbers = #tpu.dot_dimension_numbers<[1], [0], [0], [1], [0, 0, 1, 1], [], []>} : vector<256x512xbf16>, vector<512x256xbf16>, vector<256x256xf32> -> vector<256x256xf32>
    %7 = arith.addf %3, %6 : vector<256x256xf32>
    %c0_6 = arith.constant 0 : index
    %c0_7 = arith.constant 0 : index
    %8 = vector.load %arg6[%c0_6, %c0_7] : memref<256x256xf32, #tpu.memory_space<vmem>>, vector<256x256xf32>
    tpu.vector_store %arg6[%c0_6, %c0_7], %7 {strides = array<i32>} : memref<256x256xf32, #tpu.memory_space<vmem>>, vector<256x256xf32>,
    %c0_i32_8 = arith.constant 0 : i32
    %9 = arith.cmpi eq, %arg2, %c0_i32_8 : i32
    %10 = arith.extui %9 : i1 to i32
    %c0_i32_9 = arith.constant 0 : i32
    %11 = arith.cmpi ne, %10, %c0_i32_9 : i32
    scf.if %11 {
      %c0_10 = arith.constant 0 : index
      %c0_11 = arith.constant 0 : index
      %12 = vector.load %arg6[%c0_10, %c0_11] : memref<256x256xf32, #tpu.memory_space<vmem>>, vector<256x256xf32>
      %c0_12 = arith.constant 0 : index
      %c0_13 = arith.constant 0 : index
      %13 = vector.load %arg5[%c0_12, %c0_13] : memref<256x256xf32, #tpu.memory_space<vmem>>, vector<256x256xf32>
      tpu.vector_store %arg5[%c0_12, %c0_13], %12 {strides = array<i32>} : memref<256x256xf32, #tpu.memory_space<vmem>>, vector<256x256xf32>,
    } else {
    }
    return
  }
  func.func @transform_0(%arg0: i32, %arg1: i32, %arg2: i32) -> (i32, i32) {
    %c0_i32 = arith.constant 0 : i32
    return %arg0, %arg2 : i32, i32
  }
  func.func @transform_1(%arg0: i32, %arg1: i32, %arg2: i32) -> (i32, i32) {
    %c0_i32 = arith.constant 0 : i32
    return %arg2, %arg1 : i32, i32
  }
  func.func @transform_2(%arg0: i32, %arg1: i32, %arg2: i32) -> (i32, i32) {
    %c0_i32 = arith.constant 0 : i32
    return %arg0, %arg1 : i32, i32
  }
}

</mosaic_0001>

<bundles_post_ra>
// kernel: attention_forward.3
= control target key start
LH: loop header
LB: loop body
LE: loop exit
PB: predicated region body
PF: predicated region fallthrough
CT: control target
= control target key end

     0   :  { %s3095_s9 = smov 0   ;;  %s3097_s10 = smov 0   ;;  %s3581_s0 = inlined_call_operand.vmem [shape: bf16[512,512], index: 0, kind: input, shape index: {}]   ;;  %s3582_s1 = inlined_call_operand.vmem [shape: bf16[512,1024], index: 1, kind: input, shape index: {}]   ;;  %s3583_s2 = inlined_call_operand.vmem [shape: bf16[512,1024], index: 2, kind: output, shape index: {}]  }
   0x1   :  { %s3099_s11 = smov 0   ;;  %s3101_s12 = smov 0  }
   0x2   :  { %s3103_s13 = smov 0   ;;  %s3105_s14 = smov 0  }
   0x3   :  { %s3107_s15 = smov 0   ;;  %s3109_s16 = smov 0  }
   0x4   :  { %s3111_s17 = smov 0  }
   0x5 LB: > { %s2465_s18 = sadd.s32 4294967295, %s3078_s17   ;;  %s27_s19 = sadd.s32 1, %s3070_s15  ;;  %s3078_s17 = sphi %s3111_s17, %s12_s17   ;;  %s3074_s16 = sphi %s3109_s16, %s3592_s16   ;;  %s3070_s15 = sphi %s3107_s15, %s3591_s15   ;;  %s3066_s14 = sphi %s3105_s14, %s3590_s14   ;;  %s3062_s13 = sphi %s3103_s13, %s3589_s13   ;;  %s3058_s12 = sphi %s3101_s12, %s3588_s12   ;;  %s3054_s11 = sphi %s3099_s11, %s3587_s11   ;;  %s3050_s10 = sphi %s3097_s10, %s3586_s10   ;;  %s3046_s9 = sphi %s3095_s9, %s3585_s9  }
   0x6   : > { %p29_p0 = scmp.ge.s32.totalorder %s27_s19, 4  ;;  %s31_s20 = sadd.s32 1, %s3074_s16 }
   0x7   : > { %s68_s21 = sadd.s32 1, %s3058_s12  ;;  %p75_p1 = scmp.ne.s32.totalorder %s3058_s12, %s3054_s11 }
   0x8   : > { %s3594_s19 = smov (%p29_p0, %s27_s19), 0  ;;  %s3596_s20 = smov (!%p29_p0, %s31_s20), %s3074_s16 }
   0x9   : > { %s64_s22 = ssub.s32 %s3070_s15, %s3594_s19  ;;  %p76_p2 = scmp.eq.s32.totalorder %s3078_s17, 0 }
   0xa   : > { %p33_p3 = scmp.ge.s32.totalorder %s3596_s20, 2  ;;  %p66_p4 = scmp.eq.s32.totalorder %s64_s22, 0 }
   0xb   : > { %p77_p5 = por %p76_p2, %p75_p1  ;;  %s96_s23 = sadd.s32 1, %s3050_s10 }
   0xc   : > { %s3598_s20 = smov (%p33_p3, %s3596_s20), 0  ;;  %p106_p6 = scmp.ne.s32.totalorder %s3050_s10, %s3046_s9 }
   0xd   : > { %s3156_s24 = scalar_select %p66_p4, %s3058_s12, %s68_s21  }
   0xe   : > { %s91_s25 = ssub.s32 %s3074_s16, %s3598_s20  ;;  %p107_p7 = scmp.eq.s32.totalorder %s2465_s18, 7 }
   0xf   : > { %s93_s26 = sor.u32 %s91_s25, %s64_s22  ;;  %p2468_p10 = scmp.ge.s32.totalorder %s3078_s17, 8 }
  0x10   : > { %p94_p8 = scmp.eq.s32.totalorder %s93_s26, 0  ;;  %p3162_p9 = por %p107_p7, %p106_p6 }
  0x11   : > { %129 = sbr.rel (%p2468_p10) target bundleno = 92 (0x5c), region = 16 }
  0x12   : > { %s3167_s28 = scalar_select %p94_p8, %s3050_s10, %s96_s23  }
  0x18   : > { %147 = sbr.rel (!%p77_p5) target bundleno = 92 (0x5c), region = 24  ;;  %s149_s29 = sand.u32 (%p77_p5), 1, %s3058_s12  }
  0x19   : > { %s2645_s30 = sshll.u32 (%p77_p5), %s3070_s15, 3  ;;  %s2469_s3 = sshll.u32 (%p77_p5), %s149_s29, 9 }
  0x1a   : > { %s3175_s6 = scalar_lea.vmem (%p77_p5), %s3582_s1, %s2645_s30  ;;  %s3180_s7 = scalar_lea.vmem (%p77_p5), [#allocation3], %s2469_s3 }
  0x1b   : > { %v311_v0 = vld [vmem:[%s3175_s6] sm:$0xff] (%p77_p5) }
  0x1c   : > { %v313_v1 = vld [vmem:[%s3175_s6 + $0x20] sm:$0xff] (%p77_p5)  ;;  %312 = vst [vmem:[%s3180_s7] sm:$0xff] (%p77_p5), %v311_v0 }
  0x1d   : > { %v315_v2 = vld [vmem:[%s3175_s6 + $0x40] sm:$0xff] (%p77_p5)  ;;  %314 = vst [vmem:[%s3180_s7 + $0x8] sm:$0xff] (%p77_p5), %v313_v1 }
  0x1e   : > { %316 = vst [vmem:[%s3180_s7 + $0x10] sm:$0xff] (%p77_p5), %v315_v2  ;;  %v317_v3 = vld [vmem:[%s3175_s6 + $0x60] sm:$0xff] (%p77_p5) }
  0x1f   : > { %v319_v4 = vld [vmem:[%s3175_s6 + $0x80] sm:$0xff]  ;;  %318 = vst [vmem:[%s3180_s7 + $0x18] sm:$0xff] %v317_v3 }
  0x20   : > { %v321_v5 = vld [vmem:[%s3175_s6 + $0xa0] sm:$0xff]  ;;  %320 = vst [vmem:[%s3180_s7 + $0x20] sm:$0xff] %v319_v4 }
  0x21   : > { %322 = vst [vmem:[%s3180_s7 + $0x28] sm:$0xff] %v321_v5  ;;  %v323_v6 = vld [vmem:[%s3175_s6 + $0xc0] sm:$0xff] }
  0x22   : > { %v325_v7 = vld [vmem:[%s3175_s6 + $0xe0] sm:$0xff]  ;;  %324 = vst [vmem:[%s3180_s7 + $0x30] sm:$0xff] %v323_v6 }
  0x23   : > { %v327_v8 = vld [vmem:[%s3175_s6 + $0x100] sm:$0xff]  ;;  %326 = vst [vmem:[%s3180_s7 + $0x38] sm:$0xff] %v325_v7 }
  0x24   : > { %328 = vst [vmem:[%s3180_s7 + $0x40] sm:$0xff] %v327_v8  ;;  %v329_v9 = vld [vmem:[%s3175_s6 + $0x120] sm:$0xff] }
  0x25   : > { %v331_v10 = vld [vmem:[%s3175_s6 + $0x140] sm:$0xff]  ;;  %330 = vst [vmem:[%s3180_s7 + $0x48] sm:$0xff] %v329_v9 }
  0x26   : > { %v333_v11 = vld [vmem:[%s3175_s6 + $0x160] sm:$0xff]  ;;  %332 = vst [vmem:[%s3180_s7 + $0x50] sm:$0xff] %v331_v10 }
  0x27   : > { %334 = vst [vmem:[%s3180_s7 + $0x58] sm:$0xff] %v333_v11  ;;  %v335_v12 = vld [vmem:[%s3175_s6 + $0x180] sm:$0xff] }
  0x28   : > { %v337_v13 = vld [vmem:[%s3175_s6 + $0x1a0] sm:$0xff]  ;;  %336 = vst [vmem:[%s3180_s7 + $0x60] sm:$0xff] %v335_v12 }
  0x29   : > { %v339_v14 = vld [vmem:[%s3175_s6 + $0x1c0] sm:$0xff]  ;;  %338 = vst [vmem:[%s3180_s7 + $0x68] sm:$0xff] %v337_v13 }
  0x2a   : > { %340 = vst [vmem:[%s3180_s7 + $0x70] sm:$0xff] %v339_v14  ;;  %v341_v15 = vld [vmem:[%s3175_s6 + $0x1e0] sm:$0xff] }
  0x2b   : > { %v343_v16 = vld [vmem:[%s3175_s6 + $0x200] sm:$0xff]  ;;  %342 = vst [vmem:[%s3180_s7 + $0x78] sm:$0xff] %v341_v15 }
  0x2c   : > { %v345_v17 = vld [vmem:[%s3175_s6 + $0x220] sm:$0xff]  ;;  %344 = vst [vmem:[%s3180_s7 + $0x80] sm:$0xff] %v343_v16 }
  0x2d   : > { %346 = vst [vmem:[%s3180_s7 + $0x88] sm:$0xff] %v345_v17  ;;  %v347_v18 = vld [vmem:[%s3175_s6 + $0x240] sm:$0xff] }
  0x2e   : > { %v349_v19 = vld [vmem:[%s3175_s6 + $0x260] sm:$0xff]  ;;  %348 = vst [vmem:[%s3180_s7 + $0x90] sm:$0xff] %v347_v18 }
  0x2f   : > { %v351_v20 = vld [vmem:[%s3175_s6 + $0x280] sm:$0xff]  ;;  %350 = vst [vmem:[%s3180_s7 + $0x98] sm:$0xff] %v349_v19 }
  0x30   : > { %352 = vst [vmem:[%s3180_s7 + $0xa0] sm:$0xff] %v351_v20  ;;  %v353_v21 = vld [vmem:[%s3175_s6 + $0x2a0] sm:$0xff] }
  0x31   : > { %v355_v22 = vld [vmem:[%s3175_s6 + $0x2c0] sm:$0xff]  ;;  %354 = vst [vmem:[%s3180_s7 + $0xa8] sm:$0xff] %v353_v21 }
  0x32   : > { %v357_v23 = vld [vmem:[%s3175_s6 + $0x2e0] sm:$0xff]  ;;  %356 = vst [vmem:[%s3180_s7 + $0xb0] sm:$0xff] %v355_v22 }
  0x33   : > { %358 = vst [vmem:[%s3180_s7 + $0xb8] sm:$0xff] %v357_v23  ;;  %v359_v24 = vld [vmem:[%s3175_s6 + $0x300] sm:$0xff] }
  0x34   : > { %v361_v25 = vld [vmem:[%s3175_s6 + $0x320] sm:$0xff]  ;;  %360 = vst [vmem:[%s3180_s7 + $0xc0] sm:$0xff] %v359_v24 }
  0x35   : > { %v363_v26 = vld [vmem:[%s3175_s6 + $0x340] sm:$0xff]  ;;  %362 = vst [vmem:[%s3180_s7 + $0xc8] sm:$0xff] %v361_v25 }
  0x36   : > { %364 = vst [vmem:[%s3180_s7 + $0xd0] sm:$0xff] %v363_v26  ;;  %v365_v27 = vld [vmem:[%s3175_s6 + $0x360] sm:$0xff] }
  0x37   : > { %v367_v28 = vld [vmem:[%s3175_s6 + $0x380] sm:$0xff]  ;;  %366 = vst [vmem:[%s3180_s7 + $0xd8] sm:$0xff] %v365_v27 }
  0x38   : > { %v369_v29 = vld [vmem:[%s3175_s6 + $0x3a0] sm:$0xff]  ;;  %368 = vst [vmem:[%s3180_s7 + $0xe0] sm:$0xff] %v367_v28 }
  0x39   : > { %370 = vst [vmem:[%s3180_s7 + $0xe8] sm:$0xff] %v369_v29  ;;  %v371_v30 = vld [vmem:[%s3175_s6 + $0x3c0] sm:$0xff] }
  0x3a   : > { %v373_v31 = vld [vmem:[%s3175_s6 + $0x3e0] sm:$0xff]  ;;  %372 = vst [vmem:[%s3180_s7 + $0xf0] sm:$0xff] %v371_v30 }
  0x3b   : > { %v375_v32 = vld [vmem:[%s3175_s6 + $0x400] sm:$0xff]  ;;  %374 = vst [vmem:[%s3180_s7 + $0xf8] sm:$0xff] %v373_v31 }
  0x3c   : > { %376 = vst [vmem:[%s3180_s7 + $0x100] sm:$0xff] %v375_v32  ;;  %v377_v33 = vld [vmem:[%s3175_s6 + $0x420] sm:$0xff] }
  0x3d   : > { %v379_v34 = vld [vmem:[%s3175_s6 + $0x440] sm:$0xff]  ;;  %378 = vst [vmem:[%s3180_s7 + $0x108] sm:$0xff] %v377_v33 }
  0x3e   : > { %v381_v35 = vld [vmem:[%s3175_s6 + $0x460] sm:$0xff]  ;;  %380 = vst [vmem:[%s3180_s7 + $0x110] sm:$0xff] %v379_v34 }
  0x3f   : > { %382 = vst [vmem:[%s3180_s7 + $0x118] sm:$0xff] %v381_v35  ;;  %v383_v36 = vld [vmem:[%s3175_s6 + $0x480] sm:$0xff] }
  0x40   : > { %v385_v37 = vld [vmem:[%s3175_s6 + $0x4a0] sm:$0xff]  ;;  %384 = vst [vmem:[%s3180_s7 + $0x120] sm:$0xff] %v383_v36 }
  0x41   : > { %v387_v38 = vld [vmem:[%s3175_s6 + $0x4c0] sm:$0xff]  ;;  %386 = vst [vmem:[%s3180_s7 + $0x128] sm:$0xff] %v385_v37 }
  0x42   : > { %388 = vst [vmem:[%s3180_s7 + $0x130] sm:$0xff] %v387_v38  ;;  %v389_v39 = vld [vmem:[%s3175_s6 + $0x4e0] sm:$0xff] }
  0x43   : > { %v391_v40 = vld [vmem:[%s3175_s6 + $0x500] sm:$0xff]  ;;  %390 = vst [vmem:[%s3180_s7 + $0x138] sm:$0xff] %v389_v39 }
  0x44   : > { %v393_v41 = vld [vmem:[%s3175_s6 + $0x520] sm:$0xff]  ;;  %392 = vst [vmem:[%s3180_s7 + $0x140] sm:$0xff] %v391_v40 }
  0x45   : > { %394 = vst [vmem:[%s3180_s7 + $0x148] sm:$0xff] %v393_v41  ;;  %v395_v42 = vld [vmem:[%s3175_s6 + $0x540] sm:$0xff] }
  0x46   : > { %v397_v43 = vld [vmem:[%s3175_s6 + $0x560] sm:$0xff]  ;;  %396 = vst [vmem:[%s3180_s7 + $0x150] sm:$0xff] %v395_v42 }
  0x47   : > { %v399_v44 = vld [vmem:[%s3175_s6 + $0x580] sm:$0xff]  ;;  %398 = vst [vmem:[%s3180_s7 + $0x158] sm:$0xff] %v397_v43 }
  0x48   : > { %400 = vst [vmem:[%s3180_s7 + $0x160] sm:$0xff] %v399_v44  ;;  %v401_v45 = vld [vmem:[%s3175_s6 + $0x5a0] sm:$0xff] }
  0x49   : > { %v403_v46 = vld [vmem:[%s3175_s6 + $0x5c0] sm:$0xff]  ;;  %402 = vst [vmem:[%s3180_s7 + $0x168] sm:$0xff] %v401_v45 }
  0x4a   : > { %v405_v47 = vld [vmem:[%s3175_s6 + $0x5e0] sm:$0xff]  ;;  %404 = vst [vmem:[%s3180_s7 + $0x170] sm:$0xff] %v403_v46 }
  0x4b   : > { %406 = vst [vmem:[%s3180_s7 + $0x178] sm:$0xff] %v405_v47  ;;  %v407_v48 = vld [vmem:[%s3175_s6 + $0x600] sm:$0xff] }
  0x4c   : > { %v409_v49 = vld [vmem:[%s3175_s6 + $0x620] sm:$0xff]  ;;  %408 = vst [vmem:[%s3180_s7 + $0x180] sm:$0xff] %v407_v48 }
  0x4d   : > { %v411_v50 = vld [vmem:[%s3175_s6 + $0x640] sm:$0xff]  ;;  %410 = vst [vmem:[%s3180_s7 + $0x188] sm:$0xff] %v409_v49 }
  0x4e   : > { %412 = vst [vmem:[%s3180_s7 + $0x190] sm:$0xff] %v411_v50  ;;  %v413_v51 = vld [vmem:[%s3175_s6 + $0x660] sm:$0xff] }
  0x4f   : > { %v415_v52 = vld [vmem:[%s3175_s6 + $0x680] sm:$0xff]  ;;  %414 = vst [vmem:[%s3180_s7 + $0x198] sm:$0xff] %v413_v51 }
  0x50   : > { %v417_v53 = vld [vmem:[%s3175_s6 + $0x6a0] sm:$0xff]  ;;  %416 = vst [vmem:[%s3180_s7 + $0x1a0] sm:$0xff] %v415_v52 }
  0x51   : > { %418 = vst [vmem:[%s3180_s7 + $0x1a8] sm:$0xff] %v417_v53  ;;  %v419_v54 = vld [vmem:[%s3175_s6 + $0x6c0] sm:$0xff] }
  0x52   : > { %v421_v55 = vld [vmem:[%s3175_s6 + $0x6e0] sm:$0xff]  ;;  %420 = vst [vmem:[%s3180_s7 + $0x1b0] sm:$0xff] %v419_v54 }
  0x53   : > { %v423_v56 = vld [vmem:[%s3175_s6 + $0x700] sm:$0xff]  ;;  %422 = vst [vmem:[%s3180_s7 + $0x1b8] sm:$0xff] %v421_v55 }
  0x54   : > { %424 = vst [vmem:[%s3180_s7 + $0x1c0] sm:$0xff] %v423_v56  ;;  %v425_v57 = vld [vmem:[%s3175_s6 + $0x720] sm:$0xff] }
  0x55   : > { %v427_v58 = vld [vmem:[%s3175_s6 + $0x740] sm:$0xff]  ;;  %426 = vst [vmem:[%s3180_s7 + $0x1c8] sm:$0xff] %v425_v57 }
  0x56   : > { %v429_v59 = vld [vmem:[%s3175_s6 + $0x760] sm:$0xff]  ;;  %428 = vst [vmem:[%s3180_s7 + $0x1d0] sm:$0xff] %v427_v58 }
  0x57   : > { %430 = vst [vmem:[%s3180_s7 + $0x1d8] sm:$0xff] %v429_v59  ;;  %v431_v60 = vld [vmem:[%s3175_s6 + $0x780] sm:$0xff] }
  0x58   : > { %v433_v61 = vld [vmem:[%s3175_s6 + $0x7a0] sm:$0xff]  ;;  %432 = vst [vmem:[%s3180_s7 + $0x1e0] sm:$0xff] %v431_v60 }
  0x59   : > { %v435_v62 = vld [vmem:[%s3175_s6 + $0x7c0] sm:$0xff]  ;;  %434 = vst [vmem:[%s3180_s7 + $0x1e8] sm:$0xff] %v433_v61 }
  0x5a   : > { %436 = vst [vmem:[%s3180_s7 + $0x1f0] sm:$0xff] %v435_v62  ;;  %v437_v63 = vld [vmem:[%s3175_s6 + $0x7e0] sm:$0xff] }
  0x5b   : > { %438 = vst [vmem:[%s3180_s7 + $0x1f8] sm:$0xff] %v437_v63 }
  0x5c PF: > { %p2472_p11 = scmp.ge.s32.totalorder %s3078_s17, 1  ;;  %p443_p12 = scmp.lt.s32.totalorder %s3078_s17, 9 }
  0x5e   : > { %p444_p13 = pnand %p2472_p11, %p443_p12 }
  0x5f   : > { %s450_s8 = sand.u32 (!%p444_p13), 1, %s3054_s11   ;;  %s2475_s11 = sshll.u32 (!%p444_p13), %s3066_s14, 5 }
  0x60   : > { %447 = sbr.rel (%p444_p13) target bundleno = 512 (0x200), region = 62  ;;  %s2473_s18 = sshll.u32 (!%p444_p13), %s450_s8, 9 }
  0x61   : > { %s3310_s21 = scalar_lea.vmem (!%p444_p13), [#allocation3], %s2473_s18  ;;  %p482_p0 = scmp.lt.s32.totalorder (!%p444_p13), %s2475_s11, 63 }
  0x62   : > { %v2816_v0 = vld [vmem:[%s3310_s21 + $0x4] ss:$8 sps:$4 sm:$0xff] (!%p444_p13)   ;;  %v2820_v2 = vld [vmem:[%s3310_s21] ss:$8 sps:$4 sm:$0xff] (!%p444_p13)   ;;  %v2822_v4 = vld [vmem:[%s3310_s21 + $0x14] ss:$8 sps:$4 sm:$0xff] (!%p444_p13)  }
  0x63   : > { %v2818_v1 = vld [vmem:[%s3310_s21 + $0x104] ss:$8 sps:$4 sm:$0xff] (!%p444_p13)   ;;  %1396 = vmatprep.subr.bf16.mxu1 (!%p444_p13), %v2816_v0  ;;  %v2821_v3 = vld [vmem:[%s3310_s21 + $0x100] ss:$8 sps:$4 sm:$0xff] (!%p444_p13)   ;;  %v2824_v5 = vld [vmem:[%s3310_s21 + $0x114] ss:$8 sps:$4 sm:$0xff] (!%p444_p13)  }
  0x64   : > { %1589 = vmatprep.subr.bf16.mxu0 (!%p444_p13), %v2818_v1  ;;  %1397 = vmatpush1.bf16.msra.mxu1 (!%p444_p13), %v2820_v2  ;;  %v2826_v6 = vld [vmem:[%s3310_s21 + $0x10] ss:$8 sps:$4 sm:$0xff] (!%p444_p13)   ;;  %v2828_v8 = vld [vmem:[%s3310_s21 + $0x24] ss:$8 sps:$4 sm:$0xff] (!%p444_p13)   ;;  %v2832_v10 = vld [vmem:[%s3310_s21 + $0x20] ss:$8 sps:$4 sm:$0xff] (!%p444_p13)  }
  0x65   : > { %1590 = vmatpush1.bf16.msra.mxu0 (!%p444_p13), %v2821_v3  ;;  %1398 = vmatprep.subr.bf16.mxu1 (!%p444_p13), %v2822_v4  ;;  %v2827_v7 = vld [vmem:[%s3310_s21 + $0x110] ss:$8 sps:$4 sm:$0xff] (!%p444_p13)   ;;  %v2830_v9 = vld [vmem:[%s3310_s21 + $0x124] ss:$8 sps:$4 sm:$0xff] (!%p444_p13)   ;;  %v2833_v11 = vld [vmem:[%s3310_s21 + $0x120] ss:$8 sps:$4 sm:$0xff] (!%p444_p13)  }
  0x66   : > { %1591 = vmatprep.subr.bf16.mxu0 (!%p444_p13), %v2824_v5  ;;  %v2834_v12 = vld [vmem:[%s3310_s21 + $0x34] ss:$8 sps:$4 sm:$0xff] (!%p444_p13)   ;;  %v2838_v14 = vld [vmem:[%s3310_s21 + $0x30] ss:$8 sps:$4 sm:$0xff] (!%p444_p13)   ;;  %v2840_v16 = vld [vmem:[%s3310_s21 + $0x44] ss:$8 sps:$4 sm:$0xff] (!%p444_p13)  }
  0x67   : > { %v2836_v13 = vld [vmem:[%s3310_s21 + $0x134] ss:$8 sps:$4 sm:$0xff]   ;;  %v2839_v15 = vld [vmem:[%s3310_s21 + $0x130] ss:$8 sps:$4 sm:$0xff]   ;;  %v2842_v17 = vld [vmem:[%s3310_s21 + $0x144] ss:$8 sps:$4 sm:$0xff]  }
  0x68   : > { %1399 = vmatpush1.bf16.msra.mxu1 %v2826_v6  ;;  %v2844_v18 = vld [vmem:[%s3310_s21 + $0x40] ss:$8 sps:$4 sm:$0xff]   ;;  %v2846_v20 = vld [vmem:[%s3310_s21 + $0x54] ss:$8 sps:$4 sm:$0xff]   ;;  %v2850_v22 = vld [vmem:[%s3310_s21 + $0x50] ss:$8 sps:$4 sm:$0xff]  }
  0x69   : > { %1592 = vmatpush1.bf16.msra.mxu0 %v2827_v7  ;;  %1400 = vmatprep.subr.bf16.mxu1 %v2828_v8  ;;  %v2845_v19 = vld [vmem:[%s3310_s21 + $0x140] ss:$8 sps:$4 sm:$0xff]   ;;  %v2848_v21 = vld [vmem:[%s3310_s21 + $0x154] ss:$8 sps:$4 sm:$0xff]   ;;  %v2851_v23 = vld [vmem:[%s3310_s21 + $0x150] ss:$8 sps:$4 sm:$0xff]  }
  0x6a   : > { %1593 = vmatprep.subr.bf16.mxu0 %v2830_v9  ;;  %v2852_v24 = vld [vmem:[%s3310_s21 + $0x64] ss:$8 sps:$4 sm:$0xff]   ;;  %v2856_v26 = vld [vmem:[%s3310_s21 + $0x60] ss:$8 sps:$4 sm:$0xff]   ;;  %v2858_v28 = vld [vmem:[%s3310_s21 + $0x74] ss:$8 sps:$4 sm:$0xff]  }
  0x6b   : > { %v2854_v25 = vld [vmem:[%s3310_s21 + $0x164] ss:$8 sps:$4 sm:$0xff]   ;;  %v2857_v27 = vld [vmem:[%s3310_s21 + $0x160] ss:$8 sps:$4 sm:$0xff]   ;;  %v2860_v29 = vld [vmem:[%s3310_s21 + $0x174] ss:$8 sps:$4 sm:$0xff]  }
  0x6c   : > { %1401 = vmatpush1.bf16.msra.mxu1 %v2832_v10  ;;  %v2862_v30 = vld [vmem:[%s3310_s21 + $0x70] ss:$8 sps:$4 sm:$0xff]   ;;  %v2864_v32 = vld [vmem:[%s3310_s21 + $0x84] ss:$8 sps:$4 sm:$0xff]   ;;  %v2868_v34 = vld [vmem:[%s3310_s21 + $0x80] ss:$8 sps:$4 sm:$0xff]  }
  0x6d   : > { %1594 = vmatpush1.bf16.msra.mxu0 %v2833_v11  ;;  %1402 = vmatprep.subr.bf16.mxu1 %v2834_v12  ;;  %v2863_v31 = vld [vmem:[%s3310_s21 + $0x170] ss:$8 sps:$4 sm:$0xff]   ;;  %v2866_v33 = vld [vmem:[%s3310_s21 + $0x184] ss:$8 sps:$4 sm:$0xff]   ;;  %v2869_v35 = vld [vmem:[%s3310_s21 + $0x180] ss:$8 sps:$4 sm:$0xff]  }
  0x6e   : > { %1595 = vmatprep.subr.bf16.mxu0 %v2836_v13  ;;  %v2870_v36 = vld [vmem:[%s3310_s21 + $0x94] ss:$8 sps:$4 sm:$0xff]   ;;  %s3600_s11 = smov (!%p482_p0, %s2475_s11), 63  ;;  %v2874_v38 = vld [vmem:[%s3310_s21 + $0x90] ss:$8 sps:$4 sm:$0xff]   ;;  %s477_s29 = sand.u32 1, %s3046_s9  }
  0x6f   : > { %v2872_v37 = vld [vmem:[%s3310_s21 + $0x194] ss:$8 sps:$4 sm:$0xff]   ;;  %v2875_v39 = vld [vmem:[%s3310_s21 + $0x190] ss:$8 sps:$4 sm:$0xff]   ;;  %v2876_v40 = vld [vmem:[%s3310_s21 + $0xa4] ss:$8 sps:$4 sm:$0xff]  }
  0x70   : > { %1403 = vmatpush1.bf16.msra.mxu1 %v2838_v14  ;;  %v2878_v41 = vld [vmem:[%s3310_s21 + $0x1a4] ss:$8 sps:$4 sm:$0xff]   ;;  %s2646_s22 = sshll.u32 %s3600_s11, 4  ;;  %v2880_v42 = vld [vmem:[%s3310_s21 + $0xa0] ss:$8 sps:$4 sm:$0xff]   ;;  %s2474_s30 = sshll.u32 %s477_s29, 8 }
  0x71   : > { %1596 = vmatpush1.bf16.msra.mxu0 %v2839_v15  ;;  %1404 = vmatprep.subr.bf16.mxu1 %v2840_v16  ;;  %v2881_v43 = vld [vmem:[%s3310_s21 + $0x1a0] ss:$8 sps:$4 sm:$0xff]   ;;  %v2882_v44 = vld [vmem:[%s3310_s21 + $0xb4] ss:$8 sps:$4 sm:$0xff]   ;;  %s3361_s26 = scalar_lea.vmem %s3581_s0, %s2646_s22  ;;  %v2886_v46 = vld [vmem:[%s3310_s21 + $0xb0] ss:$8 sps:$4 sm:$0xff]  }
  0x72   : > { %1597 = vmatprep.subr.bf16.mxu0 %v2842_v17  ;;  %v2884_v45 = vld [vmem:[%s3310_s21 + $0x1b4] ss:$8 sps:$4 sm:$0xff]   ;;  %v2887_v47 = vld [vmem:[%s3310_s21 + $0x1b0] ss:$8 sps:$4 sm:$0xff]   ;;  %v2888_v48 = vld [vmem:[%s3310_s21 + $0xc4] ss:$8 sps:$4 sm:$0xff]  }
  0x73   : > { %v2914_v49 = vld [vmem:[%s3361_s26 + $0x4] ss:$16 sps:$4 sm:$0xff]   ;;  %v2917_v51 = vld [vmem:[%s3361_s26 + $0xc] ss:$16 sps:$4 sm:$0xff]   ;;  %v2892_v52 = vld [vmem:[%s3310_s21 + $0xc0] ss:$8 sps:$4 sm:$0xff]  }
  0x74   : > { %1405 = vmatpush1.bf16.msra.mxu1 %v2844_v18  ;;  %v2890_v50 = vld [vmem:[%s3310_s21 + $0x1c4] ss:$8 sps:$4 sm:$0xff]   ;;  %1428 = vmatprep.mubr.bf16.mxu1 %v2914_v49  ;;  %v2893_v53 = vld [vmem:[%s3310_s21 + $0x1c0] ss:$8 sps:$4 sm:$0xff]   ;;  %v2894_v54 = vld [vmem:[%s3310_s21 + $0xd4] ss:$8 sps:$4 sm:$0xff]  }
  0x75   : > { %1598 = vmatpush1.bf16.msra.mxu0 %v2845_v19  ;;  %1406 = vmatprep.subr.bf16.mxu1 %v2846_v20  ;;  %v2896_v55 = vld [vmem:[%s3310_s21 + $0x1d4] ss:$8 sps:$4 sm:$0xff]   ;;  %v2898_v56 = vld [vmem:[%s3310_s21 + $0xd0] ss:$8 sps:$4 sm:$0xff]   ;;  %v2900_v58 = vld [vmem:[%s3310_s21 + $0xe4] ss:$8 sps:$4 sm:$0xff]  }
  0x76   : > { %1599 = vmatprep.subr.bf16.mxu0 %v2848_v21  ;;  %1621 = vmatprep.mubr.bf16.mxu0 %v2917_v51  ;;  %v2899_v57 = vld [vmem:[%s3310_s21 + $0x1d0] ss:$8 sps:$4 sm:$0xff]   ;;  %v2902_v59 = vld [vmem:[%s3310_s21 + $0x1e4] ss:$8 sps:$4 sm:$0xff]   ;;  %v2904_v60 = vld [vmem:[%s3310_s21 + $0xe0] ss:$8 sps:$4 sm:$0xff]  }
  0x77   : > { %v2905_v61 = vld [vmem:[%s3310_s21 + $0x1e0] ss:$8 sps:$4 sm:$0xff]   ;;  %v2906_v62 = vld [vmem:[%s3310_s21 + $0xf4] ss:$8 sps:$4 sm:$0xff]   ;;  %v2910_v0 = vld [vmem:[%s3310_s21 + $0xf0] ss:$8 sps:$4 sm:$0xff]  }
  0x78   : > { %1407 = vmatpush1.bf16.msra.mxu1 %v2850_v22  ;;  %v2908_v63 = vld [vmem:[%s3310_s21 + $0x1f4] ss:$8 sps:$4 sm:$0xff]   ;;  %v2911_v1 = vld [vmem:[%s3310_s21 + $0x1f0] ss:$8 sps:$4 sm:$0xff]   ;;  %s3447_s3 = scalar_lea.vmem [#allocation4], %s2474_s30  ;;  %s2640_s9 = sshll.u32 (%p3162_p9), %s3062_s13, 1 }
  0x79   : > { %1600 = vmatpush1.bf16.msra.mxu0 %v2851_v23  ;;  %1408 = vmatprep.subr.bf16.mxu1 %v2852_v24  ;;  %v2912_v2 = vld [vmem:[%s3361_s26] ss:$16 sps:$4 sm:$0xff]   ;;  %v2915_v3 = vld [vmem:[%s3361_s26 + $0x8] ss:$16 sps:$4 sm:$0xff]   ;;  %v2918_v4 = vld [vmem:[%s3361_s26 + $0x24] ss:$16 sps:$4 sm:$0xff]  }
  0x7a   : > { %1601 = vmatprep.subr.bf16.mxu0 %v2854_v25  ;;  %v2920_v5 = vld [vmem:[%s3361_s26 + $0x2c] ss:$16 sps:$4 sm:$0xff]   ;;  %v2922_v6 = vld [vmem:[%s3361_s26 + $0x20] ss:$16 sps:$4 sm:$0xff]   ;;  %v2923_v7 = vld [vmem:[%s3361_s26 + $0x28] ss:$16 sps:$4 sm:$0xff]  }
  0x7b   : > { %v2924_v8 = vld [vmem:[%s3361_s26 + $0x44] ss:$16 sps:$4 sm:$0xff]   ;;  %v2926_v9 = vld [vmem:[%s3361_s26 + $0x4c] ss:$16 sps:$4 sm:$0xff]   ;;  %v2928_v10 = vld [vmem:[%s3361_s26 + $0x40] ss:$16 sps:$4 sm:$0xff]  }
  0x7c   : > { %1409 = vmatpush1.bf16.msra.mxu1 %v2856_v26  ;;  %v2929_v11 = vld [vmem:[%s3361_s26 + $0x48] ss:$16 sps:$4 sm:$0xff]   ;;  %v2930_v12 = vld [vmem:[%s3361_s26 + $0x64] ss:$16 sps:$4 sm:$0xff]   ;;  %v2932_v13 = vld [vmem:[%s3361_s26 + $0x6c] ss:$16 sps:$4 sm:$0xff]  }
  0x7d   : > { %1602 = vmatpush1.bf16.msra.mxu0 %v2857_v27  ;;  %1410 = vmatprep.subr.bf16.mxu1 %v2858_v28  ;;  %v2934_v14 = vld [vmem:[%s3361_s26 + $0x60] ss:$16 sps:$4 sm:$0xff]   ;;  %v2935_v15 = vld [vmem:[%s3361_s26 + $0x68] ss:$16 sps:$4 sm:$0xff]   ;;  %v2936_v16 = vld [vmem:[%s3361_s26 + $0x84] ss:$16 sps:$4 sm:$0xff]  }
  0x7e   : > { %1603 = vmatprep.subr.bf16.mxu0 %v2860_v29  ;;  %v2938_v17 = vld [vmem:[%s3361_s26 + $0x8c] ss:$16 sps:$4 sm:$0xff]   ;;  %v2940_v18 = vld [vmem:[%s3361_s26 + $0x80] ss:$16 sps:$4 sm:$0xff]   ;;  %v2941_v19 = vld [vmem:[%s3361_s26 + $0x88] ss:$16 sps:$4 sm:$0xff]  }
  0x7f   : > { %v2942_v20 = vld [vmem:[%s3361_s26 + $0xa4] ss:$16 sps:$4 sm:$0xff]   ;;  %v2944_v21 = vld [vmem:[%s3361_s26 + $0xac] ss:$16 sps:$4 sm:$0xff]   ;;  %v2946_v22 = vld [vmem:[%s3361_s26 + $0xa0] ss:$16 sps:$4 sm:$0xff]  }
  0x80   : > { %1411 = vmatpush1.bf16.msra.mxu1 %v2862_v30  ;;  %v2947_v23 = vld [vmem:[%s3361_s26 + $0xa8] ss:$16 sps:$4 sm:$0xff]   ;;  %v2948_v24 = vld [vmem:[%s3361_s26 + $0xc4] ss:$16 sps:$4 sm:$0xff]   ;;  %v2950_v25 = vld [vmem:[%s3361_s26 + $0xcc] ss:$16 sps:$4 sm:$0xff]  }
  0x81   : > { %1604 = vmatpush1.bf16.msra.mxu0 %v2863_v31  ;;  %1412 = vmatprep.subr.bf16.mxu1 %v2864_v32  ;;  %v2952_v26 = vld [vmem:[%s3361_s26 + $0xc0] ss:$16 sps:$4 sm:$0xff]   ;;  %v2953_v27 = vld [vmem:[%s3361_s26 + $0xc8] ss:$16 sps:$4 sm:$0xff]   ;;  %v2954_v28 = vld [vmem:[%s3361_s26 + $0xe4] ss:$16 sps:$4 sm:$0xff]  }
  0x82   : > { %1605 = vmatprep.subr.bf16.mxu0 %v2866_v33  ;;  %v2956_v29 = vld [vmem:[%s3361_s26 + $0xec] ss:$16 sps:$4 sm:$0xff]   ;;  %v2958_v30 = vld [vmem:[%s3361_s26 + $0xe0] ss:$16 sps:$4 sm:$0xff]   ;;  %v2959_v31 = vld [vmem:[%s3361_s26 + $0xe8] ss:$16 sps:$4 sm:$0xff]  }
  0x83   : > { %v2960_v32 = vld [vmem:[%s3361_s26 + $0x104] ss:$16 sps:$4 sm:$0xff]   ;;  %v2962_v33 = vld [vmem:[%s3361_s26 + $0x10c] ss:$16 sps:$4 sm:$0xff]   ;;  %v2989_v51 = vld [vmem:[%s3361_s26 + $0x188] ss:$16 sps:$4 sm:$0xff]  }
  0x84   : > { %1413 = vmatpush1.bf16.msra.mxu1 %v2868_v34  ;;  %v2964_v34 = vld [vmem:[%s3361_s26 + $0x100] ss:$16 sps:$4 sm:$0xff]   ;;  %v2986_v49 = vld [vmem:[%s3361_s26 + $0x18c] ss:$16 sps:$4 sm:$0xff]   ;;  %s2679_s4 = sshll.u32 (%p3162_p9), %s3066_s14, 8 }
  0x85   : > { %1606 = vmatpush1.bf16.msra.mxu0 %v2869_v35  ;;  %1414 = vmatprep.subr.bf16.mxu1 %v2870_v36  ;;  %v2965_v35 = vld [vmem:[%s3361_s26 + $0x108] ss:$16 sps:$4 sm:$0xff]   ;;  %v2966_v36 = vld [vmem:[%s3361_s26 + $0x124] ss:$16 sps:$4 sm:$0xff]   ;;  %s2211_s27 = sadd.s32 (%p3162_p9), %s2679_s4, %s2640_s9 }
  0x86   : > { %1607 = vmatprep.subr.bf16.mxu0 %v2872_v37  ;;  %v2968_v37 = vld [vmem:[%s3361_s26 + $0x12c] ss:$16 sps:$4 sm:$0xff]   ;;  %s2642_s5 = sshll.u32 (%p3162_p9), %s2211_s27, 2 }
  0x87   : > { %s3497_s8 = scalar_lea.vmem (%p3162_p9), %s3583_s2, %s2642_s5 }
  0x88   : > { %1415 = vmatpush1.bf16.msra.mxu1 %v2874_v38  ;;  %v2970_v38 = vld [vmem:[%s3361_s26 + $0x120] ss:$16 sps:$4 sm:$0xff]  }
  0x89   : > { %1608 = vmatpush1.bf16.msra.mxu0 %v2875_v39  ;;  %1416 = vmatprep.subr.bf16.mxu1 %v2876_v40  ;;  %v2971_v39 = vld [vmem:[%s3361_s26 + $0x128] ss:$16 sps:$4 sm:$0xff]   ;;  %v2972_v40 = vld [vmem:[%s3361_s26 + $0x144] ss:$16 sps:$4 sm:$0xff]  }
  0x8a   : > { %1609 = vmatprep.subr.bf16.mxu0 %v2878_v41  ;;  %v2974_v41 = vld [vmem:[%s3361_s26 + $0x14c] ss:$16 sps:$4 sm:$0xff]  }
  0x8c   : > { %1417 = vmatpush1.bf16.msra.mxu1 %v2880_v42  ;;  %v2976_v42 = vld [vmem:[%s3361_s26 + $0x140] ss:$16 sps:$4 sm:$0xff]  }
  0x8d   : > { %1610 = vmatpush1.bf16.msra.mxu0 %v2881_v43  ;;  %1418 = vmatprep.subr.bf16.mxu1 %v2882_v44  ;;  %v2977_v43 = vld [vmem:[%s3361_s26 + $0x148] ss:$16 sps:$4 sm:$0xff]   ;;  %v2978_v44 = vld [vmem:[%s3361_s26 + $0x164] ss:$16 sps:$4 sm:$0xff]  }
  0x8e   : > { %1611 = vmatprep.subr.bf16.mxu0 %v2884_v45  ;;  %v2980_v45 = vld [vmem:[%s3361_s26 + $0x16c] ss:$16 sps:$4 sm:$0xff]  }
  0x90   : > { %1419 = vmatpush1.bf16.msra.mxu1 %v2886_v46  ;;  %v2982_v46 = vld [vmem:[%s3361_s26 + $0x160] ss:$16 sps:$4 sm:$0xff]  }
  0x91   : > { %1612 = vmatpush1.bf16.msra.mxu0 %v2887_v47  ;;  %1420 = vmatprep.subr.bf16.mxu1 %v2888_v48  ;;  %v2983_v47 = vld [vmem:[%s3361_s26 + $0x168] ss:$16 sps:$4 sm:$0xff]   ;;  %v2984_v48 = vld [vmem:[%s3361_s26 + $0x184] ss:$16 sps:$4 sm:$0xff]  }
  0x92   : > { %1613 = vmatprep.subr.bf16.mxu0 %v2890_v50  ;;  %v2988_v50 = vld [vmem:[%s3361_s26 + $0x180] ss:$16 sps:$4 sm:$0xff]  }
  0x94   : > { %1421 = vmatpush1.bf16.msra.mxu1 %v2892_v52  ;;  %v2990_v52 = vld [vmem:[%s3361_s26 + $0x1a4] ss:$16 sps:$4 sm:$0xff]  }
  0x95   : > { %1614 = vmatpush1.bf16.msra.mxu0 %v2893_v53  ;;  %1422 = vmatprep.subr.bf16.mxu1 %v2894_v54  ;;  %v2992_v53 = vld [vmem:[%s3361_s26 + $0x1ac] ss:$16 sps:$4 sm:$0xff]   ;;  %v2994_v54 = vld [vmem:[%s3361_s26 + $0x1a0] ss:$16 sps:$4 sm:$0xff]  }
  0x96   : > { %1615 = vmatprep.subr.bf16.mxu0 %v2896_v55  ;;  %v2995_v55 = vld [vmem:[%s3361_s26 + $0x1a8] ss:$16 sps:$4 sm:$0xff]  }
  0x98   : > { %1423 = vmatpush1.bf16.msra.mxu1 %v2898_v56  ;;  %v2996_v56 = vld [vmem:[%s3361_s26 + $0x1c4] ss:$16 sps:$4 sm:$0xff]  }
  0x99   : > { %1616 = vmatpush1.bf16.msra.mxu0 %v2899_v57  ;;  %1424 = vmatprep.subr.bf16.mxu1 %v2900_v58  ;;  %v2998_v57 = vld [vmem:[%s3361_s26 + $0x1cc] ss:$16 sps:$4 sm:$0xff]   ;;  %v3000_v58 = vld [vmem:[%s3361_s26 + $0x1c0] ss:$16 sps:$4 sm:$0xff]  }
  0x9a   : > { %1617 = vmatprep.subr.bf16.mxu0 %v2902_v59  ;;  %v3001_v59 = vld [vmem:[%s3361_s26 + $0x1c8] ss:$16 sps:$4 sm:$0xff]  }
  0x9c   : > { %1425 = vmatpush1.bf16.msra.mxu1 %v2904_v60  ;;  %v3002_v60 = vld [vmem:[%s3361_s26 + $0x1e4] ss:$16 sps:$4 sm:$0xff]  }
  0x9d   : > { %1618 = vmatpush1.bf16.msra.mxu0 %v2905_v61  ;;  %1426 = vmatprep.subr.bf16.mxu1 %v2906_v62  ;;  %v3004_v61 = vld [vmem:[%s3361_s26 + $0x1ec] ss:$16 sps:$4 sm:$0xff]   ;;  %v3006_v62 = vld [vmem:[%s3361_s26 + $0x1e0] ss:$16 sps:$4 sm:$0xff]  }
  0x9e   : > { %1619 = vmatprep.subr.bf16.mxu0 %v2908_v63  ;;  %v3007_v63 = vld [vmem:[%s3361_s26 + $0x1e8] ss:$16 sps:$4 sm:$0xff]  }
  0xa0   : > { %1427 = vmatpush1.bf16.msra.mxu1 %v2910_v0 }
  0xa1   : > { %1620 = vmatpush1.bf16.msra.mxu0 %v2911_v1 }
  0xa3   : > { %1429 = vmatmul.mubr.bf16.vlgmr.msra.gmra.mrb[0].mxu1 %v2912_v2 }
  0xa4   : > { %1622 = vmatmul.mubr.bf16.vlgmr.msra.gmra.mrb[0].mxu0 %v2915_v3  ;;  %1438 = vmatprep.mubr.bf16.mxu1 %v2918_v4 }
  0xa5   : > { %1631 = vmatprep.mubr.bf16.mxu0 %v2920_v5 }
  0xab   : > { %1439 = vmatmul.mubr.bf16.gmra.mrb[4].mxu1 %v2922_v6 }
  0xac   : > { %1632 = vmatmul.mubr.bf16.gmra.mrb[4].mxu0 %v2923_v7  ;;  %1448 = vmatprep.mubr.bf16.mxu1 %v2924_v8 }
  0xad   : > { %1641 = vmatprep.mubr.bf16.mxu0 %v2926_v9 }
  0xb3   : > { %1449 = vmatmul.mubr.bf16.gmra.mrb[8].mxu1 %v2928_v10 }
  0xb4   : > { %1642 = vmatmul.mubr.bf16.gmra.mrb[8].mxu0 %v2929_v11  ;;  %1458 = vmatprep.mubr.bf16.mxu1 %v2930_v12 }
  0xb5   : > { %1651 = vmatprep.mubr.bf16.mxu0 %v2932_v13 }
  0xbb   : > { %1459 = vmatmul.mubr.bf16.gmra.mrb[12].mxu1 %v2934_v14 }
  0xbc   : > { %1652 = vmatmul.mubr.bf16.gmra.mrb[12].mxu0 %v2935_v15  ;;  %1468 = vmatprep.mubr.bf16.mxu1 %v2936_v16 }
  0xbd   : > { %1661 = vmatprep.mubr.bf16.mxu0 %v2938_v17 }
  0xc3   : > { %1469 = vmatmul.mubr.bf16.gmra.mrb[16].mxu1 %v2940_v18 }
  0xc4   : > { %1662 = vmatmul.mubr.bf16.gmra.mrb[16].mxu0 %v2941_v19  ;;  %1478 = vmatprep.mubr.bf16.mxu1 %v2942_v20 }
  0xc5   : > { %1671 = vmatprep.mubr.bf16.mxu0 %v2944_v21 }
  0xcb   : > { %1479 = vmatmul.mubr.bf16.gmra.mrb[20].mxu1 %v2946_v22 }
  0xcc   : > { %1672 = vmatmul.mubr.bf16.gmra.mrb[20].mxu0 %v2947_v23  ;;  %1488 = vmatprep.mubr.bf16.mxu1 %v2948_v24 }
  0xcd   : > { %1681 = vmatprep.mubr.bf16.mxu0 %v2950_v25 }
  0xd3   : > { %1489 = vmatmul.mubr.bf16.gmra.mrb[24].mxu1 %v2952_v26 }
  0xd4   : > { %1682 = vmatmul.mubr.bf16.gmra.mrb[24].mxu0 %v2953_v27  ;;  %1498 = vmatprep.mubr.bf16.mxu1 %v2954_v28 }
  0xd5   : > { %1691 = vmatprep.mubr.bf16.mxu0 %v2956_v29 }
  0xdb   : > { %1499 = vmatmul.mubr.bf16.gmra.mrb[28].mxu1 %v2958_v30 }
  0xdc   : > { %1692 = vmatmul.mubr.bf16.gmra.mrb[28].mxu0 %v2959_v31  ;;  %1508 = vmatprep.mubr.bf16.mxu1 %v2960_v32 }
  0xdd   : > { %1701 = vmatprep.mubr.bf16.mxu0 %v2962_v33 }
  0xe3   : > { %1509 = vmatmul.mubr.bf16.gmra.mrb[32].mxu1 %v2964_v34 }
  0xe4   : > { %1702 = vmatmul.mubr.bf16.gmra.mrb[32].mxu0 %v2965_v35  ;;  %1518 = vmatprep.mubr.bf16.mxu1 %v2966_v36 }
  0xe5   : > { %1711 = vmatprep.mubr.bf16.mxu0 %v2968_v37 }
  0xeb   : > { %1519 = vmatmul.mubr.bf16.gmra.mrb[36].mxu1 %v2970_v38 }
  0xec   : > { %1712 = vmatmul.mubr.bf16.gmra.mrb[36].mxu0 %v2971_v39  ;;  %1528 = vmatprep.mubr.bf16.mxu1 %v2972_v40 }
  0xed   : > { %1721 = vmatprep.mubr.bf16.mxu0 %v2974_v41 }
  0xf3   : > { %1529 = vmatmul.mubr.bf16.gmra.mrb[40].mxu1 %v2976_v42 }
  0xf4   : > { %1722 = vmatmul.mubr.bf16.gmra.mrb[40].mxu0 %v2977_v43  ;;  %1538 = vmatprep.mubr.bf16.mxu1 %v2978_v44 }
  0xf5   : > { %1731 = vmatprep.mubr.bf16.mxu0 %v2980_v45 }
  0xfb   : > { %1539 = vmatmul.mubr.bf16.gmra.mrb[44].mxu1 %v2982_v46 }
  0xfc   : > { %1732 = vmatmul.mubr.bf16.gmra.mrb[44].mxu0 %v2983_v47  ;;  %1548 = vmatprep.mubr.bf16.mxu1 %v2984_v48 }
  0xfd   : > { %1741 = vmatprep.mubr.bf16.mxu0 %v2986_v49 }
 0x103   : > { %1549 = vmatmul.mubr.bf16.gmra.mrb[48].mxu1 %v2988_v50 }
 0x104   : > { %1742 = vmatmul.mubr.bf16.gmra.mrb[48].mxu0 %v2989_v51  ;;  %1558 = vmatprep.mubr.bf16.mxu1 %v2990_v52 }
 0x105   : > { %1751 = vmatprep.mubr.bf16.mxu0 %v2992_v53 }
 0x10b   : > { %1559 = vmatmul.mubr.bf16.gmra.mrb[52].mxu1 %v2994_v54 }
 0x10c   : > { %1752 = vmatmul.mubr.bf16.gmra.mrb[52].mxu0 %v2995_v55  ;;  %1568 = vmatprep.mubr.bf16.mxu1 %v2996_v56 }
 0x10d   : > { %1761 = vmatprep.mubr.bf16.mxu0 %v2998_v57 }
 0x113   : > { %1569 = vmatmul.mubr.bf16.gmra.mrb[56].mxu1 %v3000_v58 }
 0x114   : > { %1762 = vmatmul.mubr.bf16.gmra.mrb[56].mxu0 %v3001_v59  ;;  %1578 = vmatprep.mubr.bf16.mxu1 %v3002_v60 }
 0x115   : > { %1771 = vmatprep.mubr.bf16.mxu0 %v3004_v61 }
 0x11b   : > { %1579 = vmatmul.mubr.bf16.gmra.mrb[60].mxu1 %v3006_v62 }
 0x11c   : > { %1772 = vmatmul.mubr.bf16.gmra.mrb[60].mxu0 %v3007_v63 }
 0x176   : > { %v1430_v0 = vpop.f32.mrb[0].mxu1 }
 0x177   : > { %v1623_v1 = vpop.f32.mrb[0].mxu0  ;;  %v1432_v3 = vpop.f32.mrb[1].mxu1 }
 0x178   : > { %v1624_v2 = vadd.f32 %v1623_v1, %v1430_v0  ;;  %v1625_v4 = vpop.f32.mrb[1].mxu0  ;;  %v1434_v6 = vpop.f32.mrb[2].mxu1 }
 0x179   : > { %v1626_v5 = vadd.f32 %v1625_v4, %v1432_v3  ;;  %v1627_v7 = vpop.f32.mrb[2].mxu0  ;;  %v1436_v9 = vpop.f32.mrb[3].mxu1 }
 0x17a   : > { %v1628_v8 = vadd.f32 %v1627_v7, %v1434_v6  ;;  %v1629_v10 = vpop.f32.mrb[3].mxu0 }
 0x17b   : > { %v2647_v11 = vpack.c.bf16 %v1626_v5, %v1624_v2  ;;  %v1630_v12 = vadd.f32 %v1629_v10, %v1436_v9 }
 0x17d   : > { %2169 = vst [vmem:[%s3447_s3] sm:$0xff] %v2647_v11  ;;  %v2648_v13 = vpack.c.bf16 %v1630_v12, %v1628_v8 }
 0x17e   : > { %v1440_v14 = vpop.f32.mrb[4].mxu1 }
 0x17f   : > { %2170 = vst [vmem:[%s3447_s3 + $0x8] sm:$0xff] %v2648_v13  ;;  %v1633_v15 = vpop.f32.mrb[4].mxu0  ;;  %v1442_v17 = vpop.f32.mrb[5].mxu1 }
 0x180   : > { %v1634_v16 = vadd.f32 %v1633_v15, %v1440_v14  ;;  %v1635_v18 = vpop.f32.mrb[5].mxu0  ;;  %v1444_v20 = vpop.f32.mrb[6].mxu1 }
 0x181   : > { %v1636_v19 = vadd.f32 %v1635_v18, %v1442_v17  ;;  %v1637_v21 = vpop.f32.mrb[6].mxu0  ;;  %v1446_v23 = vpop.f32.mrb[7].mxu1 }
 0x182   : > { %v1638_v22 = vadd.f32 %v1637_v21, %v1444_v20  ;;  %v1639_v24 = vpop.f32.mrb[7].mxu0 }
 0x183   : > { %v2649_v25 = vpack.c.bf16 %v1636_v19, %v1634_v16  ;;  %v1640_v26 = vadd.f32 %v1639_v24, %v1446_v23 }
 0x185   : > { %2171 = vst [vmem:[%s3447_s3 + $0x10] sm:$0xff] %v2649_v25  ;;  %v2650_v27 = vpack.c.bf16 %v1640_v26, %v1638_v22 }
 0x186   : > { %v1450_v28 = vpop.f32.mrb[8].mxu1 }
 0x187   : > { %2172 = vst [vmem:[%s3447_s3 + $0x18] sm:$0xff] %v2650_v27  ;;  %v1643_v29 = vpop.f32.mrb[8].mxu0  ;;  %v1452_v31 = vpop.f32.mrb[9].mxu1 }
 0x188   : > { %v1644_v30 = vadd.f32 %v1643_v29, %v1450_v28  ;;  %v1645_v32 = vpop.f32.mrb[9].mxu0  ;;  %v1454_v34 = vpop.f32.mrb[10].mxu1 }
 0x189   : > { %v1646_v33 = vadd.f32 %v1645_v32, %v1452_v31  ;;  %v1647_v35 = vpop.f32.mrb[10].mxu0  ;;  %v1456_v37 = vpop.f32.mrb[11].mxu1 }
 0x18a   : > { %v1648_v36 = vadd.f32 %v1647_v35, %v1454_v34  ;;  %v1649_v38 = vpop.f32.mrb[11].mxu0 }
 0x18b   : > { %v2651_v39 = vpack.c.bf16 %v1646_v33, %v1644_v30  ;;  %v1650_v40 = vadd.f32 %v1649_v38, %v1456_v37 }
 0x18d   : > { %2173 = vst [vmem:[%s3447_s3 + $0x20] sm:$0xff] %v2651_v39  ;;  %v2652_v41 = vpack.c.bf16 %v1650_v40, %v1648_v36 }
 0x18e   : > { %v1460_v42 = vpop.f32.mrb[12].mxu1 }
 0x18f   : > { %2174 = vst [vmem:[%s3447_s3 + $0x28] sm:$0xff] %v2652_v41  ;;  %v1653_v43 = vpop.f32.mrb[12].mxu0  ;;  %v1462_v45 = vpop.f32.mrb[13].mxu1 }
 0x190   : > { %v1654_v44 = vadd.f32 %v1653_v43, %v1460_v42  ;;  %v1655_v46 = vpop.f32.mrb[13].mxu0  ;;  %v1464_v48 = vpop.f32.mrb[14].mxu1 }
 0x191   : > { %v1656_v47 = vadd.f32 %v1655_v46, %v1462_v45  ;;  %v1657_v49 = vpop.f32.mrb[14].mxu0  ;;  %v1466_v51 = vpop.f32.mrb[15].mxu1 }
 0x192   : > { %v1658_v50 = vadd.f32 %v1657_v49, %v1464_v48  ;;  %v1659_v52 = vpop.f32.mrb[15].mxu0 }
 0x193   : > { %v2653_v53 = vpack.c.bf16 %v1656_v47, %v1654_v44  ;;  %v1660_v54 = vadd.f32 %v1659_v52, %v1466_v51 }
 0x195   : > { %2175 = vst [vmem:[%s3447_s3 + $0x30] sm:$0xff] %v2653_v53  ;;  %v2654_v55 = vpack.c.bf16 %v1660_v54, %v1658_v50 }
 0x196   : > { %v1470_v56 = vpop.f32.mrb[16].mxu1 }
 0x197   : > { %2176 = vst [vmem:[%s3447_s3 + $0x38] sm:$0xff] %v2654_v55  ;;  %v1663_v57 = vpop.f32.mrb[16].mxu0  ;;  %v1472_v59 = vpop.f32.mrb[17].mxu1 }
 0x198   : > { %v1664_v58 = vadd.f32 %v1663_v57, %v1470_v56  ;;  %v1665_v60 = vpop.f32.mrb[17].mxu0  ;;  %v1474_v62 = vpop.f32.mrb[18].mxu1 }
 0x199   : > { %v1666_v61 = vadd.f32 %v1665_v60, %v1472_v59  ;;  %v1667_v63 = vpop.f32.mrb[18].mxu0  ;;  %v1476_v1 = vpop.f32.mrb[19].mxu1 }
 0x19a   : > { %v1668_v0 = vadd.f32 %v1667_v63, %v1474_v62  ;;  %v1669_v2 = vpop.f32.mrb[19].mxu0 }
 0x19b   : > { %v2655_v3 = vpack.c.bf16 %v1666_v61, %v1664_v58  ;;  %v1670_v4 = vadd.f32 %v1669_v2, %v1476_v1 }
 0x19d   : > { %2177 = vst [vmem:[%s3447_s3 + $0x40] sm:$0xff] %v2655_v3  ;;  %v2656_v5 = vpack.c.bf16 %v1670_v4, %v1668_v0 }
 0x19e   : > { %v1480_v6 = vpop.f32.mrb[20].mxu1 }
 0x19f   : > { %2178 = vst [vmem:[%s3447_s3 + $0x48] sm:$0xff] %v2656_v5  ;;  %v1673_v7 = vpop.f32.mrb[20].mxu0  ;;  %v1482_v9 = vpop.f32.mrb[21].mxu1 }
 0x1a0   : > { %v1674_v8 = vadd.f32 %v1673_v7, %v1480_v6  ;;  %v1675_v10 = vpop.f32.mrb[21].mxu0  ;;  %v1484_v12 = vpop.f32.mrb[22].mxu1 }
 0x1a1   : > { %v1676_v11 = vadd.f32 %v1675_v10, %v1482_v9  ;;  %v1677_v13 = vpop.f32.mrb[22].mxu0  ;;  %v1486_v15 = vpop.f32.mrb[23].mxu1 }
 0x1a2   : > { %v1678_v14 = vadd.f32 %v1677_v13, %v1484_v12  ;;  %v1679_v16 = vpop.f32.mrb[23].mxu0 }
 0x1a3   : > { %v2657_v17 = vpack.c.bf16 %v1676_v11, %v1674_v8  ;;  %v1680_v18 = vadd.f32 %v1679_v16, %v1486_v15 }
 0x1a5   : > { %2179 = vst [vmem:[%s3447_s3 + $0x50] sm:$0xff] %v2657_v17  ;;  %v2658_v19 = vpack.c.bf16 %v1680_v18, %v1678_v14 }
 0x1a6   : > { %v1490_v20 = vpop.f32.mrb[24].mxu1 }
 0x1a7   : > { %2180 = vst [vmem:[%s3447_s3 + $0x58] sm:$0xff] %v2658_v19  ;;  %v1683_v21 = vpop.f32.mrb[24].mxu0  ;;  %v1492_v23 = vpop.f32.mrb[25].mxu1 }
 0x1a8   : > { %v1684_v22 = vadd.f32 %v1683_v21, %v1490_v20  ;;  %v1685_v24 = vpop.f32.mrb[25].mxu0  ;;  %v1494_v26 = vpop.f32.mrb[26].mxu1 }
 0x1a9   : > { %v1686_v25 = vadd.f32 %v1685_v24, %v1492_v23  ;;  %v1687_v27 = vpop.f32.mrb[26].mxu0  ;;  %v1496_v29 = vpop.f32.mrb[27].mxu1 }
 0x1aa   : > { %v1688_v28 = vadd.f32 %v1687_v27, %v1494_v26  ;;  %v1689_v30 = vpop.f32.mrb[27].mxu0 }
 0x1ab   : > { %v2659_v31 = vpack.c.bf16 %v1686_v25, %v1684_v22  ;;  %v1690_v32 = vadd.f32 %v1689_v30, %v1496_v29 }
 0x1ad   : > { %2181 = vst [vmem:[%s3447_s3 + $0x60] sm:$0xff] %v2659_v31  ;;  %v2660_v33 = vpack.c.bf16 %v1690_v32, %v1688_v28 }
 0x1ae   : > { %v1500_v34 = vpop.f32.mrb[28].mxu1 }
 0x1af   : > { %2182 = vst [vmem:[%s3447_s3 + $0x68] sm:$0xff] %v2660_v33  ;;  %v1693_v35 = vpop.f32.mrb[28].mxu0  ;;  %v1502_v37 = vpop.f32.mrb[29].mxu1 }
 0x1b0   : > { %v1694_v36 = vadd.f32 %v1693_v35, %v1500_v34  ;;  %v1695_v38 = vpop.f32.mrb[29].mxu0  ;;  %v1504_v40 = vpop.f32.mrb[30].mxu1 }
 0x1b1   : > { %v1696_v39 = vadd.f32 %v1695_v38, %v1502_v37  ;;  %v1697_v41 = vpop.f32.mrb[30].mxu0  ;;  %v1506_v43 = vpop.f32.mrb[31].mxu1 }
 0x1b2   : > { %v1698_v42 = vadd.f32 %v1697_v41, %v1504_v40  ;;  %v1699_v44 = vpop.f32.mrb[31].mxu0 }
 0x1b3   : > { %v2661_v45 = vpack.c.bf16 %v1696_v39, %v1694_v36  ;;  %v1700_v46 = vadd.f32 %v1699_v44, %v1506_v43 }
 0x1b5   : > { %2183 = vst [vmem:[%s3447_s3 + $0x70] sm:$0xff] %v2661_v45  ;;  %v2662_v47 = vpack.c.bf16 %v1700_v46, %v1698_v42 }
 0x1b6   : > { %v1510_v48 = vpop.f32.mrb[32].mxu1 }
 0x1b7   : > { %2184 = vst [vmem:[%s3447_s3 + $0x78] sm:$0xff] %v2662_v47  ;;  %v1703_v49 = vpop.f32.mrb[32].mxu0  ;;  %v1512_v51 = vpop.f32.mrb[33].mxu1 }
 0x1b8   : > { %v1704_v50 = vadd.f32 %v1703_v49, %v1510_v48  ;;  %v1705_v52 = vpop.f32.mrb[33].mxu0  ;;  %v1514_v54 = vpop.f32.mrb[34].mxu1 }
 0x1b9   : > { %v1706_v53 = vadd.f32 %v1705_v52, %v1512_v51  ;;  %v1707_v55 = vpop.f32.mrb[34].mxu0  ;;  %v1516_v57 = vpop.f32.mrb[35].mxu1 }
 0x1ba   : > { %v1708_v56 = vadd.f32 %v1707_v55, %v1514_v54  ;;  %v1709_v58 = vpop.f32.mrb[35].mxu0 }
 0x1bb   : > { %v2663_v59 = vpack.c.bf16 %v1706_v53, %v1704_v50  ;;  %v1710_v60 = vadd.f32 %v1709_v58, %v1516_v57 }
 0x1bd   : > { %2185 = vst [vmem:[%s3447_s3 + $0x80] sm:$0xff] %v2663_v59  ;;  %v2664_v61 = vpack.c.bf16 %v1710_v60, %v1708_v56 }
 0x1be   : > { %v1520_v62 = vpop.f32.mrb[36].mxu1 }
 0x1bf   : > { %2186 = vst [vmem:[%s3447_s3 + $0x88] sm:$0xff] %v2664_v61  ;;  %v1713_v63 = vpop.f32.mrb[36].mxu0  ;;  %v1522_v1 = vpop.f32.mrb[37].mxu1 }
 0x1c0   : > { %v1714_v0 = vadd.f32 %v1713_v63, %v1520_v62  ;;  %v1715_v2 = vpop.f32.mrb[37].mxu0  ;;  %v1524_v4 = vpop.f32.mrb[38].mxu1 }
 0x1c1   : > { %v1716_v3 = vadd.f32 %v1715_v2, %v1522_v1  ;;  %v1717_v5 = vpop.f32.mrb[38].mxu0  ;;  %v1526_v7 = vpop.f32.mrb[39].mxu1 }
 0x1c2   : > { %v1718_v6 = vadd.f32 %v1717_v5, %v1524_v4  ;;  %v1719_v8 = vpop.f32.mrb[39].mxu0 }
 0x1c3   : > { %v2665_v9 = vpack.c.bf16 %v1716_v3, %v1714_v0  ;;  %v1720_v10 = vadd.f32 %v1719_v8, %v1526_v7 }
 0x1c5   : > { %2187 = vst [vmem:[%s3447_s3 + $0x90] sm:$0xff] %v2665_v9  ;;  %v2666_v11 = vpack.c.bf16 %v1720_v10, %v1718_v6 }
 0x1c6   : > { %v1530_v12 = vpop.f32.mrb[40].mxu1 }
 0x1c7   : > { %2188 = vst [vmem:[%s3447_s3 + $0x98] sm:$0xff] %v2666_v11  ;;  %v1723_v13 = vpop.f32.mrb[40].mxu0  ;;  %v1532_v15 = vpop.f32.mrb[41].mxu1 }
 0x1c8   : > { %v1724_v14 = vadd.f32 %v1723_v13, %v1530_v12  ;;  %v1725_v16 = vpop.f32.mrb[41].mxu0  ;;  %v1534_v18 = vpop.f32.mrb[42].mxu1 }
 0x1c9   : > { %v1726_v17 = vadd.f32 %v1725_v16, %v1532_v15  ;;  %v1727_v19 = vpop.f32.mrb[42].mxu0  ;;  %v1536_v21 = vpop.f32.mrb[43].mxu1 }
 0x1ca   : > { %v1728_v20 = vadd.f32 %v1727_v19, %v1534_v18  ;;  %v1729_v22 = vpop.f32.mrb[43].mxu0 }
 0x1cb   : > { %v2667_v23 = vpack.c.bf16 %v1726_v17, %v1724_v14  ;;  %v1730_v24 = vadd.f32 %v1729_v22, %v1536_v21 }
 0x1cd   : > { %2189 = vst [vmem:[%s3447_s3 + $0xa0] sm:$0xff] %v2667_v23  ;;  %v2668_v25 = vpack.c.bf16 %v1730_v24, %v1728_v20 }
 0x1ce   : > { %v1540_v26 = vpop.f32.mrb[44].mxu1 }
 0x1cf   : > { %2190 = vst [vmem:[%s3447_s3 + $0xa8] sm:$0xff] %v2668_v25  ;;  %v1733_v27 = vpop.f32.mrb[44].mxu0  ;;  %v1542_v29 = vpop.f32.mrb[45].mxu1 }
 0x1d0   : > { %v1734_v28 = vadd.f32 %v1733_v27, %v1540_v26  ;;  %v1735_v30 = vpop.f32.mrb[45].mxu0  ;;  %v1544_v32 = vpop.f32.mrb[46].mxu1 }
 0x1d1   : > { %v1736_v31 = vadd.f32 %v1735_v30, %v1542_v29  ;;  %v1737_v33 = vpop.f32.mrb[46].mxu0  ;;  %v1546_v35 = vpop.f32.mrb[47].mxu1 }
 0x1d2   : > { %v1738_v34 = vadd.f32 %v1737_v33, %v1544_v32  ;;  %v1739_v36 = vpop.f32.mrb[47].mxu0  ;;  %v2303_v32 = vld [vmem:[%s3447_s3] sm:$0xff] (%p3162_p9)  ;;  %v2305_v33 = vld [vmem:[%s3447_s3 + $0x8] sm:$0xff] (%p3162_p9) }
 0x1d3   : > { %v2669_v37 = vpack.c.bf16 %v1736_v31, %v1734_v28  ;;  %v1740_v38 = vadd.f32 %v1739_v36, %v1546_v35  ;;  %v2309_v35 = vld [vmem:[%s3447_s3 + $0x18] sm:$0xff] (%p3162_p9)  ;;  %v2311_v36 = vld [vmem:[%s3447_s3 + $0x20] sm:$0xff] (%p3162_p9)  ;;  %2304 = vst [vmem:[%s3497_s8] sm:$0xff] (%p3162_p9), %v2303_v32  ;;  %2306 = vst [vmem:[%s3497_s8 + $0x20] sm:$0xff] (%p3162_p9), %v2305_v33 }
 0x1d4   : > { %2310 = vst [vmem:[%s3497_s8 + $0x60] sm:$0xff] (%p3162_p9), %v2309_v35  ;;  %2312 = vst [vmem:[%s3497_s8 + $0x80] sm:$0xff] (%p3162_p9), %v2311_v36 }
 0x1d5   : > { %2191 = vst [vmem:[%s3447_s3 + $0xb0] sm:$0xff] %v2669_v37  ;;  %v2670_v39 = vpack.c.bf16 %v1740_v38, %v1738_v34  ;;  %v2307_v34 = vld [vmem:[%s3447_s3 + $0x10] sm:$0xff] (%p3162_p9)  ;;  %v2313_v37 = vld [vmem:[%s3447_s3 + $0x28] sm:$0xff] (%p3162_p9) }
 0x1d6   : > { %v1550_v40 = vpop.f32.mrb[48].mxu1  ;;  %v2315_v38 = vld [vmem:[%s3447_s3 + $0x30] sm:$0xff] (%p3162_p9)  ;;  %2308 = vst [vmem:[%s3497_s8 + $0x40] sm:$0xff] (%p3162_p9), %v2307_v34  ;;  %2314 = vst [vmem:[%s3497_s8 + $0xa0] sm:$0xff] (%p3162_p9), %v2313_v37 }
 0x1d7   : > { %2192 = vst [vmem:[%s3447_s3 + $0xb8] sm:$0xff] %v2670_v39  ;;  %v1743_v41 = vpop.f32.mrb[48].mxu0  ;;  %v1552_v43 = vpop.f32.mrb[49].mxu1  ;;  %v2317_v39 = vld [vmem:[%s3447_s3 + $0x38] sm:$0xff] (%p3162_p9)  ;;  %2316 = vst [vmem:[%s3497_s8 + $0xc0] sm:$0xff] (%p3162_p9), %v2315_v38 }
 0x1d8   : > { %v1744_v42 = vadd.f32 %v1743_v41, %v1550_v40  ;;  %v1745_v44 = vpop.f32.mrb[49].mxu0  ;;  %v1554_v46 = vpop.f32.mrb[50].mxu1  ;;  %v2319_v40 = vld [vmem:[%s3447_s3 + $0x40] sm:$0xff] (%p3162_p9)  ;;  %v2321_v41 = vld [vmem:[%s3447_s3 + $0x48] sm:$0xff] (%p3162_p9)  ;;  %2318 = vst [vmem:[%s3497_s8 + $0xe0] sm:$0xff] (%p3162_p9), %v2317_v39 }
 0x1d9   : > { %v1746_v45 = vadd.f32 %v1745_v44, %v1552_v43  ;;  %v1747_v47 = vpop.f32.mrb[50].mxu0  ;;  %v1556_v49 = vpop.f32.mrb[51].mxu1  ;;  %v2325_v43 = vld [vmem:[%s3447_s3 + $0x58] sm:$0xff] (%p3162_p9)  ;;  %2320 = vst [vmem:[%s3497_s8 + $0x100] sm:$0xff] (%p3162_p9), %v2319_v40  ;;  %2322 = vst [vmem:[%s3497_s8 + $0x120] sm:$0xff] (%p3162_p9), %v2321_v41  ;;  %v2327_v44 = vld [vmem:[%s3447_s3 + $0x60] sm:$0xff] (%p3162_p9) }
 0x1da   : > { %v1748_v48 = vadd.f32 %v1747_v47, %v1554_v46  ;;  %v1749_v50 = vpop.f32.mrb[51].mxu0  ;;  %2326 = vst [vmem:[%s3497_s8 + $0x160] sm:$0xff] (%p3162_p9), %v2325_v43  ;;  %v2331_v46 = vld [vmem:[%s3447_s3 + $0x70] sm:$0xff] (%p3162_p9)  ;;  %2328 = vst [vmem:[%s3497_s8 + $0x180] sm:$0xff] (%p3162_p9), %v2327_v44  ;;  %v2333_v47 = vld [vmem:[%s3447_s3 + $0x78] sm:$0xff] (%p3162_p9) }
 0x1db   : > { %v2671_v51 = vpack.c.bf16 %v1746_v45, %v1744_v42  ;;  %v1750_v52 = vadd.f32 %v1749_v50, %v1556_v49  ;;  %v2323_v42 = vld [vmem:[%s3447_s3 + $0x50] sm:$0xff] (%p3162_p9)  ;;  %v2329_v45 = vld [vmem:[%s3447_s3 + $0x68] sm:$0xff] (%p3162_p9)  ;;  %2332 = vst [vmem:[%s3497_s8 + $0x1c0] sm:$0xff] (%p3162_p9), %v2331_v46  ;;  %2334 = vst [vmem:[%s3497_s8 + $0x1e0] sm:$0xff] (%p3162_p9), %v2333_v47 }
 0x1dc   : > { %2324 = vst [vmem:[%s3497_s8 + $0x140] sm:$0xff] (%p3162_p9), %v2323_v42  ;;  %2330 = vst [vmem:[%s3497_s8 + $0x1a0] sm:$0xff] (%p3162_p9), %v2329_v45  ;;  %v2337_v49 = vld [vmem:[%s3447_s3 + $0x88] sm:$0xff] (%p3162_p9)  ;;  %v2339_v50 = vld [vmem:[%s3447_s3 + $0x90] sm:$0xff] (%p3162_p9) }
 0x1dd   : > { %2193 = vst [vmem:[%s3447_s3 + $0xc0] sm:$0xff] %v2671_v51  ;;  %v2672_v53 = vpack.c.bf16 %v1750_v52, %v1748_v48  ;;  %v2335_v48 = vld [vmem:[%s3447_s3 + $0x80] sm:$0xff] (%p3162_p9)  ;;  %2338 = vst [vmem:[%s3497_s8 + $0x220] sm:$0xff] (%p3162_p9), %v2337_v49  ;;  %v2341_v51 = vld [vmem:[%s3447_s3 + $0x98] sm:$0xff] (%p3162_p9) }
 0x1de   : > { %v1560_v54 = vpop.f32.mrb[52].mxu1  ;;  %2336 = vst [vmem:[%s3497_s8 + $0x200] sm:$0xff] (%p3162_p9), %v2335_v48  ;;  %v2343_v52 = vld [vmem:[%s3447_s3 + $0xa0] sm:$0xff] (%p3162_p9)  ;;  %2340 = vst [vmem:[%s3497_s8 + $0x240] sm:$0xff] (%p3162_p9), %v2339_v50 }
 0x1df   : > { %2194 = vst [vmem:[%s3447_s3 + $0xc8] sm:$0xff] %v2672_v53  ;;  %v1753_v55 = vpop.f32.mrb[52].mxu0  ;;  %v1562_v57 = vpop.f32.mrb[53].mxu1  ;;  %2342 = vst [vmem:[%s3497_s8 + $0x260] sm:$0xff] (%p3162_p9), %v2341_v51  ;;  %v2345_v53 = vld [vmem:[%s3447_s3 + $0xa8] sm:$0xff] (%p3162_p9) }
 0x1e0   : > { %v1754_v56 = vadd.f32 %v1753_v55, %v1560_v54  ;;  %v1755_v58 = vpop.f32.mrb[53].mxu0  ;;  %v1564_v60 = vpop.f32.mrb[54].mxu1  ;;  %2344 = vst [vmem:[%s3497_s8 + $0x280] sm:$0xff] (%p3162_p9), %v2343_v52  ;;  %v2347_v54 = vld [vmem:[%s3447_s3 + $0xb0] sm:$0xff] (%p3162_p9)  ;;  %v2349_v55 = vld [vmem:[%s3447_s3 + $0xb8] sm:$0xff] (%p3162_p9)  ;;  %2346 = vst [vmem:[%s3497_s8 + $0x2a0] sm:$0xff] (%p3162_p9), %v2345_v53 }
 0x1e1   : > { %v1756_v59 = vadd.f32 %v1755_v58, %v1562_v57  ;;  %v1757_v61 = vpop.f32.mrb[54].mxu0  ;;  %v1566_v63 = vpop.f32.mrb[55].mxu1  ;;  %2348 = vst [vmem:[%s3497_s8 + $0x2c0] sm:$0xff] (%p3162_p9), %v2347_v54  ;;  %2350 = vst [vmem:[%s3497_s8 + $0x2e0] sm:$0xff] (%p3162_p9), %v2349_v55 }
 0x1e2   : > { %v1758_v62 = vadd.f32 %v1757_v61, %v1564_v60  ;;  %v1759_v0 = vpop.f32.mrb[55].mxu0 }
 0x1e3   : > { %v2673_v1 = vpack.c.bf16 %v1756_v59, %v1754_v56  ;;  %v1760_v2 = vadd.f32 %v1759_v0, %v1566_v63 }
 0x1e4   : > { %v2351_v56 = vld [vmem:[%s3447_s3 + $0xc0] sm:$0xff] (%p3162_p9) }
 0x1e5   : > { %2195 = vst [vmem:[%s3447_s3 + $0xd0] sm:$0xff] %v2673_v1  ;;  %v2674_v3 = vpack.c.bf16 %v1760_v2, %v1758_v62  ;;  %2352 = vst [vmem:[%s3497_s8 + $0x300] sm:$0xff] (%p3162_p9), %v2351_v56 }
 0x1e6   : > { %v1570_v4 = vpop.f32.mrb[56].mxu1  ;;  %v2353_v57 = vld [vmem:[%s3447_s3 + $0xc8] sm:$0xff] (%p3162_p9) }
 0x1e7   : > { %2196 = vst [vmem:[%s3447_s3 + $0xd8] sm:$0xff] %v2674_v3  ;;  %v1763_v5 = vpop.f32.mrb[56].mxu0  ;;  %v1572_v7 = vpop.f32.mrb[57].mxu1  ;;  %2354 = vst [vmem:[%s3497_s8 + $0x320] sm:$0xff] (%p3162_p9), %v2353_v57 }
 0x1e8   : > { %v1764_v6 = vadd.f32 %v1763_v5, %v1570_v4  ;;  %v1765_v8 = vpop.f32.mrb[57].mxu0  ;;  %v1574_v10 = vpop.f32.mrb[58].mxu1 }
 0x1e9   : > { %v1766_v9 = vadd.f32 %v1765_v8, %v1572_v7  ;;  %v1767_v11 = vpop.f32.mrb[58].mxu0  ;;  %v1576_v13 = vpop.f32.mrb[59].mxu1 }
 0x1ea   : > { %v1768_v12 = vadd.f32 %v1767_v11, %v1574_v10  ;;  %v1769_v14 = vpop.f32.mrb[59].mxu0 }
 0x1eb   : > { %v2675_v15 = vpack.c.bf16 %v1766_v9, %v1764_v6  ;;  %v1770_v16 = vadd.f32 %v1769_v14, %v1576_v13 }
 0x1ec   : > { %v2355_v58 = vld [vmem:[%s3447_s3 + $0xd0] sm:$0xff] (%p3162_p9) }
 0x1ed   : > { %2197 = vst [vmem:[%s3447_s3 + $0xe0] sm:$0xff] %v2675_v15  ;;  %v2676_v17 = vpack.c.bf16 %v1770_v16, %v1768_v12  ;;  %2356 = vst [vmem:[%s3497_s8 + $0x340] sm:$0xff] (%p3162_p9), %v2355_v58 }
 0x1ee   : > { %v1580_v18 = vpop.f32.mrb[60].mxu1  ;;  %v2357_v59 = vld [vmem:[%s3447_s3 + $0xd8] sm:$0xff] (%p3162_p9) }
 0x1ef   : > { %2198 = vst [vmem:[%s3447_s3 + $0xe8] sm:$0xff] %v2676_v17  ;;  %v1773_v19 = vpop.f32.mrb[60].mxu0  ;;  %v1582_v21 = vpop.f32.mrb[61].mxu1  ;;  %2358 = vst [vmem:[%s3497_s8 + $0x360] sm:$0xff] (%p3162_p9), %v2357_v59 }
 0x1f0   : > { %v1774_v20 = vadd.f32 %v1773_v19, %v1580_v18  ;;  %v1775_v22 = vpop.f32.mrb[61].mxu0  ;;  %v1584_v24 = vpop.f32.mrb[62].mxu1 }
 0x1f1   : > { %v1776_v23 = vadd.f32 %v1775_v22, %v1582_v21  ;;  %v1777_v25 = vpop.f32.mrb[62].mxu0  ;;  %v1586_v27 = vpop.f32.mrb[63].mxu1  ;;  %2207 = sbr.rel (!%p3162_p9) target bundleno = 512 (0x200), region = 78 }
 0x1f2   : > { %v1778_v26 = vadd.f32 %v1777_v25, %v1584_v24  ;;  %v1779_v28 = vpop.f32.mrb[63].mxu0 }
 0x1f3   : > { %v2677_v29 = vpack.c.bf16 %v1776_v23, %v1774_v20  ;;  %v1780_v30 = vadd.f32 %v1779_v28, %v1586_v27 }
 0x1f4   : > { %v2359_v60 = vld [vmem:[%s3447_s3 + $0xe0] sm:$0xff] (%p3162_p9) }
 0x1f5   : > { %2199 = vst [vmem:[%s3447_s3 + $0xf0] sm:$0xff] %v2677_v29  ;;  %v2678_v31 = vpack.c.bf16 %v1780_v30, %v1778_v26  ;;  %2360 = vst [vmem:[%s3497_s8 + $0x380] sm:$0xff] (%p3162_p9), %v2359_v60 }
 0x1f6   : > { %v2361_v61 = vld [vmem:[%s3447_s3 + $0xe8] sm:$0xff] (%p3162_p9) }
 0x1f7   : > { %2200 = vst [vmem:[%s3447_s3 + $0xf8] sm:$0xff] %v2678_v31  ;;  %2362 = vst [vmem:[%s3497_s8 + $0x3a0] sm:$0xff] (%p3162_p9), %v2361_v61 }
 0x1fc   : > { %v2363_v62 = vld [vmem:[%s3447_s3 + $0xf0] sm:$0xff] }
 0x1fd   : > { %2364 = vst [vmem:[%s3497_s8 + $0x3c0] sm:$0xff] %v2363_v62 }
 0x1fe   : > { %v2365_v63 = vld [vmem:[%s3447_s3 + $0xf8] sm:$0xff] }
 0x1ff   : > { %2366 = vst [vmem:[%s3497_s8 + $0x3e0] sm:$0xff] %v2365_v63 }
 0x200 PF: > { %s12_s17 = sadd.s32 1, %s3078_s17   ;;  %s3585_s9 = smov %s3050_s10 }
 0x201   : > { %p9_p1 = scmp.ge.s32.totalorder %s12_s17, 10   ;;  %s3586_s10 = smov %s3167_s28 }
 0x202   : > { %s3587_s11 = smov %s3058_s12  ;;  %s3588_s12 = smov %s3156_s24 }
 0x203   : > { %s3589_s13 = smov %s3070_s15  ;;  %s3590_s14 = smov %s3074_s16 }
 0x204   : > { %s3591_s15 = smov %s3594_s19  ;;  %s3592_s16 = smov %s3598_s20 }
 0x205   :  { %11 = sbr.rel (!%p9_p1) target bundleno = 5 (0x5), region = 150 }

// kernel: attention_forward.4
= control target key start
LH: loop header
LB: loop body
LE: loop exit
PB: predicated region body
PF: predicated region fallthrough
CT: control target
= control target key end

     0   :  { %s5942_s0 = inlined_call_operand.vmem [shape: s32[2,256,128], index: 0, kind: input, shape index: {}]   ;;  %s5943_s1 = inlined_call_operand.vmem [shape: s32[2,8,256], index: 1, kind: input, shape index: {}]   ;;  %s5944_s2 = inlined_call_operand.vmem [shape: bf16[2,256,512], index: 2, kind: input, shape index: {}]   ;;  %s5945_s3 = inlined_call_operand.vmem [shape: bf16[2,256,256], index: 3, kind: input, shape index: {}]   ;;  %s5946_s4 = inlined_call_operand.vmem [shape: bf16[2,256,256], index: 4, kind: input, shape index: {}]   ;;  %s5947_s5 = inlined_call_operand.vmem [shape: bf16[2,256,512], index: 5, kind: output, shape index: {}]  }
   0x1   :  { %5999 = sst [smem:[#allocation68_spill]] %s5942_s0 }
   0x2   :  { %6000 = sst [smem:[#allocation69_spill]] %s5943_s1 }
   0x3   :  { %6001 = sst [smem:[#allocation70_spill]] %s5944_s2 }
   0x4   :  { %6002 = sst [smem:[#allocation71_spill]] %s5945_s3 }
   0x5   :  { %6003 = sst [smem:[#allocation72_spill]] %s5946_s4 }
   0x6   :  { %6004 = sst [smem:[#allocation73_spill]] %s5947_s5 }
   0x7   :  { %s4271_s18 = smov 0   ;;  %s4273_s19 = smov 0  }
   0x8   :  { %s4275_s20 = smov 0   ;;  %s4277_s21 = smov 0  }
   0x9   :  { %s4279_s22 = smov 0   ;;  %s4281_s23 = smov 0  }
   0xa   :  { %s4283_s24 = smov 0   ;;  %s4285_s25 = smov 0  }
   0xb   :  { %s4287_s26 = smov 0   ;;  %s4289_s27 = smov 0  }
   0xc   :  { %s4291_s28 = smov 0   ;;  %s4293_s29 = smov 0  }
   0xd   :  { %s4295_s30 = smov 0  }
   0xe LB: > { %6005 = sst [smem:[#allocation9_spill]] %s4211_s24  ;;  %s30_s6 = sadd.s32 1, %s4219_s26  ;;  %s4235_s30 = sphi %s4295_s30, %s15_s30   ;;  %s4231_s29 = sphi %s4293_s29, %s6210_s29   ;;  %s4227_s28 = sphi %s4291_s28, %s6209_s28   ;;  %s4223_s27 = sphi %s4289_s27, %s6218_s27   ;;  %s4219_s26 = sphi %s4287_s26, %s6207_s26   ;;  %s4215_s25 = sphi %s4285_s25, %s6217_s25   ;;  %s4211_s24 = sphi %s4283_s24, %s6205_s24   ;;  %s4207_s23 = sphi %s4281_s23, %s6216_s23   ;;  %s4203_s22 = sphi %s4279_s22, %s6204_s22   ;;  %s4199_s21 = sphi %s4277_s21, %s6215_s21   ;;  %s4195_s20 = sphi %s4275_s20, %s6214_s20   ;;  %s4191_s19 = sphi %s4273_s19, %s6213_s19   ;;  %s4187_s18 = sphi %s4271_s18, %s6212_s18  }
   0xf   : > { %6006 = sst [smem:[#allocation10_spill]] %s4219_s26  ;;  %p31_p0 = scmp.ge.s32.totalorder %s30_s6, 2 }
  0x10   : > { %6007 = sst [smem:[#allocation11_spill]] %s4227_s28  ;;  %s33_s7 = sadd.s32 1, %s4223_s27 }
  0x11   : > { %6008 = sst [smem:[#allocation12_spill]] %s4231_s29  ;;  %s37_s9 = sadd.s32 1, %s4227_s28 }
  0x12   : > { %s6220_s6 = smov (%p31_p0, %s30_s6), 0  ;;  %s6222_s7 = smov (!%p31_p0, %s33_s7), %s4223_s27 }
  0x13   : > { %6009 = sst [smem:[#allocation13_spill]] %s6220_s6  ;;  %s41_s10 = sadd.s32 1, %s4231_s29 }
  0x14   : > { %p125_p1 = scmp.ne.s32.totalorder %s4199_s21, %s4195_s20  ;;  %p35_p2 = scmp.ge.s32.totalorder %s6222_s7, 2 }
  0x15   : > { %p126_p3 = scmp.eq.s32.totalorder %s4235_s30, 0  ;;  %s3450_s11 = sshll.u32 %s4219_s26, 7 }
  0x16   : > { %s3451_s12 = sshll.u32 %s4223_s27, 7  ;;  %s6224_s7 = smov (%p35_p2, %s6222_s7), 0 }
  0x17   : > { %6010 = sst [smem:[#allocation14_spill]] %s6224_s7  ;;  %s6226_s9 = smov (!%p35_p2, %s37_s9), %s4227_s28 }
  0x18   : > { %s118_s13 = sadd.s32 1, %s4199_s21  ;;  %p4358_p4 = por %p126_p3, %p125_p1 }
  0x19   : > { %p39_p5 = scmp.ge.s32.totalorder %s6226_s9, 2  ;;  %s143_s15 = sadd.s32 127, %s3451_s12 }
  0x1a   : > { %s112_s16 = ssub.s32 %s4223_s27, %s6224_s7  ;;  %p144_p6 = scmp.le.s32.totalorder %s3450_s11, %s143_s15 }
  0x1b   : > { %s6228_s9 = smov (%p39_p5, %s6226_s9), 0  ;;  %s6230_s10 = smov (!%p39_p5, %s41_s10), %s4231_s29 }
  0x1c   : > { %6012 = sst [smem:[#allocation15_spill]] %s6228_s9  ;;  %s3452_s17 = sshll.u32 %s6220_s6, 7 }
  0x1d   : > { %s3453_s8 = sshll.u32 %s6224_s7, 7  ;;  %p43_p7 = scmp.ge.s32.totalorder %s6230_s10, 2 }
  0x1e   : > { %s148_s5 = sadd.s32 127, %s3453_s8  ;;  %s114_s11 = ssub.s32 %s4227_s28, %s6228_s9 }
  0x1f   : > { %s4370_s24 = scalar_select %p144_p6, %s4219_s26, 0 }
  0x20   : > { %s6232_s10 = smov (%p43_p7, %s6230_s10), 0  ;;  %p149_p8 = scmp.le.s32.totalorder %s3452_s17, %s148_s5 }
  0x21   : > { %6013 = sst [smem:[#allocation16_spill]] %s6232_s10  ;;  %s111_s12 = ssub.s32 %s4231_s29, %s6232_s10 }
  0x22   : > { %p165_p9 = scmp.ne.s32.totalorder %s4191_s19, %s4187_s18  ;;  %s113_s15 = sor.u32 %s112_s16, %s111_s12 }
  0x23   : > { %s6014_s1 = sadd.s32 4294967295, %s4235_s30   ;;  %s115_s0 = sor.u32 %s114_s11, %s113_s15 }
  0x24   : > { %p239_p10 = scmp.eq.s32.totalorder %s6014_s1, 15  ;;  %p4384_p11 = por %p165_p9, %p126_p3 }
  0x25   : > { %p116_p12 = scmp.eq.s32.totalorder %s115_s0, 0  ;;  %s158_s26 = sadd.s32 1, %s4191_s19 }
  0x26   : > { %p4391_p13 = por %p239_p10, %p125_p1  ;;  %p3459_p2 = scmp.ge.s32.totalorder %s4235_s30, 16 }
  0x27   : > { %s150_s9 = scalar_select %p149_p8, %s6220_s6, 0 }
  0x28   : > { %s4397_s5 = scalar_select %p116_p12, %s4199_s21, %s118_s13  }
  0x29   : > { %s152_s17 = ssub.s32 %s4370_s24, %s150_s9  ;;  %261 = sbr.rel (%p3459_p2) target bundleno = 109 (0x6d), region = 16 }
  0x2a   : > { %s153_s10 = sor.u32 %s152_s17, %s111_s12 }
  0x2b   : > { %s155_s16 = sor.u32 %s153_s10, %s114_s11 }
  0x2c   : > { %p156_p0 = scmp.eq.s32.totalorder %s155_s16, 0 }
  0x2e   : > { %s4402_s1 = scalar_select %p156_p0, %s4191_s19, %s158_s26  }
  0x30   : > { %298 = sbr.rel (!%p4358_p4) target bundleno = 67 (0x43), region = 28  ;;  %s300_s0 = sand.u32 (%p4358_p4), 1, %s4199_s21  }
  0x31   : > { %s3462_s13 = sshll.u32 (%p4358_p4), %s4227_s28, 1  ;;  %s3569_s15 = sshll.u32 (%p4358_p4), %s4223_s27, 6 }
  0x32   : > { %s3460_s9 = sshll.u32 (%p4358_p4), %s300_s0, 7  ;;  %s306_s12 = sadd.s32 (%p4358_p4), %s3569_s15, %s3462_s13 }
  0x33   : > { %s3464_s10 = sshll.u32 (%p4358_p4), %s4231_s29, 7  ;;  %s6017_s2 = sld [smem:[#allocation70_spill]] (%p4358_p4) }
  0x34   : > { %s308_s11 = sadd.s32 (%p4358_p4), %s3464_s10, %s306_s12  ;;  %s302_s14 = scalar_lea.vmem (%p4358_p4), [#allocation5], %s3460_s9 }
  0x35   : > { %s3465_s17 = sshll.u32 (%p4358_p4), %s308_s11, 2 }
  0x39   : > { %s4414_s6 = scalar_lea.vmem %s6017_s2, %s3465_s17 }
  0x3a   : > { %v368_v0 = vld [vmem:[%s4414_s6] sm:$0xff]  ;;  %v370_v1 = vld [vmem:[%s4414_s6 + $0x10] sm:$0xff] }
  0x3b   : > { %v372_v2 = vld [vmem:[%s4414_s6 + $0x20] sm:$0xff]  ;;  %369 = vst [vmem:[%s302_s14] sm:$0xff] %v368_v0  ;;  %371 = vst [vmem:[%s302_s14 + $0x8] sm:$0xff] %v370_v1  ;;  %v374_v3 = vld [vmem:[%s4414_s6 + $0x30] sm:$0xff] }
  0x3c   : > { %373 = vst [vmem:[%s302_s14 + $0x10] sm:$0xff] %v372_v2  ;;  %v376_v4 = vld [vmem:[%s4414_s6 + $0x40] sm:$0xff]  ;;  %v378_v5 = vld [vmem:[%s4414_s6 + $0x50] sm:$0xff]  ;;  %375 = vst [vmem:[%s302_s14 + $0x18] sm:$0xff] %v374_v3 }
  0x3d   : > { %377 = vst [vmem:[%s302_s14 + $0x20] sm:$0xff] %v376_v4  ;;  %379 = vst [vmem:[%s302_s14 + $0x28] sm:$0xff] %v378_v5  ;;  %v380_v6 = vld [vmem:[%s4414_s6 + $0x60] sm:$0xff]  ;;  %v382_v7 = vld [vmem:[%s4414_s6 + $0x70] sm:$0xff] }
  0x3e   : > { %v384_v8 = vld [vmem:[%s4414_s6 + $0x80] sm:$0xff]  ;;  %381 = vst [vmem:[%s302_s14 + $0x30] sm:$0xff] %v380_v6  ;;  %383 = vst [vmem:[%s302_s14 + $0x38] sm:$0xff] %v382_v7  ;;  %v386_v9 = vld [vmem:[%s4414_s6 + $0x90] sm:$0xff] }
  0x3f   : > { %385 = vst [vmem:[%s302_s14 + $0x40] sm:$0xff] %v384_v8  ;;  %v388_v10 = vld [vmem:[%s4414_s6 + $0xa0] sm:$0xff]  ;;  %v390_v11 = vld [vmem:[%s4414_s6 + $0xb0] sm:$0xff]  ;;  %387 = vst [vmem:[%s302_s14 + $0x48] sm:$0xff] %v386_v9 }
  0x40   : > { %389 = vst [vmem:[%s302_s14 + $0x50] sm:$0xff] %v388_v10  ;;  %391 = vst [vmem:[%s302_s14 + $0x58] sm:$0xff] %v390_v11  ;;  %v392_v12 = vld [vmem:[%s4414_s6 + $0xc0] sm:$0xff]  ;;  %v394_v13 = vld [vmem:[%s4414_s6 + $0xd0] sm:$0xff] }
  0x41   : > { %v396_v14 = vld [vmem:[%s4414_s6 + $0xe0] sm:$0xff]  ;;  %393 = vst [vmem:[%s302_s14 + $0x60] sm:$0xff] %v392_v12  ;;  %395 = vst [vmem:[%s302_s14 + $0x68] sm:$0xff] %v394_v13  ;;  %v398_v15 = vld [vmem:[%s4414_s6 + $0xf0] sm:$0xff] }
  0x42   : > { %397 = vst [vmem:[%s302_s14 + $0x70] sm:$0xff] %v396_v14  ;;  %399 = vst [vmem:[%s302_s14 + $0x78] sm:$0xff] %v398_v15 }
  0x43 PF: > { %405 = sbr.rel (!%p4384_p11) target bundleno = 88 (0x58), region = 66  ;;  %s407_s0 = sand.u32 (%p4384_p11), 1, %s4191_s19  }
  0x44   : > { %s3570_s13 = sshll.u32 (%p4384_p11), %s4370_s24, 5  ;;  %s3466_s15 = sshll.u32 (%p4384_p11), %s407_s0, 6 }
  0x45   : > { %s417_s9 = sadd.s32 (%p4384_p11), %s4227_s28, %s3570_s13  ;;  %s3471_s12 = sshll.u32 (%p4384_p11), %s4231_s29, 6 }
  0x46   : > { %s419_s10 = sadd.s32 (%p4384_p11), %s3471_s12, %s417_s9  ;;  %s6018_s3 = sld [smem:[#allocation71_spill]] (%p4384_p11) }
  0x47   : > { %s3472_s11 = sshll.u32 (%p4384_p11), %s419_s10, 2  ;;  %s409_s16 = scalar_lea.vmem (%p4384_p11), [#allocation6], %s3466_s15 }
  0x4c   : > { %s4441_s6 = scalar_lea.vmem %s6018_s3, %s3472_s11 }
  0x4d   : > { %v437_v16 = vld [vmem:[%s4441_s6] sm:$0xf]  ;;  %v439_v17 = vld [vmem:[%s4441_s6 + $0x8] sm:$0xf]  ;;  %v441_v18 = vld [vmem:[%s4441_s6 + $0x10] sm:$0xf] }
  0x4e   : > { %438 = vst [vmem:[%s409_s16] sm:$0xf] %v437_v16  ;;  %440 = vst [vmem:[%s409_s16 + $0x4] sm:$0xf] %v439_v17  ;;  %v443_v19 = vld [vmem:[%s4441_s6 + $0x18] sm:$0xf] }
  0x4f   : > { %442 = vst [vmem:[%s409_s16 + $0x8] sm:$0xf] %v441_v18  ;;  %v445_v20 = vld [vmem:[%s4441_s6 + $0x20] sm:$0xf]  ;;  %v447_v21 = vld [vmem:[%s4441_s6 + $0x28] sm:$0xf] }
  0x50   : > { %444 = vst [vmem:[%s409_s16 + $0xc] sm:$0xf] %v443_v19  ;;  %446 = vst [vmem:[%s409_s16 + $0x10] sm:$0xf] %v445_v20  ;;  %v449_v22 = vld [vmem:[%s4441_s6 + $0x30] sm:$0xf] }
  0x51   : > { %448 = vst [vmem:[%s409_s16 + $0x14] sm:$0xf] %v447_v21  ;;  %v451_v23 = vld [vmem:[%s4441_s6 + $0x38] sm:$0xf]  ;;  %v453_v24 = vld [vmem:[%s4441_s6 + $0x40] sm:$0xf] }
  0x52   : > { %450 = vst [vmem:[%s409_s16 + $0x18] sm:$0xf] %v449_v22  ;;  %452 = vst [vmem:[%s409_s16 + $0x1c] sm:$0xf] %v451_v23  ;;  %v455_v25 = vld [vmem:[%s4441_s6 + $0x48] sm:$0xf] }
  0x53   : > { %454 = vst [vmem:[%s409_s16 + $0x20] sm:$0xf] %v453_v24  ;;  %v457_v26 = vld [vmem:[%s4441_s6 + $0x50] sm:$0xf]  ;;  %v459_v27 = vld [vmem:[%s4441_s6 + $0x58] sm:$0xf] }
  0x54   : > { %456 = vst [vmem:[%s409_s16 + $0x24] sm:$0xf] %v455_v25  ;;  %458 = vst [vmem:[%s409_s16 + $0x28] sm:$0xf] %v457_v26  ;;  %v461_v28 = vld [vmem:[%s4441_s6 + $0x60] sm:$0xf] }
  0x55   : > { %460 = vst [vmem:[%s409_s16 + $0x2c] sm:$0xf] %v459_v27  ;;  %v463_v29 = vld [vmem:[%s4441_s6 + $0x68] sm:$0xf]  ;;  %v465_v30 = vld [vmem:[%s4441_s6 + $0x70] sm:$0xf] }
  0x56   : > { %462 = vst [vmem:[%s409_s16 + $0x30] sm:$0xf] %v461_v28  ;;  %464 = vst [vmem:[%s409_s16 + $0x34] sm:$0xf] %v463_v29  ;;  %v467_v31 = vld [vmem:[%s4441_s6 + $0x78] sm:$0xf] }
  0x57   : > { %466 = vst [vmem:[%s409_s16 + $0x38] sm:$0xf] %v465_v30  ;;  %468 = vst [vmem:[%s409_s16 + $0x3c] sm:$0xf] %v467_v31 }
  0x58 PF: > { %523 = sbr.rel (!%p4384_p11) target bundleno = 109 (0x6d), region = 107  ;;  %s525_s14 = sand.u32 (%p4384_p11), 1, %s4191_s19  }
  0x59   : > { %s3571_s0 = sshll.u32 (%p4384_p11), %s4370_s24, 5  ;;  %s3473_s13 = sshll.u32 (%p4384_p11), %s525_s14, 6 }
  0x5a   : > { %s535_s15 = sadd.s32 (%p4384_p11), %s4227_s28, %s3571_s0  ;;  %s3478_s9 = sshll.u32 (%p4384_p11), %s4231_s29, 6 }
  0x5b   : > { %s537_s12 = sadd.s32 (%p4384_p11), %s3478_s9, %s535_s15  ;;  %s6019_s4 = sld [smem:[#allocation72_spill]] (%p4384_p11) }
  0x5c   : > { %s3479_s10 = sshll.u32 (%p4384_p11), %s537_s12, 2  ;;  %s527_s24 = scalar_lea.vmem (%p4384_p11), [#allocation7], %s3473_s13 }
  0x61   : > { %s4468_s26 = scalar_lea.vmem %s6019_s4, %s3479_s10 }
  0x62   : > { %v555_v32 = vld [vmem:[%s4468_s26] sm:$0xf]  ;;  %v557_v33 = vld [vmem:[%s4468_s26 + $0x8] sm:$0xf]  ;;  %v559_v34 = vld [vmem:[%s4468_s26 + $0x10] sm:$0xf] }
  0x63   : > { %556 = vst [vmem:[%s527_s24] sm:$0xf] %v555_v32  ;;  %558 = vst [vmem:[%s527_s24 + $0x4] sm:$0xf] %v557_v33  ;;  %v561_v35 = vld [vmem:[%s4468_s26 + $0x18] sm:$0xf] }
  0x64   : > { %560 = vst [vmem:[%s527_s24 + $0x8] sm:$0xf] %v559_v34  ;;  %v563_v36 = vld [vmem:[%s4468_s26 + $0x20] sm:$0xf]  ;;  %v565_v37 = vld [vmem:[%s4468_s26 + $0x28] sm:$0xf] }
  0x65   : > { %562 = vst [vmem:[%s527_s24 + $0xc] sm:$0xf] %v561_v35  ;;  %564 = vst [vmem:[%s527_s24 + $0x10] sm:$0xf] %v563_v36  ;;  %v567_v38 = vld [vmem:[%s4468_s26 + $0x30] sm:$0xf] }
  0x66   : > { %566 = vst [vmem:[%s527_s24 + $0x14] sm:$0xf] %v565_v37  ;;  %v569_v39 = vld [vmem:[%s4468_s26 + $0x38] sm:$0xf]  ;;  %v571_v40 = vld [vmem:[%s4468_s26 + $0x40] sm:$0xf] }
  0x67   : > { %568 = vst [vmem:[%s527_s24 + $0x18] sm:$0xf] %v567_v38  ;;  %570 = vst [vmem:[%s527_s24 + $0x1c] sm:$0xf] %v569_v39  ;;  %v573_v41 = vld [vmem:[%s4468_s26 + $0x48] sm:$0xf] }
  0x68   : > { %572 = vst [vmem:[%s527_s24 + $0x20] sm:$0xf] %v571_v40  ;;  %v575_v42 = vld [vmem:[%s4468_s26 + $0x50] sm:$0xf]  ;;  %v577_v43 = vld [vmem:[%s4468_s26 + $0x58] sm:$0xf] }
  0x69   : > { %574 = vst [vmem:[%s527_s24 + $0x24] sm:$0xf] %v573_v41  ;;  %576 = vst [vmem:[%s527_s24 + $0x28] sm:$0xf] %v575_v42  ;;  %v579_v44 = vld [vmem:[%s4468_s26 + $0x60] sm:$0xf] }
  0x6a   : > { %578 = vst [vmem:[%s527_s24 + $0x2c] sm:$0xf] %v577_v43  ;;  %v581_v45 = vld [vmem:[%s4468_s26 + $0x68] sm:$0xf]  ;;  %v583_v46 = vld [vmem:[%s4468_s26 + $0x70] sm:$0xf] }
  0x6b   : > { %580 = vst [vmem:[%s527_s24 + $0x30] sm:$0xf] %v579_v44  ;;  %582 = vst [vmem:[%s527_s24 + $0x34] sm:$0xf] %v581_v45  ;;  %v585_v47 = vld [vmem:[%s4468_s26 + $0x78] sm:$0xf] }
  0x6c   : > { %584 = vst [vmem:[%s527_s24 + $0x38] sm:$0xf] %v583_v46  ;;  %586 = vst [vmem:[%s527_s24 + $0x3c] sm:$0xf] %v585_v47 }
  0x6d PF: > { %p3480_p1 = scmp.ge.s32.totalorder %s4235_s30, 1  ;;  %p640_p3 = scmp.lt.s32.totalorder %s4235_s30, 17 }
  0x6f   : > { %p641_p4 = pnand %p3480_p1, %p640_p3 }
  0x70   : > { %s647_s7 = sand.u32 (!%p641_p4), 1, %s4195_s20   ;;  %s654_s6 = sand.u32 (!%p641_p4), 1, %s4187_s18  }
  0x71   : > { %644 = sbr.rel (%p641_p4) target bundleno = 1801 (0x709), region = 148  ;;  %s3481_s16 = sshll.u32 (!%p641_p4), %s647_s7, 7 }
  0x72   : > { %s3482_s14 = sshll.u32 (!%p641_p4), %s654_s6, 6  ;;  %s3485_s0 = sshll.u32 (!%p641_p4), %s4207_s23, 4 }
  0x73   : > { %p718_p5 = scmp.lt.s32.totalorder (!%p641_p4), %s4215_s25, 1  ;;  %p720_p6 = scmp.lt.s32.totalorder (!%p641_p4), %s3485_s0, 31 }
  0x74   : > { %s4493_s13 = sshll.u32 (!%p641_p4), %s4203_s22, 7  ;;  %s5954_s12 = sshll.u32 (!%p641_p4), %s4207_s23, 7 }
  0x75   : > { %s4499_s11 = sadd.s32 (!%p641_p4), 127, %s5954_s12  ;;  %s6020_s26 = sld [smem:[#allocation68_spill]] (!%p641_p4) }
  0x76   : > { %p730_p7 = scmp.le.s32.totalorder (!%p641_p4), %s4493_s13, %s4499_s11  ;;  %s4514_s12 = scalar_lea.vmem (!%p641_p4), [#allocation5], %s3481_s16 }
  0x77   : > { %s4518_s28 = scalar_lea.vmem (!%p641_p4), [#allocation7], %s3482_s14  ;;  %s4520_s18 = scalar_lea.vmem (!%p641_p4), [#allocation8], %s3481_s16 }
  0x78   : > { %s719_s15 = scalar_select %p718_p5, %s4215_s25, 1 }
  0x79   : > { %s6234_s0 = smov (!%p720_p6, %s3485_s0), 31  ;;  %p3492_p9 = scmp.ne.s32.totalorder %s4203_s22, 0 }
  0x7a   : > { %s3486_s9 = sshll.u32 %s719_s15, 5  ;;  %s3490_s6 = sshll.u32 %s719_s15, 1  ;;  %vm766_vm0 = vcmask (!%p3492_p9), 7168   ;;  %v4237_v48 = vmov (!%p3492_p9), -1e+30   ;;  %v4238_v49 = vmov (!%p3492_p9), 0.0  }
  0x7b   : > { %s723_s10 = sadd.s32 %s3486_s9, %s6234_s0  ;;  %s6021_s0 = sld [smem:[#allocation69_spill]]  ;;  %767 = vst.msk [vmem:[#allocation2] sm:$0xff] (!%p3492_p9), %vm766_vm0, %v4237_v48  ;;  %768 = vst.msk [vmem:[#allocation2 + $0x8] sm:$0xff] (!%p3492_p9), %vm766_vm0, %v4237_v48 }
  0x7c   : > { %s3487_s20 = sshll.u32 %s723_s10, 3  ;;  %s4516_s10 = scalar_lea.vmem [#allocation6], %s3482_s14  ;;  %769 = vst.msk [vmem:[#allocation2 + $0x10] sm:$0xff] (!%p3492_p9), %vm766_vm0, %v4237_v48  ;;  %770 = vst.msk [vmem:[#allocation2 + $0x18] sm:$0xff] (!%p3492_p9), %vm766_vm0, %v4237_v48 }
  0x7d   : > { %s4506_s24 = scalar_lea.vmem %s6020_s26, %s3487_s20  ;;  %771 = vst.msk [vmem:[#allocation2 + $0x20] sm:$0xff] (!%p3492_p9), %vm766_vm0, %v4237_v48  ;;  %772 = vst.msk [vmem:[#allocation2 + $0x28] sm:$0xff] (!%p3492_p9), %vm766_vm0, %v4237_v48 }
  0x7e   : > { %s731_s7 = scalar_select %p730_p7, %s4203_s22, 0 }
  0x7f   : > { %765 = sbr.rel (%p3492_p9) target bundleno = 172 (0xac), region = 164  ;;  %773 = vst.msk [vmem:[#allocation2 + $0x30] sm:$0xff] (!%p3492_p9), %vm766_vm0, %v4237_v48  ;;  %774 = vst.msk [vmem:[#allocation2 + $0x38] sm:$0xff] (!%p3492_p9), %vm766_vm0, %v4237_v48 }
  0x80   : > { %p734_p8 = scmp.lt.s32.totalorder %s731_s7, 1  ;;  %775 = vst.msk [vmem:[#allocation2 + $0x40] sm:$0xff] (!%p3492_p9), %vm766_vm0, %v4237_v48  ;;  %776 = vst.msk [vmem:[#allocation2 + $0x48] sm:$0xff] (!%p3492_p9), %vm766_vm0, %v4237_v48 }
  0x81   : > { %777 = vst.msk [vmem:[#allocation2 + $0x50] sm:$0xff] (!%p3492_p9), %vm766_vm0, %v4237_v48  ;;  %778 = vst.msk [vmem:[#allocation2 + $0x58] sm:$0xff] (!%p3492_p9), %vm766_vm0, %v4237_v48 }
  0x82   : > { %s6236_s7 = smov (!%p734_p8, %s731_s7), 1  ;;  %779 = vst.msk [vmem:[#allocation2 + $0x60] sm:$0xff] (!%p3492_p9), %vm766_vm0, %v4237_v48  ;;  %780 = vst.msk [vmem:[#allocation2 + $0x68] sm:$0xff] (!%p3492_p9), %vm766_vm0, %v4237_v48 }
  0x83   : > { %s737_s2 = sadd.s32 %s3490_s6, %s6236_s7  ;;  %781 = vst.msk [vmem:[#allocation2 + $0x70] sm:$0xff] (!%p3492_p9), %vm766_vm0, %v4237_v48  ;;  %782 = vst.msk [vmem:[#allocation2 + $0x78] sm:$0xff] (!%p3492_p9), %vm766_vm0, %v4237_v48 }
  0x84   : > { %s3491_s3 = sshll.u32 %s737_s2, 3  ;;  %783 = vst.msk [vmem:[#allocation2 + $0x80] sm:$0xff] (!%p3492_p9), %vm766_vm0, %v4237_v48  ;;  %784 = vst.msk [vmem:[#allocation2 + $0x88] sm:$0xff] (!%p3492_p9), %vm766_vm0, %v4237_v48 }
  0x85   : > { %s4512_s9 = scalar_lea.vmem %s6021_s0, %s3491_s3  ;;  %785 = vst.msk [vmem:[#allocation2 + $0x90] sm:$0xff] (!%p3492_p9), %vm766_vm0, %v4237_v48  ;;  %786 = vst.msk [vmem:[#allocation2 + $0x98] sm:$0xff] (!%p3492_p9), %vm766_vm0, %v4237_v48 }
  0x86   : > { %787 = vst.msk [vmem:[#allocation2 + $0xa0] sm:$0xff] %vm766_vm0, %v4237_v48  ;;  %788 = vst.msk [vmem:[#allocation2 + $0xa8] sm:$0xff] %vm766_vm0, %v4237_v48 }
  0x87   : > { %789 = vst.msk [vmem:[#allocation2 + $0xb0] sm:$0xff] %vm766_vm0, %v4237_v48  ;;  %790 = vst.msk [vmem:[#allocation2 + $0xb8] sm:$0xff] %vm766_vm0, %v4237_v48 }
  0x88   : > { %791 = vst.msk [vmem:[#allocation2 + $0xc0] sm:$0xff] %vm766_vm0, %v4237_v48  ;;  %792 = vst.msk [vmem:[#allocation2 + $0xc8] sm:$0xff] %vm766_vm0, %v4237_v48 }
  0x89   : > { %793 = vst.msk [vmem:[#allocation2 + $0xd0] sm:$0xff] %vm766_vm0, %v4237_v48  ;;  %794 = vst.msk [vmem:[#allocation2 + $0xd8] sm:$0xff] %vm766_vm0, %v4237_v48 }
  0x8a   : > { %795 = vst.msk [vmem:[#allocation2 + $0xe0] sm:$0xff] %vm766_vm0, %v4237_v48  ;;  %796 = vst.msk [vmem:[#allocation2 + $0xe8] sm:$0xff] %vm766_vm0, %v4237_v48 }
  0x8b   : > { %797 = vst.msk [vmem:[#allocation2 + $0xf0] sm:$0xff] %vm766_vm0, %v4237_v48  ;;  %798 = vst.msk [vmem:[#allocation2 + $0xf8] sm:$0xff] %vm766_vm0, %v4237_v48 }
  0x8c   : > { %799 = vst.msk [vmem:[#allocation3] sm:$0xff] %vm766_vm0, %v4238_v49  ;;  %800 = vst.msk [vmem:[#allocation3 + $0x8] sm:$0xff] %vm766_vm0, %v4238_v49 }
  0x8d   : > { %801 = vst.msk [vmem:[#allocation3 + $0x10] sm:$0xff] %vm766_vm0, %v4238_v49  ;;  %802 = vst.msk [vmem:[#allocation3 + $0x18] sm:$0xff] %vm766_vm0, %v4238_v49 }
  0x8e   : > { %803 = vst.msk [vmem:[#allocation3 + $0x20] sm:$0xff] %vm766_vm0, %v4238_v49  ;;  %804 = vst.msk [vmem:[#allocation3 + $0x28] sm:$0xff] %vm766_vm0, %v4238_v49 }
  0x8f   : > { %805 = vst.msk [vmem:[#allocation3 + $0x30] sm:$0xff] %vm766_vm0, %v4238_v49  ;;  %806 = vst.msk [vmem:[#allocation3 + $0x38] sm:$0xff] %vm766_vm0, %v4238_v49 }
  0x90   : > { %807 = vst.msk [vmem:[#allocation3 + $0x40] sm:$0xff] %vm766_vm0, %v4238_v49  ;;  %808 = vst.msk [vmem:[#allocation3 + $0x48] sm:$0xff] %vm766_vm0, %v4238_v49 }
  0x91   : > { %809 = vst.msk [vmem:[#allocation3 + $0x50] sm:$0xff] %vm766_vm0, %v4238_v49  ;;  %810 = vst.msk [vmem:[#allocation3 + $0x58] sm:$0xff] %vm766_vm0, %v4238_v49 }
  0x92   : > { %811 = vst.msk [vmem:[#allocation3 + $0x60] sm:$0xff] %vm766_vm0, %v4238_v49  ;;  %812 = vst.msk [vmem:[#allocation3 + $0x68] sm:$0xff] %vm766_vm0, %v4238_v49 }
  0x93   : > { %813 = vst.msk [vmem:[#allocation3 + $0x70] sm:$0xff] %vm766_vm0, %v4238_v49  ;;  %814 = vst.msk [vmem:[#allocation3 + $0x78] sm:$0xff] %vm766_vm0, %v4238_v49 }
  0x94   : > { %815 = vst.msk [vmem:[#allocation3 + $0x80] sm:$0xff] %vm766_vm0, %v4238_v49  ;;  %816 = vst.msk [vmem:[#allocation3 + $0x88] sm:$0xff] %vm766_vm0, %v4238_v49 }
  0x95   : > { %817 = vst.msk [vmem:[#allocation3 + $0x90] sm:$0xff] %vm766_vm0, %v4238_v49  ;;  %818 = vst.msk [vmem:[#allocation3 + $0x98] sm:$0xff] %vm766_vm0, %v4238_v49 }
  0x96   : > { %819 = vst.msk [vmem:[#allocation3 + $0xa0] sm:$0xff] %vm766_vm0, %v4238_v49  ;;  %820 = vst.msk [vmem:[#allocation3 + $0xa8] sm:$0xff] %vm766_vm0, %v4238_v49 }
  0x97   : > { %821 = vst.msk [vmem:[#allocation3 + $0xb0] sm:$0xff] %vm766_vm0, %v4238_v49  ;;  %822 = vst.msk [vmem:[#allocation3 + $0xb8] sm:$0xff] %vm766_vm0, %v4238_v49 }
  0x98   : > { %823 = vst.msk [vmem:[#allocation3 + $0xc0] sm:$0xff] %vm766_vm0, %v4238_v49  ;;  %824 = vst.msk [vmem:[#allocation3 + $0xc8] sm:$0xff] %vm766_vm0, %v4238_v49 }
  0x99   : > { %825 = vst.msk [vmem:[#allocation3 + $0xd0] sm:$0xff] %vm766_vm0, %v4238_v49  ;;  %826 = vst.msk [vmem:[#allocation3 + $0xd8] sm:$0xff] %vm766_vm0, %v4238_v49 }
  0x9a   : > { %827 = vst.msk [vmem:[#allocation3 + $0xe0] sm:$0xff] %vm766_vm0, %v4238_v49  ;;  %828 = vst.msk [vmem:[#allocation3 + $0xe8] sm:$0xff] %vm766_vm0, %v4238_v49 }
  0x9b   : > { %829 = vst.msk [vmem:[#allocation3 + $0xf0] sm:$0xff] %vm766_vm0, %v4238_v49  ;;  %830 = vst.msk [vmem:[#allocation3 + $0xf8] sm:$0xff] %vm766_vm0, %v4238_v49 }
  0x9c   : > { %831 = vst [vmem:[#allocation4] sm:$0xff] %v4238_v49  ;;  %832 = vst [vmem:[#allocation4 + $0x8] sm:$0xff] %v4238_v49 }
  0x9d   : > { %833 = vst [vmem:[#allocation4 + $0x10] sm:$0xff] %v4238_v49  ;;  %834 = vst [vmem:[#allocation4 + $0x18] sm:$0xff] %v4238_v49 }
  0x9e   : > { %835 = vst [vmem:[#allocation4 + $0x20] sm:$0xff] %v4238_v49  ;;  %836 = vst [vmem:[#allocation4 + $0x28] sm:$0xff] %v4238_v49 }
  0x9f   : > { %837 = vst [vmem:[#allocation4 + $0x30] sm:$0xff] %v4238_v49  ;;  %838 = vst [vmem:[#allocation4 + $0x38] sm:$0xff] %v4238_v49 }
  0xa0   : > { %839 = vst [vmem:[#allocation4 + $0x40] sm:$0xff] %v4238_v49  ;;  %840 = vst [vmem:[#allocation4 + $0x48] sm:$0xff] %v4238_v49 }
  0xa1   : > { %841 = vst [vmem:[#allocation4 + $0x50] sm:$0xff] %v4238_v49  ;;  %842 = vst [vmem:[#allocation4 + $0x58] sm:$0xff] %v4238_v49 }
  0xa2   : > { %843 = vst [vmem:[#allocation4 + $0x60] sm:$0xff] %v4238_v49  ;;  %844 = vst [vmem:[#allocation4 + $0x68] sm:$0xff] %v4238_v49 }
  0xa3   : > { %845 = vst [vmem:[#allocation4 + $0x70] sm:$0xff] %v4238_v49  ;;  %846 = vst [vmem:[#allocation4 + $0x78] sm:$0xff] %v4238_v49 }
  0xa4   : > { %847 = vst [vmem:[#allocation4 + $0x80] sm:$0xff] %v4238_v49  ;;  %848 = vst [vmem:[#allocation4 + $0x88] sm:$0xff] %v4238_v49 }
  0xa5   : > { %849 = vst [vmem:[#allocation4 + $0x90] sm:$0xff] %v4238_v49  ;;  %850 = vst [vmem:[#allocation4 + $0x98] sm:$0xff] %v4238_v49 }
  0xa6   : > { %851 = vst [vmem:[#allocation4 + $0xa0] sm:$0xff] %v4238_v49  ;;  %852 = vst [vmem:[#allocation4 + $0xa8] sm:$0xff] %v4238_v49 }
  0xa7   : > { %853 = vst [vmem:[#allocation4 + $0xb0] sm:$0xff] %v4238_v49  ;;  %854 = vst [vmem:[#allocation4 + $0xb8] sm:$0xff] %v4238_v49 }
  0xa8   : > { %855 = vst [vmem:[#allocation4 + $0xc0] sm:$0xff] %v4238_v49  ;;  %856 = vst [vmem:[#allocation4 + $0xc8] sm:$0xff] %v4238_v49 }
  0xa9   : > { %857 = vst [vmem:[#allocation4 + $0xd0] sm:$0xff] %v4238_v49  ;;  %858 = vst [vmem:[#allocation4 + $0xd8] sm:$0xff] %v4238_v49 }
  0xaa   : > { %859 = vst [vmem:[#allocation4 + $0xe0] sm:$0xff] %v4238_v49  ;;  %860 = vst [vmem:[#allocation4 + $0xe8] sm:$0xff] %v4238_v49 }
  0xab   : > { %861 = vst [vmem:[#allocation4 + $0xf0] sm:$0xff] %v4238_v49  ;;  %862 = vst [vmem:[#allocation4 + $0xf8] sm:$0xff] %v4238_v49 }
  0xac PF: > { %p3495_p10 = scmp.gt.s32.totalorder %s4493_s13, %s4499_s11 }
  0xae   : > { %869 = sbr.rel (%p3495_p10) target bundleno = 1575 (0x627), region = 168 }
  0xb5   : > { %v4654_v50 = vld [vmem:[%s4516_s10] sm:$0xff]   ;;  %v4657_v51 = vld [vmem:[%s4516_s10 + $0x8] sm:$0xff]   ;;  %v4239_v52 = vmov 0   ;;  %v4663_v53 = vld [vmem:[%s4516_s10 + $0x10] sm:$0xff]   ;;  %v902_v20 = vlaneseq  ;;  %s6022_s2 = sshll.u32 %s4207_s23, 7  ;;  %v938_v30 = vstv %s4493_s13 }
  0xb6   : > { %3905 = vset.pattern.permute.xlu0 %v4239_v52  ;;  %3906 = vset.pattern.permute.xlu1 %v4239_v52  ;;  %v3915_v54 = vld [vmem:[%s4514_s12] ss:$8 sps:$4 sm:$0xff]   ;;  %v4669_v55 = vld [vmem:[%s4516_s10 + $0x18] sm:$0xff]   ;;  %v942_v57 = vld [vmem:[%s4506_s24 + $0x10] sm:$0xff]  ;;  %v4725_v29 = vstv %s6022_s2 }
  0xb7   : > { %3669 = vmatprep.subr.bf16.mxu0 %v4654_v50  ;;  %3685 = vmatprep.mubr.bf16.mxu0 %v3915_v54  ;;  %v940_v56 = vld [vmem:[%s4506_s24] sm:$0xff]  ;;  %v941_v58 = vld [vmem:[%s4506_s24 + $0x8] sm:$0xff]  ;;  %v943_v59 = vld [vmem:[%s4506_s24 + $0x18] sm:$0xff]  ;;  %v4717_v23 = vshrl.u32 %v902_v20, 7  ;;  %v937_v27 = vand.u32 127, %v902_v20 }
  0xb8   : > { %3670 = vmatpush3.bf16.xpose.msra.mxu0 %v4654_v50  ;;  %958 = vperm.xlu0 %3905, %v940_v56   ;;  %v944_v60 = vld [vmem:[%s4506_s24 + $0x20] sm:$0xff]  ;;  %v945_v61 = vld [vmem:[%s4506_s24 + $0x28] sm:$0xff]  ;;  %v946_v63 = vld [vmem:[%s4506_s24 + $0x30] sm:$0xff] }
  0xb9   : > { %3671 = vmatprep.subr.bf16.mxu0 %v4657_v51  ;;  %964 = vperm.xlu1 %3906, %v942_v57   ;;  %v4680_v62 = vld [vmem:[%s4516_s10 + $0x20] sm:$0xff]   ;;  %v947_v0 = vld [vmem:[%s4506_s24 + $0x38] sm:$0xff]  ;;  %v949_v2 = vld [vmem:[%s4506_s24 + $0x48] sm:$0xff]  ;;  %v1007_v25 = vsub.s32 0, %v4717_v23  ;;  %v905_v31 = vadd.s32 16, %v4717_v23  ;;  %v920_v33 = vadd.s32 %v4725_v29, %v4717_v23  ;;  %v4733_v34 = vadd.s32 %v938_v30, %v937_v27 }
  0xba   : > { %v948_v1 = vld [vmem:[%s4506_s24 + $0x40] sm:$0xff]  ;;  %v4689_v3 = vld [vmem:[%s4516_s10 + $0x28] sm:$0xff]   ;;  %v950_v4 = vld [vmem:[%s4506_s24 + $0x50] sm:$0xff]  ;;  %v904_v35 = vadd.s32 8, %v4717_v23  ;;  %v906_v40 = vadd.s32 24, %v4717_v23  ;;  %v909_v41 = vadd.s32 48, %v4717_v23 }
  0xbb   : > { %v951_v5 = vld [vmem:[%s4506_s24 + $0x58] sm:$0xff]  ;;  %v952_v6 = vld [vmem:[%s4506_s24 + $0x60] sm:$0xff]  ;;  %v953_v7 = vld [vmem:[%s4506_s24 + $0x68] sm:$0xff]  ;;  %v922_v38 = vadd.s32 %v4725_v29, %v905_v31  ;;  %vm1025_vm2 = vcmp.ge.s32.totalorder %v920_v33, %v4733_v34  ;;  %v907_v49 = vadd.s32 32, %v4717_v23  ;;  %v910_v57 = vadd.s32 56, %v4717_v23 }
  0xbc   : > { %961 = vperm.xlu0 %3905, %v941_v58   ;;  %v4698_v8 = vld [vmem:[%s4516_s10 + $0x30] sm:$0xff]   ;;  %v955_v10 = vld [vmem:[%s4506_s24 + $0x78] sm:$0xff]  ;;  %v3917_v13 = vld [vmem:[%s4514_s12 + $0x20] ss:$8 sps:$4 sm:$0xff]   ;;  %v921_v39 = vadd.s32 %v4725_v29, %v904_v35  ;;  %v923_v46 = vadd.s32 %v4725_v29, %v906_v40  ;;  %v926_v48 = vadd.s32 %v4725_v29, %v909_v41  ;;  %v912_v31 = vadd.s32 72, %v4717_v23 }
  0xbd   : > { %967 = vperm.xlu1 %3906, %v943_v59   ;;  %v954_v9 = vld [vmem:[%s4506_s24 + $0x70] sm:$0xff]  ;;  %v4705_v11 = vld [vmem:[%s4516_s10 + $0x38] sm:$0xff]   ;;  %v3919_v15 = vld [vmem:[%s4514_s12 + $0x40] ss:$8 sps:$4 sm:$0xff]   ;;  %vm1027_vm5 = vcmp.ge.s32.totalorder %v922_v38, %v4733_v34  ;;  %v6037_v35 = vmov 0 }
  0xbe   : > { %v3916_v12 = vld [vmem:[%s4514_s12 + $0x10] ss:$8 sps:$4 sm:$0xff]   ;;  %v3921_v17 = vld [vmem:[%s4514_s12 + $0x60] ss:$8 sps:$4 sm:$0xff]   ;;  %vm1026_vm7 = vcmp.ge.s32.totalorder %v921_v39, %v4733_v34  ;;  %vm1028_vm11 = vcmp.ge.s32.totalorder %v923_v46, %v4733_v34  ;;  %vm1031_vm13 = vcmp.ge.s32.totalorder %v926_v48, %v4733_v34 }
  0xbf   : > { %v3918_v14 = vld [vmem:[%s4514_s12 + $0x30] ss:$8 sps:$4 sm:$0xff]   ;;  %v956_v28 = vld [vmem:[%s4512_s9] sm:$0xff] }
  0xc0   : > { %3672 = vmatpush3.bf16.xpose.msra.mxu0 %v4657_v51  ;;  %970 = vperm.xlu0 %3905, %v944_v60   ;;  %v3920_v16 = vld [vmem:[%s4514_s12 + $0x50] ss:$8 sps:$4 sm:$0xff]   ;;  %v4729_v32 = vrot.slane %v956_v28, %v1007_v25  ;;  %v917_v25 = vadd.s32 112, %v4717_v23 }
  0xc1   : > { %3673 = vmatprep.subr.bf16.mxu0 %v4663_v53  ;;  %973 = vperm.xlu1 %3906, %v945_v61   ;;  %v3922_v18 = vld [vmem:[%s4514_s12 + $0x70] ss:$8 sps:$4 sm:$0xff]   ;;  %v913_v61 = vadd.s32 80, %v4717_v23 }
  0xc4   : > { %976 = vperm.xlu0 %3905, %v946_v63  }
  0xc5   : > { %979 = vperm.xlu1 %3906, %v947_v0   ;;  %v924_v0 = vadd.s32 %v4725_v29, %v907_v49 }
  0xc8   : > { %3674 = vmatpush3.bf16.xpose.msra.mxu0 %v4663_v53  ;;  %982 = vperm.xlu0 %3905, %v948_v1  }
  0xc9   : > { %3675 = vmatprep.subr.bf16.mxu0 %v4669_v55  ;;  %985 = vperm.xlu1 %3906, %v949_v2  }
  0xcc   : > { %988 = vperm.xlu0 %3905, %v950_v4   ;;  %v927_v4 = vadd.s32 %v4725_v29, %v910_v57 }
  0xcd   : > { %991 = vperm.xlu1 %3906, %v951_v5   ;;  %v908_v5 = vadd.s32 40, %v4717_v23 }
  0xd0   : > { %3676 = vmatpush3.bf16.xpose.msra.mxu0 %v4669_v55  ;;  %994 = vperm.xlu0 %3905, %v952_v6  }
  0xd1   : > { %3677 = vmatprep.subr.bf16.mxu0 %v4680_v62  ;;  %997 = vperm.xlu1 %3906, %v953_v7  }
  0xd4   : > { %1000 = vperm.xlu0 %3905, %v954_v9  }
  0xd5   : > { %1003 = vperm.xlu1 %3906, %v955_v10   ;;  %v930_v10 = vadd.s32 %v4725_v29, %v913_v61 }
  0xd8   : > { %3678 = vmatpush3.bf16.xpose.msra.mxu0 %v4680_v62 }
  0xd9   : > { %3679 = vmatprep.subr.bf16.mxu0 %v4689_v3 }
  0xe0   : > { %3680 = vmatpush3.bf16.xpose.msra.mxu0 %v4689_v3 }
  0xe1   : > { %3681 = vmatprep.subr.bf16.mxu0 %v4698_v8 }
  0xe8   : > { %3682 = vmatpush3.bf16.xpose.msra.mxu0 %v4698_v8 }
  0xe9   : > { %3683 = vmatprep.subr.bf16.mxu0 %v4705_v11 }
  0xf0   : > { %3684 = vmatpush3.bf16.xpose.msra.mxu0 %v4705_v11 }
  0xf7   : > { %3686 = vmatmul.mubr.bf16.vlgmr.msra.gmra.mrb[0].mxu0 %v3916_v12  ;;  %v911_v12 = vadd.s32 64, %v4717_v23 }
  0xf8   : > { %3689 = vmatprep.mubr.bf16.mxu0 %v3917_v13 }
  0xff   : > { %3690 = vmatmul.mubr.bf16.gmra.mrb[4].mxu0 %v3918_v14 }
 0x100   : > { %3693 = vmatprep.mubr.bf16.mxu0 %v3919_v15  ;;  %v914_v15 = vadd.s32 88, %v4717_v23 }
 0x102   : > { %v931_v30 = vadd.s32 %v4725_v29, %v914_v15 }
 0x107   : > { %3694 = vmatmul.mubr.bf16.gmra.mrb[8].mxu0 %v3920_v16 }
 0x108   : > { %3697 = vmatprep.mubr.bf16.mxu0 %v3921_v17 }
 0x10f   : > { %3698 = vmatmul.mubr.bf16.gmra.mrb[12].mxu0 %v3922_v18  ;;  %v925_v18 = vadd.s32 %v4725_v29, %v908_v5 }
 0x137   : > { %v959_v19 = vpop.permute.xlu0 %958 }
 0x138   : > { %v965_v21 = vpop.permute.xlu1 %964  ;;  %vm1009_vm1 = vcmp.eq.s32.totalorder %v959_v19, %v4729_v32 }
 0x139   : > { %vm1011_vm3 = vcmp.eq.s32.totalorder %v965_v21, %v4729_v32  ;;  %vm4745_vm4 = vmand %vm1009_vm1, %vm1025_vm2  ;;  %vm1029_vm1 = vcmp.ge.s32.totalorder %v924_v0, %v4733_v34 }
 0x13a   : > { %vm4761_vm8 = vmand %vm1011_vm3, %vm1027_vm5  ;;  %vm1032_vm3 = vcmp.ge.s32.totalorder %v927_v4, %v4733_v34 }
 0x13b   : > { %v962_v22 = vpop.permute.xlu0 %961 }
 0x13c   : > { %v968_v24 = vpop.permute.xlu1 %967  ;;  %vm1010_vm6 = vcmp.eq.s32.totalorder %v962_v22, %v4729_v32 }
 0x13d   : > { %vm4767_vm9 = vmand %vm1010_vm6, %vm1026_vm7  ;;  %vm1012_vm10 = vcmp.eq.s32.totalorder %v968_v24, %v4729_v32  ;;  %v928_v24 = vadd.s32 %v4725_v29, %v911_v12 }
 0x13e   : > { %vm4791_vm14 = vmand %vm1012_vm10, %vm1028_vm11  ;;  %vm1035_vm11 = vcmp.ge.s32.totalorder %v930_v10, %v4733_v34 }
 0x13f   : > { %v4720_v26 = vpop.permute.xlu0 %970 }
 0x140   : > { %v4736_v36 = vpop.permute.xlu1 %973  ;;  %vm1013_vm0 = vcmp.eq.s32.totalorder %v4720_v26, %v4729_v32  ;;  %v6035_v26 = vmov 0 }
 0x141   : > { %vm4823_vm5 = vmand %vm1013_vm0, %vm1029_vm1  ;;  %vm1014_vm6 = vcmp.eq.s32.totalorder %v4736_v36, %v4729_v32  ;;  %vm1033_vm0 = vcmp.ge.s32.totalorder %v928_v24, %v4733_v34  ;;  %v929_v36 = vadd.s32 %v4725_v29, %v912_v31  ;;  %v4970_v31 = vld [vmem:[#allocation2] sm:$0xff] }
 0x143   : > { %v977_v37 = vpop.permute.xlu0 %976 }
 0x144   : > { %v980_v42 = vpop.permute.xlu1 %979  ;;  %vm1015_vm12 = vcmp.eq.s32.totalorder %v977_v37, %v4729_v32  ;;  %v934_v37 = vadd.s32 %v4725_v29, %v917_v25  ;;  %v3924_v25 = vld [vmem:[%s4518_s28 + $0x8] sm:$0xff]  }
 0x145   : > { %vm4795_vm15 = vmand %vm1015_vm12, %vm1031_vm13  ;;  %vm1016_vm2 = vcmp.eq.s32.totalorder %v980_v42, %v4729_v32  ;;  %vm1030_vm12 = vcmp.ge.s32.totalorder %v925_v18, %v4733_v34  ;;  %v915_v42 = vadd.s32 96, %v4717_v23 }
 0x146   : > { %vm4838_vm10 = vmand %vm1016_vm2, %vm1032_vm3 }
 0x147   : > { %v4751_v44 = vpop.permute.xlu0 %982  ;;  %v6036_v26 = vsel %vm4838_vm10, 4294967295, %v6035_v26  ;;  %vm4867_vm2 = vmand %vm1014_vm6, %vm1030_vm12  ;;  %v932_v61 = vadd.s32 %v4725_v29, %v915_v42  ;;  %v4977_v42 = vld [vmem:[#allocation2 + $0x10] sm:$0xff] }
 0x148   : > { %v4779_v63 = vpop.permute.xlu1 %985  ;;  %vm1017_vm1 = vcmp.eq.s32.totalorder %v4751_v44, %v4729_v32  ;;  %v916_v44 = vadd.s32 104, %v4717_v23 }
 0x149   : > { %vm4887_vm6 = vmand %vm1017_vm1, %vm1033_vm0  ;;  %vm1018_vm0 = vcmp.eq.s32.totalorder %v4779_v63, %v4729_v32  ;;  %vm1034_vm1 = vcmp.ge.s32.totalorder %v929_v36, %v4733_v34  ;;  %v3927_v36 = vld [vmem:[%s4518_s28 + $0x20] sm:$0xff]  }
 0x14a   : > { %v933_v15 = vadd.s32 %v4725_v29, %v916_v44  ;;  %v4996_v44 = vld [vmem:[#allocation2 + $0x30] sm:$0xff] }
 0x14b   : > { %v989_v1 = vpop.permute.xlu0 %988  ;;  %6055 = vst [vmem:[#allocation17_spill] sm:$0xff] %v4996_v44 }
 0x14c   : > { %v992_v19 = vpop.permute.xlu1 %991  ;;  %vm1019_vm7 = vcmp.eq.s32.totalorder %v989_v1, %v4729_v32 }
 0x14d   : > { %vm4852_vm13 = vmand %vm1019_vm7, %vm1035_vm11  ;;  %vm1020_vm3 = vcmp.eq.s32.totalorder %v992_v19, %v4729_v32  ;;  %vm1036_vm7 = vcmp.ge.s32.totalorder %v931_v30, %v4733_v34  ;;  %vm1039_vm11 = vcmp.ge.s32.totalorder %v934_v37, %v4733_v34  ;;  %v3926_v30 = vld [vmem:[%s4518_s28 + $0x18] sm:$0xff]   ;;  %v4972_v37 = vld [vmem:[#allocation2 + $0x8] sm:$0xff] }
 0x14e   : > { %v6038_v35 = vsel %vm4852_vm13, 4294967295, %v6037_v35 }
 0x14f   : > { %v4818_v21 = vpop.permute.xlu0 %994 }
 0x150   : > { %v998_v38 = vpop.permute.xlu1 %997 }
 0x153   : > { %v1001_v46 = vpop.permute.xlu0 %1000 }
 0x154   : > { %vm1023_vm12 = vcmp.eq.s32.totalorder %v1001_v46, %v4729_v32  ;;  %v1004_v4 = vpop.permute.xlu1 %1003 }
 0x1ca   : > { %v3687_v45 = vpop.f32.mrb[0].mxu0 }
 0x1cb   : > { %v1203_v47 = vpop.f32.mrb[1].mxu0  ;;  %v4786_v2 = vsel %vm4761_vm8, %v3687_v45, -1e+30  ;;  %v918_v45 = vadd.s32 120, %v4717_v23 }
 0x1cc   : > { %v3688_v52 = vpop.f32.mrb[2].mxu0  ;;  %v4759_v54 = vsel %vm4745_vm4, %v1203_v47, -1e+30 }
 0x1cd   : > { %1298 = vmax.xlane.f32.xlu0 %v4759_v54  ;;  %v1206_v58 = vpop.f32.mrb[3].mxu0  ;;  %v4813_v17 = vsel %vm4791_vm14, %v3688_v52, -1e+30  ;;  %v6041_v52 = vmov 0  ;;  %v935_v1 = vadd.s32 %v4725_v29, %v918_v45  ;;  %v5052_v45 = vld [vmem:[#allocation2 + $0x40] sm:$0xff] }
 0x1ce   : > { %v4774_v60 = vsel %vm4767_vm9, %v1206_v58, -1e+30  ;;  %v6042_v52 = vsel %vm4887_vm6, 4294967295, %v6041_v52  ;;  %v6043_v58 = vmov 0  ;;  %6063 = vst [vmem:[#allocation25_spill] sm:$0xff] %v5052_v45 }
 0x1cf   : > { %1300 = vmax.xlane.f32.xlu1 %v4774_v60 }
 0x1d1   : > { %1302 = vmax.xlane.f32.xlu0 %v4786_v2 }
 0x1d2   : > { %v3691_v7 = vpop.f32.mrb[4].mxu0 }
 0x1d3   : > { %v1219_v13 = vpop.f32.mrb[5].mxu0  ;;  %v4805_v14 = vsel %vm4795_vm15, %v3691_v7, -1e+30  ;;  %v5341_v7 = vld [vmem:[#allocation2 + $0x90] sm:$0xff] }
 0x1d4   : > { %1310 = vmax.xlane.f32.xlu1 %v4805_v14  ;;  %v3692_v16 = vpop.f32.mrb[6].mxu0  ;;  %v4834_v27 = vsel %vm4823_vm5, %v1219_v13, -1e+30 }
 0x1d5   : > { %1304 = vmax.xlane.f32.xlu0 %v4813_v17  ;;  %v1222_v20 = vpop.f32.mrb[7].mxu0  ;;  %v4846_v28 = vsel %vm4838_vm10, %v3692_v16, -1e+30  ;;  %vm1024_vm10 = vcmp.eq.s32.totalorder %v1004_v4, %v4729_v32  ;;  %v3930_v4 = vld [vmem:[%s4518_s28 + $0x38] sm:$0xff]  }
 0x1d6   : > { %v4877_v48 = vsel %vm4867_vm2, %v1222_v20, -1e+30 }
 0x1d8   : > { %1306 = vmax.xlane.f32.xlu1 %v4834_v27 }
 0x1d9   : > { %1312 = vmax.xlane.f32.xlu0 %v4846_v28 }
 0x1da   : > { %v3695_v33 = vpop.f32.mrb[8].mxu0 }
 0x1db   : > { %v1235_v39 = vpop.f32.mrb[9].mxu0  ;;  %v4862_v40 = vsel %vm4852_vm13, %v3695_v33, -1e+30  ;;  %vm4897_vm13 = vmand %vm1020_vm3, %vm1036_vm7  ;;  %vm1021_vm7 = vcmp.eq.s32.totalorder %v4818_v21, %v4729_v32  ;;  %v5346_v21 = vld [vmem:[#allocation2 + $0x88] sm:$0xff] }
 0x1dc   : > { %1318 = vmax.xlane.f32.xlu1 %v4862_v40  ;;  %v3696_v47 = vpop.f32.mrb[10].mxu0  ;;  %v4895_v57 = vsel %vm4887_vm6, %v1235_v39, -1e+30  ;;  %v6044_v58 = vsel %vm4897_vm13, 4294967295, %v6043_v58  ;;  %vm4913_vm3 = vmand %vm1023_vm12, %vm1039_vm11  ;;  %vm1037_vm6 = vcmp.ge.s32.totalorder %v932_v61, %v4733_v34  ;;  %vm1040_vm11 = vcmp.ge.s32.totalorder %v935_v1, %v4733_v34  ;;  %v4998_v1 = vld [vmem:[#allocation2 + $0x18] sm:$0xff] }
 0x1dd   : > { %1308 = vmax.xlane.f32.xlu0 %v4877_v48  ;;  %v1238_v49 = vpop.f32.mrb[11].mxu0  ;;  %v4908_v0 = vsel %vm4897_vm13, %v3696_v47, -1e+30  ;;  %vm4923_vm13 = vmand %vm1018_vm0, %vm1034_vm1  ;;  %vm1022_vm1 = vcmp.eq.s32.totalorder %v998_v38, %v4729_v32  ;;  %v3923_v32 = vld [vmem:[%s4518_s28] sm:$0xff]  }
 0x1de   : > { %v4932_v13 = vsel %vm4923_vm13, %v1238_v49, -1e+30  ;;  %vm4937_vm12 = vmand %vm1021_vm7, %vm1037_vm6  ;;  %vm1038_vm6 = vcmp.ge.s32.totalorder %v933_v15, %v4733_v34  ;;  %3701 = vmatprep.subr.bf16.mxu1 %v3923_v32  ;;  %3765 = vmatprep.subr.bf16.mxu0 %v3923_v32  ;;  %v3925_v34 = vld [vmem:[%s4518_s28 + $0x10] sm:$0xff]   ;;  %v3928_v15 = vld [vmem:[%s4518_s28 + $0x28] sm:$0xff]  }
 0x1df   : > { %vm4945_vm0 = vmand %vm1024_vm10, %vm1040_vm11  ;;  %3702 = vmatpush3.bf16.msra.mxu1 %v3923_v32  ;;  %3766 = vmatpush3.bf16.msra.mxu0 %v3923_v32  ;;  %vm1602_vm10 = vcmask 7168   ;;  %v5012_v32 = vld [vmem:[#allocation2 + $0x20] sm:$0xff] }
 0x1e0   : > { %1314 = vmax.xlane.f32.xlu1 %v4895_v57  ;;  %vm4957_vm7 = vmand %vm1022_vm1, %vm1038_vm6  ;;  %3703 = vmatprep.subr.bf16.mxu1 %v3924_v25 }
 0x1e1   : > { %1320 = vmax.xlane.f32.xlu0 %v4908_v0  ;;  %3767 = vmatprep.subr.bf16.mxu0 %v3924_v25 }
 0x1e2   : > { %v3699_v5 = vpop.f32.mrb[12].mxu0 }
 0x1e3   : > { %v1251_v23 = vpop.f32.mrb[13].mxu0  ;;  %v4921_v63 = vsel %vm4913_vm3, %v3699_v5, -1e+30  ;;  %3704 = vmatpush3.bf16.msra.mxu1 %v3924_v25  ;;  %3768 = vmatpush3.bf16.msra.mxu0 %v3924_v25 }
 0x1e4   : > { %1326 = vmax.xlane.f32.xlu1 %v4921_v63  ;;  %v3700_v12 = vpop.f32.mrb[14].mxu0  ;;  %v4943_v19 = vsel %vm4937_vm12, %v1251_v23, -1e+30  ;;  %3705 = vmatprep.subr.bf16.mxu1 %v3925_v34 }
 0x1e5   : > { %1316 = vmax.xlane.f32.xlu0 %v4932_v13  ;;  %v1254_v16 = vpop.f32.mrb[15].mxu0  ;;  %v4953_v29 = vsel %vm4945_vm0, %v3700_v12, -1e+30  ;;  %3769 = vmatprep.subr.bf16.mxu0 %v3925_v34 }
 0x1e6   : > { %v4963_v24 = vsel %vm4957_vm7, %v1254_v16, -1e+30 }
 0x1e7   : > { %3706 = vmatpush3.bf16.msra.mxu1 %v3925_v34  ;;  %3770 = vmatpush3.bf16.msra.mxu0 %v3925_v34  ;;  %v5018_v34 = vld [vmem:[#allocation2 + $0x38] sm:$0xff] }
 0x1e8   : > { %1322 = vmax.xlane.f32.xlu1 %v4943_v19  ;;  %3707 = vmatprep.subr.bf16.mxu1 %v3926_v30  ;;  %6057 = vst [vmem:[#allocation19_spill] sm:$0xff] %v5018_v34 }
 0x1e9   : > { %1328 = vmax.xlane.f32.xlu0 %v4953_v29  ;;  %3771 = vmatprep.subr.bf16.mxu0 %v3926_v30 }
 0x1eb   : > { %3708 = vmatpush3.bf16.msra.mxu1 %v3926_v30  ;;  %3772 = vmatpush3.bf16.msra.mxu0 %v3926_v30  ;;  %v5039_v30 = vld [vmem:[#allocation2 + $0x28] sm:$0xff] }
 0x1ec   : > { %3709 = vmatprep.subr.bf16.mxu1 %v3927_v36  ;;  %3773 = vmatprep.subr.bf16.mxu0 %v3927_v36  ;;  %6060 = vst [vmem:[#allocation22_spill] sm:$0xff] %v5039_v30 }
 0x1ed   : > { %1324 = vmax.xlane.f32.xlu0 %v4963_v24 }
 0x1ef   : > { %3710 = vmatpush3.bf16.msra.mxu1 %v3927_v36  ;;  %3774 = vmatpush3.bf16.msra.mxu0 %v3927_v36  ;;  %v3929_v36 = vld [vmem:[%s4518_s28 + $0x30] sm:$0xff]  }
 0x1f0   : > { %3711 = vmatprep.subr.bf16.mxu1 %v3928_v15  ;;  %3775 = vmatprep.subr.bf16.mxu0 %v3928_v15 }
 0x1f3   : > { %3712 = vmatpush3.bf16.msra.mxu1 %v3928_v15  ;;  %3776 = vmatpush3.bf16.msra.mxu0 %v3928_v15 }
 0x1f4   : > { %3713 = vmatprep.subr.bf16.mxu1 %v3929_v36  ;;  %3777 = vmatprep.subr.bf16.mxu0 %v3929_v36 }
 0x1f7   : > { %3714 = vmatpush3.bf16.msra.mxu1 %v3929_v36  ;;  %3778 = vmatpush3.bf16.msra.mxu0 %v3929_v36 }
 0x1f8   : > { %3715 = vmatprep.subr.bf16.mxu1 %v3930_v4  ;;  %3779 = vmatprep.subr.bf16.mxu0 %v3930_v4 }
 0x1fb   : > { %3716 = vmatpush3.bf16.msra.mxu1 %v3930_v4  ;;  %3780 = vmatpush3.bf16.msra.mxu0 %v3930_v4 }
 0x1fc   : > { %3733 = vmatprep.subr.bf16.mxu1 %v4654_v50 }
 0x25a   : > { %v1299_v33 = vpop.xlane.xlu0 %1298 }
 0x25b   : > { %v4975_v38 = vmax.f32 %v4970_v31, %v1299_v33 }
 0x25c   : > { %v1301_v39 = vpop.xlane.xlu1 %1300 }
 0x25d   : > { %1916 = vst.msk [vmem:[#allocation2] sm:$0xff] %vm1602_vm10, %v4975_v38  ;;  %v4984_v46 = vmax.f32 %v4972_v37, %v1301_v39  ;;  %1396 = vperm.xlu1 %3906, %v4975_v38  }
 0x25e   : > { %v1303_v47 = vpop.xlane.xlu0 %1302 }
 0x25f   : > { %1917 = vst.msk [vmem:[#allocation2 + $0x8] sm:$0xff] %vm1602_vm10, %v4984_v46  ;;  %v4993_v61 = vmax.f32 %v4977_v42, %v1303_v47  ;;  %1401 = vperm.xlu0 %3905, %v4984_v46  }
 0x261   : > { %1918 = vst.msk [vmem:[#allocation2 + $0x10] sm:$0xff] %vm1602_vm10, %v4993_v61  ;;  %v1311_v5 = vpop.xlane.xlu1 %1310  ;;  %1406 = vperm.xlu1 %3906, %v4993_v61  }
 0x262   : > { %v5006_v23 = vmax.f32 %v4996_v44, %v1311_v5  ;;  %v1305_v12 = vpop.xlane.xlu0 %1304 }
 0x263   : > { %v5010_v16 = vmax.f32 %v4998_v1, %v1305_v12  ;;  %v5032_v12 = vld [vmem:[#allocation2 + $0x50] sm:$0xff] }
 0x264   : > { %6056 = vst [vmem:[#allocation18_spill] sm:$0xff] %v5006_v23  ;;  %1922 = vst.msk [vmem:[#allocation2 + $0x30] sm:$0xff] %vm1602_vm10, %v5006_v23 }
 0x265   : > { %1919 = vst.msk [vmem:[#allocation2 + $0x18] sm:$0xff] %vm1602_vm10, %v5010_v16  ;;  %v1307_v33 = vpop.xlane.xlu1 %1306  ;;  %1411 = vperm.xlu1 %3906, %v5010_v16   ;;  %6059 = vst [vmem:[#allocation21_spill] sm:$0xff] %v5032_v12 }
 0x266   : > { %v5026_v39 = vmax.f32 %v5012_v32, %v1307_v33  ;;  %v1313_v47 = vpop.xlane.xlu0 %1312 }
 0x267   : > { %v5030_v5 = vmax.f32 %v5018_v34, %v1313_v47  ;;  %v5059_v34 = vld [vmem:[#allocation2 + $0x58] sm:$0xff] }
 0x268   : > { %1920 = vst.msk [vmem:[#allocation2 + $0x20] sm:$0xff] %vm1602_vm10, %v5026_v39  ;;  %1416 = vperm.xlu0 %3905, %v5026_v39   ;;  %6064 = vst [vmem:[#allocation26_spill] sm:$0xff] %v5059_v34 }
 0x269   : > { %6058 = vst [vmem:[#allocation20_spill] sm:$0xff] %v5030_v5  ;;  %1923 = vst.msk [vmem:[#allocation2 + $0x38] sm:$0xff] %vm1602_vm10, %v5030_v5  ;;  %v1319_v15 = vpop.xlane.xlu1 %1318 }
 0x26a   : > { %v5046_v47 = vmax.f32 %v5032_v12, %v1319_v15  ;;  %v1309_v25 = vpop.xlane.xlu0 %1308 }
 0x26b   : > { %v5050_v49 = vmax.f32 %v5039_v30, %v1309_v25  ;;  %v5093_v30 = vld [vmem:[#allocation2 + $0x60] sm:$0xff] }
 0x26c   : > { %6061 = vst [vmem:[#allocation23_spill] sm:$0xff] %v5046_v47  ;;  %1926 = vst.msk [vmem:[#allocation2 + $0x50] sm:$0xff] %vm1602_vm10, %v5046_v47  ;;  %1426 = vperm.xlu0 %3905, %v5006_v23   ;;  %v5073_v23 = vld [vmem:[#allocation2 + $0x70] sm:$0xff] }
 0x26d   : > { %6062 = vst [vmem:[#allocation24_spill] sm:$0xff] %v5050_v49  ;;  %1921 = vst.msk [vmem:[#allocation2 + $0x28] sm:$0xff] %vm1602_vm10, %v5050_v49  ;;  %v1315_v25 = vpop.xlane.xlu1 %1314  ;;  %1421 = vperm.xlu1 %3906, %v5050_v49   ;;  %v5100_v49 = vld [vmem:[#allocation2 + $0x78] sm:$0xff] }
 0x26e   : > { %v5067_v36 = vmax.f32 %v5052_v45, %v1315_v25  ;;  %v1321_v33 = vpop.xlane.xlu0 %1320  ;;  %6067 = vst [vmem:[#allocation29_spill] sm:$0xff] %v5073_v23  ;;  %v5080_v25 = vld [vmem:[#allocation2 + $0x48] sm:$0xff]  ;;  %6071 = vst [vmem:[#allocation33_spill] sm:$0xff] %v5093_v30 }
 0x26f   : > { %v5071_v12 = vmax.f32 %v5059_v34, %v1321_v33  ;;  %6068 = vst [vmem:[#allocation30_spill] sm:$0xff] %v5080_v25  ;;  %6072 = vst [vmem:[#allocation34_spill] sm:$0xff] %v5100_v49 }
 0x270   : > { %6065 = vst [vmem:[#allocation27_spill] sm:$0xff] %v5067_v36  ;;  %1924 = vst.msk [vmem:[#allocation2 + $0x40] sm:$0xff] %vm1602_vm10, %v5067_v36  ;;  %1436 = vperm.xlu0 %3905, %v5067_v36  }
 0x271   : > { %6066 = vst [vmem:[#allocation28_spill] sm:$0xff] %v5071_v12  ;;  %1927 = vst.msk [vmem:[#allocation2 + $0x58] sm:$0xff] %vm1602_vm10, %v5071_v12  ;;  %v1327_v33 = vpop.xlane.xlu1 %1326  ;;  %1431 = vperm.xlu1 %3906, %v5030_v5  }
 0x272   : > { %v5088_v4 = vmax.f32 %v5073_v23, %v1327_v33  ;;  %v1317_v15 = vpop.xlane.xlu0 %1316  ;;  %v5118_v33 = vld [vmem:[#allocation2 + $0x68] sm:$0xff] }
 0x273   : > { %v5091_v45 = vmax.f32 %v5080_v25, %v1317_v15  ;;  %6075 = vst [vmem:[#allocation37_spill] sm:$0xff] %v5118_v33 }
 0x274   : > { %6069 = vst [vmem:[#allocation31_spill] sm:$0xff] %v5088_v4  ;;  %1930 = vst.msk [vmem:[#allocation2 + $0x70] sm:$0xff] %vm1602_vm10, %v5088_v4  ;;  %1446 = vperm.xlu0 %3905, %v5046_v47  }
 0x275   : > { %6070 = vst [vmem:[#allocation32_spill] sm:$0xff] %v5091_v45  ;;  %1925 = vst.msk [vmem:[#allocation2 + $0x48] sm:$0xff] %vm1602_vm10, %v5091_v45  ;;  %1441 = vperm.xlu1 %3906, %v5091_v45   ;;  %v1323_v15 = vpop.xlane.xlu1 %1322 }
 0x276   : > { %v5108_v34 = vmax.f32 %v5093_v30, %v1323_v15  ;;  %v1329_v36 = vpop.xlane.xlu0 %1328 }
 0x277   : > { %v5111_v23 = vmax.f32 %v5100_v49, %v1329_v36 }
 0x278   : > { %6073 = vst [vmem:[#allocation35_spill] sm:$0xff] %v5108_v34  ;;  %1928 = vst.msk [vmem:[#allocation2 + $0x60] sm:$0xff] %vm1602_vm10, %v5108_v34  ;;  %1456 = vperm.xlu0 %3905, %v5108_v34  }
 0x279   : > { %6074 = vst [vmem:[#allocation36_spill] sm:$0xff] %v5111_v23  ;;  %1931 = vst.msk [vmem:[#allocation2 + $0x78] sm:$0xff] %vm1602_vm10, %v5111_v23  ;;  %1451 = vperm.xlu1 %3906, %v5071_v12  }
 0x27a   : > { %v1325_v36 = vpop.xlane.xlu0 %1324 }
 0x27b   : > { %v5126_v15 = vmax.f32 %v5118_v33, %v1325_v36 }
 0x27c   : > { %1466 = vperm.xlu0 %3905, %v5088_v4  }
 0x27d   : > { %6076 = vst [vmem:[#allocation38_spill] sm:$0xff] %v5126_v15  ;;  %1929 = vst.msk [vmem:[#allocation2 + $0x68] sm:$0xff] %vm1602_vm10, %v5126_v15  ;;  %1461 = vperm.xlu1 %3906, %v5126_v15  }
 0x281   : > { %1471 = vperm.xlu1 %3906, %v5111_v23  }
 0x2dc   : > { %v1397_v45 = vpop.permute.xlu1 %1396 }
 0x2dd   : > { %v1474_v49 = vsub.f32 %v4759_v54, %v1397_v45 }
 0x2de   : > { %v1402_v34 = vpop.permute.xlu0 %1401 }
 0x2df   : > { %v1490_v30 = vmul.f32 1.442695, %v1474_v49  ;;  %v1475_v36 = vsub.f32 %v4774_v60, %v1402_v34 }
 0x2e0   : > { %v1407_v12 = vpop.permute.xlu1 %1406 }
 0x2e1   : > { %v1492_v25 = vmul.f32 1.442695, %v1475_v36  ;;  %v1476_v4 = vsub.f32 %v4786_v2, %v1407_v12  ;;  %3939 = vpow2.f32 %v1490_v30 }
 0x2e3   : > { %3941 = vpow2.f32 %v1492_v25  ;;  %v1494_v47 = vmul.f32 1.442695, %v1476_v4 }
 0x2e4   : > { %v1412_v33 = vpop.permute.xlu1 %1411 }
 0x2e5   : > { %v1477_v5 = vsub.f32 %v4813_v17, %v1412_v33  ;;  %3943 = vpow2.f32 %v1494_v47 }
 0x2e7   : > { %v1496_v15 = vmul.f32 1.442695, %v1477_v5  ;;  %v1417_v44 = vpop.permute.xlu0 %1416 }
 0x2e8   : > { %v1478_v23 = vsub.f32 %v4834_v27, %v1417_v44 }
 0x2e9   : > { %3945 = vpow2.f32 %v1496_v15 }
 0x2ea   : > { %v1498_v60 = vmul.f32 1.442695, %v1478_v23 }
 0x2eb   : > { %v1427_v54 = vpop.permute.xlu0 %1426  ;;  %v5140_v45 = vpop.eup %3939 }
 0x2ec   : > { %v1480_v49 = vsub.f32 %v4805_v14, %v1427_v54  ;;  %v1422_v34 = vpop.permute.xlu1 %1421  ;;  %3947 = vpow2.f32 %v1498_v60 }
 0x2ed   : > { %v5143_v2 = vpop.eup %3941  ;;  %v1479_v30 = vsub.f32 %v4877_v48, %v1422_v34 }
 0x2ee   : > { %v1731_v17 = vpack.c.bf16 %v5143_v2, %v5140_v45  ;;  %v1502_v47 = vmul.f32 1.442695, %v1480_v49 }
 0x2ef   : > { %v1500_v5 = vmul.f32 1.442695, %v1479_v30  ;;  %v1437_v12 = vpop.permute.xlu0 %1436  ;;  %v5150_v14 = vpop.eup %3943 }
 0x2f0   : > { %v1482_v27 = vsub.f32 %v4895_v57, %v1437_v12  ;;  %v1432_v44 = vpop.permute.xlu1 %1431  ;;  %3717 = vmatprep.mubr.bf16.mxu1 %v1731_v17 }
 0x2f1   : > { %3949 = vpow2.f32 %v1500_v5  ;;  %v1481_v23 = vsub.f32 %v4846_v28, %v1432_v44 }
 0x2f2   : > { %3951 = vpow2.f32 %v1502_v47  ;;  %v1506_v33 = vmul.f32 1.442695, %v1482_v27 }
 0x2f3   : > { %v5152_v25 = vpop.eup %3945  ;;  %v1504_v4 = vmul.f32 1.442695, %v1481_v23  ;;  %v1447_v48 = vpop.permute.xlu0 %1446 }
 0x2f4   : > { %v1484_v15 = vsub.f32 %v4862_v40, %v1447_v48  ;;  %v1442_v36 = vpop.permute.xlu1 %1441  ;;  %v1732_v54 = vpack.c.bf16 %v5152_v25, %v5150_v14 }
 0x2f5   : > { %3953 = vpow2.f32 %v1504_v4  ;;  %v1483_v57 = vsub.f32 %v4932_v13, %v1442_v36 }
 0x2f6   : > { %3718 = vmatmul.mubr.bf16.vlgmr.msra.gmra.mrb[0].mxu1 %v1732_v54  ;;  %3955 = vpow2.f32 %v1506_v33  ;;  %v1510_v49 = vmul.f32 1.442695, %v1484_v15  ;;  %v5162_v17 = vpop.eup %3947 }
 0x2f7   : > { %v1508_v60 = vmul.f32 1.442695, %v1483_v57  ;;  %3734 = vmatpush3.bf16.xpose.msra.mxu1 %v4654_v50  ;;  %v1457_v28 = vpop.permute.xlu0 %1456 }
 0x2f8   : > { %v1486_v34 = vsub.f32 %v4943_v19, %v1457_v28  ;;  %v1452_v30 = vpop.permute.xlu1 %1451  ;;  %3735 = vmatprep.subr.bf16.mxu1 %v4657_v51 }
 0x2f9   : > { %3957 = vpow2.f32 %v1508_v60  ;;  %v1485_v40 = vsub.f32 %v4908_v0, %v1452_v30 }
 0x2fa   : > { %3959 = vpow2.f32 %v1510_v49  ;;  %v1514_v47 = vmul.f32 1.442695, %v1486_v34 }
 0x2fb   : > { %v5164_v5 = vpop.eup %3949  ;;  %v1512_v13 = vmul.f32 1.442695, %v1485_v40  ;;  %v1467_v12 = vpop.permute.xlu0 %1466 }
 0x2fc   : > { %v1488_v50 = vsub.f32 %v4921_v63, %v1467_v12  ;;  %v1462_v27 = vpop.permute.xlu1 %1461  ;;  %v1733_v19 = vpack.c.bf16 %v5164_v5, %v5162_v17  ;;  %v5170_v23 = vpop.eup %3951  ;;  %v3933_v12 = vld [vmem:[%s4514_s12 + $0x24] ss:$8 sps:$4 sm:$0xff]  }
 0x2fd   : > { %3961 = vpow2.f32 %v1512_v13  ;;  %v1487_v44 = vsub.f32 %v4963_v24, %v1462_v27  ;;  %v3937_v27 = vld [vmem:[%s4514_s12 + $0x64] ss:$8 sps:$4 sm:$0xff]  }
 0x2fe   : > { %3721 = vmatprep.mubr.bf16.mxu1 %v1733_v19  ;;  %3963 = vpow2.f32 %v1514_v47  ;;  %v1518_v48 = vmul.f32 1.442695, %v1488_v50  ;;  %v3934_v47 = vld [vmem:[%s4514_s12 + $0x34] ss:$8 sps:$4 sm:$0xff]  }
 0x2ff   : > { %v5172_v0 = vpop.eup %3953  ;;  %v1516_v4 = vmul.f32 1.442695, %v1487_v44  ;;  %3736 = vmatpush3.bf16.xpose.msra.mxu1 %v4657_v51  ;;  %v3936_v50 = vld [vmem:[%s4514_s12 + $0x54] ss:$8 sps:$4 sm:$0xff]  }
 0x300   : > { %v1472_v33 = vpop.permute.xlu1 %1471  ;;  %v1734_v63 = vpack.c.bf16 %v5172_v0, %v5170_v23  ;;  %3737 = vmatprep.subr.bf16.mxu1 %v4663_v53  ;;  %v5179_v24 = vpop.eup %3955 }
 0x301   : > { %3965 = vpow2.f32 %v1516_v4  ;;  %v1489_v15 = vsub.f32 %v4953_v29, %v1472_v33 }
 0x302   : > { %3722 = vmatmul.mubr.bf16.gmra.mrb[4].mxu1 %v1734_v63  ;;  %3967 = vpow2.f32 %v1518_v48 }
 0x303   : > { %v5181_v36 = vpop.eup %3957  ;;  %v1520_v54 = vmul.f32 1.442695, %v1489_v15 }
 0x304   : > { %v1735_v51 = vpack.c.bf16 %v5181_v36, %v5179_v24  ;;  %v5185_v57 = vpop.eup %3959 }
 0x305   : > { %3969 = vpow2.f32 %v1520_v54 }
 0x306   : > { %3725 = vmatprep.mubr.bf16.mxu1 %v1735_v51 }
 0x307   : > { %v5187_v60 = vpop.eup %3961  ;;  %3738 = vmatpush3.bf16.xpose.msra.mxu1 %v4663_v53  ;;  %v3931_v53 = vld [vmem:[%s4514_s12 + $0x4] ss:$8 sps:$4 sm:$0xff]  }
 0x308   : > { %v1736_v29 = vpack.c.bf16 %v5187_v60, %v5185_v57  ;;  %3739 = vmatprep.subr.bf16.mxu1 %v4669_v55  ;;  %v5193_v28 = vpop.eup %3963 }
 0x30a   : > { %3726 = vmatmul.mubr.bf16.gmra.mrb[8].mxu1 %v1736_v29 }
 0x30b   : > { %v5195_v49 = vpop.eup %3965 }
 0x30c   : > { %v1737_v34 = vpack.c.bf16 %v5195_v49, %v5193_v28  ;;  %v5199_v30 = vpop.eup %3967 }
 0x30e   : > { %3729 = vmatprep.mubr.bf16.mxu1 %v1737_v34 }
 0x30f   : > { %v5201_v40 = vpop.eup %3969  ;;  %3740 = vmatpush3.bf16.xpose.msra.mxu1 %v4669_v55  ;;  %v3932_v55 = vld [vmem:[%s4514_s12 + $0x14] ss:$8 sps:$4 sm:$0xff]  }
 0x310   : > { %v1738_v13 = vpack.c.bf16 %v5201_v40, %v5199_v30  ;;  %3741 = vmatprep.subr.bf16.mxu1 %v4680_v62 }
 0x312   : > { %3730 = vmatmul.mubr.bf16.gmra.mrb[12].mxu1 %v1738_v13 }
 0x313   : > { %3749 = vmatprep.mubr.bf16.mxu1 %v3931_v53 }
 0x317   : > { %3742 = vmatpush3.bf16.xpose.msra.mxu1 %v4680_v62  ;;  %v3935_v62 = vld [vmem:[%s4514_s12 + $0x44] ss:$8 sps:$4 sm:$0xff]  }
 0x318   : > { %3743 = vmatprep.subr.bf16.mxu1 %v4689_v3 }
 0x31f   : > { %3744 = vmatpush3.bf16.xpose.msra.mxu1 %v4689_v3  ;;  %v3938_v3 = vld [vmem:[%s4514_s12 + $0x74] ss:$8 sps:$4 sm:$0xff]  }
 0x320   : > { %3745 = vmatprep.subr.bf16.mxu1 %v4698_v8 }
 0x327   : > { %3746 = vmatpush3.bf16.xpose.msra.mxu1 %v4698_v8 }
 0x328   : > { %3747 = vmatprep.subr.bf16.mxu1 %v4705_v11 }
 0x32f   : > { %3748 = vmatpush3.bf16.xpose.msra.mxu1 %v4705_v11 }
 0x336   : > { %3750 = vmatmul.mubr.bf16.vlgmr.msra.gmra.mrb[16].mxu1 %v3932_v55 }
 0x337   : > { %3753 = vmatprep.mubr.bf16.mxu1 %v3933_v12 }
 0x33e   : > { %3754 = vmatmul.mubr.bf16.gmra.mrb[20].mxu1 %v3934_v47 }
 0x33f   : > { %3757 = vmatprep.mubr.bf16.mxu1 %v3935_v62 }
 0x346   : > { %3758 = vmatmul.mubr.bf16.gmra.mrb[24].mxu1 %v3936_v50 }
 0x347   : > { %3761 = vmatprep.mubr.bf16.mxu1 %v3937_v27 }
 0x34e   : > { %3762 = vmatmul.mubr.bf16.gmra.mrb[28].mxu1 %v3938_v3 }
 0x3c9   : > { %v5222_v19 = vpop.f32.mrb[0].mxu1 }
 0x3ca   : > { %6077 = vst [vmem:[#allocation39_spill] sm:$0xff] %v5222_v19  ;;  %v5224_v8 = vpop.f32.mrb[1].mxu1 }
 0x3cb   : > { %6078 = vst [vmem:[#allocation40_spill] sm:$0xff] %v5224_v8  ;;  %v5226_v44 = vpop.f32.mrb[2].mxu1  ;;  %v5481_v8 = vld [vmem:[#allocation2 + $0xe0] sm:$0xff] }
 0x3cc   : > { %6079 = vst [vmem:[#allocation41_spill] sm:$0xff] %v5226_v44  ;;  %v5228_v11 = vpop.f32.mrb[3].mxu1  ;;  %v5431_v44 = vld [vmem:[#allocation2 + $0xc8] sm:$0xff] }
 0x3cd   : > { %6080 = vst [vmem:[#allocation42_spill] sm:$0xff] %v5228_v11 }
 0x3d5   : > { %v5230_v4 = vpop.f32.mrb[4].mxu1 }
 0x3d6   : > { %6081 = vst [vmem:[#allocation43_spill] sm:$0xff] %v5230_v4  ;;  %v5232_v48 = vpop.f32.mrb[5].mxu1  ;;  %v5429_v4 = vld [vmem:[#allocation2 + $0xc0] sm:$0xff] }
 0x3d7   : > { %6082 = vst [vmem:[#allocation44_spill] sm:$0xff] %v5232_v48  ;;  %v5234_v33 = vpop.f32.mrb[6].mxu1  ;;  %v5455_v48 = vld [vmem:[#allocation2 + $0xd8] sm:$0xff] }
 0x3d8   : > { %6083 = vst [vmem:[#allocation45_spill] sm:$0xff] %v5234_v33  ;;  %v5236_v63 = vpop.f32.mrb[7].mxu1 }
 0x3d9   : > { %6084 = vst [vmem:[#allocation46_spill] sm:$0xff] %v5236_v63 }
 0x3dd   : > { %v5238_v15 = vpop.f32.mrb[8].mxu1 }
 0x3de   : > { %6085 = vst [vmem:[#allocation47_spill] sm:$0xff] %v5238_v15  ;;  %v5240_v54 = vpop.f32.mrb[9].mxu1  ;;  %v5403_v15 = vld [vmem:[#allocation2 + $0xb8] sm:$0xff] }
 0x3df   : > { %6086 = vst [vmem:[#allocation48_spill] sm:$0xff] %v5240_v54  ;;  %v5242_v51 = vpop.f32.mrb[10].mxu1 }
 0x3e0   : > { %6087 = vst [vmem:[#allocation49_spill] sm:$0xff] %v5242_v51  ;;  %v5244_v29 = vpop.f32.mrb[11].mxu1 }
 0x3e1   : > { %6088 = vst [vmem:[#allocation50_spill] sm:$0xff] %v5244_v29 }
 0x3e5   : > { %v5246_v34 = vpop.f32.mrb[12].mxu1 }
 0x3e6   : > { %6089 = vst [vmem:[#allocation51_spill] sm:$0xff] %v5246_v34  ;;  %v5248_v53 = vpop.f32.mrb[13].mxu1 }
 0x3e7   : > { %6090 = vst [vmem:[#allocation52_spill] sm:$0xff] %v5248_v53  ;;  %v5250_v13 = vpop.f32.mrb[14].mxu1 }
 0x3e8   : > { %6091 = vst [vmem:[#allocation53_spill] sm:$0xff] %v5250_v13  ;;  %v5252_v55 = vpop.f32.mrb[15].mxu1 }
 0x3e9   : > { %6092 = vst [vmem:[#allocation54_spill] sm:$0xff] %v5252_v55 }
 0x409   : > { %v3751_v12 = vpop.f32.mrb[16].mxu1 }
 0x40a   : > { %v2030_v47 = vpop.f32.mrb[17].mxu1  ;;  %v5256_v62 = vsel %vm4761_vm8, %v3751_v12, -1e+30  ;;  %vm6096_vm8 = vnez %v6038_v35 }
 0x40b   : > { %2130 = vmax.xlane.f32.xlu0 %v5256_v62  ;;  %v3752_v50 = vpop.f32.mrb[18].mxu1  ;;  %v5266_v13 = vsel %vm4745_vm4, %v2030_v47, -1e+30  ;;  %vm6094_vm4 = vnez %v6036_v26 }
 0x40c   : > { %v2033_v27 = vpop.f32.mrb[19].mxu1  ;;  %v5271_v12 = vsel %vm4791_vm14, %v3752_v50, -1e+30  ;;  %vm6101_vm14 = vnez %v6044_v58 }
 0x40d   : > { %v5261_v3 = vsel %vm4767_vm9, %v2033_v27, -1e+30  ;;  %vm6099_vm9 = vnez %v6042_v52 }
 0x40e   : > { %2128 = vmax.xlane.f32.xlu1 %v5261_v3 }
 0x40f   : > { %2126 = vmax.xlane.f32.xlu0 %v5266_v13 }
 0x411   : > { %v3755_v55 = vpop.f32.mrb[20].mxu1 }
 0x412   : > { %v2046_v56 = vpop.f32.mrb[21].mxu1  ;;  %v5275_v34 = vsel %vm4795_vm15, %v3755_v55, -1e+30 }
 0x413   : > { %6093 = vst [vmem:[#allocation55_spill] sm:$0xff] %v5275_v34  ;;  %2132 = vmax.xlane.f32.xlu0 %v5271_v12  ;;  %2138 = vmax.xlane.f32.xlu1 %v5275_v34  ;;  %v3756_v59 = vpop.f32.mrb[22].mxu1  ;;  %v5285_v27 = vsel %vm4823_vm5, %v2046_v56, -1e+30 }
 0x414   : > { %v2049_v43 = vpop.f32.mrb[23].mxu1  ;;  %v5291_v55 = vsel %vm6094_vm4, %v3756_v59, -1e+30 }
 0x415   : > { %v5281_v47 = vsel %vm4867_vm2, %v2049_v43, -1e+30  ;;  %6095 = vst [vmem:[#allocation56_spill] sm:$0xff] %v5291_v55 }
 0x417   : > { %2134 = vmax.xlane.f32.xlu1 %v5285_v27  ;;  %2136 = vmax.xlane.f32.xlu0 %v5281_v47 }
 0x419   : > { %v3759_v6 = vpop.f32.mrb[24].mxu1 }
 0x41a   : > { %v2062_v9 = vpop.f32.mrb[25].mxu1  ;;  %v5295_v50 = vsel %vm6096_vm8, %v3759_v6, -1e+30 }
 0x41b   : > { %6097 = vst [vmem:[#allocation57_spill] sm:$0xff] %v5295_v50  ;;  %2140 = vmax.xlane.f32.xlu0 %v5291_v55  ;;  %2146 = vmax.xlane.f32.xlu1 %v5295_v50  ;;  %v3760_v22 = vpop.f32.mrb[26].mxu1  ;;  %v5305_v43 = vsel %vm6099_vm9, %v2062_v9, -1e+30  ;;  %v1526_v50 = vld [vmem:[#allocation3 + $0x20] sm:$0xff]  ;;  %v1527_v55 = vld [vmem:[#allocation3 + $0x28] sm:$0xff] }
 0x41c   : > { %v2065_v41 = vpop.f32.mrb[27].mxu1  ;;  %6100 = vst [vmem:[#allocation59_spill] sm:$0xff] %v5305_v43  ;;  %v5311_v59 = vsel %vm6101_vm14, %v3760_v22, -1e+30  ;;  %v5365_v22 = vld [vmem:[#allocation2 + $0x98] sm:$0xff] }
 0x41d   : > { %v5301_v56 = vsel %vm4923_vm13, %v2065_v41, -1e+30  ;;  %6102 = vst [vmem:[#allocation60_spill] sm:$0xff] %v5311_v59 }
 0x41e   : > { %6098 = vst [vmem:[#allocation58_spill] sm:$0xff] %v5301_v56 }
 0x41f   : > { %2142 = vmax.xlane.f32.xlu1 %v5305_v43  ;;  %2144 = vmax.xlane.f32.xlu0 %v5301_v56  ;;  %v1525_v56 = vld [vmem:[#allocation3 + $0x18] sm:$0xff] }
 0x421   : > { %v3763_v26 = vpop.f32.mrb[28].mxu1 }
 0x422   : > { %v2078_v35 = vpop.f32.mrb[29].mxu1  ;;  %v5315_v6 = vsel %vm4913_vm3, %v3763_v26, -1e+30  ;;  %v5367_v26 = vld [vmem:[#allocation2 + $0xb0] sm:$0xff] }
 0x423   : > { %6103 = vst [vmem:[#allocation61_spill] sm:$0xff] %v5315_v6  ;;  %2148 = vmax.xlane.f32.xlu0 %v5311_v59  ;;  %2154 = vmax.xlane.f32.xlu1 %v5315_v6  ;;  %v3764_v52 = vpop.f32.mrb[30].mxu1  ;;  %v5325_v41 = vsel %vm4937_vm12, %v2078_v35, -1e+30  ;;  %v6107_v35 = vsub.f32 %v4970_v31, %v4975_v38 }
 0x424   : > { %v2081_v10 = vpop.f32.mrb[31].mxu1  ;;  %6105 = vst [vmem:[#allocation63_spill] sm:$0xff] %v5325_v41  ;;  %v5331_v58 = vsel %vm4945_vm0, %v3764_v52, -1e+30 }
 0x425   : > { %v5321_v9 = vsel %vm4957_vm7, %v2081_v10, -1e+30  ;;  %6106 = vst [vmem:[#allocation64_spill] sm:$0xff] %v5331_v58  ;;  %v1362_v29 = vmul.f32 1.442695, %v6107_v35  ;;  %v6108_v35 = vsub.f32 %v4972_v37, %v4984_v46  ;;  %v5457_v37 = vld [vmem:[#allocation2 + $0xf0] sm:$0xff] }
 0x426   : > { %6104 = vst [vmem:[#allocation62_spill] sm:$0xff] %v5321_v9  ;;  %6113 = vst [vmem:[#allocation66_spill] sm:$0xff] %v5457_v37 }
 0x427   : > { %2150 = vmax.xlane.f32.xlu1 %v5325_v41  ;;  %2152 = vmax.xlane.f32.xlu0 %v5321_v9  ;;  %3971 = vpow2.f32 %v1362_v29 }
 0x42b   : > { %1554 = vadd.xlane.f32.xlu1 %v5140_v45  ;;  %2156 = vmax.xlane.f32.xlu0 %v5331_v58  ;;  %v5348_v45 = vld [vmem:[#allocation2 + $0x80] sm:$0xff]  ;;  %v5483_v58 = vld [vmem:[#allocation2 + $0xe8] sm:$0xff] }
 0x42f   : > { %1558 = vadd.xlane.f32.xlu1 %v5150_v14  ;;  %1556 = vadd.xlane.f32.xlu0 %v5143_v2  ;;  %v5383_v2 = vld [vmem:[#allocation2 + $0xa8] sm:$0xff] }
 0x433   : > { %1562 = vadd.xlane.f32.xlu1 %v5162_v17  ;;  %1560 = vadd.xlane.f32.xlu0 %v5152_v25 }
 0x437   : > { %1566 = vadd.xlane.f32.xlu1 %v5170_v23  ;;  %1564 = vadd.xlane.f32.xlu0 %v5164_v5  ;;  %v5405_v23 = vld [vmem:[#allocation2 + $0xd0] sm:$0xff] }
 0x498   : > { %v2131_v18 = vpop.xlane.xlu0 %2130 }
 0x499   : > { %v5344_v20 = vmax.f32 %v5341_v7, %v2131_v18 }
 0x49b   : > { %2699 = vst.msk [vmem:[#allocation2 + $0x90] sm:$0xff] %vm1602_vm10, %v5344_v20  ;;  %v2129_v14 = vpop.xlane.xlu1 %2128 }
 0x49c   : > { %v5355_v25 = vmax.f32 %v5346_v21, %v2129_v14  ;;  %v2127_v17 = vpop.xlane.xlu0 %2126 }
 0x49d   : > { %v5358_v5 = vmax.f32 %v5348_v45, %v2127_v17  ;;  %v5381_v17 = vld [vmem:[#allocation2 + $0xa0] sm:$0xff] }
 0x49e   : > { %2698 = vst.msk [vmem:[#allocation2 + $0x88] sm:$0xff] %vm1602_vm10, %v5355_v25  ;;  %2229 = vperm.xlu1 %3906, %v5355_v25  }
 0x49f   : > { %2697 = vst.msk [vmem:[#allocation2 + $0x80] sm:$0xff] %vm1602_vm10, %v5358_v5  ;;  %2224 = vperm.xlu0 %3905, %v5358_v5  }
 0x4a0   : > { %v2133_v52 = vpop.xlane.xlu0 %2132  ;;  %v2139_v10 = vpop.xlane.xlu1 %2138 }
 0x4a1   : > { %v5375_v18 = vmax.f32 %v5365_v22, %v2133_v52  ;;  %v5378_v14 = vmax.f32 %v5367_v26, %v2139_v10 }
 0x4a2   : > { %2234 = vperm.xlu1 %3906, %v5344_v20  }
 0x4a3   : > { %2700 = vst.msk [vmem:[#allocation2 + $0x98] sm:$0xff] %vm1602_vm10, %v5375_v18  ;;  %2703 = vst.msk [vmem:[#allocation2 + $0xb0] sm:$0xff] %vm1602_vm10, %v5378_v14  ;;  %2239 = vperm.xlu0 %3905, %v5375_v18  }
 0x4a4   : > { %v2135_v52 = vpop.xlane.xlu1 %2134  ;;  %v2137_v10 = vpop.xlane.xlu0 %2136 }
 0x4a5   : > { %v5395_v51 = vmax.f32 %v5381_v17, %v2135_v52  ;;  %v5398_v53 = vmax.f32 %v5383_v2, %v2137_v10  ;;  %v1364_v10 = vmul.f32 1.442695, %v6108_v35  ;;  %v6109_v52 = vsub.f32 %v4977_v42, %v4993_v61 }
 0x4a6   : > { %v6110_v61 = vsub.f32 %v4998_v1, %v5010_v16  ;;  %v6118_v1 = vld [vmem:[#allocation22_spill] sm:$0xff] }
 0x4a7   : > { %2701 = vst.msk [vmem:[#allocation2 + $0xa0] sm:$0xff] %vm1602_vm10, %v5395_v51  ;;  %2702 = vst.msk [vmem:[#allocation2 + $0xa8] sm:$0xff] %vm1602_vm10, %v5398_v53  ;;  %2244 = vperm.xlu1 %3906, %v5395_v51   ;;  %2249 = vperm.xlu0 %3905, %v5398_v53   ;;  %v1366_v63 = vmul.f32 1.442695, %v6109_v52  ;;  %3973 = vpow2.f32 %v1364_v10  ;;  %v6119_v10 = vld [vmem:[#allocation24_spill] sm:$0xff] }
 0x4a8   : > { %v2141_v31 = vpop.xlane.xlu0 %2140  ;;  %v2147_v38 = vpop.xlane.xlu1 %2146  ;;  %v1368_v29 = vmul.f32 1.442695, %v6110_v61  ;;  %v6120_v19 = vsub.f32 %v6118_v1, %v6119_v10  ;;  %v1522_v1 = vld [vmem:[#allocation3] sm:$0xff] }
 0x4a9   : > { %v5421_v33 = vmax.f32 %v5403_v15, %v2141_v31  ;;  %v5424_v54 = vmax.f32 %v5405_v23, %v2147_v38  ;;  %3975 = vpow2.f32 %v1366_v63  ;;  %v6112_v38 = vsub.f32 %v5012_v32, %v5026_v39  ;;  %v6114_v39 = vld [vmem:[#allocation17_spill] sm:$0xff]  ;;  %v6115_v63 = vld [vmem:[#allocation18_spill] sm:$0xff] }
 0x4aa   : > { %3977 = vpow2.f32 %v1368_v29  ;;  %v1372_v11 = vmul.f32 1.442695, %v6120_v19  ;;  %6121 = vst [vmem:[#allocation18_spill] sm:$0xff] %v5483_v58  ;;  %v5495_v19 = vpop.eup %3971  ;;  %v1523_v29 = vld [vmem:[#allocation3 + $0x8] sm:$0xff] }
 0x4ab   : > { %2704 = vst.msk [vmem:[#allocation2 + $0xb8] sm:$0xff] %vm1602_vm10, %v5421_v33  ;;  %2707 = vst.msk [vmem:[#allocation2 + $0xd0] sm:$0xff] %vm1602_vm10, %v5424_v54  ;;  %2254 = vperm.xlu1 %3906, %v5378_v14   ;;  %2259 = vperm.xlu0 %3905, %v5421_v33   ;;  %v1370_v35 = vmul.f32 1.442695, %v6112_v38 }
 0x4ac   : > { %v2143_v42 = vpop.xlane.xlu1 %2142  ;;  %v2145_v46 = vpop.xlane.xlu0 %2144 }
 0x4ad   : > { %v5447_v52 = vmax.f32 %v5429_v4, %v2143_v42  ;;  %v5450_v31 = vmax.f32 %v5431_v44, %v2145_v46  ;;  %v6116_v42 = vsub.f32 %v6114_v39, %v6115_v63  ;;  %3979 = vpow2.f32 %v1370_v35  ;;  %v5503_v63 = vld [vmem:[#allocation2 + $0xf8] sm:$0xff] }
 0x4ae   : > { %6123 = vst [vmem:[#allocation24_spill] sm:$0xff] %v5503_v63 }
 0x4af   : > { %6111 = vst [vmem:[#allocation65_spill] sm:$0xff] %v5450_v31  ;;  %2705 = vst.msk [vmem:[#allocation2 + $0xc0] sm:$0xff] %vm1602_vm10, %v5447_v52  ;;  %2264 = vperm.xlu1 %3906, %v5447_v52   ;;  %2269 = vperm.xlu0 %3905, %v5450_v31   ;;  %v1374_v46 = vmul.f32 1.442695, %v6116_v42 }
 0x4b0   : > { %2706 = vst.msk [vmem:[#allocation2 + $0xc8] sm:$0xff] %vm1602_vm10, %v5450_v31  ;;  %v2149_v16 = vpop.xlane.xlu0 %2148  ;;  %v2155_v32 = vpop.xlane.xlu1 %2154 }
 0x4b1   : > { %v5473_v61 = vmax.f32 %v5455_v48, %v2149_v16  ;;  %v5476_v38 = vmax.f32 %v5457_v37, %v2155_v32  ;;  %3981 = vpow2.f32 %v1374_v46  ;;  %v5505_v42 = vpop.eup %3973  ;;  %v1524_v37 = vld [vmem:[#allocation3 + $0x10] sm:$0xff] }
 0x4b2   : > { %3983 = vpow2.f32 %v1372_v11  ;;  %v1538_v11 = vmul.f32 %v5495_v19, %v1522_v1  ;;  %v1539_v59 = vmul.f32 %v5505_v42, %v1523_v29 }
 0x4b3   : > { %6117 = vst [vmem:[#allocation17_spill] sm:$0xff] %v5476_v38  ;;  %2708 = vst.msk [vmem:[#allocation2 + $0xd8] sm:$0xff] %vm1602_vm10, %v5473_v61  ;;  %2274 = vperm.xlu1 %3906, %v5424_v54   ;;  %2279 = vperm.xlu0 %3905, %v5473_v61  }
 0x4b4   : > { %2711 = vst.msk [vmem:[#allocation2 + $0xf0] sm:$0xff] %vm1602_vm10, %v5476_v38  ;;  %v2151_v35 = vpop.xlane.xlu1 %2150  ;;  %v2153_v10 = vpop.xlane.xlu0 %2152 }
 0x4b5   : > { %v5498_v16 = vmax.f32 %v5481_v8, %v2151_v35  ;;  %v5501_v32 = vmax.f32 %v5483_v58, %v2153_v10  ;;  %v3976_v35 = vpop.eup %3975 }
 0x4b6   : > { %v3978_v41 = vpop.eup %3977  ;;  %v1540_v1 = vmul.f32 %v3976_v35, %v1524_v37  ;;  %v1528_v37 = vld [vmem:[#allocation3 + $0x30] sm:$0xff] }
 0x4b7   : > { %6122 = vst [vmem:[#allocation22_spill] sm:$0xff] %v5501_v32  ;;  %2709 = vst.msk [vmem:[#allocation2 + $0xe0] sm:$0xff] %vm1602_vm10, %v5498_v16  ;;  %2284 = vperm.xlu1 %3906, %v5498_v16   ;;  %2289 = vperm.xlu0 %3905, %v5501_v32  }
 0x4b8   : > { %2710 = vst.msk [vmem:[#allocation2 + $0xe8] sm:$0xff] %vm1602_vm10, %v5501_v32  ;;  %v1555_v10 = vpop.xlane.xlu1 %1554  ;;  %v2157_v39 = vpop.xlane.xlu0 %2156 }
 0x4b9   : > { %v1586_v6 = vadd.f32 %v1555_v10, %v1538_v11  ;;  %v5519_v9 = vmax.f32 %v5503_v63, %v2157_v39  ;;  %v3980_v11 = vpop.eup %3979  ;;  %v1541_v63 = vmul.f32 %v3978_v41, %v1525_v56 }
 0x4ba   : > { %v1542_v46 = vmul.f32 %v3980_v11, %v1526_v50 }
 0x4bb   : > { %6124 = vst [vmem:[#allocation67_spill] sm:$0xff] %v5519_v9  ;;  %1603 = vst.msk [vmem:[#allocation3] sm:$0xff] %vm1602_vm10, %v1586_v6  ;;  %2294 = vperm.xlu1 %3906, %v5476_v38   ;;  %2299 = vperm.xlu0 %3905, %v5519_v9   ;;  %v3982_v32 = vpop.eup %3981 }
 0x4bc   : > { %2712 = vst.msk [vmem:[#allocation2 + $0xf8] sm:$0xff] %vm1602_vm10, %v5519_v9  ;;  %v1559_v10 = vpop.xlane.xlu1 %1558  ;;  %v1557_v39 = vpop.xlane.xlu0 %1556 }
 0x4bd   : > { %v1588_v43 = vadd.f32 %v1559_v10, %v1540_v1  ;;  %v1587_v6 = vadd.f32 %v1557_v39, %v1539_v59  ;;  %v3984_v38 = vpop.eup %3983  ;;  %v1544_v1 = vmul.f32 %v3982_v32, %v1528_v37  ;;  %v6140_v37 = vld [vmem:[#allocation33_spill] sm:$0xff] }
 0x4be   : > { %v1543_v59 = vmul.f32 %v3984_v38, %v1527_v55  ;;  %v6126_v55 = vld [vmem:[#allocation20_spill] sm:$0xff] }
 0x4bf   : > { %1605 = vst.msk [vmem:[#allocation3 + $0x10] sm:$0xff] %vm1602_vm10, %v1588_v43  ;;  %1604 = vst.msk [vmem:[#allocation3 + $0x8] sm:$0xff] %vm1602_vm10, %v1587_v6 }
 0x4c0   : > { %v1563_v58 = vpop.xlane.xlu1 %1562  ;;  %v1561_v9 = vpop.xlane.xlu0 %1560 }
 0x4c1   : > { %v1590_v29 = vadd.f32 %v1563_v58, %v1542_v46  ;;  %v1589_v34 = vadd.f32 %v1561_v9, %v1541_v63  ;;  %v6132_v9 = vld [vmem:[#allocation23_spill] sm:$0xff]  ;;  %v6137_v63 = vld [vmem:[#allocation26_spill] sm:$0xff] }
 0x4c3   : > { %1607 = vst.msk [vmem:[#allocation3 + $0x20] sm:$0xff] %vm1602_vm10, %v1590_v29  ;;  %1606 = vst.msk [vmem:[#allocation3 + $0x18] sm:$0xff] %vm1602_vm10, %v1589_v34  ;;  %v6125_v34 = vld [vmem:[#allocation19_spill] sm:$0xff] }
 0x4c4   : > { %v1567_v10 = vpop.xlane.xlu1 %1566  ;;  %v1565_v39 = vpop.xlane.xlu0 %1564  ;;  %v6127_v50 = vsub.f32 %v6125_v34, %v6126_v55  ;;  %v6141_v29 = vld [vmem:[#allocation35_spill] sm:$0xff]  ;;  %v6147_v34 = vld [vmem:[#allocation38_spill] sm:$0xff] }
 0x4c5   : > { %v1592_v43 = vadd.f32 %v1567_v10, %v1544_v1  ;;  %v1591_v31 = vadd.f32 %v1565_v39, %v1543_v59  ;;  %v6142_v1 = vsub.f32 %v6140_v37, %v6141_v29 }
 0x4c7   : > { %1609 = vst.msk [vmem:[#allocation3 + $0x30] sm:$0xff] %vm1602_vm10, %v1592_v43  ;;  %1608 = vst.msk [vmem:[#allocation3 + $0x28] sm:$0xff] %vm1602_vm10, %v1591_v31  ;;  %v1386_v59 = vmul.f32 1.442695, %v6142_v1  ;;  %v6146_v43 = vld [vmem:[#allocation37_spill] sm:$0xff] }
 0x4c8   : > { %v6148_v55 = vsub.f32 %v6146_v43, %v6147_v34 }
 0x4da   : > { %1570 = vadd.xlane.f32.xlu0 %v5179_v24  ;;  %v1376_v24 = vmul.f32 1.442695, %v6127_v50  ;;  %v1388_v50 = vmul.f32 1.442695, %v6148_v55 }
 0x4dc   : > { %3985 = vpow2.f32 %v1376_v24 }
 0x4de   : > { %1572 = vadd.xlane.f32.xlu0 %v5181_v36  ;;  %v6128_v36 = vld [vmem:[#allocation25_spill] sm:$0xff] }
 0x4df   : > { %1568 = vadd.xlane.f32.xlu1 %v5172_v0  ;;  %v6129_v0 = vld [vmem:[#allocation27_spill] sm:$0xff] }
 0x4e0   : > { %v6130_v56 = vsub.f32 %v6128_v36, %v6129_v0  ;;  %v6150_v36 = vld [vmem:[#allocation36_spill] sm:$0xff] }
 0x4e2   : > { %1576 = vadd.xlane.f32.xlu0 %v5187_v60  ;;  %v1378_v60 = vmul.f32 1.442695, %v6130_v56 }
 0x4e3   : > { %1574 = vadd.xlane.f32.xlu1 %v5185_v57  ;;  %v6131_v57 = vld [vmem:[#allocation21_spill] sm:$0xff] }
 0x4e4   : > { %3987 = vpow2.f32 %v1378_v60 }
 0x4e6   : > { %1580 = vadd.xlane.f32.xlu0 %v5195_v49  ;;  %v6133_v49 = vsub.f32 %v6131_v57, %v6132_v9  ;;  %v5570_v24 = vpop.eup %3985  ;;  %v6153_v9 = vsub.f32 %v5348_v45, %v5358_v5  ;;  %v6156_v45 = vsub.f32 %v5367_v26, %v5378_v14 }
 0x4e7   : > { %1578 = vadd.xlane.f32.xlu1 %v5193_v28  ;;  %v6134_v28 = vld [vmem:[#allocation30_spill] sm:$0xff] }
 0x4e8   : > { %v1382_v58 = vmul.f32 1.442695, %v6133_v49  ;;  %v2190_v49 = vmul.f32 1.442695, %v6153_v9  ;;  %v2202_v5 = vmul.f32 1.442695, %v6156_v45 }
 0x4e9   : > { %v6169_v45 = vld [vmem:[#allocation22_spill] sm:$0xff] }
 0x4ea   : > { %1584 = vadd.xlane.f32.xlu0 %v5201_v40  ;;  %3989 = vpow2.f32 %v1382_v58  ;;  %v6154_v58 = vsub.f32 %v5381_v17, %v5395_v51 }
 0x4eb   : > { %1582 = vadd.xlane.f32.xlu1 %v5199_v30  ;;  %v6135_v30 = vld [vmem:[#allocation32_spill] sm:$0xff] }
 0x4ec   : > { %v6136_v40 = vsub.f32 %v6134_v28, %v6135_v30  ;;  %v2198_v28 = vmul.f32 1.442695, %v6154_v58  ;;  %v6155_v30 = vsub.f32 %v5341_v7, %v5344_v20  ;;  %v6158_v20 = vsub.f32 %v5405_v23, %v5424_v54  ;;  %v6167_v58 = vld [vmem:[#allocation56_spill] sm:$0xff] }
 0x4ee   : > { %v1380_v31 = vmul.f32 1.442695, %v6136_v40  ;;  %v2194_v40 = vmul.f32 1.442695, %v6155_v30  ;;  %v2210_v26 = vmul.f32 1.442695, %v6158_v20 }
 0x4f0   : > { %3991 = vpow2.f32 %v1380_v31  ;;  %v6157_v31 = vsub.f32 %v5365_v22, %v5375_v18  ;;  %v6160_v22 = vsub.f32 %v5429_v4, %v5447_v52  ;;  %v6162_v4 = vsub.f32 %v5481_v8, %v5498_v16 }
 0x4f1   : > { %v6163_v8 = vsub.f32 %v5455_v48, %v5473_v61  ;;  %v6164_v48 = vld [vmem:[#allocation65_spill] sm:$0xff] }
 0x4f2   : > { %v2196_v7 = vmul.f32 1.442695, %v6157_v31  ;;  %v2206_v18 = vmul.f32 1.442695, %v6160_v22  ;;  %v6165_v61 = vsub.f32 %v5431_v44, %v6164_v48 }
 0x4f3   : > { %v2212_v16 = vmul.f32 1.442695, %v6163_v8 }
 0x4fc   : > { %1637 = vperm.xlu1 %3906, %v5495_v19   ;;  %v6138_v19 = vld [vmem:[#allocation28_spill] sm:$0xff] }
 0x4fd   : > { %v6139_v46 = vsub.f32 %v6137_v63, %v6138_v19  ;;  %v6159_v19 = vsub.f32 %v5383_v2, %v5398_v53  ;;  %v6161_v2 = vsub.f32 %v5403_v15, %v5421_v33 }
 0x4ff   : > { %v1384_v6 = vmul.f32 1.442695, %v6139_v46  ;;  %v2200_v46 = vmul.f32 1.442695, %v6159_v19  ;;  %v2204_v1 = vmul.f32 1.442695, %v6161_v2 }
 0x500   : > { %1647 = vperm.xlu1 %3906, %v3976_v35   ;;  %1642 = vperm.xlu0 %3905, %v5505_v42   ;;  %v6143_v35 = vld [vmem:[#allocation29_spill] sm:$0xff]  ;;  %v6144_v42 = vld [vmem:[#allocation31_spill] sm:$0xff] }
 0x501   : > { %3993 = vpow2.f32 %v1384_v6  ;;  %v6145_v10 = vsub.f32 %v6143_v35, %v6144_v42 }
 0x502   : > { %3995 = vpow2.f32 %v1386_v59 }
 0x503   : > { %v1390_v39 = vmul.f32 1.442695, %v6145_v10 }
 0x504   : > { %1652 = vperm.xlu1 %3906, %v3978_v41   ;;  %1657 = vperm.xlu0 %3905, %v3980_v11   ;;  %v5572_v41 = vpop.eup %3987  ;;  %v6149_v11 = vld [vmem:[#allocation34_spill] sm:$0xff] }
 0x505   : > { %3997 = vpow2.f32 %v1390_v39  ;;  %v6151_v0 = vsub.f32 %v6149_v11, %v6150_v36  ;;  %v5582_v60 = vpop.eup %3989  ;;  %v2208_v36 = vmul.f32 1.442695, %v6165_v61  ;;  %v6175_v61 = vld [vmem:[#allocation63_spill] sm:$0xff] }
 0x506   : > { %3999 = vpow2.f32 %v1388_v50  ;;  %v5584_v57 = vpop.eup %3991 }
 0x507   : > { %v1392_v56 = vmul.f32 1.442695, %v6151_v0 }
 0x508   : > { %1662 = vperm.xlu1 %3906, %v3984_v38   ;;  %1667 = vperm.xlu0 %3905, %v3982_v32   ;;  %v6152_v38 = vsub.f32 %v5346_v21, %v5355_v25 }
 0x509   : > { %4001 = vpow2.f32 %v1392_v56 }
 0x50a   : > { %v2192_v32 = vmul.f32 1.442695, %v6152_v38 }
 0x50b   : > { %v5594_v21 = vpop.eup %3993 }
 0x50c   : > { %1672 = vperm.xlu1 %3906, %v5570_v24   ;;  %1677 = vperm.xlu0 %3905, %v5572_v41   ;;  %4003 = vpow2.f32 %v2192_v32  ;;  %v5596_v25 = vpop.eup %3995 }
 0x50d   : > { %4005 = vpow2.f32 %v2190_v49 }
 0x50e   : > { %4007 = vpow2.f32 %v2198_v28 }
 0x50f   : > { %v5606_v51 = vpop.eup %3997  ;;  %4009 = vpow2.f32 %v2194_v40  ;;  %v6168_v40 = vld [vmem:[#allocation18_spill] sm:$0xff] }
 0x510   : > { %1682 = vperm.xlu1 %3906, %v5584_v57   ;;  %1687 = vperm.xlu0 %3905, %v5582_v60   ;;  %v5608_v17 = vpop.eup %3999  ;;  %4011 = vpow2.f32 %v2202_v5  ;;  %v6170_v5 = vsub.f32 %v6168_v40, %v6169_v45 }
 0x511   : > { %4013 = vpow2.f32 %v2196_v7 }
 0x512   : > { %4015 = vpow2.f32 %v2210_v26  ;;  %v2216_v31 = vmul.f32 1.442695, %v6170_v5  ;;  %v6177_v5 = vld [vmem:[#allocation61_spill] sm:$0xff] }
 0x513   : > { %v5618_v14 = vpop.eup %4001  ;;  %4017 = vpow2.f32 %v2200_v46 }
 0x514   : > { %1692 = vperm.xlu1 %3906, %v5594_v21   ;;  %1697 = vperm.xlu0 %3905, %v5596_v25   ;;  %4019 = vpow2.f32 %v2206_v18 }
 0x516   : > { %v5620_v63 = vpop.eup %4003 }
 0x517   : > { %v5630_v23 = vpop.eup %4005 }
 0x518   : > { %1702 = vperm.xlu1 %3906, %v5608_v17   ;;  %1707 = vperm.xlu0 %3905, %v5606_v51   ;;  %v5633_v29 = vpop.eup %4007 }
 0x519   : > { %v5644_v42 = vpop.eup %4009 }
 0x51a   : > { %v5647_v33 = vpop.eup %4011 }
 0x51b   : > { %v5655_v34 = vpop.eup %4013 }
 0x51c   : > { %1712 = vperm.xlu1 %3906, %v5618_v14   ;;  %2471 = vperm.xlu0 %3905, %v5620_v63   ;;  %v5657_v50 = vpop.eup %4015 }
 0x51d   : > { %v2230_v54 = vpop.permute.xlu1 %2229  ;;  %v5666_v38 = vpop.eup %4017 }
 0x51e   : > { %v2303_v6 = vsub.f32 %v5261_v3, %v2230_v54  ;;  %v2225_v37 = vpop.permute.xlu0 %2224  ;;  %v2214_v3 = vmul.f32 1.442695, %v6162_v4  ;;  %v5668_v49 = vpop.eup %4019  ;;  %v6171_v54 = vld [vmem:[#allocation59_spill] sm:$0xff] }
 0x51f   : > { %v2302_v53 = vsub.f32 %v5266_v13, %v2225_v37  ;;  %v6172_v37 = vld [vmem:[#allocation58_spill] sm:$0xff] }
 0x520   : > { %v2320_v59 = vmul.f32 1.442695, %v2303_v6  ;;  %2466 = vperm.xlu1 %3906, %v5630_v23   ;;  %2486 = vperm.xlu0 %3905, %v5633_v29  }
 0x521   : > { %v2318_v52 = vmul.f32 1.442695, %v2302_v53  ;;  %v2235_v35 = vpop.permute.xlu1 %2234 }
 0x522   : > { %4021 = vpow2.f32 %v2320_v59  ;;  %v2304_v13 = vsub.f32 %v5256_v62, %v2235_v35  ;;  %v2240_v10 = vpop.permute.xlu0 %2239 }
 0x523   : > { %4023 = vpow2.f32 %v2318_v52  ;;  %v2305_v15 = vsub.f32 %v5271_v12, %v2240_v10  ;;  %v6173_v10 = vld [vmem:[#allocation57_spill] sm:$0xff] }
 0x524   : > { %4025 = vpow2.f32 %v2204_v1  ;;  %v2322_v39 = vmul.f32 1.442695, %v2304_v13  ;;  %2476 = vperm.xlu1 %3906, %v5644_v42   ;;  %2496 = vperm.xlu0 %3905, %v5647_v33  }
 0x525   : > { %4027 = vpow2.f32 %v2214_v3  ;;  %v2324_v43 = vmul.f32 1.442695, %v2305_v15 }
 0x526   : > { %4029 = vpow2.f32 %v2322_v39  ;;  %v2245_v62 = vpop.permute.xlu1 %2244  ;;  %v2250_v55 = vpop.permute.xlu0 %2249  ;;  %v6174_v39 = vld [vmem:[#allocation60_spill] sm:$0xff] }
 0x527   : > { %4031 = vpow2.f32 %v2324_v43  ;;  %v2306_v12 = vsub.f32 %v5285_v27, %v2245_v62  ;;  %v2307_v11 = vsub.f32 %v5281_v47, %v2250_v55  ;;  %v6166_v27 = vld [vmem:[#allocation55_spill] sm:$0xff] }
 0x528   : > { %2481 = vperm.xlu1 %3906, %v5655_v34   ;;  %2516 = vperm.xlu0 %3905, %v5657_v50   ;;  %4033 = vpow2.f32 %v2212_v16 }
 0x529   : > { %v2326_v0 = vmul.f32 1.442695, %v2306_v12  ;;  %v2328_v56 = vmul.f32 1.442695, %v2307_v11 }
 0x52a   : > { %v2255_v32 = vpop.permute.xlu1 %2254  ;;  %v2260_v9 = vpop.permute.xlu0 %2259 }
 0x52b   : > { %4035 = vpow2.f32 %v2326_v0  ;;  %v2308_v47 = vsub.f32 %v6166_v27, %v2255_v32  ;;  %v2309_v28 = vsub.f32 %v6167_v58, %v2260_v9  ;;  %v6176_v0 = vld [vmem:[#allocation62_spill] sm:$0xff] }
 0x52c   : > { %v5672_v30 = vpop.eup %4021  ;;  %4037 = vpow2.f32 %v2328_v56  ;;  %2491 = vperm.xlu1 %3906, %v5666_v38   ;;  %2506 = vperm.xlu0 %3905, %v5668_v49  }
 0x52d   : > { %v5676_v44 = vpop.eup %4023  ;;  %4039 = vpow2.f32 %v2208_v36  ;;  %v2330_v7 = vmul.f32 1.442695, %v2308_v47  ;;  %v2332_v20 = vmul.f32 1.442695, %v2309_v28 }
 0x52e   : > { %v5681_v26 = vpop.eup %4025  ;;  %v2265_v19 = vpop.permute.xlu1 %2264  ;;  %v2560_v22 = vpack.c.bf16 %v5672_v30, %v5676_v44 }
 0x52f   : > { %v2270_v46 = vpop.permute.xlu0 %2269  ;;  %v5685_v18 = vpop.eup %4027  ;;  %4041 = vpow2.f32 %v2330_v7  ;;  %v2310_v6 = vsub.f32 %v6171_v54, %v2265_v19  ;;  %v6178_v7 = vld [vmem:[#allocation64_spill] sm:$0xff] }
 0x530   : > { %v2311_v53 = vsub.f32 %v6172_v37, %v2270_v46  ;;  %v5689_v2 = vpop.eup %4029  ;;  %4043 = vpow2.f32 %v2332_v20  ;;  %2501 = vperm.xlu1 %3906, %v5681_v26   ;;  %2526 = vperm.xlu0 %3905, %v5685_v18  }
 0x531   : > { %v5693_v1 = vpop.eup %4031  ;;  %4045 = vpow2.f32 %v2216_v31  ;;  %v2334_v59 = vmul.f32 1.442695, %v2310_v6  ;;  %3781 = vmatprep.mubr.bf16.mxu0 %v2560_v22 }
 0x532   : > { %v2336_v4 = vmul.f32 1.442695, %v2311_v53  ;;  %v2275_v3 = vpop.permute.xlu1 %2274  ;;  %v2561_v35 = vpack.c.bf16 %v5693_v1, %v5689_v2  ;;  %v5697_v13 = vpop.eup %4033 }
 0x533   : > { %v2280_v52 = vpop.permute.xlu0 %2279  ;;  %4047 = vpow2.f32 %v2334_v59  ;;  %v2312_v15 = vsub.f32 %v6173_v10, %v2275_v3 }
 0x534   : > { %v2313_v8 = vsub.f32 %v6174_v39, %v2280_v52  ;;  %4049 = vpow2.f32 %v2336_v4  ;;  %2521 = vperm.xlu1 %3906, %v5697_v13   ;;  %3782 = vmatmul.mubr.bf16.vlgmr.msra.gmra.mrb[16].mxu0 %v2561_v35 }
 0x535   : > { %v4036_v16 = vpop.eup %4035  ;;  %v2338_v43 = vmul.f32 1.442695, %v2312_v15 }
 0x536   : > { %v2340_v62 = vmul.f32 1.442695, %v2313_v8  ;;  %v4038_v55 = vpop.eup %4037  ;;  %v2285_v12 = vpop.permute.xlu1 %2284  ;;  %v1530_v8 = vld [vmem:[#allocation3 + $0x40] sm:$0xff] }
 0x537   : > { %v2290_v11 = vpop.permute.xlu0 %2289  ;;  %v5702_v48 = vpop.eup %4039  ;;  %4051 = vpow2.f32 %v2338_v43  ;;  %v2314_v36 = vsub.f32 %v6175_v61, %v2285_v12  ;;  %v2562_v32 = vpack.c.bf16 %v4038_v55, %v4036_v16  ;;  %v1546_v43 = vmul.f32 %v5572_v41, %v1530_v8  ;;  %v1531_v12 = vld [vmem:[#allocation3 + $0x48] sm:$0xff]  ;;  %v1529_v61 = vld [vmem:[#allocation3 + $0x38] sm:$0xff] }
 0x538   : > { %v2315_v56 = vsub.f32 %v6176_v0, %v2290_v11  ;;  %4053 = vpow2.f32 %v2340_v62  ;;  %2511 = vperm.xlu1 %3906, %v5702_v48   ;;  %v1532_v0 = vld [vmem:[#allocation3 + $0x50] sm:$0xff]  ;;  %v6185_v8 = vld [vmem:[#allocation40_spill] sm:$0xff] }
 0x539   : > { %v4042_v9 = vpop.eup %4041  ;;  %v2342_v27 = vmul.f32 1.442695, %v2314_v36  ;;  %3785 = vmatprep.mubr.bf16.mxu0 %v2562_v32  ;;  %v1535_v32 = vld [vmem:[#allocation3 + $0x68] sm:$0xff] }
 0x53a   : > { %v2344_v47 = vmul.f32 1.442695, %v2315_v56  ;;  %v4044_v58 = vpop.eup %4043  ;;  %v2295_v28 = vpop.permute.xlu1 %2294 }
 0x53b   : > { %v2300_v40 = vpop.permute.xlu0 %2299  ;;  %v5707_v45 = vpop.eup %4045  ;;  %4055 = vpow2.f32 %v2342_v27  ;;  %v2316_v31 = vsub.f32 %v6177_v5, %v2295_v28  ;;  %v2563_v19 = vpack.c.bf16 %v4044_v58, %v4042_v9 }
 0x53c   : > { %v2317_v20 = vsub.f32 %v6178_v7, %v2300_v40  ;;  %4057 = vpow2.f32 %v2344_v47  ;;  %2531 = vperm.xlu1 %3906, %v5707_v45   ;;  %v1537_v40 = vld [vmem:[#allocation3 + $0x78] sm:$0xff] }
 0x53d   : > { %v4048_v46 = vpop.eup %4047  ;;  %v2346_v22 = vmul.f32 1.442695, %v2316_v31  ;;  %3786 = vmatmul.mubr.bf16.gmra.mrb[20].mxu0 %v2563_v19  ;;  %v6180_v19 = vld [vmem:[#allocation17_spill] sm:$0xff] }
 0x53e   : > { %v2348_v54 = vmul.f32 1.442695, %v2317_v20  ;;  %v4050_v6 = vpop.eup %4049  ;;  %v6179_v20 = vld [vmem:[#allocation66_spill] sm:$0xff] }
 0x53f   : > { %4059 = vpow2.f32 %v2346_v22  ;;  %v2564_v37 = vpack.c.bf16 %v4050_v6, %v4048_v46 }
 0x540   : > { %4061 = vpow2.f32 %v2348_v54  ;;  %v1553_v54 = vmul.f32 %v5618_v14, %v1537_v40 }
 0x541   : > { %v4052_v53 = vpop.eup %4051  ;;  %3789 = vmatprep.mubr.bf16.mxu0 %v2564_v37 }
 0x542   : > { %v4054_v59 = vpop.eup %4053 }
 0x543   : > { %v2565_v4 = vpack.c.bf16 %v4054_v59, %v4052_v53 }
 0x545   : > { %v5712_v3 = vpop.eup %4055  ;;  %3790 = vmatmul.mubr.bf16.gmra.mrb[24].mxu0 %v2565_v4  ;;  %v6183_v4 = vld [vmem:[#allocation67_spill] sm:$0xff] }
 0x546   : > { %v4058_v52 = vpop.eup %4057 }
 0x547   : > { %v2566_v35 = vpack.c.bf16 %v4058_v52, %v5712_v3 }
 0x549   : > { %v4060_v10 = vpop.eup %4059  ;;  %3793 = vmatprep.mubr.bf16.mxu0 %v2566_v35 }
 0x54a   : > { %v4062_v15 = vpop.eup %4061 }
 0x54b   : > { %v2567_v39 = vpack.c.bf16 %v4062_v15, %v4060_v10 }
 0x54d   : > { %3794 = vmatmul.mubr.bf16.gmra.mrb[28].mxu0 %v2567_v39  ;;  %v1620_v39 = vld [vmem:[#allocation4 + $0x8] sm:$0xff] }
 0x54f   : > { %2387 = vadd.xlane.f32.xlu0 %v5689_v2 }
 0x553   : > { %2383 = vadd.xlane.f32.xlu0 %v5676_v44  ;;  %v1547_v44 = vmul.f32 %v5584_v57, %v1531_v12  ;;  %v1548_v57 = vmul.f32 %v5582_v60, %v1532_v0  ;;  %v1536_v60 = vld [vmem:[#allocation3 + $0x70] sm:$0xff] }
 0x557   : > { %2389 = vadd.xlane.f32.xlu0 %v5693_v1  ;;  %v1545_v1 = vmul.f32 %v5570_v24, %v1529_v61  ;;  %v1534_v24 = vld [vmem:[#allocation3 + $0x60] sm:$0xff] }
 0x558   : > { %v1623_v61 = vld [vmem:[#allocation4 + $0x20] sm:$0xff] }
 0x55b   : > { %2397 = vadd.xlane.f32.xlu0 %v4044_v58  ;;  %v1551_v58 = vmul.f32 %v5608_v17, %v1535_v32  ;;  %v6188_v32 = vld [vmem:[#allocation44_spill] sm:$0xff] }
 0x55f   : > { %2393 = vadd.xlane.f32.xlu0 %v4038_v55 }
 0x560   : > { %2385 = vadd.xlane.f32.xlu1 %v5672_v30  ;;  %v1533_v30 = vld [vmem:[#allocation3 + $0x58] sm:$0xff] }
 0x561   : > { %v1549_v56 = vmul.f32 %v5594_v21, %v1533_v30  ;;  %v1550_v21 = vmul.f32 %v5596_v25, %v1534_v24  ;;  %v6187_v30 = vld [vmem:[#allocation39_spill] sm:$0xff]  ;;  %v6189_v24 = vld [vmem:[#allocation41_spill] sm:$0xff] }
 0x563   : > { %2405 = vadd.xlane.f32.xlu0 %v4054_v59  ;;  %v6182_v59 = vld [vmem:[#allocation24_spill] sm:$0xff] }
 0x564   : > { %2395 = vadd.xlane.f32.xlu1 %v4042_v9 }
 0x567   : > { %2401 = vadd.xlane.f32.xlu0 %v4050_v6  ;;  %v1571_v62 = vpop.xlane.xlu0 %1570  ;;  %v1552_v6 = vmul.f32 %v5606_v51, %v1536_v60  ;;  %v1621_v51 = vld [vmem:[#allocation4 + $0x10] sm:$0xff] }
 0x568   : > { %v1594_v11 = vadd.f32 %v1571_v62, %v1546_v43  ;;  %2391 = vadd.xlane.f32.xlu1 %v4036_v16  ;;  %v6190_v60 = vld [vmem:[#allocation43_spill] sm:$0xff] }
 0x56a   : > { %1611 = vst.msk [vmem:[#allocation3 + $0x40] sm:$0xff] %vm1602_vm10, %v1594_v11 }
 0x56b   : > { %2413 = vadd.xlane.f32.xlu0 %v4062_v15  ;;  %v1573_v2 = vpop.xlane.xlu0 %1572 }
 0x56c   : > { %v1595_v55 = vadd.f32 %v1573_v2, %v1547_v44  ;;  %v1569_v36 = vpop.xlane.xlu1 %1568  ;;  %2403 = vadd.xlane.f32.xlu1 %v4052_v53  ;;  %v6186_v44 = vld [vmem:[#allocation42_spill] sm:$0xff] }
 0x56d   : > { %v1593_v41 = vadd.f32 %v1569_v36, %v1545_v1  ;;  %v1622_v1 = vld [vmem:[#allocation4 + $0x18] sm:$0xff] }
 0x56e   : > { %1612 = vst.msk [vmem:[#allocation3 + $0x48] sm:$0xff] %vm1602_vm10, %v1595_v55 }
 0x56f   : > { %1610 = vst.msk [vmem:[#allocation3 + $0x38] sm:$0xff] %vm1602_vm10, %v1593_v41  ;;  %2409 = vadd.xlane.f32.xlu0 %v4058_v52  ;;  %v1577_v16 = vpop.xlane.xlu0 %1576  ;;  %v6184_v52 = vsub.f32 %v6182_v59, %v6183_v4  ;;  %v1628_v59 = vld [vmem:[#allocation4 + $0x48] sm:$0xff]  ;;  %v6193_v4 = vld [vmem:[#allocation45_spill] sm:$0xff] }
 0x570   : > { %v1597_v9 = vadd.f32 %v1577_v16, %v1549_v56  ;;  %v1575_v27 = vpop.xlane.xlu1 %1574  ;;  %2399 = vadd.xlane.f32.xlu1 %v4048_v46  ;;  %v6181_v46 = vsub.f32 %v6179_v20, %v6180_v19  ;;  %v1626_v20 = vld [vmem:[#allocation4 + $0x38] sm:$0xff]  ;;  %v6191_v19 = vld [vmem:[#allocation46_spill] sm:$0xff] }
 0x571   : > { %v1596_v47 = vadd.f32 %v1575_v27, %v1548_v57  ;;  %v2220_v35 = vmul.f32 1.442695, %v6184_v52  ;;  %v1625_v57 = vld [vmem:[#allocation4 + $0x30] sm:$0xff]  ;;  %v1624_v27 = vld [vmem:[#allocation4 + $0x28] sm:$0xff] }
 0x572   : > { %1614 = vst.msk [vmem:[#allocation3 + $0x58] sm:$0xff] %vm1602_vm10, %v1597_v9  ;;  %v2218_v22 = vmul.f32 1.442695, %v6181_v46 }
 0x573   : > { %1613 = vst.msk [vmem:[#allocation3 + $0x50] sm:$0xff] %vm1602_vm10, %v1596_v47  ;;  %v1581_v28 = vpop.xlane.xlu0 %1580 }
 0x574   : > { %v1599_v5 = vadd.f32 %v1581_v28, %v1551_v58  ;;  %v1579_v31 = vpop.xlane.xlu1 %1578  ;;  %2411 = vadd.xlane.f32.xlu1 %v4060_v10  ;;  %4063 = vpow2.f32 %v2218_v22  ;;  %v1619_v10 = vld [vmem:[#allocation4] sm:$0xff] }
 0x575   : > { %v1598_v7 = vadd.f32 %v1579_v31, %v1550_v21  ;;  %4065 = vpow2.f32 %v2220_v35  ;;  %v1627_v31 = vld [vmem:[#allocation4 + $0x40] sm:$0xff] }
 0x576   : > { %1616 = vst.msk [vmem:[#allocation3 + $0x68] sm:$0xff] %vm1602_vm10, %v1599_v5 }
 0x577   : > { %1615 = vst.msk [vmem:[#allocation3 + $0x60] sm:$0xff] %vm1602_vm10, %v1598_v7  ;;  %v1585_v17 = vpop.xlane.xlu0 %1584 }
 0x578   : > { %v1601_v25 = vadd.f32 %v1585_v17, %v1553_v54  ;;  %v1583_v37 = vpop.xlane.xlu1 %1582  ;;  %2407 = vadd.xlane.f32.xlu1 %v5712_v3 }
 0x579   : > { %v1600_v53 = vadd.f32 %v1583_v37, %v1552_v6  ;;  %v6192_v37 = vld [vmem:[#allocation48_spill] sm:$0xff] }
 0x57a   : > { %1618 = vst.msk [vmem:[#allocation3 + $0x78] sm:$0xff] %vm1602_vm10, %v1601_v25  ;;  %v1629_v25 = vld [vmem:[#allocation4 + $0x50] sm:$0xff] }
 0x57b   : > { %1617 = vst.msk [vmem:[#allocation3 + $0x70] sm:$0xff] %vm1602_vm10, %v1600_v53 }
 0x57c   : > { %v1638_v14 = vpop.permute.xlu1 %1637 }
 0x57d   : > { %v1715_v15 = vmul.f32 %v1638_v14, %v1619_v10 }
 0x57e   : > { %v5747_v0 = vpop.eup %4063 }
 0x57f   : > { %v1884_v43 = vadd.f32 %v6185_v8, %v1715_v15  ;;  %v1643_v62 = vpop.permute.xlu0 %1642  ;;  %v5752_v28 = vpop.eup %4065 }
 0x580   : > { %v1716_v3 = vmul.f32 %v1643_v62, %v1620_v39  ;;  %v1648_v12 = vpop.permute.xlu1 %1647  ;;  %v1631_v39 = vld [vmem:[#allocation4 + $0x60] sm:$0xff]  ;;  %v6195_v62 = vld [vmem:[#allocation50_spill] sm:$0xff] }
 0x581   : > { %1900 = vst [vmem:[#allocation4] sm:$0xff] %v1884_v43  ;;  %v1717_v11 = vmul.f32 %v1648_v12, %v1621_v51  ;;  %v6194_v51 = vld [vmem:[#allocation47_spill] sm:$0xff]  ;;  %v1630_v43 = vld [vmem:[#allocation4 + $0x58] sm:$0xff] }
 0x582   : > { %v1885_v2 = vadd.f32 %v6186_v44, %v1716_v3 }
 0x583   : > { %v1886_v55 = vadd.f32 %v6187_v30, %v1717_v11  ;;  %v1658_v36 = vpop.permute.xlu0 %1657 }
 0x584   : > { %1901 = vst [vmem:[#allocation4 + $0x8] sm:$0xff] %v1885_v2  ;;  %v1719_v41 = vmul.f32 %v1658_v36, %v1623_v61  ;;  %v1653_v56 = vpop.permute.xlu1 %1652  ;;  %v1633_v2 = vld [vmem:[#allocation4 + $0x70] sm:$0xff]  ;;  %v6197_v36 = vld [vmem:[#allocation49_spill] sm:$0xff] }
 0x585   : > { %1902 = vst [vmem:[#allocation4 + $0x10] sm:$0xff] %v1886_v55  ;;  %v1718_v16 = vmul.f32 %v1653_v56, %v1622_v1  ;;  %2536 = vperm.xlu0 %3905, %v5747_v0   ;;  %v6196_v1 = vld [vmem:[#allocation52_spill] sm:$0xff]  ;;  %v1632_v55 = vld [vmem:[#allocation4 + $0x68] sm:$0xff] }
 0x586   : > { %v1888_v9 = vadd.f32 %v6188_v32, %v1719_v41 }
 0x587   : > { %v1887_v47 = vadd.f32 %v6189_v24, %v1718_v16  ;;  %v1668_v58 = vpop.permute.xlu0 %1667  ;;  %v1634_v24 = vld [vmem:[#allocation4 + $0x78] sm:$0xff] }
 0x588   : > { %1904 = vst [vmem:[#allocation4 + $0x20] sm:$0xff] %v1888_v9  ;;  %v1721_v21 = vmul.f32 %v1668_v58, %v1625_v57  ;;  %v1663_v40 = vpop.permute.xlu1 %1662  ;;  %v6198_v9 = vld [vmem:[#allocation51_spill] sm:$0xff] }
 0x589   : > { %1903 = vst [vmem:[#allocation4 + $0x18] sm:$0xff] %v1887_v47  ;;  %v1720_v5 = vmul.f32 %v1663_v40, %v1624_v27  ;;  %2541 = vperm.xlu1 %3906, %v5752_v28   ;;  %v6199_v47 = vld [vmem:[#allocation54_spill] sm:$0xff] }
 0x58a   : > { %v1890_v7 = vadd.f32 %v6190_v60, %v1721_v21 }
 0x58b   : > { %v1889_v46 = vadd.f32 %v6191_v19, %v1720_v5  ;;  %v1678_v22 = vpop.permute.xlu0 %1677  ;;  %v6200_v5 = vld [vmem:[#allocation53_spill] sm:$0xff] }
 0x58c   : > { %1906 = vst [vmem:[#allocation4 + $0x30] sm:$0xff] %v1890_v7  ;;  %v1723_v54 = vmul.f32 %v1678_v22, %v1627_v31  ;;  %v1673_v17 = vpop.permute.xlu1 %1672 }
 0x58d   : > { %1905 = vst [vmem:[#allocation4 + $0x28] sm:$0xff] %v1889_v46  ;;  %v1722_v6 = vmul.f32 %v1673_v17, %v1626_v20 }
 0x58e   : > { %v1892_v53 = vadd.f32 %v6192_v37, %v1723_v54 }
 0x58f   : > { %v1891_v52 = vadd.f32 %v6193_v4, %v1722_v6  ;;  %v1688_v35 = vpop.permute.xlu0 %1687 }
 0x590   : > { %1908 = vst [vmem:[#allocation4 + $0x40] sm:$0xff] %v1892_v53  ;;  %v1725_v10 = vmul.f32 %v1688_v35, %v1629_v25  ;;  %v1683_v14 = vpop.permute.xlu1 %1682  ;;  %v2353_v53 = vld [vmem:[#allocation3 + $0x90] sm:$0xff] }
 0x591   : > { %1907 = vst [vmem:[#allocation4 + $0x38] sm:$0xff] %v1891_v52  ;;  %v1724_v15 = vmul.f32 %v1683_v14, %v1628_v59  ;;  %v2369_v59 = vmul.f32 %v5644_v42, %v2353_v53  ;;  %v2351_v52 = vld [vmem:[#allocation3 + $0x80] sm:$0xff]  ;;  %v2358_v42 = vld [vmem:[#allocation3 + $0xb8] sm:$0xff] }
 0x592   : > { %v1894_v8 = vadd.f32 %v6194_v51, %v1725_v10  ;;  %v2367_v14 = vmul.f32 %v5630_v23, %v2351_v52 }
 0x593   : > { %v1893_v3 = vadd.f32 %v6195_v62, %v1724_v15  ;;  %v1698_v12 = vpop.permute.xlu0 %1697 }
 0x594   : > { %1910 = vst [vmem:[#allocation4 + $0x50] sm:$0xff] %v1894_v8  ;;  %v1727_v11 = vmul.f32 %v1698_v12, %v1631_v39  ;;  %v1693_v61 = vpop.permute.xlu1 %1692  ;;  %v2354_v39 = vld [vmem:[#allocation3 + $0x98] sm:$0xff]  ;;  %v2374_v12 = vmul.f32 %v5681_v26, %v2358_v42 }
 0x595   : > { %1909 = vst [vmem:[#allocation4 + $0x48] sm:$0xff] %v1893_v3  ;;  %v1726_v44 = vmul.f32 %v1693_v61, %v1630_v43  ;;  %v2370_v43 = vmul.f32 %v5655_v34, %v2354_v39  ;;  %v2356_v61 = vld [vmem:[#allocation3 + $0xa8] sm:$0xff] }
 0x596   : > { %v1896_v30 = vadd.f32 %v6196_v1, %v1727_v11  ;;  %v2372_v1 = vmul.f32 %v5666_v38, %v2356_v61  ;;  %v2450_v61 = vld [vmem:[#allocation4 + $0x90] sm:$0xff] }
 0x597   : > { %v1895_v41 = vadd.f32 %v6197_v36, %v1726_v44  ;;  %v1708_v56 = vpop.permute.xlu0 %1707 }
 0x598   : > { %1912 = vst [vmem:[#allocation4 + $0x60] sm:$0xff] %v1896_v30  ;;  %v1729_v16 = vmul.f32 %v1708_v56, %v1633_v2  ;;  %v1703_v57 = vpop.permute.xlu1 %1702  ;;  %v2352_v2 = vld [vmem:[#allocation3 + $0x88] sm:$0xff]  ;;  %v2357_v56 = vld [vmem:[#allocation3 + $0xb0] sm:$0xff] }
 0x599   : > { %1911 = vst [vmem:[#allocation4 + $0x58] sm:$0xff] %v1895_v41  ;;  %v1728_v32 = vmul.f32 %v1703_v57, %v1632_v55  ;;  %v2368_v34 = vmul.f32 %v5620_v63, %v2352_v2  ;;  %v2362_v55 = vld [vmem:[#allocation3 + $0xd8] sm:$0xff] }
 0x59a   : > { %v1898_v27 = vadd.f32 %v6198_v9, %v1729_v16  ;;  %v2378_v26 = vmul.f32 %v5697_v13, %v2362_v55  ;;  %v2360_v9 = vld [vmem:[#allocation3 + $0xc8] sm:$0xff]  ;;  %v2366_v13 = vld [vmem:[#allocation3 + $0xf8] sm:$0xff] }
 0x59b   : > { %v1897_v58 = vadd.f32 %v6199_v47, %v1728_v32  ;;  %v5766_v60 = vpop.permute.xlu0 %2471  ;;  %v2373_v32 = vmul.f32 %v5647_v33, %v2357_v56  ;;  %v2376_v63 = vmul.f32 %v5702_v48, %v2360_v9  ;;  %v2382_v33 = vmul.f32 %v5752_v28, %v2366_v13  ;;  %v2364_v48 = vld [vmem:[#allocation3 + $0xe8] sm:$0xff] }
 0x59c   : > { %1914 = vst [vmem:[#allocation4 + $0x70] sm:$0xff] %v1898_v27  ;;  %v1713_v21 = vpop.permute.xlu1 %1712 }
 0x59d   : > { %1913 = vst [vmem:[#allocation4 + $0x68] sm:$0xff] %v1897_v58  ;;  %v1730_v40 = vmul.f32 %v1713_v21, %v1634_v24  ;;  %v2355_v24 = vld [vmem:[#allocation3 + $0xa0] sm:$0xff] }
 0x59e   : > { %v2371_v21 = vmul.f32 %v5633_v29, %v2355_v24  ;;  %v2380_v29 = vmul.f32 %v5707_v45, %v2364_v48  ;;  %v2448_v45 = vld [vmem:[#allocation4 + $0x80] sm:$0xff] }
 0x59f   : > { %v1899_v31 = vadd.f32 %v6200_v5, %v1730_v40  ;;  %v5770_v20 = vpop.permute.xlu0 %2486 }
 0x5a0   : > { %v5768_v7 = vpop.permute.xlu1 %2466 }
 0x5a1   : > { %1915 = vst [vmem:[#allocation4 + $0x78] sm:$0xff] %v1899_v31  ;;  %v2361_v31 = vld [vmem:[#allocation3 + $0xd0] sm:$0xff]  ;;  %v2544_v55 = vmul.f32 %v5768_v7, %v2448_v45  ;;  %v2455_v7 = vld [vmem:[#allocation4 + $0xb8] sm:$0xff] }
 0x5a3   : > { %v5774_v46 = vpop.permute.xlu0 %2496 }
 0x5a4   : > { %v5772_v19 = vpop.permute.xlu1 %2476 }
 0x5a7   : > { %v5778_v54 = vpop.permute.xlu0 %2516 }
 0x5a8   : > { %v5776_v22 = vpop.permute.xlu1 %2481 }
 0x5ab   : > { %v5782_v6 = vpop.permute.xlu0 %2506 }
 0x5ac   : > { %v5780_v17 = vpop.permute.xlu1 %2491 }
 0x5af   : > { %v5786_v37 = vpop.permute.xlu0 %2526 }
 0x5b0   : > { %v5784_v25 = vpop.permute.xlu1 %2501 }
 0x5b4   : > { %v5789_v35 = vpop.permute.xlu1 %2521 }
 0x5b8   : > { %v5793_v8 = vpop.permute.xlu1 %2511 }
 0x5bc   : > { %v5799_v44 = vpop.permute.xlu1 %2531 }
 0x5dc   : > { %v2388_v4 = vpop.xlane.xlu0 %2387 }
 0x5dd   : > { %v2417_v10 = vadd.f32 %v2388_v4, %v2369_v59  ;;  %v2377_v4 = vmul.f32 %v5657_v50, %v2361_v31 }
 0x5df   : > { %2433 = vst.msk [vmem:[#allocation3 + $0x90] sm:$0xff] %vm1602_vm10, %v2417_v10 }
 0x5e0   : > { %v2384_v15 = vpop.xlane.xlu0 %2383 }
 0x5e1   : > { %v2415_v51 = vadd.f32 %v2384_v15, %v2367_v14  ;;  %v2359_v14 = vld [vmem:[#allocation3 + $0xc0] sm:$0xff] }
 0x5e3   : > { %2431 = vst.msk [vmem:[#allocation3 + $0x80] sm:$0xff] %vm1602_vm10, %v2415_v51  ;;  %v2375_v51 = vmul.f32 %v5668_v49, %v2359_v14  ;;  %v2451_v49 = vld [vmem:[#allocation4 + $0x98] sm:$0xff] }
 0x5e4   : > { %v2390_v62 = vpop.xlane.xlu0 %2389 }
 0x5e5   : > { %v2418_v3 = vadd.f32 %v2390_v62, %v2370_v43  ;;  %v2365_v62 = vld [vmem:[#allocation3 + $0xf0] sm:$0xff] }
 0x5e6   : > { %v2381_v50 = vmul.f32 %v5747_v0, %v2365_v62  ;;  %v2547_v0 = vmul.f32 %v5776_v22, %v2451_v49 }
 0x5e7   : > { %2434 = vst.msk [vmem:[#allocation3 + $0x98] sm:$0xff] %vm1602_vm10, %v2418_v3 }
 0x5e8   : > { %v2398_v11 = vpop.xlane.xlu0 %2397 }
 0x5e9   : > { %v2422_v23 = vadd.f32 %v2398_v11, %v2374_v12  ;;  %v2363_v12 = vld [vmem:[#allocation3 + $0xe0] sm:$0xff] }
 0x5eb   : > { %2438 = vst.msk [vmem:[#allocation3 + $0xb8] sm:$0xff] %vm1602_vm10, %v2422_v23  ;;  %v2379_v23 = vmul.f32 %v5685_v18, %v2363_v12 }
 0x5ec   : > { %v2394_v30 = vpop.xlane.xlu0 %2393 }
 0x5ed   : > { %v2420_v36 = vadd.f32 %v2394_v30, %v2372_v1  ;;  %v2386_v41 = vpop.xlane.xlu1 %2385  ;;  %v2449_v1 = vld [vmem:[#allocation4 + $0x88] sm:$0xff]  ;;  %v2546_v30 = vmul.f32 %v5772_v19, %v2450_v61  ;;  %v2454_v19 = vld [vmem:[#allocation4 + $0xb0] sm:$0xff] }
 0x5ee   : > { %v2416_v16 = vadd.f32 %v2386_v41, %v2368_v34  ;;  %v2550_v22 = vmul.f32 %v5774_v46, %v2454_v19  ;;  %v2459_v46 = vld [vmem:[#allocation4 + $0xd8] sm:$0xff] }
 0x5ef   : > { %2436 = vst.msk [vmem:[#allocation3 + $0xa8] sm:$0xff] %vm1602_vm10, %v2420_v36 }
 0x5f0   : > { %2432 = vst.msk [vmem:[#allocation3 + $0x88] sm:$0xff] %vm1602_vm10, %v2416_v16  ;;  %v2406_v57 = vpop.xlane.xlu0 %2405  ;;  %v2545_v16 = vmul.f32 %v5766_v60, %v2449_v1  ;;  %v2551_v60 = vmul.f32 %v5784_v25, %v2455_v7 }
 0x5f1   : > { %v2426_v27 = vadd.f32 %v2406_v57, %v2378_v26  ;;  %v2396_v38 = vpop.xlane.xlu1 %2395 }
 0x5f2   : > { %v2421_v47 = vadd.f32 %v2396_v38, %v2373_v32  ;;  %v2453_v38 = vld [vmem:[#allocation4 + $0xa8] sm:$0xff] }
 0x5f3   : > { %2442 = vst.msk [vmem:[#allocation3 + $0xd8] sm:$0xff] %vm1602_vm10, %v2426_v27  ;;  %v2452_v27 = vld [vmem:[#allocation4 + $0xa0] sm:$0xff] }
 0x5f4   : > { %2437 = vst.msk [vmem:[#allocation3 + $0xb0] sm:$0xff] %vm1602_vm10, %v2421_v47  ;;  %v2402_v58 = vpop.xlane.xlu0 %2401  ;;  %v2548_v24 = vmul.f32 %v5770_v20, %v2452_v27 }
 0x5f5   : > { %v2424_v40 = vadd.f32 %v2402_v58, %v2376_v63  ;;  %v2392_v5 = vpop.xlane.xlu1 %2391 }
 0x5f6   : > { %v2419_v53 = vadd.f32 %v2392_v5, %v2371_v21  ;;  %v2549_v21 = vmul.f32 %v5780_v17, %v2453_v38  ;;  %v2555_v17 = vmul.f32 %v5789_v35, %v2459_v46 }
 0x5f7   : > { %2440 = vst.msk [vmem:[#allocation3 + $0xc8] sm:$0xff] %vm1602_vm10, %v2424_v40 }
 0x5f8   : > { %2435 = vst.msk [vmem:[#allocation3 + $0xa0] sm:$0xff] %vm1602_vm10, %v2419_v53  ;;  %v2414_v59 = vpop.xlane.xlu0 %2413  ;;  %v2458_v53 = vld [vmem:[#allocation4 + $0xd0] sm:$0xff] }
 0x5f9   : > { %v2430_v52 = vadd.f32 %v2414_v59, %v2382_v33  ;;  %v2404_v10 = vpop.xlane.xlu1 %2403  ;;  %v2456_v59 = vld [vmem:[#allocation4 + $0xc0] sm:$0xff]  ;;  %v2554_v20 = vmul.f32 %v5778_v54, %v2458_v53 }
 0x5fa   : > { %v2425_v15 = vadd.f32 %v2404_v10, %v2377_v4  ;;  %v2457_v4 = vld [vmem:[#allocation4 + $0xc8] sm:$0xff]  ;;  %v2552_v25 = vmul.f32 %v5782_v6, %v2456_v59  ;;  %v2460_v54 = vld [vmem:[#allocation4 + $0xe0] sm:$0xff] }
 0x5fb   : > { %2446 = vst.msk [vmem:[#allocation3 + $0xf8] sm:$0xff] %vm1602_vm10, %v2430_v52  ;;  %v2553_v14 = vmul.f32 %v5793_v8, %v2457_v4 }
 0x5fc   : > { %2441 = vst.msk [vmem:[#allocation3 + $0xd0] sm:$0xff] %vm1602_vm10, %v2425_v15  ;;  %v2410_v39 = vpop.xlane.xlu0 %2409 }
 0x5fd   : > { %v2428_v28 = vadd.f32 %v2410_v39, %v2380_v29  ;;  %v2400_v43 = vpop.xlane.xlu1 %2399 }
 0x5fe   : > { %v2423_v42 = vadd.f32 %v2400_v43, %v2375_v51 }
 0x5ff   : > { %2444 = vst.msk [vmem:[#allocation3 + $0xe8] sm:$0xff] %vm1602_vm10, %v2428_v28  ;;  %v2462_v28 = vld [vmem:[#allocation4 + $0xf0] sm:$0xff] }
 0x600   : > { %2439 = vst.msk [vmem:[#allocation3 + $0xc0] sm:$0xff] %vm1602_vm10, %v2423_v42  ;;  %v2463_v42 = vld [vmem:[#allocation4 + $0xf8] sm:$0xff] }
 0x601   : > { %v2412_v3 = vpop.xlane.xlu1 %2411 }
 0x602   : > { %v2429_v11 = vadd.f32 %v2412_v3, %v2381_v50  ;;  %v2461_v50 = vld [vmem:[#allocation4 + $0xe8] sm:$0xff]  ;;  %v2556_v3 = vmul.f32 %v5786_v37, %v2460_v54 }
 0x603   : > { %v2557_v45 = vmul.f32 %v5799_v44, %v2461_v50 }
 0x604   : > { %2445 = vst.msk [vmem:[#allocation3 + $0xf0] sm:$0xff] %vm1602_vm10, %v2429_v11  ;;  %v2537_v43 = vpop.permute.xlu0 %2536 }
 0x605   : > { %v2408_v2 = vpop.xlane.xlu1 %2407  ;;  %v2558_v35 = vmul.f32 %v2537_v43, %v2462_v28 }
 0x606   : > { %v2427_v34 = vadd.f32 %v2408_v2, %v2379_v23 }
 0x607   : > { %v3783_v36 = vpop.f32.mrb[16].mxu0 }
 0x608   : > { %2443 = vst.msk [vmem:[#allocation3 + $0xe0] sm:$0xff] %vm1602_vm10, %v2427_v34  ;;  %v2667_v41 = vadd.f32 %v3783_v36, %v2546_v30  ;;  %v2602_v56 = vpop.f32.mrb[17].mxu0 }
 0x609   : > { %v2665_v26 = vadd.f32 %v2602_v56, %v2544_v55  ;;  %v3784_v57 = vpop.f32.mrb[18].mxu0  ;;  %v2542_v6 = vpop.permute.xlu1 %2541 }
 0x60a   : > { %2683 = vst [vmem:[#allocation4 + $0x90] sm:$0xff] %v2667_v41  ;;  %v2668_v18 = vadd.f32 %v3784_v57, %v2547_v0  ;;  %v2605_v32 = vpop.f32.mrb[19].mxu0  ;;  %v2559_v8 = vmul.f32 %v2542_v6, %v2463_v42 }
 0x60b   : > { %2681 = vst [vmem:[#allocation4 + $0x80] sm:$0xff] %v2665_v26  ;;  %v2666_v9 = vadd.f32 %v2605_v32, %v2545_v16 }
 0x60c   : > { %2684 = vst [vmem:[#allocation4 + $0x98] sm:$0xff] %v2668_v18 }
 0x60d   : > { %2682 = vst [vmem:[#allocation4 + $0x88] sm:$0xff] %v2666_v9 }
 0x610   : > { %v3787_v47 = vpop.f32.mrb[20].mxu0 }
 0x611   : > { %v2671_v63 = vadd.f32 %v3787_v47, %v2550_v22  ;;  %v2618_v58 = vpop.f32.mrb[21].mxu0 }
 0x612   : > { %v2669_v13 = vadd.f32 %v2618_v58, %v2548_v24  ;;  %v3788_v40 = vpop.f32.mrb[22].mxu0 }
 0x613   : > { %2687 = vst [vmem:[#allocation4 + $0xb0] sm:$0xff] %v2671_v63  ;;  %v2672_v5 = vadd.f32 %v3788_v40, %v2551_v60  ;;  %v2621_v31 = vpop.f32.mrb[23].mxu0 }
 0x614   : > { %2685 = vst [vmem:[#allocation4 + $0xa0] sm:$0xff] %v2669_v13  ;;  %v2670_v33 = vadd.f32 %v2621_v31, %v2549_v21 }
 0x615   : > { %2688 = vst [vmem:[#allocation4 + $0xb8] sm:$0xff] %v2672_v5 }
 0x616   : > { %2686 = vst [vmem:[#allocation4 + $0xa8] sm:$0xff] %v2670_v33 }
 0x618   : > { %v3791_v48 = vpop.f32.mrb[24].mxu0 }
 0x619   : > { %v2675_v52 = vadd.f32 %v3791_v48, %v2554_v20  ;;  %v2634_v10 = vpop.f32.mrb[25].mxu0 }
 0x61a   : > { %v2673_v15 = vadd.f32 %v2634_v10, %v2552_v25  ;;  %v3792_v29 = vpop.f32.mrb[26].mxu0 }
 0x61b   : > { %2691 = vst [vmem:[#allocation4 + $0xd0] sm:$0xff] %v2675_v52  ;;  %v2676_v39 = vadd.f32 %v3792_v29, %v2555_v17  ;;  %v2637_v51 = vpop.f32.mrb[27].mxu0 }
 0x61c   : > { %2689 = vst [vmem:[#allocation4 + $0xc0] sm:$0xff] %v2673_v15  ;;  %v2674_v62 = vadd.f32 %v2637_v51, %v2553_v14 }
 0x61d   : > { %2692 = vst [vmem:[#allocation4 + $0xd8] sm:$0xff] %v2676_v39 }
 0x61e   : > { %2690 = vst [vmem:[#allocation4 + $0xc8] sm:$0xff] %v2674_v62 }
 0x620   : > { %v3795_v12 = vpop.f32.mrb[28].mxu0 }
 0x621   : > { %v2679_v11 = vadd.f32 %v3795_v12, %v2558_v35  ;;  %v2650_v61 = vpop.f32.mrb[29].mxu0 }
 0x622   : > { %v2677_v23 = vadd.f32 %v2650_v61, %v2556_v3  ;;  %v3796_v49 = vpop.f32.mrb[30].mxu0 }
 0x623   : > { %2695 = vst [vmem:[#allocation4 + $0xf0] sm:$0xff] %v2679_v11  ;;  %v2680_v2 = vadd.f32 %v3796_v49, %v2559_v8  ;;  %v2653_v1 = vpop.f32.mrb[31].mxu0 }
 0x624   : > { %2693 = vst [vmem:[#allocation4 + $0xe0] sm:$0xff] %v2677_v23  ;;  %v2678_v30 = vadd.f32 %v2653_v1, %v2557_v45 }
 0x625   : > { %2696 = vst [vmem:[#allocation4 + $0xf8] sm:$0xff] %v2680_v2 }
 0x626   : > { %2694 = vst [vmem:[#allocation4 + $0xe8] sm:$0xff] %v2678_v30 }
 0x627 PF: > { %p3528_p11 = scmp.ne.s32.totalorder %s4203_s22, 1 }
 0x628   : > { %v2719_v37 = vld [vmem:[#allocation3 + $0x10] sm:$0xff] (!%p3528_p11)  ;;  %v2717_v34 = vld [vmem:[#allocation3] sm:$0xff] (!%p3528_p11)  ;;  %v2720_v55 = vld [vmem:[#allocation3 + $0x18] sm:$0xff] (!%p3528_p11)  ;;  %v4240_v36 = vmov (!%p3528_p11), 0  }
 0x629   : > { %2716 = sbr.rel (%p3528_p11) target bundleno = 1782 (0x6f6), region = 172  ;;  %4068 = vset.pattern.permute.xlu1 (!%p3528_p11), %v4240_v36  ;;  %4067 = vset.pattern.permute.xlu0 (!%p3528_p11), %v4240_v36  ;;  %4069 = vrcp.f32 (!%p3528_p11), %v2719_v37  ;;  %v2718_v44 = vld [vmem:[#allocation3 + $0x8] sm:$0xff] (!%p3528_p11)  ;;  %v2721_v41 = vld [vmem:[#allocation3 + $0x20] sm:$0xff] (!%p3528_p11)  ;;  %v2724_v56 = vld [vmem:[#allocation3 + $0x38] sm:$0xff] (!%p3528_p11) }
 0x62a   : > { %4071 = vrcp.f32 (!%p3528_p11), %v2717_v34  ;;  %v2722_v0 = vld [vmem:[#allocation3 + $0x28] sm:$0xff] (!%p3528_p11)  ;;  %v2723_v16 = vld [vmem:[#allocation3 + $0x30] sm:$0xff] (!%p3528_p11)  ;;  %v2725_v9 = vld [vmem:[#allocation3 + $0x40] sm:$0xff] (!%p3528_p11) }
 0x62b   : > { %4073 = vrcp.f32 (!%p3528_p11), %v2720_v55  ;;  %v2726_v18 = vld [vmem:[#allocation3 + $0x48] sm:$0xff] (!%p3528_p11)  ;;  %v2728_v27 = vld [vmem:[#allocation3 + $0x58] sm:$0xff] (!%p3528_p11)  ;;  %v2727_v22 = vld [vmem:[#allocation3 + $0x50] sm:$0xff] (!%p3528_p11) }
 0x62c   : > { %4075 = vrcp.f32 (!%p3528_p11), %v2718_v44  ;;  %v2730_v24 = vld [vmem:[#allocation3 + $0x68] sm:$0xff] (!%p3528_p11)  ;;  %v2729_v60 = vld [vmem:[#allocation3 + $0x60] sm:$0xff] (!%p3528_p11)  ;;  %v2732_v58 = vld [vmem:[#allocation3 + $0x78] sm:$0xff] (!%p3528_p11) }
 0x62d   : > { %4077 = vrcp.f32 (!%p3528_p11), %v2722_v0  ;;  %v2731_v13 = vld [vmem:[#allocation3 + $0x70] sm:$0xff] (!%p3528_p11)  ;;  %v2943_v5 = vld [vmem:[#allocation3 + $0x88] sm:$0xff] (!%p3528_p11)  ;;  %v2942_v53 = vld [vmem:[#allocation3 + $0x80] sm:$0xff] (!%p3528_p11) }
 0x62e   : > { %4079 = vrcp.f32 (!%p3528_p11), %v2721_v41  ;;  %v2945_v59 = vld [vmem:[#allocation3 + $0x98] sm:$0xff] (!%p3528_p11)  ;;  %v2944_v20 = vld [vmem:[#allocation3 + $0x90] sm:$0xff] (!%p3528_p11)  ;;  %v2947_v25 = vld [vmem:[#allocation3 + $0xa8] sm:$0xff] (!%p3528_p11) }
 0x62f   : > { %4081 = vrcp.f32 (!%p3528_p11), %v2724_v56  ;;  %v2946_v17 = vld [vmem:[#allocation3 + $0xa0] sm:$0xff] (!%p3528_p11)  ;;  %v2949_v10 = vld [vmem:[#allocation3 + $0xb8] sm:$0xff] (!%p3528_p11)  ;;  %v2948_v15 = vld [vmem:[#allocation3 + $0xb0] sm:$0xff] (!%p3528_p11) }
 0x630   : > { %4083 = vrcp.f32 %v2723_v16  ;;  %v2951_v39 = vld [vmem:[#allocation3 + $0xc8] sm:$0xff]  ;;  %v2950_v28 = vld [vmem:[#allocation3 + $0xc0] sm:$0xff]  ;;  %v2953_v62 = vld [vmem:[#allocation3 + $0xd8] sm:$0xff] }
 0x631   : > { %4085 = vrcp.f32 %v2726_v18  ;;  %v2952_v42 = vld [vmem:[#allocation3 + $0xd0] sm:$0xff]  ;;  %v2955_v50 = vld [vmem:[#allocation3 + $0xe8] sm:$0xff]  ;;  %v2954_v3 = vld [vmem:[#allocation3 + $0xe0] sm:$0xff] }
 0x632   : > { %4087 = vrcp.f32 %v2725_v9  ;;  %v2957_v8 = vld [vmem:[#allocation3 + $0xf8] sm:$0xff]  ;;  %v2956_v61 = vld [vmem:[#allocation3 + $0xf0] sm:$0xff]  ;;  %v2749_v55 = vld [vmem:[#allocation4] sm:$0xff] }
 0x633   : > { %v4070_v26 = vpop.eup %4069  ;;  %4089 = vrcp.f32 %v2728_v27  ;;  %v2751_v34 = vld [vmem:[#allocation4 + $0x10] sm:$0xff]  ;;  %v2752_v56 = vld [vmem:[#allocation4 + $0x18] sm:$0xff]  ;;  %v2754_v27 = vld [vmem:[#allocation4 + $0x28] sm:$0xff] }
 0x634   : > { %v4072_v57 = vpop.eup %4071  ;;  %2777 = vperm.xlu1 %4068, %v4070_v26   ;;  %4091 = vrcp.f32 %v2727_v22  ;;  %v2750_v26 = vld [vmem:[#allocation4 + $0x8] sm:$0xff]  ;;  %v2753_v22 = vld [vmem:[#allocation4 + $0x20] sm:$0xff] }
 0x635   : > { %v4074_v32 = vpop.eup %4073  ;;  %2767 = vperm.xlu0 %4067, %v4072_v57   ;;  %4093 = vrcp.f32 %v2730_v24 }
 0x636   : > { %v4076_v19 = vpop.eup %4075  ;;  %4095 = vrcp.f32 %v2729_v60 }
 0x637   : > { %v4078_v7 = vpop.eup %4077  ;;  %4097 = vrcp.f32 %v2732_v58  ;;  %v2756_v58 = vld [vmem:[#allocation4 + $0x38] sm:$0xff] }
 0x638   : > { %2782 = vperm.xlu1 %4068, %v4074_v32   ;;  %v4080_v38 = vpop.eup %4079  ;;  %4099 = vrcp.f32 %v2731_v13  ;;  %v2755_v13 = vld [vmem:[#allocation4 + $0x30] sm:$0xff] }
 0x639   : > { %2772 = vperm.xlu0 %4067, %v4076_v19   ;;  %v4082_v47 = vpop.eup %4081  ;;  %4101 = vrcp.f32 %v2943_v5 }
 0x63a   : > { %v4084_v63 = vpop.eup %4083  ;;  %4103 = vrcp.f32 %v2942_v53 }
 0x63b   : > { %v4086_v21 = vpop.eup %4085  ;;  %4105 = vrcp.f32 %v2945_v59  ;;  %v2758_v59 = vld [vmem:[#allocation4 + $0x48] sm:$0xff] }
 0x63c   : > { %2792 = vperm.xlu1 %4068, %v4078_v7   ;;  %v4088_v40 = vpop.eup %4087  ;;  %4107 = vrcp.f32 %v2944_v20  ;;  %v2757_v20 = vld [vmem:[#allocation4 + $0x40] sm:$0xff] }
 0x63d   : > { %2787 = vperm.xlu0 %4067, %v4080_v38   ;;  %v4090_v31 = vpop.eup %4089  ;;  %4109 = vrcp.f32 %v2947_v25 }
 0x63e   : > { %v4092_v33 = vpop.eup %4091  ;;  %4111 = vrcp.f32 %v2946_v17 }
 0x63f   : > { %v4094_v46 = vpop.eup %4093  ;;  %4113 = vrcp.f32 %v2949_v10  ;;  %v2760_v10 = vld [vmem:[#allocation4 + $0x58] sm:$0xff] }
 0x640   : > { %2802 = vperm.xlu1 %4068, %v4082_v47   ;;  %v4096_v4 = vpop.eup %4095  ;;  %4115 = vrcp.f32 %v2948_v15  ;;  %v2759_v15 = vld [vmem:[#allocation4 + $0x50] sm:$0xff] }
 0x641   : > { %2797 = vperm.xlu0 %4067, %v4084_v63   ;;  %v4098_v48 = vpop.eup %4097  ;;  %4117 = vrcp.f32 %v2951_v39 }
 0x642   : > { %v4100_v52 = vpop.eup %4099  ;;  %4119 = vrcp.f32 %v2950_v28 }
 0x643   : > { %v4102_v14 = vpop.eup %4101  ;;  %4121 = vrcp.f32 %v2953_v62  ;;  %v2762_v62 = vld [vmem:[#allocation4 + $0x68] sm:$0xff] }
 0x644   : > { %2812 = vperm.xlu1 %4068, %v4086_v21   ;;  %v4104_v29 = vpop.eup %4103  ;;  %4123 = vrcp.f32 %v2952_v42  ;;  %v2761_v42 = vld [vmem:[#allocation4 + $0x60] sm:$0xff] }
 0x645   : > { %2807 = vperm.xlu0 %4067, %v4088_v40   ;;  %v4106_v51 = vpop.eup %4105  ;;  %4125 = vrcp.f32 %v2955_v50 }
 0x646   : > { %v4108_v43 = vpop.eup %4107  ;;  %4127 = vrcp.f32 %v2954_v3 }
 0x647   : > { %v4110_v54 = vpop.eup %4109  ;;  %4129 = vrcp.f32 %v2957_v8  ;;  %v2764_v8 = vld [vmem:[#allocation4 + $0x78] sm:$0xff] }
 0x648   : > { %2822 = vperm.xlu1 %4068, %v4090_v31   ;;  %v4112_v6 = vpop.eup %4111  ;;  %4131 = vrcp.f32 %v2956_v61  ;;  %v2763_v61 = vld [vmem:[#allocation4 + $0x70] sm:$0xff] }
 0x649   : > { %2817 = vperm.xlu0 %4067, %v4092_v33   ;;  %v4114_v35 = vpop.eup %4113 }
 0x64a   : > { %v4116_v12 = vpop.eup %4115 }
 0x64b   : > { %v4118_v11 = vpop.eup %4117 }
 0x64c   : > { %2832 = vperm.xlu1 %4068, %v4094_v46   ;;  %v4120_v45 = vpop.eup %4119 }
 0x64d   : > { %2827 = vperm.xlu0 %4067, %v4096_v4   ;;  %v4122_v23 = vpop.eup %4121 }
 0x64e   : > { %v4124_v49 = vpop.eup %4123 }
 0x64f   : > { %v4126_v2 = vpop.eup %4125 }
 0x650   : > { %2842 = vperm.xlu1 %4068, %v4098_v48   ;;  %v4128_v1 = vpop.eup %4127 }
 0x651   : > { %2837 = vperm.xlu0 %4067, %v4100_v52   ;;  %v4130_v30 = vpop.eup %4129 }
 0x652   : > { %v4132_v37 = vpop.eup %4131 }
 0x654   : > { %2998 = vperm.xlu1 %4068, %v4102_v14  }
 0x655   : > { %2993 = vperm.xlu0 %4067, %v4104_v29  }
 0x658   : > { %3008 = vperm.xlu1 %4068, %v4106_v51  }
 0x659   : > { %3003 = vperm.xlu0 %4067, %v4108_v43  }
 0x65c   : > { %3018 = vperm.xlu1 %4068, %v4110_v54  }
 0x65d   : > { %3013 = vperm.xlu0 %4067, %v4112_v6  }
 0x660   : > { %3028 = vperm.xlu1 %4068, %v4114_v35  }
 0x661   : > { %3023 = vperm.xlu0 %4067, %v4116_v12  }
 0x664   : > { %3038 = vperm.xlu1 %4068, %v4118_v11  }
 0x665   : > { %3033 = vperm.xlu0 %4067, %v4120_v45  }
 0x668   : > { %3048 = vperm.xlu1 %4068, %v4122_v23  }
 0x669   : > { %3043 = vperm.xlu0 %4067, %v4124_v49  }
 0x66c   : > { %3058 = vperm.xlu1 %4068, %v4126_v2  }
 0x66d   : > { %3053 = vperm.xlu0 %4067, %v4128_v1  }
 0x670   : > { %3068 = vperm.xlu1 %4068, %v4130_v30   ;;  %v2976_v30 = vld [vmem:[#allocation4 + $0x88] sm:$0xff] }
 0x671   : > { %3063 = vperm.xlu0 %4067, %v4132_v37  }
 0x6b3   : > { %v2778_v36 = vpop.permute.xlu1 %2777 }
 0x6b4   : > { %v2847_v44 = vmul.f32 %v2778_v36, %v2751_v34  ;;  %v2768_v0 = vpop.permute.xlu0 %2767  ;;  %v2975_v34 = vld [vmem:[#allocation4 + $0x80] sm:$0xff] }
 0x6b5   : > { %v2845_v41 = vmul.f32 %v2768_v0, %v2749_v55 }
 0x6b6   : > { %v3574_v16 = vpack.c.bf16 %v2847_v44, %v2847_v44 }
 0x6b7   : > { %v3572_v57 = vpack.c.bf16 %v2845_v41, %v2845_v41  ;;  %v2783_v18 = vpop.permute.xlu1 %2782 }
 0x6b8   : > { %2927 = vst [vmem:[%s4520_s18 + $0x10] sm:$0xf] %v3574_v16  ;;  %v2848_v32 = vmul.f32 %v2783_v18, %v2752_v56  ;;  %v2773_v9 = vpop.permute.xlu0 %2772  ;;  %v2978_v56 = vld [vmem:[#allocation4 + $0x98] sm:$0xff] }
 0x6b9   : > { %2925 = vst [vmem:[%s4520_s18] sm:$0xf] %v3572_v57  ;;  %v2846_v19 = vmul.f32 %v2773_v9, %v2750_v26  ;;  %v2977_v26 = vld [vmem:[#allocation4 + $0x90] sm:$0xff] }
 0x6ba   : > { %v3575_v7 = vpack.c.bf16 %v2848_v32, %v2848_v32 }
 0x6bb   : > { %v3573_v38 = vpack.c.bf16 %v2846_v19, %v2846_v19  ;;  %v2793_v24 = vpop.permute.xlu1 %2792 }
 0x6bc   : > { %2928 = vst [vmem:[%s4520_s18 + $0x18] sm:$0xf] %v3575_v7  ;;  %v2850_v47 = vmul.f32 %v2793_v24, %v2754_v27  ;;  %v2788_v60 = vpop.permute.xlu0 %2787  ;;  %v2980_v27 = vld [vmem:[#allocation4 + $0xa8] sm:$0xff] }
 0x6bd   : > { %2926 = vst [vmem:[%s4520_s18 + $0x8] sm:$0xf] %v3573_v38  ;;  %v2849_v63 = vmul.f32 %v2788_v60, %v2753_v22  ;;  %v2979_v22 = vld [vmem:[#allocation4 + $0xa0] sm:$0xff] }
 0x6be   : > { %v3577_v21 = vpack.c.bf16 %v2850_v47, %v2850_v47 }
 0x6bf   : > { %v3576_v40 = vpack.c.bf16 %v2849_v63, %v2849_v63  ;;  %v2803_v5 = vpop.permute.xlu1 %2802 }
 0x6c0   : > { %2930 = vst [vmem:[%s4520_s18 + $0x28] sm:$0xf] %v3577_v21  ;;  %v2852_v31 = vmul.f32 %v2803_v5, %v2756_v58  ;;  %v2798_v53 = vpop.permute.xlu0 %2797  ;;  %v2982_v58 = vld [vmem:[#allocation4 + $0xb8] sm:$0xff] }
 0x6c1   : > { %2929 = vst [vmem:[%s4520_s18 + $0x20] sm:$0xf] %v3576_v40  ;;  %v2851_v33 = vmul.f32 %v2798_v53, %v2755_v13  ;;  %v2981_v13 = vld [vmem:[#allocation4 + $0xb0] sm:$0xff] }
 0x6c2   : > { %v3579_v46 = vpack.c.bf16 %v2852_v31, %v2852_v31 }
 0x6c3   : > { %v3578_v4 = vpack.c.bf16 %v2851_v33, %v2851_v33  ;;  %v2813_v25 = vpop.permute.xlu1 %2812 }
 0x6c4   : > { %2932 = vst [vmem:[%s4520_s18 + $0x38] sm:$0xf] %v3579_v46  ;;  %v2854_v48 = vmul.f32 %v2813_v25, %v2758_v59  ;;  %v2808_v17 = vpop.permute.xlu0 %2807  ;;  %v2984_v59 = vld [vmem:[#allocation4 + $0xc8] sm:$0xff] }
 0x6c5   : > { %2931 = vst [vmem:[%s4520_s18 + $0x30] sm:$0xf] %v3578_v4  ;;  %v2853_v52 = vmul.f32 %v2808_v17, %v2757_v20  ;;  %v2983_v20 = vld [vmem:[#allocation4 + $0xc0] sm:$0xff] }
 0x6c6   : > { %v3581_v14 = vpack.c.bf16 %v2854_v48, %v2854_v48 }
 0x6c7   : > { %v3580_v29 = vpack.c.bf16 %v2853_v52, %v2853_v52  ;;  %v2823_v39 = vpop.permute.xlu1 %2822 }
 0x6c8   : > { %2934 = vst [vmem:[%s4520_s18 + $0x48] sm:$0xf] %v3581_v14  ;;  %v2856_v51 = vmul.f32 %v2823_v39, %v2760_v10  ;;  %v2818_v28 = vpop.permute.xlu0 %2817  ;;  %v2986_v10 = vld [vmem:[#allocation4 + $0xd8] sm:$0xff] }
 0x6c9   : > { %2933 = vst [vmem:[%s4520_s18 + $0x40] sm:$0xf] %v3580_v29  ;;  %v2855_v43 = vmul.f32 %v2818_v28, %v2759_v15  ;;  %v2985_v15 = vld [vmem:[#allocation4 + $0xd0] sm:$0xff] }
 0x6ca   : > { %v3583_v54 = vpack.c.bf16 %v2856_v51, %v2856_v51 }
 0x6cb   : > { %v3582_v6 = vpack.c.bf16 %v2855_v43, %v2855_v43  ;;  %v2833_v50 = vpop.permute.xlu1 %2832 }
 0x6cc   : > { %2936 = vst [vmem:[%s4520_s18 + $0x58] sm:$0xf] %v3583_v54  ;;  %v2858_v35 = vmul.f32 %v2833_v50, %v2762_v62  ;;  %v2828_v3 = vpop.permute.xlu0 %2827  ;;  %v2988_v62 = vld [vmem:[#allocation4 + $0xe8] sm:$0xff] }
 0x6cd   : > { %2935 = vst [vmem:[%s4520_s18 + $0x50] sm:$0xf] %v3582_v6  ;;  %v2857_v12 = vmul.f32 %v2828_v3, %v2761_v42  ;;  %v2987_v42 = vld [vmem:[#allocation4 + $0xe0] sm:$0xff] }
 0x6ce   : > { %v3585_v11 = vpack.c.bf16 %v2858_v35, %v2858_v35 }
 0x6cf   : > { %v3584_v45 = vpack.c.bf16 %v2857_v12, %v2857_v12  ;;  %v2843_v23 = vpop.permute.xlu1 %2842 }
 0x6d0   : > { %2938 = vst [vmem:[%s4520_s18 + $0x68] sm:$0xf] %v3585_v11  ;;  %v2860_v49 = vmul.f32 %v2843_v23, %v2764_v8  ;;  %v2838_v2 = vpop.permute.xlu0 %2837  ;;  %v2990_v8 = vld [vmem:[#allocation4 + $0xf8] sm:$0xff] }
 0x6d1   : > { %2937 = vst [vmem:[%s4520_s18 + $0x60] sm:$0xf] %v3584_v45  ;;  %v2859_v1 = vmul.f32 %v2838_v2, %v2763_v61  ;;  %v2989_v61 = vld [vmem:[#allocation4 + $0xf0] sm:$0xff] }
 0x6d2   : > { %v3587_v37 = vpack.c.bf16 %v2860_v49, %v2860_v49 }
 0x6d3   : > { %v3586_v55 = vpack.c.bf16 %v2859_v1, %v2859_v1  ;;  %v2999_v36 = vpop.permute.xlu1 %2998 }
 0x6d4   : > { %2940 = vst [vmem:[%s4520_s18 + $0x78] sm:$0xf] %v3587_v37  ;;  %v3072_v44 = vmul.f32 %v2999_v36, %v2976_v30  ;;  %v2994_v0 = vpop.permute.xlu0 %2993 }
 0x6d5   : > { %2939 = vst [vmem:[%s4520_s18 + $0x70] sm:$0xf] %v3586_v55  ;;  %v3071_v41 = vmul.f32 %v2994_v0, %v2975_v34 }
 0x6d6   : > { %v3589_v16 = vpack.c.bf16 %v3072_v44, %v3072_v44 }
 0x6d7   : > { %v3588_v57 = vpack.c.bf16 %v3071_v41, %v3071_v41  ;;  %v3009_v18 = vpop.permute.xlu1 %3008 }
 0x6d8   : > { %3152 = vst [vmem:[%s4520_s18 + $0xc] sm:$0xf] %v3589_v16  ;;  %v3074_v32 = vmul.f32 %v3009_v18, %v2978_v56  ;;  %v3004_v9 = vpop.permute.xlu0 %3003 }
 0x6d9   : > { %3151 = vst [vmem:[%s4520_s18 + $0x4] sm:$0xf] %v3588_v57  ;;  %v3073_v19 = vmul.f32 %v3004_v9, %v2977_v26 }
 0x6da   : > { %v3591_v7 = vpack.c.bf16 %v3074_v32, %v3074_v32 }
 0x6db   : > { %v3590_v38 = vpack.c.bf16 %v3073_v19, %v3073_v19  ;;  %v3019_v24 = vpop.permute.xlu1 %3018 }
 0x6dc   : > { %3154 = vst [vmem:[%s4520_s18 + $0x1c] sm:$0xf] %v3591_v7  ;;  %v3076_v47 = vmul.f32 %v3019_v24, %v2980_v27  ;;  %v3014_v60 = vpop.permute.xlu0 %3013 }
 0x6dd   : > { %3153 = vst [vmem:[%s4520_s18 + $0x14] sm:$0xf] %v3590_v38  ;;  %v3075_v63 = vmul.f32 %v3014_v60, %v2979_v22 }
 0x6de   : > { %v3593_v21 = vpack.c.bf16 %v3076_v47, %v3076_v47 }
 0x6df   : > { %v3592_v40 = vpack.c.bf16 %v3075_v63, %v3075_v63  ;;  %v3029_v5 = vpop.permute.xlu1 %3028 }
 0x6e0   : > { %3156 = vst [vmem:[%s4520_s18 + $0x2c] sm:$0xf] %v3593_v21  ;;  %v3078_v31 = vmul.f32 %v3029_v5, %v2982_v58  ;;  %v3024_v53 = vpop.permute.xlu0 %3023 }
 0x6e1   : > { %3155 = vst [vmem:[%s4520_s18 + $0x24] sm:$0xf] %v3592_v40  ;;  %v3077_v33 = vmul.f32 %v3024_v53, %v2981_v13 }
 0x6e2   : > { %v3595_v46 = vpack.c.bf16 %v3078_v31, %v3078_v31 }
 0x6e3   : > { %v3594_v4 = vpack.c.bf16 %v3077_v33, %v3077_v33  ;;  %v3039_v25 = vpop.permute.xlu1 %3038 }
 0x6e4   : > { %3158 = vst [vmem:[%s4520_s18 + $0x3c] sm:$0xf] %v3595_v46  ;;  %v3080_v48 = vmul.f32 %v3039_v25, %v2984_v59  ;;  %v3034_v17 = vpop.permute.xlu0 %3033 }
 0x6e5   : > { %3157 = vst [vmem:[%s4520_s18 + $0x34] sm:$0xf] %v3594_v4  ;;  %v3079_v52 = vmul.f32 %v3034_v17, %v2983_v20 }
 0x6e6   : > { %v3597_v14 = vpack.c.bf16 %v3080_v48, %v3080_v48 }
 0x6e7   : > { %v3596_v29 = vpack.c.bf16 %v3079_v52, %v3079_v52  ;;  %v3049_v39 = vpop.permute.xlu1 %3048 }
 0x6e8   : > { %3160 = vst [vmem:[%s4520_s18 + $0x4c] sm:$0xf] %v3597_v14  ;;  %v3082_v51 = vmul.f32 %v3049_v39, %v2986_v10  ;;  %v3044_v28 = vpop.permute.xlu0 %3043 }
 0x6e9   : > { %3159 = vst [vmem:[%s4520_s18 + $0x44] sm:$0xf] %v3596_v29  ;;  %v3081_v43 = vmul.f32 %v3044_v28, %v2985_v15 }
 0x6ea   : > { %v3599_v54 = vpack.c.bf16 %v3082_v51, %v3082_v51 }
 0x6eb   : > { %v3598_v6 = vpack.c.bf16 %v3081_v43, %v3081_v43  ;;  %v3059_v50 = vpop.permute.xlu1 %3058 }
 0x6ec   : > { %3162 = vst [vmem:[%s4520_s18 + $0x5c] sm:$0xf] %v3599_v54  ;;  %v3084_v35 = vmul.f32 %v3059_v50, %v2988_v62  ;;  %v3054_v3 = vpop.permute.xlu0 %3053 }
 0x6ed   : > { %3161 = vst [vmem:[%s4520_s18 + $0x54] sm:$0xf] %v3598_v6  ;;  %v3083_v12 = vmul.f32 %v3054_v3, %v2987_v42 }
 0x6ee   : > { %v3601_v11 = vpack.c.bf16 %v3084_v35, %v3084_v35 }
 0x6ef   : > { %v3600_v45 = vpack.c.bf16 %v3083_v12, %v3083_v12  ;;  %v3069_v23 = vpop.permute.xlu1 %3068 }
 0x6f0   : > { %3164 = vst [vmem:[%s4520_s18 + $0x6c] sm:$0xf] %v3601_v11  ;;  %v3086_v49 = vmul.f32 %v3069_v23, %v2990_v8  ;;  %v3064_v2 = vpop.permute.xlu0 %3063 }
 0x6f1   : > { %3163 = vst [vmem:[%s4520_s18 + $0x64] sm:$0xf] %v3600_v45  ;;  %v3085_v1 = vmul.f32 %v3064_v2, %v2989_v61 }
 0x6f2   : > { %v3603_v30 = vpack.c.bf16 %v3086_v49, %v3086_v49 }
 0x6f3   : > { %v3602_v37 = vpack.c.bf16 %v3085_v1, %v3085_v1 }
 0x6f4   : > { %3166 = vst [vmem:[%s4520_s18 + $0x7c] sm:$0xf] %v3603_v30 }
 0x6f5   : > { %3165 = vst [vmem:[%s4520_s18 + $0x74] sm:$0xf] %v3602_v37 }
 0x6f6 PF: > { %3173 = sbr.rel (!%p4391_p13) target bundleno = 1801 (0x709), region = 176  ;;  %s6201_s3 = sld [smem:[#allocation9_spill]] (%p4391_p13)  ;;  %v3239_v34 = vld [vmem:[%s4520_s18] sm:$0xff] (%p4391_p13)  ;;  %v3241_v55 = vld [vmem:[%s4520_s18 + $0x8] sm:$0xff] (%p4391_p13)  ;;  %v3243_v36 = vld [vmem:[%s4520_s18 + $0x10] sm:$0xff] (%p4391_p13) }
 0x6f7   : > { %s3604_s22 = sshll.u32 (%p4391_p13), %s4207_s23, 6  ;;  %s3565_s29 = sshll.u32 (%p4391_p13), %s4215_s25, 7  ;;  %v3245_v44 = vld [vmem:[%s4520_s18 + $0x18] sm:$0xff] (%p4391_p13)  ;;  %v3247_v0 = vld [vmem:[%s4520_s18 + $0x20] sm:$0xff] (%p4391_p13)  ;;  %v3249_v41 = vld [vmem:[%s4520_s18 + $0x28] sm:$0xff] (%p4391_p13) }
 0x6f8   : > { %v3251_v56 = vld [vmem:[%s4520_s18 + $0x30] sm:$0xff] (%p4391_p13)  ;;  %v3253_v16 = vld [vmem:[%s4520_s18 + $0x38] sm:$0xff] (%p4391_p13)  ;;  %v3255_v26 = vld [vmem:[%s4520_s18 + $0x40] sm:$0xff] (%p4391_p13)  ;;  %s6202_s13 = sld [smem:[#allocation73_spill]] (%p4391_p13) }
 0x6f9   : > { %v3257_v57 = vld [vmem:[%s4520_s18 + $0x48] sm:$0xff] (%p4391_p13)  ;;  %v3259_v18 = vld [vmem:[%s4520_s18 + $0x50] sm:$0xff] (%p4391_p13)  ;;  %v3261_v32 = vld [vmem:[%s4520_s18 + $0x58] sm:$0xff] (%p4391_p13) }
 0x6fa   : > { %v3263_v9 = vld [vmem:[%s4520_s18 + $0x60] sm:$0xff] (%p4391_p13)  ;;  %v3265_v19 = vld [vmem:[%s4520_s18 + $0x68] sm:$0xff] (%p4391_p13) }
 0x6fb   : > { %v3269_v7 = vld [vmem:[%s4520_s18 + $0x78] sm:$0xff] (%p4391_p13) }
 0x6fc   : > { %s3563_s4 = sshll.u32 (%p4391_p13), %s6201_s3, 1  ;;  %v3267_v27 = vld [vmem:[%s4520_s18 + $0x70] sm:$0xff] (%p4391_p13) }
 0x6fd   : > { %s3177_s28 = sadd.s32 %s3604_s22, %s3563_s4 }
 0x6fe   : > { %s3179_s8 = sadd.s32 %s3565_s29, %s3177_s28 }
 0x6ff   : > { %s3566_s16 = sshll.u32 %s3179_s8, 2 }
 0x700   : > { %s3181_s15 = scalar_lea.vmem %s6202_s13, %s3566_s16 }
 0x701   : > { %3240 = vst [vmem:[%s3181_s15] sm:$0xff] %v3239_v34  ;;  %3242 = vst [vmem:[%s3181_s15 + $0x10] sm:$0xff] %v3241_v55 }
 0x702   : > { %3244 = vst [vmem:[%s3181_s15 + $0x20] sm:$0xff] %v3243_v36  ;;  %3246 = vst [vmem:[%s3181_s15 + $0x30] sm:$0xff] %v3245_v44 }
 0x703   : > { %3248 = vst [vmem:[%s3181_s15 + $0x40] sm:$0xff] %v3247_v0  ;;  %3250 = vst [vmem:[%s3181_s15 + $0x50] sm:$0xff] %v3249_v41 }
 0x704   : > { %3252 = vst [vmem:[%s3181_s15 + $0x60] sm:$0xff] %v3251_v56  ;;  %3254 = vst [vmem:[%s3181_s15 + $0x70] sm:$0xff] %v3253_v16 }
 0x705   : > { %3256 = vst [vmem:[%s3181_s15 + $0x80] sm:$0xff] %v3255_v26  ;;  %3258 = vst [vmem:[%s3181_s15 + $0x90] sm:$0xff] %v3257_v57 }
 0x706   : > { %3260 = vst [vmem:[%s3181_s15 + $0xa0] sm:$0xff] %v3259_v18  ;;  %3262 = vst [vmem:[%s3181_s15 + $0xb0] sm:$0xff] %v3261_v32 }
 0x707   : > { %3264 = vst [vmem:[%s3181_s15 + $0xc0] sm:$0xff] %v3263_v9  ;;  %3266 = vst [vmem:[%s3181_s15 + $0xd0] sm:$0xff] %v3265_v19 }
 0x708   : > { %3268 = vst [vmem:[%s3181_s15 + $0xe0] sm:$0xff] %v3267_v27  ;;  %3270 = vst [vmem:[%s3181_s15 + $0xf0] sm:$0xff] %v3269_v7 }
 0x709 PF: > { %s15_s30 = sadd.s32 1, %s4235_s30   ;;  %s6204_s22 = sld [smem:[#allocation10_spill]] }
 0x70a   : > { %p5898_p12 = scmp.ge.s32.totalorder %s15_s30, 18   ;;  %s6205_s24 = sld [smem:[#allocation11_spill]] }
 0x70b   : > { %s6206_s12 = sld [smem:[#allocation12_spill]]  ;;  %s6207_s26 = sld [smem:[#allocation13_spill]] }
 0x70c   : > { %s6208_s11 = sld [smem:[#allocation14_spill]]  ;;  %s6209_s28 = sld [smem:[#allocation15_spill]] }
 0x70d   : > { %s6210_s29 = sld [smem:[#allocation16_spill]]  ;;  %s6212_s18 = smov %s4191_s19 }
 0x70e   : > { %s6213_s19 = smov %s4402_s1  ;;  %s6214_s20 = smov %s4199_s21 }
 0x70f   : > { %s6215_s21 = smov %s4397_s5  ;;  %s6216_s23 = smov %s4223_s27 }
 0x710   :  { %14 = sbr.rel (!%p5898_p12) target bundleno = 14 (0xe), region = 272 }
 0x711   : > { %s6217_s25 = smov %s6206_s12 }
 0x712   : > { %s6218_s27 = smov %s6208_s11 }

// kernel: attention_forward.5
= control target key start
LH: loop header
LB: loop body
LE: loop exit
PB: predicated region body
PF: predicated region fallthrough
CT: control target
= control target key end

     0   :  { %7 = vsyncpa [#allocation5], 0  ;;  %s3304_s0 = inlined_call_operand.vmem [shape: bf16[512,512], index: 0, kind: input, shape index: {}]   ;;  %s3305_s1 = inlined_call_operand.vmem [shape: bf16[512,512], index: 1, kind: input, shape index: {}]   ;;  %s3306_s2 = inlined_call_operand.hbm [shape: f32[512,512], index: 2, kind: output, shape index: {}]  }
   0x1   :  { %9 = vsyncpa [#allocation5 + $0x1], 0  ;;  %s2796_s9 = smov 0   ;;  %s2798_s10 = smov 0  }
   0x2   :  { %s2800_s11 = smov 0   ;;  %s2802_s12 = smov 0  }
   0x3   :  { %s2804_s13 = smov 0   ;;  %s2806_s14 = smov 0  }
   0x4   :  { %s2808_s15 = smov 0   ;;  %s2810_s16 = smov 0  }
   0x5   :  { %s2812_s17 = smov 0   ;;  %s2814_s18 = smov 0  }
   0x6 LB: > { %s2168_s19 = sadd.s32 4294967295, %s2775_s18   ;;  %s2169_s20 = sadd.s32 4294967294, %s2775_s18   ;;  %s2775_s18 = sphi %s2814_s18, %s15_s18   ;;  %s2771_s17 = sphi %s2812_s17, %s3318_s17   ;;  %s2767_s16 = sphi %s2810_s16, %s3317_s16   ;;  %s2763_s15 = sphi %s2808_s15, %s3316_s15   ;;  %s2759_s14 = sphi %s2806_s14, %s3315_s14   ;;  %s2755_s13 = sphi %s2804_s13, %s3314_s13   ;;  %s2751_s12 = sphi %s2802_s12, %s3313_s12   ;;  %s2747_s11 = sphi %s2800_s11, %s3312_s11   ;;  %s2743_s10 = sphi %s2798_s10, %s3311_s10   ;;  %s2739_s9 = sphi %s2796_s9, %s3310_s9  }
   0x7   : > { %s30_s21 = sadd.s32 1, %s2767_s16  ;;  %s34_s22 = sadd.s32 1, %s2771_s17 }
   0x8   : > { %p32_p0 = scmp.ge.s32.totalorder %s30_s21, 2  ;;  %s71_s23 = sadd.s32 1, %s2755_s13 }
   0x9   : > { %p78_p1 = scmp.ne.s32.totalorder %s2755_s13, %s2751_s12  ;;  %p79_p2 = scmp.eq.s32.totalorder %s2775_s18, 0 }
   0xa   : > { %s3320_s21 = smov (%p32_p0, %s30_s21), 0  ;;  %s3322_s22 = smov (!%p32_p0, %s34_s22), %s2771_s17 }
   0xb   : > { %s67_s24 = ssub.s32 %s2767_s16, %s3320_s21  ;;  %p2859_p3 = por %p79_p2, %p78_p1 }
   0xc   : > { %p36_p4 = scmp.ge.s32.totalorder %s3322_s22, 2  ;;  %p69_p5 = scmp.eq.s32.totalorder %s67_s24, 0 }
   0xd   : > { %s99_s26 = sadd.s32 1, %s2747_s11  ;;  %p109_p6 = scmp.ne.s32.totalorder %s2747_s11, %s2743_s10 }
   0xe   : > { %s3324_s22 = smov (%p36_p4, %s3322_s22), 0  ;;  %p110_p7 = scmp.eq.s32.totalorder %s2168_s19, 3 }
   0xf   : > { %s2869_s27 = scalar_select %p69_p5, %s2755_s13, %s71_s23  }
  0x10   : > { %s94_s28 = ssub.s32 %s2771_s17, %s3324_s22  ;;  %p115_p8 = scmp.ne.s32.totalorder %s2743_s10, %s2739_s9 }
  0x11   : > { %s96_s29 = sor.u32 %s94_s28, %s67_s24  ;;  %p2875_p10 = por %p110_p7, %p109_p6 }
  0x12   : > { %p97_p9 = scmp.eq.s32.totalorder %s96_s29, 0  ;;  %p116_p11 = scmp.eq.s32.totalorder %s2169_s20, 3 }
  0x13   : > { %p2171_p13 = scmp.ge.s32.totalorder %s2775_s18, 4 }
  0x14   : > { %s2880_s3 = scalar_select %p97_p9, %s2747_s11, %s99_s26  }
  0x15   : > { %p2882_p12 = por %p116_p11, %p115_p8  ;;  %132 = sbr.rel (%p2171_p13) target bundleno = 64 (0x40), region = 16 }
  0x1c   : > { %150 = sbr.rel (!%p2859_p3) target bundleno = 64 (0x40), region = 24  ;;  %s152_s5 = sand.u32 (%p2859_p3), 1, %s2755_s13  }
  0x1d   : > { %s2316_s6 = sshll.u32 (%p2859_p3), %s2767_s16, 3  ;;  %s2172_s7 = sshll.u32 (%p2859_p3), %s152_s5, 9 }
  0x1e   : > { %s2894_s20 = scalar_lea.vmem (%p2859_p3), %s3305_s1, %s2316_s6  ;;  %s2899_s23 = scalar_lea.vmem (%p2859_p3), [#allocation3], %s2172_s7 }
  0x1f   : > { %v314_v0 = vld [vmem:[%s2894_s20] sm:$0xff] (%p2859_p3)  ;;  %v316_v1 = vld [vmem:[%s2894_s20 + $0x10] sm:$0xff] (%p2859_p3) }
  0x20   : > { %v318_v2 = vld [vmem:[%s2894_s20 + $0x20] sm:$0xff] (%p2859_p3)  ;;  %315 = vst [vmem:[%s2899_s23] sm:$0xff] (%p2859_p3), %v314_v0  ;;  %317 = vst [vmem:[%s2899_s23 + $0x8] sm:$0xff] (%p2859_p3), %v316_v1  ;;  %v320_v3 = vld [vmem:[%s2894_s20 + $0x30] sm:$0xff] (%p2859_p3) }
  0x21   : > { %319 = vst [vmem:[%s2899_s23 + $0x10] sm:$0xff] (%p2859_p3), %v318_v2  ;;  %v322_v4 = vld [vmem:[%s2894_s20 + $0x40] sm:$0xff] (%p2859_p3)  ;;  %v324_v5 = vld [vmem:[%s2894_s20 + $0x50] sm:$0xff] (%p2859_p3)  ;;  %321 = vst [vmem:[%s2899_s23 + $0x18] sm:$0xff] (%p2859_p3), %v320_v3 }
  0x22   : > { %323 = vst [vmem:[%s2899_s23 + $0x20] sm:$0xff] (%p2859_p3), %v322_v4  ;;  %325 = vst [vmem:[%s2899_s23 + $0x28] sm:$0xff] (%p2859_p3), %v324_v5  ;;  %v326_v6 = vld [vmem:[%s2894_s20 + $0x60] sm:$0xff] (%p2859_p3)  ;;  %v328_v7 = vld [vmem:[%s2894_s20 + $0x70] sm:$0xff] (%p2859_p3) }
  0x23   : > { %v330_v8 = vld [vmem:[%s2894_s20 + $0x80] sm:$0xff]  ;;  %327 = vst [vmem:[%s2899_s23 + $0x30] sm:$0xff] %v326_v6  ;;  %329 = vst [vmem:[%s2899_s23 + $0x38] sm:$0xff] %v328_v7  ;;  %v332_v9 = vld [vmem:[%s2894_s20 + $0x90] sm:$0xff] }
  0x24   : > { %331 = vst [vmem:[%s2899_s23 + $0x40] sm:$0xff] %v330_v8  ;;  %v334_v10 = vld [vmem:[%s2894_s20 + $0xa0] sm:$0xff]  ;;  %v336_v11 = vld [vmem:[%s2894_s20 + $0xb0] sm:$0xff]  ;;  %333 = vst [vmem:[%s2899_s23 + $0x48] sm:$0xff] %v332_v9 }
  0x25   : > { %335 = vst [vmem:[%s2899_s23 + $0x50] sm:$0xff] %v334_v10  ;;  %337 = vst [vmem:[%s2899_s23 + $0x58] sm:$0xff] %v336_v11  ;;  %v338_v12 = vld [vmem:[%s2894_s20 + $0xc0] sm:$0xff]  ;;  %v340_v13 = vld [vmem:[%s2894_s20 + $0xd0] sm:$0xff] }
  0x26   : > { %v342_v14 = vld [vmem:[%s2894_s20 + $0xe0] sm:$0xff]  ;;  %339 = vst [vmem:[%s2899_s23 + $0x60] sm:$0xff] %v338_v12  ;;  %341 = vst [vmem:[%s2899_s23 + $0x68] sm:$0xff] %v340_v13  ;;  %v344_v15 = vld [vmem:[%s2894_s20 + $0xf0] sm:$0xff] }
  0x27   : > { %343 = vst [vmem:[%s2899_s23 + $0x70] sm:$0xff] %v342_v14  ;;  %v346_v16 = vld [vmem:[%s2894_s20 + $0x100] sm:$0xff]  ;;  %v348_v17 = vld [vmem:[%s2894_s20 + $0x110] sm:$0xff]  ;;  %345 = vst [vmem:[%s2899_s23 + $0x78] sm:$0xff] %v344_v15 }
  0x28   : > { %347 = vst [vmem:[%s2899_s23 + $0x80] sm:$0xff] %v346_v16  ;;  %349 = vst [vmem:[%s2899_s23 + $0x88] sm:$0xff] %v348_v17  ;;  %v350_v18 = vld [vmem:[%s2894_s20 + $0x120] sm:$0xff]  ;;  %v352_v19 = vld [vmem:[%s2894_s20 + $0x130] sm:$0xff] }
  0x29   : > { %v354_v20 = vld [vmem:[%s2894_s20 + $0x140] sm:$0xff]  ;;  %351 = vst [vmem:[%s2899_s23 + $0x90] sm:$0xff] %v350_v18  ;;  %353 = vst [vmem:[%s2899_s23 + $0x98] sm:$0xff] %v352_v19  ;;  %v356_v21 = vld [vmem:[%s2894_s20 + $0x150] sm:$0xff] }
  0x2a   : > { %355 = vst [vmem:[%s2899_s23 + $0xa0] sm:$0xff] %v354_v20  ;;  %v358_v22 = vld [vmem:[%s2894_s20 + $0x160] sm:$0xff]  ;;  %v360_v23 = vld [vmem:[%s2894_s20 + $0x170] sm:$0xff]  ;;  %357 = vst [vmem:[%s2899_s23 + $0xa8] sm:$0xff] %v356_v21 }
  0x2b   : > { %359 = vst [vmem:[%s2899_s23 + $0xb0] sm:$0xff] %v358_v22  ;;  %361 = vst [vmem:[%s2899_s23 + $0xb8] sm:$0xff] %v360_v23  ;;  %v362_v24 = vld [vmem:[%s2894_s20 + $0x180] sm:$0xff]  ;;  %v364_v25 = vld [vmem:[%s2894_s20 + $0x190] sm:$0xff] }
  0x2c   : > { %v366_v26 = vld [vmem:[%s2894_s20 + $0x1a0] sm:$0xff]  ;;  %363 = vst [vmem:[%s2899_s23 + $0xc0] sm:$0xff] %v362_v24  ;;  %365 = vst [vmem:[%s2899_s23 + $0xc8] sm:$0xff] %v364_v25  ;;  %v368_v27 = vld [vmem:[%s2894_s20 + $0x1b0] sm:$0xff] }
  0x2d   : > { %367 = vst [vmem:[%s2899_s23 + $0xd0] sm:$0xff] %v366_v26  ;;  %v370_v28 = vld [vmem:[%s2894_s20 + $0x1c0] sm:$0xff]  ;;  %v372_v29 = vld [vmem:[%s2894_s20 + $0x1d0] sm:$0xff]  ;;  %369 = vst [vmem:[%s2899_s23 + $0xd8] sm:$0xff] %v368_v27 }
  0x2e   : > { %371 = vst [vmem:[%s2899_s23 + $0xe0] sm:$0xff] %v370_v28  ;;  %373 = vst [vmem:[%s2899_s23 + $0xe8] sm:$0xff] %v372_v29  ;;  %v374_v30 = vld [vmem:[%s2894_s20 + $0x1e0] sm:$0xff]  ;;  %v376_v31 = vld [vmem:[%s2894_s20 + $0x1f0] sm:$0xff] }
  0x2f   : > { %v378_v32 = vld [vmem:[%s2894_s20 + $0x200] sm:$0xff]  ;;  %375 = vst [vmem:[%s2899_s23 + $0xf0] sm:$0xff] %v374_v30  ;;  %377 = vst [vmem:[%s2899_s23 + $0xf8] sm:$0xff] %v376_v31  ;;  %v380_v33 = vld [vmem:[%s2894_s20 + $0x210] sm:$0xff] }
  0x30   : > { %379 = vst [vmem:[%s2899_s23 + $0x100] sm:$0xff] %v378_v32  ;;  %v382_v34 = vld [vmem:[%s2894_s20 + $0x220] sm:$0xff]  ;;  %v384_v35 = vld [vmem:[%s2894_s20 + $0x230] sm:$0xff]  ;;  %381 = vst [vmem:[%s2899_s23 + $0x108] sm:$0xff] %v380_v33 }
  0x31   : > { %383 = vst [vmem:[%s2899_s23 + $0x110] sm:$0xff] %v382_v34  ;;  %385 = vst [vmem:[%s2899_s23 + $0x118] sm:$0xff] %v384_v35  ;;  %v386_v36 = vld [vmem:[%s2894_s20 + $0x240] sm:$0xff]  ;;  %v388_v37 = vld [vmem:[%s2894_s20 + $0x250] sm:$0xff] }
  0x32   : > { %v390_v38 = vld [vmem:[%s2894_s20 + $0x260] sm:$0xff]  ;;  %387 = vst [vmem:[%s2899_s23 + $0x120] sm:$0xff] %v386_v36  ;;  %389 = vst [vmem:[%s2899_s23 + $0x128] sm:$0xff] %v388_v37  ;;  %v392_v39 = vld [vmem:[%s2894_s20 + $0x270] sm:$0xff] }
  0x33   : > { %391 = vst [vmem:[%s2899_s23 + $0x130] sm:$0xff] %v390_v38  ;;  %v394_v40 = vld [vmem:[%s2894_s20 + $0x280] sm:$0xff]  ;;  %v396_v41 = vld [vmem:[%s2894_s20 + $0x290] sm:$0xff]  ;;  %393 = vst [vmem:[%s2899_s23 + $0x138] sm:$0xff] %v392_v39 }
  0x34   : > { %395 = vst [vmem:[%s2899_s23 + $0x140] sm:$0xff] %v394_v40  ;;  %397 = vst [vmem:[%s2899_s23 + $0x148] sm:$0xff] %v396_v41  ;;  %v398_v42 = vld [vmem:[%s2894_s20 + $0x2a0] sm:$0xff]  ;;  %v400_v43 = vld [vmem:[%s2894_s20 + $0x2b0] sm:$0xff] }
  0x35   : > { %v402_v44 = vld [vmem:[%s2894_s20 + $0x2c0] sm:$0xff]  ;;  %399 = vst [vmem:[%s2899_s23 + $0x150] sm:$0xff] %v398_v42  ;;  %401 = vst [vmem:[%s2899_s23 + $0x158] sm:$0xff] %v400_v43  ;;  %v404_v45 = vld [vmem:[%s2894_s20 + $0x2d0] sm:$0xff] }
  0x36   : > { %403 = vst [vmem:[%s2899_s23 + $0x160] sm:$0xff] %v402_v44  ;;  %v406_v46 = vld [vmem:[%s2894_s20 + $0x2e0] sm:$0xff]  ;;  %v408_v47 = vld [vmem:[%s2894_s20 + $0x2f0] sm:$0xff]  ;;  %405 = vst [vmem:[%s2899_s23 + $0x168] sm:$0xff] %v404_v45 }
  0x37   : > { %407 = vst [vmem:[%s2899_s23 + $0x170] sm:$0xff] %v406_v46  ;;  %409 = vst [vmem:[%s2899_s23 + $0x178] sm:$0xff] %v408_v47  ;;  %v410_v48 = vld [vmem:[%s2894_s20 + $0x300] sm:$0xff]  ;;  %v412_v49 = vld [vmem:[%s2894_s20 + $0x310] sm:$0xff] }
  0x38   : > { %v414_v50 = vld [vmem:[%s2894_s20 + $0x320] sm:$0xff]  ;;  %411 = vst [vmem:[%s2899_s23 + $0x180] sm:$0xff] %v410_v48  ;;  %413 = vst [vmem:[%s2899_s23 + $0x188] sm:$0xff] %v412_v49  ;;  %v416_v51 = vld [vmem:[%s2894_s20 + $0x330] sm:$0xff] }
  0x39   : > { %415 = vst [vmem:[%s2899_s23 + $0x190] sm:$0xff] %v414_v50  ;;  %v418_v52 = vld [vmem:[%s2894_s20 + $0x340] sm:$0xff]  ;;  %v420_v53 = vld [vmem:[%s2894_s20 + $0x350] sm:$0xff]  ;;  %417 = vst [vmem:[%s2899_s23 + $0x198] sm:$0xff] %v416_v51 }
  0x3a   : > { %419 = vst [vmem:[%s2899_s23 + $0x1a0] sm:$0xff] %v418_v52  ;;  %421 = vst [vmem:[%s2899_s23 + $0x1a8] sm:$0xff] %v420_v53  ;;  %v422_v54 = vld [vmem:[%s2894_s20 + $0x360] sm:$0xff]  ;;  %v424_v55 = vld [vmem:[%s2894_s20 + $0x370] sm:$0xff] }
  0x3b   : > { %v426_v56 = vld [vmem:[%s2894_s20 + $0x380] sm:$0xff]  ;;  %423 = vst [vmem:[%s2899_s23 + $0x1b0] sm:$0xff] %v422_v54  ;;  %425 = vst [vmem:[%s2899_s23 + $0x1b8] sm:$0xff] %v424_v55  ;;  %v428_v57 = vld [vmem:[%s2894_s20 + $0x390] sm:$0xff] }
  0x3c   : > { %427 = vst [vmem:[%s2899_s23 + $0x1c0] sm:$0xff] %v426_v56  ;;  %v430_v58 = vld [vmem:[%s2894_s20 + $0x3a0] sm:$0xff]  ;;  %v432_v59 = vld [vmem:[%s2894_s20 + $0x3b0] sm:$0xff]  ;;  %429 = vst [vmem:[%s2899_s23 + $0x1c8] sm:$0xff] %v428_v57 }
  0x3d   : > { %431 = vst [vmem:[%s2899_s23 + $0x1d0] sm:$0xff] %v430_v58  ;;  %433 = vst [vmem:[%s2899_s23 + $0x1d8] sm:$0xff] %v432_v59  ;;  %v434_v60 = vld [vmem:[%s2894_s20 + $0x3c0] sm:$0xff]  ;;  %v436_v61 = vld [vmem:[%s2894_s20 + $0x3d0] sm:$0xff] }
  0x3e   : > { %v438_v62 = vld [vmem:[%s2894_s20 + $0x3e0] sm:$0xff]  ;;  %435 = vst [vmem:[%s2899_s23 + $0x1e0] sm:$0xff] %v434_v60  ;;  %437 = vst [vmem:[%s2899_s23 + $0x1e8] sm:$0xff] %v436_v61  ;;  %v440_v63 = vld [vmem:[%s2894_s20 + $0x3f0] sm:$0xff] }
  0x3f   : > { %439 = vst [vmem:[%s2899_s23 + $0x1f0] sm:$0xff] %v438_v62  ;;  %441 = vst [vmem:[%s2899_s23 + $0x1f8] sm:$0xff] %v440_v63 }
  0x40 PF: > { %p2175_p0 = scmp.ge.s32.totalorder %s2775_s18, 1  ;;  %p446_p1 = scmp.lt.s32.totalorder %s2775_s18, 5 }
  0x42   : > { %p447_p2 = pnand %p2175_p0, %p446_p1 }
  0x43   : > { %s453_s24 = sand.u32 (!%p447_p2), 1, %s2751_s12   ;;  %s2178_s12 = sshll.u32 (!%p447_p2), %s2763_s15, 5 }
  0x44   : > { %450 = sbr.rel (%p447_p2) target bundleno = 489 (0x1e9), region = 62  ;;  %s2176_s25 = sshll.u32 (!%p447_p2), %s453_s24, 9 }
  0x45   : > { %s3029_s26 = scalar_lea.vmem (!%p447_p2), [#allocation3], %s2176_s25  ;;  %p486_p3 = scmp.lt.s32.totalorder (!%p447_p2), %s2178_s12, 63 }
  0x46   : > { %v2473_v0 = vld [vmem:[%s3029_s26 + $0x4] ss:$8 sps:$4 sm:$0xff] (!%p447_p2)   ;;  %v2477_v2 = vld [vmem:[%s3029_s26] ss:$8 sps:$4 sm:$0xff] (!%p447_p2)   ;;  %v2479_v4 = vld [vmem:[%s3029_s26 + $0x14] ss:$8 sps:$4 sm:$0xff] (!%p447_p2)  }
  0x47   : > { %v2475_v1 = vld [vmem:[%s3029_s26 + $0x104] ss:$8 sps:$4 sm:$0xff] (!%p447_p2)   ;;  %1400 = vmatprep.subr.bf16.mxu1 (!%p447_p2), %v2473_v0  ;;  %v2478_v3 = vld [vmem:[%s3029_s26 + $0x100] ss:$8 sps:$4 sm:$0xff] (!%p447_p2)   ;;  %v2481_v5 = vld [vmem:[%s3029_s26 + $0x114] ss:$8 sps:$4 sm:$0xff] (!%p447_p2)  }
  0x48   : > { %1593 = vmatprep.subr.bf16.mxu0 (!%p447_p2), %v2475_v1  ;;  %1401 = vmatpush1.bf16.msra.mxu1 (!%p447_p2), %v2477_v2  ;;  %v2483_v6 = vld [vmem:[%s3029_s26 + $0x10] ss:$8 sps:$4 sm:$0xff] (!%p447_p2)   ;;  %v2485_v8 = vld [vmem:[%s3029_s26 + $0x24] ss:$8 sps:$4 sm:$0xff] (!%p447_p2)   ;;  %v2489_v10 = vld [vmem:[%s3029_s26 + $0x20] ss:$8 sps:$4 sm:$0xff] (!%p447_p2)  }
  0x49   : > { %1594 = vmatpush1.bf16.msra.mxu0 (!%p447_p2), %v2478_v3  ;;  %1402 = vmatprep.subr.bf16.mxu1 (!%p447_p2), %v2479_v4  ;;  %v2484_v7 = vld [vmem:[%s3029_s26 + $0x110] ss:$8 sps:$4 sm:$0xff] (!%p447_p2)   ;;  %v2487_v9 = vld [vmem:[%s3029_s26 + $0x124] ss:$8 sps:$4 sm:$0xff] (!%p447_p2)   ;;  %v2490_v11 = vld [vmem:[%s3029_s26 + $0x120] ss:$8 sps:$4 sm:$0xff] (!%p447_p2)  }
  0x4a   : > { %1595 = vmatprep.subr.bf16.mxu0 (!%p447_p2), %v2481_v5  ;;  %v2491_v12 = vld [vmem:[%s3029_s26 + $0x34] ss:$8 sps:$4 sm:$0xff] (!%p447_p2)   ;;  %v2495_v14 = vld [vmem:[%s3029_s26 + $0x30] ss:$8 sps:$4 sm:$0xff] (!%p447_p2)   ;;  %v2497_v16 = vld [vmem:[%s3029_s26 + $0x44] ss:$8 sps:$4 sm:$0xff] (!%p447_p2)  }
  0x4b   : > { %v2493_v13 = vld [vmem:[%s3029_s26 + $0x134] ss:$8 sps:$4 sm:$0xff]   ;;  %v2496_v15 = vld [vmem:[%s3029_s26 + $0x130] ss:$8 sps:$4 sm:$0xff]   ;;  %v2499_v17 = vld [vmem:[%s3029_s26 + $0x144] ss:$8 sps:$4 sm:$0xff]  }
  0x4c   : > { %1403 = vmatpush1.bf16.msra.mxu1 %v2483_v6  ;;  %v2501_v18 = vld [vmem:[%s3029_s26 + $0x40] ss:$8 sps:$4 sm:$0xff]   ;;  %v2503_v20 = vld [vmem:[%s3029_s26 + $0x54] ss:$8 sps:$4 sm:$0xff]   ;;  %v2507_v22 = vld [vmem:[%s3029_s26 + $0x50] ss:$8 sps:$4 sm:$0xff]  }
  0x4d   : > { %1596 = vmatpush1.bf16.msra.mxu0 %v2484_v7  ;;  %1404 = vmatprep.subr.bf16.mxu1 %v2485_v8  ;;  %v2502_v19 = vld [vmem:[%s3029_s26 + $0x140] ss:$8 sps:$4 sm:$0xff]   ;;  %v2505_v21 = vld [vmem:[%s3029_s26 + $0x154] ss:$8 sps:$4 sm:$0xff]   ;;  %v2508_v23 = vld [vmem:[%s3029_s26 + $0x150] ss:$8 sps:$4 sm:$0xff]  }
  0x4e   : > { %1597 = vmatprep.subr.bf16.mxu0 %v2487_v9  ;;  %v2509_v24 = vld [vmem:[%s3029_s26 + $0x64] ss:$8 sps:$4 sm:$0xff]   ;;  %v2513_v26 = vld [vmem:[%s3029_s26 + $0x60] ss:$8 sps:$4 sm:$0xff]   ;;  %v2515_v28 = vld [vmem:[%s3029_s26 + $0x74] ss:$8 sps:$4 sm:$0xff]  }
  0x4f   : > { %v2511_v25 = vld [vmem:[%s3029_s26 + $0x164] ss:$8 sps:$4 sm:$0xff]   ;;  %v2514_v27 = vld [vmem:[%s3029_s26 + $0x160] ss:$8 sps:$4 sm:$0xff]   ;;  %v2517_v29 = vld [vmem:[%s3029_s26 + $0x174] ss:$8 sps:$4 sm:$0xff]  }
  0x50   : > { %1405 = vmatpush1.bf16.msra.mxu1 %v2489_v10  ;;  %v2519_v30 = vld [vmem:[%s3029_s26 + $0x70] ss:$8 sps:$4 sm:$0xff]   ;;  %v2521_v32 = vld [vmem:[%s3029_s26 + $0x84] ss:$8 sps:$4 sm:$0xff]   ;;  %v2525_v34 = vld [vmem:[%s3029_s26 + $0x80] ss:$8 sps:$4 sm:$0xff]  }
  0x51   : > { %1598 = vmatpush1.bf16.msra.mxu0 %v2490_v11  ;;  %1406 = vmatprep.subr.bf16.mxu1 %v2491_v12  ;;  %v2520_v31 = vld [vmem:[%s3029_s26 + $0x170] ss:$8 sps:$4 sm:$0xff]   ;;  %v2523_v33 = vld [vmem:[%s3029_s26 + $0x184] ss:$8 sps:$4 sm:$0xff]   ;;  %v2526_v35 = vld [vmem:[%s3029_s26 + $0x180] ss:$8 sps:$4 sm:$0xff]  }
  0x52   : > { %1599 = vmatprep.subr.bf16.mxu0 %v2493_v13  ;;  %v2527_v36 = vld [vmem:[%s3029_s26 + $0x94] ss:$8 sps:$4 sm:$0xff]   ;;  %s3326_s12 = smov (!%p486_p3, %s2178_s12), 63  ;;  %v2531_v38 = vld [vmem:[%s3029_s26 + $0x90] ss:$8 sps:$4 sm:$0xff]   ;;  %s481_s7 = sand.u32 1, %s2743_s10  }
  0x53   : > { %v2529_v37 = vld [vmem:[%s3029_s26 + $0x194] ss:$8 sps:$4 sm:$0xff]   ;;  %v2532_v39 = vld [vmem:[%s3029_s26 + $0x190] ss:$8 sps:$4 sm:$0xff]   ;;  %v2533_v40 = vld [vmem:[%s3029_s26 + $0xa4] ss:$8 sps:$4 sm:$0xff]  }
  0x54   : > { %1407 = vmatpush1.bf16.msra.mxu1 %v2495_v14  ;;  %v2535_v41 = vld [vmem:[%s3029_s26 + $0x1a4] ss:$8 sps:$4 sm:$0xff]   ;;  %s2317_s28 = sshll.u32 %s3326_s12, 4  ;;  %v2537_v42 = vld [vmem:[%s3029_s26 + $0xa0] ss:$8 sps:$4 sm:$0xff]   ;;  %s2177_s8 = sshll.u32 %s481_s7, 9 }
  0x55   : > { %1600 = vmatpush1.bf16.msra.mxu0 %v2496_v15  ;;  %1408 = vmatprep.subr.bf16.mxu1 %v2497_v16  ;;  %v2538_v43 = vld [vmem:[%s3029_s26 + $0x1a0] ss:$8 sps:$4 sm:$0xff]   ;;  %v2539_v44 = vld [vmem:[%s3029_s26 + $0xb4] ss:$8 sps:$4 sm:$0xff]   ;;  %s3080_s6 = scalar_lea.vmem %s3304_s0, %s2317_s28  ;;  %v2543_v46 = vld [vmem:[%s3029_s26 + $0xb0] ss:$8 sps:$4 sm:$0xff]  }
  0x56   : > { %1601 = vmatprep.subr.bf16.mxu0 %v2499_v17  ;;  %v2541_v45 = vld [vmem:[%s3029_s26 + $0x1b4] ss:$8 sps:$4 sm:$0xff]   ;;  %v2544_v47 = vld [vmem:[%s3029_s26 + $0x1b0] ss:$8 sps:$4 sm:$0xff]   ;;  %v2545_v48 = vld [vmem:[%s3029_s26 + $0xc4] ss:$8 sps:$4 sm:$0xff]  }
  0x57   : > { %v2571_v49 = vld [vmem:[%s3080_s6 + $0x4] ss:$16 sps:$4 sm:$0xff]   ;;  %v2574_v51 = vld [vmem:[%s3080_s6 + $0xc] ss:$16 sps:$4 sm:$0xff]   ;;  %v2549_v52 = vld [vmem:[%s3029_s26 + $0xc0] ss:$8 sps:$4 sm:$0xff]  }
  0x58   : > { %1409 = vmatpush1.bf16.msra.mxu1 %v2501_v18  ;;  %v2547_v50 = vld [vmem:[%s3029_s26 + $0x1c4] ss:$8 sps:$4 sm:$0xff]   ;;  %1432 = vmatprep.mubr.bf16.mxu1 %v2571_v49  ;;  %v2550_v53 = vld [vmem:[%s3029_s26 + $0x1c0] ss:$8 sps:$4 sm:$0xff]   ;;  %v2551_v54 = vld [vmem:[%s3029_s26 + $0xd4] ss:$8 sps:$4 sm:$0xff]  }
  0x59   : > { %1602 = vmatpush1.bf16.msra.mxu0 %v2502_v19  ;;  %1410 = vmatprep.subr.bf16.mxu1 %v2503_v20  ;;  %v2553_v55 = vld [vmem:[%s3029_s26 + $0x1d4] ss:$8 sps:$4 sm:$0xff]   ;;  %v2555_v56 = vld [vmem:[%s3029_s26 + $0xd0] ss:$8 sps:$4 sm:$0xff]   ;;  %v2557_v58 = vld [vmem:[%s3029_s26 + $0xe4] ss:$8 sps:$4 sm:$0xff]  }
  0x5a   : > { %1603 = vmatprep.subr.bf16.mxu0 %v2505_v21  ;;  %1625 = vmatprep.mubr.bf16.mxu0 %v2574_v51  ;;  %v2556_v57 = vld [vmem:[%s3029_s26 + $0x1d0] ss:$8 sps:$4 sm:$0xff]   ;;  %v2559_v59 = vld [vmem:[%s3029_s26 + $0x1e4] ss:$8 sps:$4 sm:$0xff]   ;;  %v2561_v60 = vld [vmem:[%s3029_s26 + $0xe0] ss:$8 sps:$4 sm:$0xff]  }
  0x5b   : > { %v2562_v61 = vld [vmem:[%s3029_s26 + $0x1e0] ss:$8 sps:$4 sm:$0xff]   ;;  %v2563_v62 = vld [vmem:[%s3029_s26 + $0xf4] ss:$8 sps:$4 sm:$0xff]   ;;  %v2567_v0 = vld [vmem:[%s3029_s26 + $0xf0] ss:$8 sps:$4 sm:$0xff]  }
  0x5c   : > { %1411 = vmatpush1.bf16.msra.mxu1 %v2507_v22  ;;  %v2565_v63 = vld [vmem:[%s3029_s26 + $0x1f4] ss:$8 sps:$4 sm:$0xff]   ;;  %v2568_v1 = vld [vmem:[%s3029_s26 + $0x1f0] ss:$8 sps:$4 sm:$0xff]   ;;  %s3168_s19 = scalar_lea.vmem [#allocation4], %s2177_s8  ;;  %s2311_s20 = sshll.u32 %s2759_s14, 1 }
  0x5d   : > { %1604 = vmatpush1.bf16.msra.mxu0 %v2508_v23  ;;  %1412 = vmatprep.subr.bf16.mxu1 %v2509_v24  ;;  %v2569_v2 = vld [vmem:[%s3080_s6] ss:$16 sps:$4 sm:$0xff]   ;;  %v2572_v3 = vld [vmem:[%s3080_s6 + $0x8] ss:$16 sps:$4 sm:$0xff]   ;;  %v2575_v4 = vld [vmem:[%s3080_s6 + $0x24] ss:$16 sps:$4 sm:$0xff]  }
  0x5e   : > { %1605 = vmatprep.subr.bf16.mxu0 %v2511_v25  ;;  %v2577_v5 = vld [vmem:[%s3080_s6 + $0x2c] ss:$16 sps:$4 sm:$0xff]   ;;  %v2579_v6 = vld [vmem:[%s3080_s6 + $0x20] ss:$16 sps:$4 sm:$0xff]   ;;  %v2580_v7 = vld [vmem:[%s3080_s6 + $0x28] ss:$16 sps:$4 sm:$0xff]  }
  0x5f   : > { %v2581_v8 = vld [vmem:[%s3080_s6 + $0x44] ss:$16 sps:$4 sm:$0xff]   ;;  %v2583_v9 = vld [vmem:[%s3080_s6 + $0x4c] ss:$16 sps:$4 sm:$0xff]   ;;  %v2585_v10 = vld [vmem:[%s3080_s6 + $0x40] ss:$16 sps:$4 sm:$0xff]  }
  0x60   : > { %1413 = vmatpush1.bf16.msra.mxu1 %v2513_v26  ;;  %v2586_v11 = vld [vmem:[%s3080_s6 + $0x48] ss:$16 sps:$4 sm:$0xff]   ;;  %v2587_v12 = vld [vmem:[%s3080_s6 + $0x64] ss:$16 sps:$4 sm:$0xff]   ;;  %v2589_v13 = vld [vmem:[%s3080_s6 + $0x6c] ss:$16 sps:$4 sm:$0xff]  }
  0x61   : > { %1606 = vmatpush1.bf16.msra.mxu0 %v2514_v27  ;;  %1414 = vmatprep.subr.bf16.mxu1 %v2515_v28  ;;  %v2591_v14 = vld [vmem:[%s3080_s6 + $0x60] ss:$16 sps:$4 sm:$0xff]   ;;  %v2592_v15 = vld [vmem:[%s3080_s6 + $0x68] ss:$16 sps:$4 sm:$0xff]   ;;  %v2593_v16 = vld [vmem:[%s3080_s6 + $0x84] ss:$16 sps:$4 sm:$0xff]  }
  0x62   : > { %1607 = vmatprep.subr.bf16.mxu0 %v2517_v29  ;;  %v2595_v17 = vld [vmem:[%s3080_s6 + $0x8c] ss:$16 sps:$4 sm:$0xff]   ;;  %v2597_v18 = vld [vmem:[%s3080_s6 + $0x80] ss:$16 sps:$4 sm:$0xff]   ;;  %v2598_v19 = vld [vmem:[%s3080_s6 + $0x88] ss:$16 sps:$4 sm:$0xff]  }
  0x63   : > { %v2599_v20 = vld [vmem:[%s3080_s6 + $0xa4] ss:$16 sps:$4 sm:$0xff]   ;;  %v2601_v21 = vld [vmem:[%s3080_s6 + $0xac] ss:$16 sps:$4 sm:$0xff]   ;;  %v2603_v22 = vld [vmem:[%s3080_s6 + $0xa0] ss:$16 sps:$4 sm:$0xff]  }
  0x64   : > { %1415 = vmatpush1.bf16.msra.mxu1 %v2519_v30  ;;  %v2604_v23 = vld [vmem:[%s3080_s6 + $0xa8] ss:$16 sps:$4 sm:$0xff]   ;;  %v2605_v24 = vld [vmem:[%s3080_s6 + $0xc4] ss:$16 sps:$4 sm:$0xff]   ;;  %v2607_v25 = vld [vmem:[%s3080_s6 + $0xcc] ss:$16 sps:$4 sm:$0xff]  }
  0x65   : > { %1608 = vmatpush1.bf16.msra.mxu0 %v2520_v31  ;;  %1416 = vmatprep.subr.bf16.mxu1 %v2521_v32  ;;  %v2609_v26 = vld [vmem:[%s3080_s6 + $0xc0] ss:$16 sps:$4 sm:$0xff]   ;;  %v2610_v27 = vld [vmem:[%s3080_s6 + $0xc8] ss:$16 sps:$4 sm:$0xff]   ;;  %v2611_v28 = vld [vmem:[%s3080_s6 + $0xe4] ss:$16 sps:$4 sm:$0xff]  }
  0x66   : > { %1609 = vmatprep.subr.bf16.mxu0 %v2523_v33  ;;  %v2613_v29 = vld [vmem:[%s3080_s6 + $0xec] ss:$16 sps:$4 sm:$0xff]   ;;  %v2615_v30 = vld [vmem:[%s3080_s6 + $0xe0] ss:$16 sps:$4 sm:$0xff]   ;;  %v2616_v31 = vld [vmem:[%s3080_s6 + $0xe8] ss:$16 sps:$4 sm:$0xff]  }
  0x67   : > { %v2617_v32 = vld [vmem:[%s3080_s6 + $0x104] ss:$16 sps:$4 sm:$0xff]   ;;  %v2619_v33 = vld [vmem:[%s3080_s6 + $0x10c] ss:$16 sps:$4 sm:$0xff]   ;;  %v2646_v51 = vld [vmem:[%s3080_s6 + $0x188] ss:$16 sps:$4 sm:$0xff]  }
  0x68   : > { %1417 = vmatpush1.bf16.msra.mxu1 %v2525_v34  ;;  %v2621_v34 = vld [vmem:[%s3080_s6 + $0x100] ss:$16 sps:$4 sm:$0xff]   ;;  %v2643_v49 = vld [vmem:[%s3080_s6 + $0x18c] ss:$16 sps:$4 sm:$0xff]   ;;  %s2318_s23 = sshll.u32 %s2763_s15, 7  ;;  %s2062_s14 = sshll.u32 %s3168_s19, 4  ;;  %s3239_s14 = int_to_ptr.vmem [resolvable:$true] %s2062_s14 }
  0x69   : > { %1610 = vmatpush1.bf16.msra.mxu0 %v2526_v35  ;;  %1418 = vmatprep.subr.bf16.mxu1 %v2527_v36  ;;  %v2622_v35 = vld [vmem:[%s3080_s6 + $0x108] ss:$16 sps:$4 sm:$0xff]   ;;  %v2623_v36 = vld [vmem:[%s3080_s6 + $0x124] ss:$16 sps:$4 sm:$0xff]   ;;  %s2059_s24 = sadd.s32 %s2318_s23, %s2311_s20  ;;  %s3246_s28 = scalar_lea.sflag [#allocation5], %s481_s7 }
  0x6a   : > { %1611 = vmatprep.subr.bf16.mxu0 %v2529_v37  ;;  %v2625_v37 = vld [vmem:[%s3080_s6 + $0x12c] ss:$16 sps:$4 sm:$0xff]   ;;  %s2313_s25 = sshll.u32 %s2059_s24, 7  ;;  %s2665_s29 = scalar_lea.vmem %s3239_s14, 8192 }
  0x6b   : > { %s3236_s12 = scalar_lea.hbm %s3306_s2, %s2313_s25  ;;  %p2666_p4 = scmp.ne.s32.totalorder %s3239_s14, %s2665_s29 }
  0x6c   : > { %1419 = vmatpush1.bf16.msra.mxu1 %v2531_v38  ;;  %v2627_v38 = vld [vmem:[%s3080_s6 + $0x120] ss:$16 sps:$4 sm:$0xff]   ;;  %s2777_s5 = smov [#allocation4]  }
  0x6d   : > { %1612 = vmatpush1.bf16.msra.mxu0 %v2532_v39  ;;  %1420 = vmatprep.subr.bf16.mxu1 %v2533_v40  ;;  %v2628_v39 = vld [vmem:[%s3080_s6 + $0x128] ss:$16 sps:$4 sm:$0xff]   ;;  %v2629_v40 = vld [vmem:[%s3080_s6 + $0x144] ss:$16 sps:$4 sm:$0xff]   ;;  %p2667_p5 = pnand %p2666_p4, %p2875_p10 }
  0x6e   : > { %1613 = vmatprep.subr.bf16.mxu0 %v2535_v41  ;;  %v2631_v41 = vld [vmem:[%s3080_s6 + $0x14c] ss:$16 sps:$4 sm:$0xff]  }
  0x6f   : > { %p2668_p6 = pneg %p2667_p5 }
  0x70   : > { %1421 = vmatpush1.bf16.msra.mxu1 %v2537_v42  ;;  %v2633_v42 = vld [vmem:[%s3080_s6 + $0x140] ss:$16 sps:$4 sm:$0xff]  }
  0x71   : > { %1614 = vmatpush1.bf16.msra.mxu0 %v2538_v43  ;;  %1422 = vmatprep.subr.bf16.mxu1 %v2539_v44  ;;  %v2634_v43 = vld [vmem:[%s3080_s6 + $0x148] ss:$16 sps:$4 sm:$0xff]   ;;  %v2635_v44 = vld [vmem:[%s3080_s6 + $0x164] ss:$16 sps:$4 sm:$0xff]  }
  0x72   : > { %1615 = vmatprep.subr.bf16.mxu0 %v2541_v45  ;;  %v2637_v45 = vld [vmem:[%s3080_s6 + $0x16c] ss:$16 sps:$4 sm:$0xff]  }
  0x74   : > { %1423 = vmatpush1.bf16.msra.mxu1 %v2543_v46  ;;  %v2639_v46 = vld [vmem:[%s3080_s6 + $0x160] ss:$16 sps:$4 sm:$0xff]  }
  0x75   : > { %1616 = vmatpush1.bf16.msra.mxu0 %v2544_v47  ;;  %1424 = vmatprep.subr.bf16.mxu1 %v2545_v48  ;;  %v2640_v47 = vld [vmem:[%s3080_s6 + $0x168] ss:$16 sps:$4 sm:$0xff]   ;;  %v2641_v48 = vld [vmem:[%s3080_s6 + $0x184] ss:$16 sps:$4 sm:$0xff]  }
  0x76   : > { %1617 = vmatprep.subr.bf16.mxu0 %v2547_v50  ;;  %v2645_v50 = vld [vmem:[%s3080_s6 + $0x180] ss:$16 sps:$4 sm:$0xff]  }
  0x78   : > { %1425 = vmatpush1.bf16.msra.mxu1 %v2549_v52  ;;  %v2647_v52 = vld [vmem:[%s3080_s6 + $0x1a4] ss:$16 sps:$4 sm:$0xff]  }
  0x79   : > { %1618 = vmatpush1.bf16.msra.mxu0 %v2550_v53  ;;  %1426 = vmatprep.subr.bf16.mxu1 %v2551_v54  ;;  %v2649_v53 = vld [vmem:[%s3080_s6 + $0x1ac] ss:$16 sps:$4 sm:$0xff]   ;;  %v2651_v54 = vld [vmem:[%s3080_s6 + $0x1a0] ss:$16 sps:$4 sm:$0xff]  }
  0x7a   : > { %1619 = vmatprep.subr.bf16.mxu0 %v2553_v55  ;;  %v2652_v55 = vld [vmem:[%s3080_s6 + $0x1a8] ss:$16 sps:$4 sm:$0xff]  }
  0x7c   : > { %1427 = vmatpush1.bf16.msra.mxu1 %v2555_v56  ;;  %v2653_v56 = vld [vmem:[%s3080_s6 + $0x1c4] ss:$16 sps:$4 sm:$0xff]  }
  0x7d   : > { %1620 = vmatpush1.bf16.msra.mxu0 %v2556_v57  ;;  %1428 = vmatprep.subr.bf16.mxu1 %v2557_v58  ;;  %v2655_v57 = vld [vmem:[%s3080_s6 + $0x1cc] ss:$16 sps:$4 sm:$0xff]   ;;  %v2657_v58 = vld [vmem:[%s3080_s6 + $0x1c0] ss:$16 sps:$4 sm:$0xff]  }
  0x7e   : > { %1621 = vmatprep.subr.bf16.mxu0 %v2559_v59  ;;  %v2658_v59 = vld [vmem:[%s3080_s6 + $0x1c8] ss:$16 sps:$4 sm:$0xff]  }
  0x80   : > { %1429 = vmatpush1.bf16.msra.mxu1 %v2561_v60  ;;  %v2659_v60 = vld [vmem:[%s3080_s6 + $0x1e4] ss:$16 sps:$4 sm:$0xff]  }
  0x81   : > { %1622 = vmatpush1.bf16.msra.mxu0 %v2562_v61  ;;  %1430 = vmatprep.subr.bf16.mxu1 %v2563_v62  ;;  %v2661_v61 = vld [vmem:[%s3080_s6 + $0x1ec] ss:$16 sps:$4 sm:$0xff]   ;;  %v2663_v62 = vld [vmem:[%s3080_s6 + $0x1e0] ss:$16 sps:$4 sm:$0xff]  }
  0x82   : > { %1623 = vmatprep.subr.bf16.mxu0 %v2565_v63  ;;  %v2664_v63 = vld [vmem:[%s3080_s6 + $0x1e8] ss:$16 sps:$4 sm:$0xff]   ;;  %s2669_s6 = sshll.u32 %s2777_s5, 4  ;;  %s2670_s6 = int_to_ptr.vmem [resolvable:$false] %s2669_s6 }
  0x83   : > { %s2671_s8 = scalar_lea.vmem %s2670_s6, 16384  ;;  %p2672_p7 = scmp.lt.s32.totalorder %s3239_s14, %s2670_s6 }
  0x84   : > { %1431 = vmatpush1.bf16.msra.mxu1 %v2567_v0  ;;  %p2673_p8 = scmp.lt.s32.totalorder %s2671_s8, %s2665_s29 }
  0x85   : > { %1624 = vmatpush1.bf16.msra.mxu0 %v2568_v1 }
  0x86   : > { %p2674_p9 = por %p2673_p8, %p2672_p7 }
  0x87   : > { %1433 = vmatmul.mubr.bf16.vlgmr.msra.gmra.mrb[0].mxu1 %v2569_v2 }
  0x88   : > { %1626 = vmatmul.mubr.bf16.vlgmr.msra.gmra.mrb[0].mxu0 %v2572_v3  ;;  %1442 = vmatprep.mubr.bf16.mxu1 %v2575_v4  ;;  %p2675_p11 = pnand %p2674_p9, %p2668_p6 }
  0x89   : > { %1635 = vmatprep.mubr.bf16.mxu0 %v2577_v5 }
  0x8f   : > { %1443 = vmatmul.mubr.bf16.gmra.mrb[4].mxu1 %v2579_v6 }
  0x90   : > { %1636 = vmatmul.mubr.bf16.gmra.mrb[4].mxu0 %v2580_v7  ;;  %1452 = vmatprep.mubr.bf16.mxu1 %v2581_v8 }
  0x91   : > { %1645 = vmatprep.mubr.bf16.mxu0 %v2583_v9 }
  0x97   : > { %1453 = vmatmul.mubr.bf16.gmra.mrb[8].mxu1 %v2585_v10 }
  0x98   : > { %1646 = vmatmul.mubr.bf16.gmra.mrb[8].mxu0 %v2586_v11  ;;  %1462 = vmatprep.mubr.bf16.mxu1 %v2587_v12 }
  0x99   : > { %1655 = vmatprep.mubr.bf16.mxu0 %v2589_v13 }
  0x9f   : > { %1463 = vmatmul.mubr.bf16.gmra.mrb[12].mxu1 %v2591_v14 }
  0xa0   : > { %1656 = vmatmul.mubr.bf16.gmra.mrb[12].mxu0 %v2592_v15  ;;  %1472 = vmatprep.mubr.bf16.mxu1 %v2593_v16 }
  0xa1   : > { %1665 = vmatprep.mubr.bf16.mxu0 %v2595_v17 }
  0xa7   : > { %1473 = vmatmul.mubr.bf16.gmra.mrb[16].mxu1 %v2597_v18 }
  0xa8   : > { %1666 = vmatmul.mubr.bf16.gmra.mrb[16].mxu0 %v2598_v19  ;;  %1482 = vmatprep.mubr.bf16.mxu1 %v2599_v20 }
  0xa9   : > { %1675 = vmatprep.mubr.bf16.mxu0 %v2601_v21 }
  0xaf   : > { %1483 = vmatmul.mubr.bf16.gmra.mrb[20].mxu1 %v2603_v22 }
  0xb0   : > { %1676 = vmatmul.mubr.bf16.gmra.mrb[20].mxu0 %v2604_v23  ;;  %1492 = vmatprep.mubr.bf16.mxu1 %v2605_v24 }
  0xb1   : > { %1685 = vmatprep.mubr.bf16.mxu0 %v2607_v25 }
  0xb7   : > { %1493 = vmatmul.mubr.bf16.gmra.mrb[24].mxu1 %v2609_v26 }
  0xb8   : > { %1686 = vmatmul.mubr.bf16.gmra.mrb[24].mxu0 %v2610_v27  ;;  %1502 = vmatprep.mubr.bf16.mxu1 %v2611_v28 }
  0xb9   : > { %1695 = vmatprep.mubr.bf16.mxu0 %v2613_v29 }
  0xbf   : > { %1503 = vmatmul.mubr.bf16.gmra.mrb[28].mxu1 %v2615_v30 }
  0xc0   : > { %1696 = vmatmul.mubr.bf16.gmra.mrb[28].mxu0 %v2616_v31  ;;  %1512 = vmatprep.mubr.bf16.mxu1 %v2617_v32 }
  0xc1   : > { %1705 = vmatprep.mubr.bf16.mxu0 %v2619_v33 }
  0xc7   : > { %1513 = vmatmul.mubr.bf16.gmra.mrb[32].mxu1 %v2621_v34 }
  0xc8   : > { %1706 = vmatmul.mubr.bf16.gmra.mrb[32].mxu0 %v2622_v35  ;;  %1522 = vmatprep.mubr.bf16.mxu1 %v2623_v36 }
  0xc9   : > { %1715 = vmatprep.mubr.bf16.mxu0 %v2625_v37 }
  0xcf   : > { %1523 = vmatmul.mubr.bf16.gmra.mrb[36].mxu1 %v2627_v38 }
  0xd0   : > { %1716 = vmatmul.mubr.bf16.gmra.mrb[36].mxu0 %v2628_v39  ;;  %1532 = vmatprep.mubr.bf16.mxu1 %v2629_v40 }
  0xd1   : > { %1725 = vmatprep.mubr.bf16.mxu0 %v2631_v41 }
  0xd7   : > { %1533 = vmatmul.mubr.bf16.gmra.mrb[40].mxu1 %v2633_v42 }
  0xd8   : > { %1726 = vmatmul.mubr.bf16.gmra.mrb[40].mxu0 %v2634_v43  ;;  %1542 = vmatprep.mubr.bf16.mxu1 %v2635_v44 }
  0xd9   : > { %1735 = vmatprep.mubr.bf16.mxu0 %v2637_v45 }
  0xdf   : > { %1543 = vmatmul.mubr.bf16.gmra.mrb[44].mxu1 %v2639_v46 }
  0xe0   : > { %1736 = vmatmul.mubr.bf16.gmra.mrb[44].mxu0 %v2640_v47  ;;  %1552 = vmatprep.mubr.bf16.mxu1 %v2641_v48 }
  0xe1   : > { %1745 = vmatprep.mubr.bf16.mxu0 %v2643_v49 }
  0xe7   : > { %1553 = vmatmul.mubr.bf16.gmra.mrb[48].mxu1 %v2645_v50 }
  0xe8   : > { %1746 = vmatmul.mubr.bf16.gmra.mrb[48].mxu0 %v2646_v51  ;;  %1562 = vmatprep.mubr.bf16.mxu1 %v2647_v52 }
  0xe9   : > { %1755 = vmatprep.mubr.bf16.mxu0 %v2649_v53 }
  0xef   : > { %1563 = vmatmul.mubr.bf16.gmra.mrb[52].mxu1 %v2651_v54 }
  0xf0   : > { %1756 = vmatmul.mubr.bf16.gmra.mrb[52].mxu0 %v2652_v55  ;;  %1572 = vmatprep.mubr.bf16.mxu1 %v2653_v56 }
  0xf1   : > { %1765 = vmatprep.mubr.bf16.mxu0 %v2655_v57 }
  0xf7   : > { %1573 = vmatmul.mubr.bf16.gmra.mrb[56].mxu1 %v2657_v58 }
  0xf8   : > { %1766 = vmatmul.mubr.bf16.gmra.mrb[56].mxu0 %v2658_v59  ;;  %1582 = vmatprep.mubr.bf16.mxu1 %v2659_v60 }
  0xf9   : > { %1775 = vmatprep.mubr.bf16.mxu0 %v2661_v61 }
  0xff   : > { %1583 = vmatmul.mubr.bf16.gmra.mrb[60].mxu1 %v2663_v62 }
 0x100   : > { %1776 = vmatmul.mubr.bf16.gmra.mrb[60].mxu0 %v2664_v63 }
 0x15a   : > { %v1434_v0 = vpop.f32.mrb[0].mxu1 }
 0x15b   : > { %v1627_v1 = vpop.f32.mrb[0].mxu0  ;;  %v1436_v3 = vpop.f32.mrb[1].mxu1 }
 0x15c   : > { %v1628_v2 = vadd.f32 %v1627_v1, %v1434_v0  ;;  %v1629_v4 = vpop.f32.mrb[1].mxu0  ;;  %v1438_v6 = vpop.f32.mrb[2].mxu1 }
 0x15d   : > { %v1630_v5 = vadd.f32 %v1629_v4, %v1436_v3  ;;  %v1631_v7 = vpop.f32.mrb[2].mxu0  ;;  %v1440_v9 = vpop.f32.mrb[3].mxu1 }
 0x15e   : > { %1981 = vst [vmem:[%s3168_s19] sm:$0xff] %v1628_v2  ;;  %v1632_v8 = vadd.f32 %v1631_v7, %v1438_v6  ;;  %v1633_v10 = vpop.f32.mrb[3].mxu0 }
 0x15f   : > { %1982 = vst [vmem:[%s3168_s19 + $0x8] sm:$0xff] %v1630_v5  ;;  %v1634_v11 = vadd.f32 %v1633_v10, %v1440_v9 }
 0x160   : > { %1983 = vst [vmem:[%s3168_s19 + $0x10] sm:$0xff] %v1632_v8 }
 0x161   : > { %1984 = vst [vmem:[%s3168_s19 + $0x18] sm:$0xff] %v1634_v11 }
 0x162   : > { %v1444_v12 = vpop.f32.mrb[4].mxu1 }
 0x163   : > { %v1637_v13 = vpop.f32.mrb[4].mxu0  ;;  %v1446_v15 = vpop.f32.mrb[5].mxu1 }
 0x164   : > { %v1638_v14 = vadd.f32 %v1637_v13, %v1444_v12  ;;  %v1639_v16 = vpop.f32.mrb[5].mxu0  ;;  %v1448_v18 = vpop.f32.mrb[6].mxu1 }
 0x165   : > { %v1640_v17 = vadd.f32 %v1639_v16, %v1446_v15  ;;  %v1641_v19 = vpop.f32.mrb[6].mxu0  ;;  %v1450_v21 = vpop.f32.mrb[7].mxu1 }
 0x166   : > { %1985 = vst [vmem:[%s3168_s19 + $0x20] sm:$0xff] %v1638_v14  ;;  %v1642_v20 = vadd.f32 %v1641_v19, %v1448_v18  ;;  %v1643_v22 = vpop.f32.mrb[7].mxu0 }
 0x167   : > { %1986 = vst [vmem:[%s3168_s19 + $0x28] sm:$0xff] %v1640_v17  ;;  %v1644_v23 = vadd.f32 %v1643_v22, %v1450_v21 }
 0x168   : > { %1987 = vst [vmem:[%s3168_s19 + $0x30] sm:$0xff] %v1642_v20 }
 0x169   : > { %1988 = vst [vmem:[%s3168_s19 + $0x38] sm:$0xff] %v1644_v23 }
 0x16a   : > { %v1454_v24 = vpop.f32.mrb[8].mxu1 }
 0x16b   : > { %v1647_v25 = vpop.f32.mrb[8].mxu0  ;;  %v1456_v27 = vpop.f32.mrb[9].mxu1 }
 0x16c   : > { %v1648_v26 = vadd.f32 %v1647_v25, %v1454_v24  ;;  %v1649_v28 = vpop.f32.mrb[9].mxu0  ;;  %v1458_v30 = vpop.f32.mrb[10].mxu1 }
 0x16d   : > { %v1650_v29 = vadd.f32 %v1649_v28, %v1456_v27  ;;  %v1651_v31 = vpop.f32.mrb[10].mxu0  ;;  %v1460_v33 = vpop.f32.mrb[11].mxu1 }
 0x16e   : > { %1989 = vst [vmem:[%s3168_s19 + $0x40] sm:$0xff] %v1648_v26  ;;  %v1652_v32 = vadd.f32 %v1651_v31, %v1458_v30  ;;  %v1653_v34 = vpop.f32.mrb[11].mxu0 }
 0x16f   : > { %1990 = vst [vmem:[%s3168_s19 + $0x48] sm:$0xff] %v1650_v29  ;;  %v1654_v35 = vadd.f32 %v1653_v34, %v1460_v33 }
 0x170   : > { %1991 = vst [vmem:[%s3168_s19 + $0x50] sm:$0xff] %v1652_v32 }
 0x171   : > { %1992 = vst [vmem:[%s3168_s19 + $0x58] sm:$0xff] %v1654_v35 }
 0x172   : > { %v1464_v36 = vpop.f32.mrb[12].mxu1 }
 0x173   : > { %v1657_v37 = vpop.f32.mrb[12].mxu0  ;;  %v1466_v39 = vpop.f32.mrb[13].mxu1 }
 0x174   : > { %v1658_v38 = vadd.f32 %v1657_v37, %v1464_v36  ;;  %v1659_v40 = vpop.f32.mrb[13].mxu0  ;;  %v1468_v42 = vpop.f32.mrb[14].mxu1 }
 0x175   : > { %v1660_v41 = vadd.f32 %v1659_v40, %v1466_v39  ;;  %v1661_v43 = vpop.f32.mrb[14].mxu0  ;;  %v1470_v45 = vpop.f32.mrb[15].mxu1 }
 0x176   : > { %1993 = vst [vmem:[%s3168_s19 + $0x60] sm:$0xff] %v1658_v38  ;;  %v1662_v44 = vadd.f32 %v1661_v43, %v1468_v42  ;;  %v1663_v46 = vpop.f32.mrb[15].mxu0 }
 0x177   : > { %1994 = vst [vmem:[%s3168_s19 + $0x68] sm:$0xff] %v1660_v41  ;;  %v1664_v47 = vadd.f32 %v1663_v46, %v1470_v45 }
 0x178   : > { %1995 = vst [vmem:[%s3168_s19 + $0x70] sm:$0xff] %v1662_v44 }
 0x179   : > { %1996 = vst [vmem:[%s3168_s19 + $0x78] sm:$0xff] %v1664_v47 }
 0x17a   : > { %v1474_v48 = vpop.f32.mrb[16].mxu1 }
 0x17b   : > { %v1667_v49 = vpop.f32.mrb[16].mxu0  ;;  %v1476_v51 = vpop.f32.mrb[17].mxu1 }
 0x17c   : > { %v1668_v50 = vadd.f32 %v1667_v49, %v1474_v48  ;;  %v1669_v52 = vpop.f32.mrb[17].mxu0  ;;  %v1478_v54 = vpop.f32.mrb[18].mxu1 }
 0x17d   : > { %v1670_v53 = vadd.f32 %v1669_v52, %v1476_v51  ;;  %v1671_v55 = vpop.f32.mrb[18].mxu0  ;;  %v1480_v57 = vpop.f32.mrb[19].mxu1 }
 0x17e   : > { %1997 = vst [vmem:[%s3168_s19 + $0x80] sm:$0xff] %v1668_v50  ;;  %v1672_v56 = vadd.f32 %v1671_v55, %v1478_v54  ;;  %v1673_v58 = vpop.f32.mrb[19].mxu0 }
 0x17f   : > { %1998 = vst [vmem:[%s3168_s19 + $0x88] sm:$0xff] %v1670_v53  ;;  %v1674_v59 = vadd.f32 %v1673_v58, %v1480_v57 }
 0x180   : > { %1999 = vst [vmem:[%s3168_s19 + $0x90] sm:$0xff] %v1672_v56 }
 0x181   : > { %2000 = vst [vmem:[%s3168_s19 + $0x98] sm:$0xff] %v1674_v59 }
 0x182   : > { %v1484_v60 = vpop.f32.mrb[20].mxu1 }
 0x183   : > { %v1677_v61 = vpop.f32.mrb[20].mxu0  ;;  %v1486_v63 = vpop.f32.mrb[21].mxu1 }
 0x184   : > { %v1678_v62 = vadd.f32 %v1677_v61, %v1484_v60  ;;  %v1679_v0 = vpop.f32.mrb[21].mxu0  ;;  %v1488_v2 = vpop.f32.mrb[22].mxu1 }
 0x185   : > { %v1680_v1 = vadd.f32 %v1679_v0, %v1486_v63  ;;  %v1681_v3 = vpop.f32.mrb[22].mxu0  ;;  %v1490_v5 = vpop.f32.mrb[23].mxu1 }
 0x186   : > { %2001 = vst [vmem:[%s3168_s19 + $0xa0] sm:$0xff] %v1678_v62  ;;  %v1682_v4 = vadd.f32 %v1681_v3, %v1488_v2  ;;  %v1683_v6 = vpop.f32.mrb[23].mxu0 }
 0x187   : > { %2002 = vst [vmem:[%s3168_s19 + $0xa8] sm:$0xff] %v1680_v1  ;;  %v1684_v7 = vadd.f32 %v1683_v6, %v1490_v5 }
 0x188   : > { %2003 = vst [vmem:[%s3168_s19 + $0xb0] sm:$0xff] %v1682_v4 }
 0x189   : > { %2004 = vst [vmem:[%s3168_s19 + $0xb8] sm:$0xff] %v1684_v7 }
 0x18a   : > { %v1494_v8 = vpop.f32.mrb[24].mxu1 }
 0x18b   : > { %v1687_v9 = vpop.f32.mrb[24].mxu0  ;;  %v1496_v11 = vpop.f32.mrb[25].mxu1 }
 0x18c   : > { %v1688_v10 = vadd.f32 %v1687_v9, %v1494_v8  ;;  %v1689_v12 = vpop.f32.mrb[25].mxu0  ;;  %v1498_v14 = vpop.f32.mrb[26].mxu1 }
 0x18d   : > { %v1690_v13 = vadd.f32 %v1689_v12, %v1496_v11  ;;  %v1691_v15 = vpop.f32.mrb[26].mxu0  ;;  %v1500_v17 = vpop.f32.mrb[27].mxu1 }
 0x18e   : > { %2005 = vst [vmem:[%s3168_s19 + $0xc0] sm:$0xff] %v1688_v10  ;;  %v1692_v16 = vadd.f32 %v1691_v15, %v1498_v14  ;;  %v1693_v18 = vpop.f32.mrb[27].mxu0 }
 0x18f   : > { %2006 = vst [vmem:[%s3168_s19 + $0xc8] sm:$0xff] %v1690_v13  ;;  %v1694_v19 = vadd.f32 %v1693_v18, %v1500_v17 }
 0x190   : > { %2007 = vst [vmem:[%s3168_s19 + $0xd0] sm:$0xff] %v1692_v16 }
 0x191   : > { %2008 = vst [vmem:[%s3168_s19 + $0xd8] sm:$0xff] %v1694_v19 }
 0x192   : > { %v1504_v20 = vpop.f32.mrb[28].mxu1 }
 0x193   : > { %v1697_v21 = vpop.f32.mrb[28].mxu0  ;;  %v1506_v23 = vpop.f32.mrb[29].mxu1 }
 0x194   : > { %v1698_v22 = vadd.f32 %v1697_v21, %v1504_v20  ;;  %v1699_v24 = vpop.f32.mrb[29].mxu0  ;;  %v1508_v26 = vpop.f32.mrb[30].mxu1 }
 0x195   : > { %v1700_v25 = vadd.f32 %v1699_v24, %v1506_v23  ;;  %v1701_v27 = vpop.f32.mrb[30].mxu0  ;;  %v1510_v29 = vpop.f32.mrb[31].mxu1 }
 0x196   : > { %2009 = vst [vmem:[%s3168_s19 + $0xe0] sm:$0xff] %v1698_v22  ;;  %v1702_v28 = vadd.f32 %v1701_v27, %v1508_v26  ;;  %v1703_v30 = vpop.f32.mrb[31].mxu0 }
 0x197   : > { %2010 = vst [vmem:[%s3168_s19 + $0xe8] sm:$0xff] %v1700_v25  ;;  %v1704_v31 = vadd.f32 %v1703_v30, %v1510_v29 }
 0x198   : > { %2011 = vst [vmem:[%s3168_s19 + $0xf0] sm:$0xff] %v1702_v28 }
 0x199   : > { %2012 = vst [vmem:[%s3168_s19 + $0xf8] sm:$0xff] %v1704_v31 }
 0x19a   : > { %v1514_v32 = vpop.f32.mrb[32].mxu1 }
 0x19b   : > { %v1707_v33 = vpop.f32.mrb[32].mxu0  ;;  %v1516_v35 = vpop.f32.mrb[33].mxu1 }
 0x19c   : > { %v1708_v34 = vadd.f32 %v1707_v33, %v1514_v32  ;;  %v1709_v36 = vpop.f32.mrb[33].mxu0  ;;  %v1518_v38 = vpop.f32.mrb[34].mxu1 }
 0x19d   : > { %v1710_v37 = vadd.f32 %v1709_v36, %v1516_v35  ;;  %v1711_v39 = vpop.f32.mrb[34].mxu0  ;;  %v1520_v41 = vpop.f32.mrb[35].mxu1 }
 0x19e   : > { %2013 = vst [vmem:[%s3168_s19 + $0x100] sm:$0xff] %v1708_v34  ;;  %v1712_v40 = vadd.f32 %v1711_v39, %v1518_v38  ;;  %v1713_v42 = vpop.f32.mrb[35].mxu0 }
 0x19f   : > { %2014 = vst [vmem:[%s3168_s19 + $0x108] sm:$0xff] %v1710_v37  ;;  %v1714_v43 = vadd.f32 %v1713_v42, %v1520_v41 }
 0x1a0   : > { %2015 = vst [vmem:[%s3168_s19 + $0x110] sm:$0xff] %v1712_v40 }
 0x1a1   : > { %2016 = vst [vmem:[%s3168_s19 + $0x118] sm:$0xff] %v1714_v43 }
 0x1a2   : > { %v1524_v44 = vpop.f32.mrb[36].mxu1 }
 0x1a3   : > { %v1717_v45 = vpop.f32.mrb[36].mxu0  ;;  %v1526_v47 = vpop.f32.mrb[37].mxu1 }
 0x1a4   : > { %v1718_v46 = vadd.f32 %v1717_v45, %v1524_v44  ;;  %v1719_v48 = vpop.f32.mrb[37].mxu0  ;;  %v1528_v50 = vpop.f32.mrb[38].mxu1 }
 0x1a5   : > { %v1720_v49 = vadd.f32 %v1719_v48, %v1526_v47  ;;  %v1721_v51 = vpop.f32.mrb[38].mxu0  ;;  %v1530_v53 = vpop.f32.mrb[39].mxu1 }
 0x1a6   : > { %2017 = vst [vmem:[%s3168_s19 + $0x120] sm:$0xff] %v1718_v46  ;;  %v1722_v52 = vadd.f32 %v1721_v51, %v1528_v50  ;;  %v1723_v54 = vpop.f32.mrb[39].mxu0 }
 0x1a7   : > { %2018 = vst [vmem:[%s3168_s19 + $0x128] sm:$0xff] %v1720_v49  ;;  %v1724_v55 = vadd.f32 %v1723_v54, %v1530_v53 }
 0x1a8   : > { %2019 = vst [vmem:[%s3168_s19 + $0x130] sm:$0xff] %v1722_v52 }
 0x1a9   : > { %2020 = vst [vmem:[%s3168_s19 + $0x138] sm:$0xff] %v1724_v55 }
 0x1aa   : > { %v1534_v56 = vpop.f32.mrb[40].mxu1 }
 0x1ab   : > { %v1727_v57 = vpop.f32.mrb[40].mxu0  ;;  %v1536_v59 = vpop.f32.mrb[41].mxu1 }
 0x1ac   : > { %v1728_v58 = vadd.f32 %v1727_v57, %v1534_v56  ;;  %v1729_v60 = vpop.f32.mrb[41].mxu0  ;;  %v1538_v62 = vpop.f32.mrb[42].mxu1 }
 0x1ad   : > { %v1730_v61 = vadd.f32 %v1729_v60, %v1536_v59  ;;  %v1731_v63 = vpop.f32.mrb[42].mxu0  ;;  %v1540_v1 = vpop.f32.mrb[43].mxu1 }
 0x1ae   : > { %2021 = vst [vmem:[%s3168_s19 + $0x140] sm:$0xff] %v1728_v58  ;;  %v1732_v0 = vadd.f32 %v1731_v63, %v1538_v62  ;;  %v1733_v2 = vpop.f32.mrb[43].mxu0 }
 0x1af   : > { %2022 = vst [vmem:[%s3168_s19 + $0x148] sm:$0xff] %v1730_v61  ;;  %v1734_v3 = vadd.f32 %v1733_v2, %v1540_v1 }
 0x1b0   : > { %2023 = vst [vmem:[%s3168_s19 + $0x150] sm:$0xff] %v1732_v0 }
 0x1b1   : > { %2024 = vst [vmem:[%s3168_s19 + $0x158] sm:$0xff] %v1734_v3 }
 0x1b2   : > { %v1544_v4 = vpop.f32.mrb[44].mxu1 }
 0x1b3   : > { %v1737_v5 = vpop.f32.mrb[44].mxu0  ;;  %v1546_v7 = vpop.f32.mrb[45].mxu1 }
 0x1b4   : > { %v1738_v6 = vadd.f32 %v1737_v5, %v1544_v4  ;;  %v1739_v8 = vpop.f32.mrb[45].mxu0  ;;  %v1548_v10 = vpop.f32.mrb[46].mxu1 }
 0x1b5   : > { %v1740_v9 = vadd.f32 %v1739_v8, %v1546_v7  ;;  %v1741_v11 = vpop.f32.mrb[46].mxu0  ;;  %v1550_v13 = vpop.f32.mrb[47].mxu1 }
 0x1b6   : > { %2025 = vst [vmem:[%s3168_s19 + $0x160] sm:$0xff] %v1738_v6  ;;  %v1742_v12 = vadd.f32 %v1741_v11, %v1548_v10  ;;  %v1743_v14 = vpop.f32.mrb[47].mxu0 }
 0x1b7   : > { %2026 = vst [vmem:[%s3168_s19 + $0x168] sm:$0xff] %v1740_v9  ;;  %v1744_v15 = vadd.f32 %v1743_v14, %v1550_v13 }
 0x1b8   : > { %2027 = vst [vmem:[%s3168_s19 + $0x170] sm:$0xff] %v1742_v12 }
 0x1b9   : > { %2028 = vst [vmem:[%s3168_s19 + $0x178] sm:$0xff] %v1744_v15 }
 0x1ba   : > { %v1554_v16 = vpop.f32.mrb[48].mxu1 }
 0x1bb   : > { %v1747_v17 = vpop.f32.mrb[48].mxu0  ;;  %v1556_v19 = vpop.f32.mrb[49].mxu1 }
 0x1bc   : > { %v1748_v18 = vadd.f32 %v1747_v17, %v1554_v16  ;;  %v1749_v20 = vpop.f32.mrb[49].mxu0  ;;  %v1558_v22 = vpop.f32.mrb[50].mxu1 }
 0x1bd   : > { %v1750_v21 = vadd.f32 %v1749_v20, %v1556_v19  ;;  %v1751_v23 = vpop.f32.mrb[50].mxu0  ;;  %v1560_v25 = vpop.f32.mrb[51].mxu1 }
 0x1be   : > { %2029 = vst [vmem:[%s3168_s19 + $0x180] sm:$0xff] %v1748_v18  ;;  %v1752_v24 = vadd.f32 %v1751_v23, %v1558_v22  ;;  %v1753_v26 = vpop.f32.mrb[51].mxu0 }
 0x1bf   : > { %2030 = vst [vmem:[%s3168_s19 + $0x188] sm:$0xff] %v1750_v21  ;;  %v1754_v27 = vadd.f32 %v1753_v26, %v1560_v25 }
 0x1c0   : > { %2031 = vst [vmem:[%s3168_s19 + $0x190] sm:$0xff] %v1752_v24 }
 0x1c1   : > { %2032 = vst [vmem:[%s3168_s19 + $0x198] sm:$0xff] %v1754_v27 }
 0x1c2   : > { %v1564_v28 = vpop.f32.mrb[52].mxu1 }
 0x1c3   : > { %v1757_v29 = vpop.f32.mrb[52].mxu0  ;;  %v1566_v31 = vpop.f32.mrb[53].mxu1 }
 0x1c4   : > { %v1758_v30 = vadd.f32 %v1757_v29, %v1564_v28  ;;  %v1759_v32 = vpop.f32.mrb[53].mxu0  ;;  %v1568_v34 = vpop.f32.mrb[54].mxu1 }
 0x1c5   : > { %v1760_v33 = vadd.f32 %v1759_v32, %v1566_v31  ;;  %v1761_v35 = vpop.f32.mrb[54].mxu0  ;;  %v1570_v37 = vpop.f32.mrb[55].mxu1 }
 0x1c6   : > { %2033 = vst [vmem:[%s3168_s19 + $0x1a0] sm:$0xff] %v1758_v30  ;;  %v1762_v36 = vadd.f32 %v1761_v35, %v1568_v34  ;;  %v1763_v38 = vpop.f32.mrb[55].mxu0 }
 0x1c7   : > { %2034 = vst [vmem:[%s3168_s19 + $0x1a8] sm:$0xff] %v1760_v33  ;;  %v1764_v39 = vadd.f32 %v1763_v38, %v1570_v37 }
 0x1c8   : > { %2035 = vst [vmem:[%s3168_s19 + $0x1b0] sm:$0xff] %v1762_v36 }
 0x1c9   : > { %2036 = vst [vmem:[%s3168_s19 + $0x1b8] sm:$0xff] %v1764_v39 }
 0x1ca   : > { %v1574_v40 = vpop.f32.mrb[56].mxu1 }
 0x1cb   : > { %v1767_v41 = vpop.f32.mrb[56].mxu0  ;;  %v1576_v43 = vpop.f32.mrb[57].mxu1 }
 0x1cc   : > { %v1768_v42 = vadd.f32 %v1767_v41, %v1574_v40  ;;  %v1769_v44 = vpop.f32.mrb[57].mxu0  ;;  %v1578_v46 = vpop.f32.mrb[58].mxu1 }
 0x1cd   : > { %v1770_v45 = vadd.f32 %v1769_v44, %v1576_v43  ;;  %v1771_v47 = vpop.f32.mrb[58].mxu0  ;;  %v1580_v49 = vpop.f32.mrb[59].mxu1 }
 0x1ce   : > { %2037 = vst [vmem:[%s3168_s19 + $0x1c0] sm:$0xff] %v1768_v42  ;;  %v1772_v48 = vadd.f32 %v1771_v47, %v1578_v46  ;;  %v1773_v50 = vpop.f32.mrb[59].mxu0 }
 0x1cf   : > { %2038 = vst [vmem:[%s3168_s19 + $0x1c8] sm:$0xff] %v1770_v45  ;;  %v1774_v51 = vadd.f32 %v1773_v50, %v1580_v49 }
 0x1d0   : > { %2039 = vst [vmem:[%s3168_s19 + $0x1d0] sm:$0xff] %v1772_v48 }
 0x1d1   : > { %2040 = vst [vmem:[%s3168_s19 + $0x1d8] sm:$0xff] %v1774_v51 }
 0x1d2   : > { %v1584_v52 = vpop.f32.mrb[60].mxu1 }
 0x1d3   : > { %v1777_v53 = vpop.f32.mrb[60].mxu0  ;;  %v1586_v55 = vpop.f32.mrb[61].mxu1 }
 0x1d4   : > { %v1778_v54 = vadd.f32 %v1777_v53, %v1584_v52  ;;  %v1779_v56 = vpop.f32.mrb[61].mxu0  ;;  %v1588_v58 = vpop.f32.mrb[62].mxu1 }
 0x1d5   : > { %v1780_v57 = vadd.f32 %v1779_v56, %v1586_v55  ;;  %v1781_v59 = vpop.f32.mrb[62].mxu0  ;;  %v1590_v61 = vpop.f32.mrb[63].mxu1 }
 0x1d6   : > { %2041 = vst [vmem:[%s3168_s19 + $0x1e0] sm:$0xff] %v1778_v54  ;;  %v1782_v60 = vadd.f32 %v1781_v59, %v1588_v58  ;;  %v1783_v62 = vpop.f32.mrb[63].mxu0 }
 0x1d7   : > { %2042 = vst [vmem:[%s3168_s19 + $0x1e8] sm:$0xff] %v1780_v57  ;;  %v1784_v63 = vadd.f32 %v1783_v62, %v1590_v61 }
 0x1d8   : > { %2043 = vst [vmem:[%s3168_s19 + $0x1f0] sm:$0xff] %v1782_v60 }
 0x1d9   : > { %2044 = vst [vmem:[%s3168_s19 + $0x1f8] sm:$0xff] %v1784_v63 }
 0x1da   : > { %2678 = shalt.err (!%p2675_p11)
}
 0x1db   : > { %s2679_s7 = scalar_lea.hbm %s3236_s12, 8192  ;;  %s2683_s23 = scalar_lea.hbm %s3306_s2, 32768 }
 0x1dc   : > { %p2680_p13 = scmp.ne.s32.totalorder %s3236_s12, %s2679_s7  ;;  %p2684_p2 = scmp.lt.u32.totalorder %s3236_s12, %s3306_s2 }
 0x1dd   : > { %p2685_p3 = scmp.lt.u32.totalorder %s2683_s23, %s2679_s7  ;;  %p2687_p5 = scmp.lt.u32.totalorder %s2679_s7, %s3236_s12 }
 0x1de   : > { %p2681_p0 = pnand %p2680_p13, %p2875_p10 }
 0x1df   : > { %p2686_p4 = por %p2685_p3, %p2684_p2 }
 0x1e0   : > { %p2682_p1 = pneg %p2681_p0 }
 0x1e1   : > { %p2688_p6 = por %p2687_p5, %p2686_p4 }
 0x1e3   : > { %p2689_p7 = pnand %p2688_p6, %p2682_p1 }
 0x1e5   : > { %2692 = shalt.err (!%p2689_p7)
}
 0x1e6   : > { %s2778_s15 = smov 256   ;;  %s2779_s26 = smov 512  }
 0x1e7   : > { %s2780_s29 = smov 16  }
 0x1e8   : > { %2383 = dma.vmem_to_hbm [thread:$0]  (%p2875_p10), %s3239_s14, 8192, %s3236_s12, %s3246_s28, %s2778_s15, %s2779_s26, %s2780_s29  }
 0x1e9 PF: > { %p2389_p8 = scmp.ge.s32.totalorder %s2775_s18, 2  ;;  %s2077_s5 = sand.u32 1, %s2739_s9  }
 0x1ea   : > { %s2078_s6 = scalar_lea.sflag [#allocation5], %s2077_s5 }
 0x1eb   : > { %p2386_p9 = pnand %p2389_p8, %p2882_p12 }
 0x1ed   : > { %2734 = dma.done.wait (!%p2386_p9), %s2078_s6, 8192  }
 0x1ee   : > { %2736 = vsyncadd (!%p2386_p9), %s2078_s6, 4294959104  ;;  %s15_s18 = sadd.s32 1, %s2775_s18   ;;  %s3310_s9 = smov %s2743_s10 }
 0x1ef   : > { %p12_p11 = scmp.ge.s32.totalorder %s15_s18, 6   ;;  %s3311_s10 = smov %s2747_s11 }
 0x1f0   : > { %s3312_s11 = smov %s2880_s3  ;;  %s3313_s12 = smov %s2755_s13 }
 0x1f1   : > { %s3314_s13 = smov %s2869_s27  ;;  %s3315_s14 = smov %s2767_s16 }
 0x1f2   : > { %s3316_s15 = smov %s2771_s17  ;;  %s3317_s16 = smov %s3320_s21 }
 0x1f3   : > { %s3318_s17 = smov %s3324_s22  ;;  %14 = sbr.rel (!%p12_p11) target bundleno = 6 (0x6), region = 117 }
 0x1fa   :  { %2083 = vsyncpa [#allocation5], 1 }
 0x1fb   :  { %2085 = vsyncpa [#allocation5 + $0x1], 1 }

</bundles_post_ra>
